<compile_context>
chip_gen: v7x
topology: tpu7x:2x2x1
jax: 0.10.0
libtpu: 0.0.40
codegen_flags: <defaults>
</compile_context>

<pallas_src>
import jax
import jax.numpy as jnp
from jax.experimental import pallas as pl
from jax.experimental.pallas import tpu as pltpu

HIDDEN = 16                        # hidden_size
MID = 128                          # mid_size
PATCH_K = 8                        # img2patch kernel size
GRID = 32                          # deploy patch_size / ViT image_size
IMG = PATCH_K * GRID               # 256
PATCH_DIM = 3 * PATCH_K * PATCH_K  # 192 (C, kh, kw flatten order, like unfold)
TOK_PER_IMG = GRID * GRID          # 1024 tokens per image
TM = TOK_PER_IMG                   # tokens per Pallas tile (== one image/tile)


def _vae_kernel(x_ref, pos_ref, noise_ref,
                wf_ref, bf_ref, wdec_ref, bdec_ref,
                out_ref, kl_ref):
    # x_ref: (TM, 192) flattened 8x8x3 patch pixels
    # Fused enc -> ViT patch-embed(+pos) -> conv1 : one (192 x 32) matmul.
    f = (jnp.dot(x_ref[...], wf_ref[...], preferred_element_type=jnp.float32)
         + bf_ref[...] + pos_ref[...])

    # DiagonalGaussianDistribution: chunk along channels, clamp logvar, sample.
    mean = f[:, :HIDDEN]
    logvar = jnp.clip(f[:, HIDDEN:], -30.0, 20.0)
    std = jnp.exp(0.5 * logvar)            # single EUP transcendental
    var = std * std
    z = mean + std * noise_ref[...]

    # KL reduced in-kernel: 0.5 * sum(mean^2 + var - 1 - logvar) over this
    # tile (== one image).  Written as a lane-dense (1,8,128) block.
    kl_tile = 0.5 * jnp.sum(mean * mean + var - 1.0 - logvar,
                            axis=(0, 1), keepdims=True)            # (1, 1)
    kl_ref[...] = jnp.broadcast_to(kl_tile.reshape(1, 1, 1), kl_ref.shape)

    # Decoder (synthetic linear placeholder): latent token -> 8x8x3 patch.
    out_ref[...] = (jnp.dot(z, wdec_ref[...], preferred_element_type=jnp.float32)
                    + bdec_ref[...])


def local_vae_forward(img, params, noise):
    """img: (B, 3, 256, 256) NCHW float32 -> (pixel (B,3,256,256), kl (B,))."""
    B = img.shape[0]
    N = B * TOK_PER_IMG

    # img2patch (unfold order): (B,3,256,256) -> (N, 192);
    # token t = b*1024 + ph*32 + pw, feature = C*64 + kh*8 + kw.
    x = img.reshape(B, 3, GRID, PATCH_K, GRID, PATCH_K)
    x = x.transpose(0, 2, 4, 1, 3, 5).reshape(N, PATCH_DIM)

    # Exact fold of the three consecutive linear stages (no nonlinearity
    # between them): enc -> ViT 1x1 patch embedding -> conv1.
    w_fused = params["w_enc"] @ params["w_vit"] @ params["w1"]            # (192, 32)
    b_fused = ((params["b_enc"] @ params["w_vit"] + params["b_vit"])
               @ params["w1"] + params["b1"])                             # (1, 32)
    pos_proj = params["pos"] @ params["w1"]                               # (1024, 32)

    tok = lambda c: pl.BlockSpec((TM, c), lambda b: (b, 0))
    full = lambda shape: pl.BlockSpec(shape, lambda b, _s=shape: (0,) * len(_s))

    out_patch, kl_blk = pl.pallas_call(
        _vae_kernel,
        out_shape=(jax.ShapeDtypeStruct((N, PATCH_DIM), jnp.float32),
                   jax.ShapeDtypeStruct((B, 8, 128), jnp.float32)),
        grid=(N // TM,),
        in_specs=[tok(PATCH_DIM),                                 # x patches
                  full((TOK_PER_IMG, 2 * HIDDEN)),                # pos_proj (VMEM-resident)
                  tok(HIDDEN),                                    # noise
                  full((PATCH_DIM, 2 * HIDDEN)),                  # W_fused
                  full((1, 2 * HIDDEN)),                          # b_fused
                  full((HIDDEN, PATCH_DIM)),                      # w_dec
                  full((1, PATCH_DIM))],                          # b_dec
        out_specs=(tok(PATCH_DIM),
                   pl.BlockSpec((1, 8, 128), lambda b: (b, 0, 0))),
        compiler_params=pltpu.CompilerParams(dimension_semantics=("parallel",)),
    )(x, pos_proj, noise, w_fused, b_fused, params["w_dec"], params["b_dec"])

    # patch2img (fold): (N, 192) -> (B, 3, 256, 256)
    pix = out_patch.reshape(B, GRID, GRID, 3, PATCH_K, PATCH_K)
    pix = pix.transpose(0, 3, 1, 4, 2, 5).reshape(B, 3, IMG, IMG)

    kl = kl_blk[:, 0, 0]           # one tile == one image -> per-batch KL
    return pix, kl


def init_params(key):
    ks = jax.random.split(key, 10)

    def w(k, shape, fan_in):
        return jax.random.normal(k, shape, jnp.float32) / jnp.sqrt(float(fan_in))

    return {
        "w_enc": w(ks[0], (PATCH_DIM, 2 * HIDDEN), PATCH_DIM),
        "b_enc": w(ks[1], (1, 2 * HIDDEN), PATCH_DIM),
        "pos":   0.02 * jax.random.normal(ks[2], (TOK_PER_IMG, MID), jnp.float32),
        "w_vit": w(ks[3], (2 * HIDDEN, MID), 2 * HIDDEN),
        "b_vit": w(ks[4], (1, MID), 2 * HIDDEN),
        "w1":    w(ks[5], (MID, 2 * HIDDEN), MID),
        "b1":    w(ks[6], (1, 2 * HIDDEN), MID),
        "w_dec": w(ks[7], (HIDDEN, PATCH_DIM), HIDDEN),
        "b_dec": w(ks[8], (1, PATCH_DIM), HIDDEN),
    }


if __name__ == "__main__":
    key = jax.random.PRNGKey(0)
    k_img, k_noise, k_par = jax.random.split(key, 3)

    B = 2
    batch_img = jax.random.normal(k_img, (B, 3, IMG, IMG), jnp.float32)
    noise = jax.random.normal(k_noise, (B * TOK_PER_IMG, HIDDEN), jnp.float32)
    params = init_params(k_par)

    pixel, kl = jax.jit(local_vae_forward)(batch_img, params, noise)
    jax.block_until_ready((pixel, kl))

    assert pixel.shape == (B, 3, IMG, IMG), pixel.shape
    assert kl.shape == (B,), kl.shape
    assert bool(jnp.all(jnp.isfinite(pixel))) and bool(jnp.all(jnp.isfinite(kl)))
    print("KERNEL_OK")
</pallas_src>

<mosaic_0001>
module attributes {stable_mosaic.version = 11 : i64} {
  func.func @_vae_kernel(%arg0: i32, %arg1: memref<1024x192xf32, #tpu.memory_space<vmem>>, %arg2: memref<1024x32xf32, #tpu.memory_space<vmem>>, %arg3: memref<1024x16xf32, #tpu.memory_space<vmem>>, %arg4: memref<192x32xf32, #tpu.memory_space<vmem>>, %arg5: memref<1x32xf32, #tpu.memory_space<vmem>>, %arg6: memref<16x192xf32, #tpu.memory_space<vmem>>, %arg7: memref<1x192xf32, #tpu.memory_space<vmem>>, %arg8: memref<1024x192xf32, #tpu.memory_space<vmem>>, %arg9: memref<1x8x128xf32, #tpu.memory_space<vmem>>) attributes {dimension_semantics = [#tpu.dimension_semantics<parallel>], iteration_bounds = array<i64: 2>, scalar_prefetch = 0 : i64, scratch_operands = 0 : i64, tpu.core_type = #tpu.core_type<tc>, window_params = [{transform_indices = @transform_0, window_bounds = array<i64: 1024, 192>}, {pipeline_mode = #tpu.pipeline_mode<synchronous>, transform_indices = @transform_1, window_bounds = array<i64: 1024, 32>}, {transform_indices = @transform_2, window_bounds = array<i64: 1024, 16>}, {pipeline_mode = #tpu.pipeline_mode<synchronous>, transform_indices = @transform_3, window_bounds = array<i64: 192, 32>}, {pipeline_mode = #tpu.pipeline_mode<synchronous>, transform_indices = @transform_4, window_bounds = array<i64: 1, 32>}, {pipeline_mode = #tpu.pipeline_mode<synchronous>, transform_indices = @transform_5, window_bounds = array<i64: 16, 192>}, {pipeline_mode = #tpu.pipeline_mode<synchronous>, transform_indices = @transform_6, window_bounds = array<i64: 1, 192>}, {transform_indices = @transform_7, window_bounds = array<i64: 1024, 192>}, {transform_indices = @transform_8, window_bounds = array<i64: 1, 8, 128>}]} {
    %c0 = arith.constant 0 : index
    %c0_0 = arith.constant 0 : index
    %0 = vector.load %arg1[%c0, %c0_0] : memref<1024x192xf32, #tpu.memory_space<vmem>>, vector<1024x192xf32>
    %c0_1 = arith.constant 0 : index
    %c0_2 = arith.constant 0 : index
    %1 = vector.load %arg4[%c0_1, %c0_2] : memref<192x32xf32, #tpu.memory_space<vmem>>, vector<192x32xf32>
    %cst = arith.constant dense<0.000000e+00> : vector<1024x32xf32>
    %2 = tpu.matmul %0, %1, %cst {dimension_numbers = #tpu.dot_dimension_numbers<[1], [0], [0], [1], [0, 0, 1, 1], [], []>} : vector<1024x192xf32>, vector<192x32xf32>, vector<1024x32xf32> -> vector<1024x32xf32>
    %c0_3 = arith.constant 0 : index
    %c0_4 = arith.constant 0 : index
    %3 = vector.load %arg5[%c0_3, %c0_4] : memref<1x32xf32, #tpu.memory_space<vmem>>, vector<1x32xf32>
    %4 = vector.broadcast %3 : vector<1x32xf32> to vector<1024x32xf32>
    %5 = arith.addf %2, %4 : vector<1024x32xf32>
    %c0_5 = arith.constant 0 : index
    %c0_6 = arith.constant 0 : index
    %6 = vector.load %arg2[%c0_5, %c0_6] : memref<1024x32xf32, #tpu.memory_space<vmem>>, vector<1024x32xf32>
    %7 = arith.addf %5, %6 : vector<1024x32xf32>
    %8 = vector.extract_strided_slice %7 {offsets = [0, 0], sizes = [1024, 16], strides = [1, 1]} : vector<1024x32xf32> to vector<1024x16xf32>
    %9 = vector.extract_strided_slice %7 {offsets = [0, 16], sizes = [1024, 16], strides = [1, 1]} : vector<1024x32xf32> to vector<1024x16xf32>
    %cst_7 = arith.constant -3.000000e+01 : f32
    %cst_8 = arith.constant 2.000000e+01 : f32
    %10 = vector.broadcast %cst_7 : f32 to vector<1024x16xf32>
    %11 = arith.maximumf %10, %9 : vector<1024x16xf32>
    %12 = vector.broadcast %cst_8 : f32 to vector<1024x16xf32>
    %13 = arith.minimumf %12, %11 : vector<1024x16xf32>
    %cst_9 = arith.constant 5.000000e-01 : f32
    %14 = vector.broadcast %cst_9 : f32 to vector<1024x16xf32>
    %15 = arith.mulf %14, %13 : vector<1024x16xf32>
    %16 = math.exp %15 : vector<1024x16xf32>
    %17 = arith.mulf %16, %16 : vector<1024x16xf32>
    %c0_10 = arith.constant 0 : index
    %c0_11 = arith.constant 0 : index
    %18 = vector.load %arg3[%c0_10, %c0_11] : memref<1024x16xf32, #tpu.memory_space<vmem>>, vector<1024x16xf32>
    %19 = arith.mulf %16, %18 : vector<1024x16xf32>
    %20 = arith.addf %8, %19 : vector<1024x16xf32>
    %21 = arith.mulf %8, %8 : vector<1024x16xf32>
    %22 = arith.addf %21, %17 : vector<1024x16xf32>
    %cst_12 = arith.constant 1.000000e+00 : f32
    %23 = vector.broadcast %cst_12 : f32 to vector<1024x16xf32>
    %24 = arith.subf %22, %23 : vector<1024x16xf32>
    %25 = arith.subf %24, %13 : vector<1024x16xf32>
    %26 = vector.shape_cast %25 : vector<1024x16xf32> to vector<1x1024x16xf32>
    %cst_13 = arith.constant dense<0.000000e+00> : vector<1xf32>
    %27 = vector.multi_reduction <add>, %26, %cst_13 [1, 2] : vector<1x1024x16xf32> to vector<1xf32>
    %28 = vector.shape_cast %27 : vector<1xf32> to vector<1x1x1xf32>
    %29 = vector.extract %28[0, 0, 0] : f32 from vector<1x1x1xf32>
    %30 = vector.broadcast %29 : f32 to vector<1x1xf32>
    %cst_14 = arith.constant 5.000000e-01 : f32
    %31 = vector.broadcast %cst_14 : f32 to vector<1x1xf32>
    %32 = arith.mulf %31, %30 : vector<1x1xf32>
    %33 = vector.shape_cast %32 : vector<1x1xf32> to vector<1x1x1xf32>
    %34 = vector.shape_cast %33 : vector<1x1x1xf32> to vector<1x1x1xf32>
    %35 = vector.broadcast %34 : vector<1x1x1xf32> to vector<1x8x128xf32>
    %c0_15 = arith.constant 0 : index
    %c0_16 = arith.constant 0 : index
    %c0_17 = arith.constant 0 : index
    %36 = vector.load %arg9[%c0_15, %c0_16, %c0_17] : memref<1x8x128xf32, #tpu.memory_space<vmem>>, vector<1x8x128xf32>
    tpu.vector_store %arg9[%c0_15, %c0_16, %c0_17], %35 {strides = array<i32>} : memref<1x8x128xf32, #tpu.memory_space<vmem>>, vector<1x8x128xf32>,
    %c0_18 = arith.constant 0 : index
    %c0_19 = arith.constant 0 : index
    %37 = vector.load %arg6[%c0_18, %c0_19] : memref<16x192xf32, #tpu.memory_space<vmem>>, vector<16x192xf32>
    %cst_20 = arith.constant dense<0.000000e+00> : vector<1024x192xf32>
    %38 = tpu.matmul %20, %37, %cst_20 {dimension_numbers = #tpu.dot_dimension_numbers<[1], [0], [0], [1], [0, 0, 1, 1], [], []>} : vector<1024x16xf32>, vector<16x192xf32>, vector<1024x192xf32> -> vector<1024x192xf32>
    %c0_21 = arith.constant 0 : index
    %c0_22 = arith.constant 0 : index
    %39 = vector.load %arg7[%c0_21, %c0_22] : memref<1x192xf32, #tpu.memory_space<vmem>>, vector<1x192xf32>
    %40 = vector.broadcast %39 : vector<1x192xf32> to vector<1024x192xf32>
    %41 = arith.addf %38, %40 : vector<1024x192xf32>
    %c0_23 = arith.constant 0 : index
    %c0_24 = arith.constant 0 : index
    %42 = vector.load %arg8[%c0_23, %c0_24] : memref<1024x192xf32, #tpu.memory_space<vmem>>, vector<1024x192xf32>
    tpu.vector_store %arg8[%c0_23, %c0_24], %41 {strides = array<i32>} : memref<1024x192xf32, #tpu.memory_space<vmem>>, vector<1024x192xf32>,
    return
  }
  func.func @transform_0(%arg0: i32) -> (i32, i32) {
    %c0_i32 = arith.constant 0 : i32
    %c0_i32_0 = arith.constant 0 : i32
    return %arg0, %c0_i32 : i32, i32
  }
  func.func @transform_1(%arg0: i32) -> (i32, i32) {
    %c0_i32 = arith.constant 0 : i32
    %c0_i32_0 = arith.constant 0 : i32
    %c0_i32_1 = arith.constant 0 : i32
    return %c0_i32, %c0_i32_0 : i32, i32
  }
  func.func @transform_2(%arg0: i32) -> (i32, i32) {
    %c0_i32 = arith.constant 0 : i32
    %c0_i32_0 = arith.constant 0 : i32
    return %arg0, %c0_i32 : i32, i32
  }
  func.func @transform_3(%arg0: i32) -> (i32, i32) {
    %c0_i32 = arith.constant 0 : i32
    %c0_i32_0 = arith.constant 0 : i32
    %c0_i32_1 = arith.constant 0 : i32
    return %c0_i32, %c0_i32_0 : i32, i32
  }
  func.func @transform_4(%arg0: i32) -> (i32, i32) {
    %c0_i32 = arith.constant 0 : i32
    %c0_i32_0 = arith.constant 0 : i32
    %c0_i32_1 = arith.constant 0 : i32
    return %c0_i32, %c0_i32_0 : i32, i32
  }
  func.func @transform_5(%arg0: i32) -> (i32, i32) {
    %c0_i32 = arith.constant 0 : i32
    %c0_i32_0 = arith.constant 0 : i32
    %c0_i32_1 = arith.constant 0 : i32
    return %c0_i32, %c0_i32_0 : i32, i32
  }
  func.func @transform_6(%arg0: i32) -> (i32, i32) {
    %c0_i32 = arith.constant 0 : i32
    %c0_i32_0 = arith.constant 0 : i32
    %c0_i32_1 = arith.constant 0 : i32
    return %c0_i32, %c0_i32_0 : i32, i32
  }
  func.func @transform_7(%arg0: i32) -> (i32, i32) {
    %c0_i32 = arith.constant 0 : i32
    %c0_i32_0 = arith.constant 0 : i32
    return %arg0, %c0_i32 : i32, i32
  }
  func.func @transform_8(%arg0: i32) -> (i32, i32, i32) {
    %c0_i32 = arith.constant 0 : i32
    %c0_i32_0 = arith.constant 0 : i32
    %c0_i32_1 = arith.constant 0 : i32
    return %arg0, %c0_i32, %c0_i32_0 : i32, i32, i32
  }
}

</mosaic_0001>

<bundles_post_ra>
// kernel: local_vae_forward.1
= control target key start
LH: loop header
LB: loop body
LE: loop exit
PB: predicated region body
PF: predicated region fallthrough
CT: control target
= control target key end

     0   :  { %s8325_s27 = smov 0   ;;  %s13726_s0 = inlined_call_operand.vmem [shape: f32[2048,192], index: 0, kind: input, shape index: {}]   ;;  %s13727_s1 = inlined_call_operand.vmem [shape: f32[1024,32], index: 1, kind: input, shape index: {}]   ;;  %s13728_s2 = inlined_call_operand.vmem [shape: f32[2048,16], index: 2, kind: input, shape index: {}]   ;;  %s13729_s3 = inlined_call_operand.vmem [shape: f32[192,32], index: 3, kind: input, shape index: {}]   ;;  %s13730_s4 = inlined_call_operand.vmem [shape: f32[1,32], index: 4, kind: input, shape index: {}]   ;;  %s13731_s5 = inlined_call_operand.vmem [shape: f32[16,192], index: 5, kind: input, shape index: {}]   ;;  %s13732_s6 = inlined_call_operand.vmem [shape: f32[1,192], index: 6, kind: input, shape index: {}]   ;;  %s13733_s7 = inlined_call_operand.vmem [shape: f32[2048,192], index: 7, kind: output, shape index: {0}]   ;;  %s13734_s8 = inlined_call_operand.vmem [shape: f32[2,8,128], index: 8, kind: output, shape index: {1}]  }
   0x1 LB: > { %s8331_s28 = sadd.s32 4294967295, %s8274_s27   ;;  %p7554_p0 = scmp.ge.s32.totalorder %s8274_s27, 1  ;;  %s8274_s27 = sphi %s8325_s27, %s19_s27  }
   0x2   : > { %p278_p1 = scmp.lt.s32.totalorder %s8274_s27, 3 }
   0x4   : > { %p279_p2 = pnand %p7554_p0, %p278_p1 }
   0x6   : > { %282 = sbr.rel (%p279_p2) target bundleno = 1387 (0x56b), region = 48 }
   0xd   : > { %v603_v0 = vld [vmem:[%s13729_s3] sm:$0xff]  ;;  %v604_v1 = vld [vmem:[%s13729_s3 + $0x8] sm:$0xff]  ;;  %v605_v2 = vld [vmem:[%s13729_s3 + $0x10] sm:$0xff]  ;;  %s7555_s13 = sshll.u32 %s8331_s28, 7  ;;  %v8276_v3 = vmov 0.0|0.0   ;;  %s8277_s25 = smov 16  }
   0xe   : > { %7953 = vmatprep.subr.bf16.mxu0 %v8276_v3  ;;  %v7954_v4 = vpack.c.bf16 %v604_v1, %v603_v0  ;;  %v606_v5 = vld [vmem:[%s13729_s3 + $0x18] sm:$0xff]  ;;  %p324_p3 = scmp.lt.s32.totalorder %s7555_s13, 255  ;;  %v607_v7 = vld [vmem:[%s13729_s3 + $0x20] sm:$0xff]  ;;  %v608_v8 = vld [vmem:[%s13729_s3 + $0x28] sm:$0xff]  ;;  %vm634_vm0 = vcmask 523264   ;;  %s8278_s22 = smov 112  }
   0xf   : > { %v7957_v6 = vpack.c.bf16 %v606_v5, %v605_v2  ;;  %v7960_v9 = vpack.c.bf16 %v608_v8, %v607_v7  ;;  %v609_v12 = vld [vmem:[%s13729_s3 + $0x30] sm:$0xff]  ;;  %v610_v13 = vld [vmem:[%s13729_s3 + $0x38] sm:$0xff]  ;;  %v611_v17 = vld [vmem:[%s13729_s3 + $0x40] sm:$0xff]  ;;  %vm5692_vm1 = vcmask 130048   ;;  %p343_p4 = scmp.lt.s32.totalorder %s8331_s28, 1 }
  0x10   : > { %7955 = vmatpush1.bf16.msra.mxu0 %v7954_v4  ;;  %s15085_s13 = smov (!%p324_p3, %s7555_s13), 255  ;;  %v7963_v16 = vpack.c.bf16 %v610_v13, %v609_v12  ;;  %v612_v18 = vld [vmem:[%s13729_s3 + $0x48] sm:$0xff]  ;;  %v613_v23 = vld [vmem:[%s13729_s3 + $0x50] sm:$0xff]  ;;  %v614_v24 = vld [vmem:[%s13729_s3 + $0x58] sm:$0xff] }
  0x11   : > { %7956 = vmatprep.subr.bf16.mxu0 %v8276_v3  ;;  %s7559_s20 = sshll.u32 %s15085_s13, 3  ;;  %s7951_s24 = sshll.u32 %s15085_s13, 4  ;;  %v7966_v22 = vpack.c.bf16 %v612_v18, %v611_v17  ;;  %v7969_v27 = vpack.c.bf16 %v614_v24, %v613_v23  ;;  %v615_v28 = vld [vmem:[%s13729_s3 + $0x60] sm:$0xff]  ;;  %v616_v29 = vld [vmem:[%s13729_s3 + $0x68] sm:$0xff]  ;;  %v617_v33 = vld [vmem:[%s13729_s3 + $0x70] sm:$0xff] }
  0x12   : > { %s8362_s23 = scalar_lea.vmem %s13728_s2, %s7559_s20  ;;  %s8383_s12 = scalar_lea.vmem %s13726_s0, %s7951_s24  ;;  %v7972_v32 = vpack.c.bf16 %v616_v29, %v615_v28  ;;  %v618_v34 = vld [vmem:[%s13729_s3 + $0x78] sm:$0xff]  ;;  %v619_v38 = vld [vmem:[%s13729_s3 + $0x80] sm:$0xff]  ;;  %v620_v39 = vld [vmem:[%s13729_s3 + $0x88] sm:$0xff] }
  0x13   : > { %v2748_v10 = vld [vmem:[%s8362_s23] sm:$0xff]  ;;  %v2750_v11 = vld [vmem:[%s8362_s23 + $0x10] sm:$0xff]  ;;  %v2749_v14 = vld [vmem:[%s8362_s23 + $0x8] sm:$0xff]  ;;  %v7975_v37 = vpack.c.bf16 %v618_v34, %v617_v33  ;;  %v7978_v42 = vpack.c.bf16 %v620_v39, %v619_v38  ;;  %s15087_s28 = smov (!%p343_p4, %s8331_s28), 1 }
  0x14   : > { %7958 = vmatpush1.bf16.msra.mxu0 %v7957_v6  ;;  %3004 = vrot.lane.b32.xlu0 %v2748_v10, %s8277_s25  ;;  %v2751_v15 = vld [vmem:[%s8362_s23 + $0x18] sm:$0xff]  ;;  %v2752_v19 = vld [vmem:[%s8362_s23 + $0x20] sm:$0xff]  ;;  %v348_v20 = vld [vmem:[%s8383_s12 + $0x8] sm:$0xff] }
  0x15   : > { %7959 = vmatprep.subr.bf16.mxu0 %v8276_v3  ;;  %3008 = vrot.lane.b32.xlu1 %v2750_v11, %s8277_s25  ;;  %v2753_v21 = vld [vmem:[%s8362_s23 + $0x28] sm:$0xff]  ;;  %v2754_v25 = vld [vmem:[%s8362_s23 + $0x30] sm:$0xff]  ;;  %v2755_v26 = vld [vmem:[%s8362_s23 + $0x38] sm:$0xff] }
  0x16   : > { %7565 = vmatprep.mubr.msk.f32.mxu0 %vm634_vm0, %v348_v20  ;;  %v2756_v30 = vld [vmem:[%s8362_s23 + $0x40] sm:$0xff]  ;;  %v2757_v31 = vld [vmem:[%s8362_s23 + $0x48] sm:$0xff]  ;;  %v2758_v35 = vld [vmem:[%s8362_s23 + $0x50] sm:$0xff] }
  0x17   : > { %v2759_v36 = vld [vmem:[%s8362_s23 + $0x58] sm:$0xff]  ;;  %v2760_v40 = vld [vmem:[%s8362_s23 + $0x60] sm:$0xff]  ;;  %v2761_v41 = vld [vmem:[%s8362_s23 + $0x68] sm:$0xff] }
  0x18   : > { %7961 = vmatpush1.bf16.msra.mxu0 %v7960_v9  ;;  %3006 = vrot.lane.b32.xlu0 %v2749_v14, %s8277_s25  ;;  %v621_v43 = vld [vmem:[%s13729_s3 + $0x90] sm:$0xff]  ;;  %v622_v44 = vld [vmem:[%s13729_s3 + $0x98] sm:$0xff]  ;;  %v623_v48 = vld [vmem:[%s13729_s3 + $0xa0] sm:$0xff] }
  0x19   : > { %7962 = vmatprep.subr.bf16.mxu0 %v8276_v3  ;;  %3010 = vrot.lane.b32.xlu1 %v2751_v15, %s8277_s25  ;;  %v2762_v45 = vld [vmem:[%s8362_s23 + $0x70] sm:$0xff]  ;;  %v2763_v46 = vld [vmem:[%s8362_s23 + $0x78] sm:$0xff]  ;;  %v7981_v47 = vpack.c.bf16 %v622_v44, %v621_v43  ;;  %v624_v49 = vld [vmem:[%s13729_s3 + $0xa8] sm:$0xff] }
  0x1a   : > { %v2764_v50 = vld [vmem:[%s8362_s23 + $0x80] sm:$0xff]  ;;  %v2765_v51 = vld [vmem:[%s8362_s23 + $0x88] sm:$0xff]  ;;  %v7984_v52 = vpack.c.bf16 %v624_v49, %v623_v48  ;;  %v625_v53 = vld [vmem:[%s13729_s3 + $0xb0] sm:$0xff] }
  0x1b   : > { %v626_v54 = vld [vmem:[%s13729_s3 + $0xb8] sm:$0xff]  ;;  %v2766_v55 = vld [vmem:[%s8362_s23 + $0x90] sm:$0xff]  ;;  %v2768_v58 = vld [vmem:[%s8362_s23 + $0xa0] sm:$0xff] }
  0x1c   : > { %7964 = vmatpush1.bf16.msra.mxu0 %v7963_v16  ;;  %3012 = vrot.lane.b32.xlu0 %v2752_v19, %s8277_s25  ;;  %v2767_v56 = vld [vmem:[%s8362_s23 + $0x98] sm:$0xff]  ;;  %v7987_v57 = vpack.c.bf16 %v626_v54, %v625_v53  ;;  %v2769_v59 = vld [vmem:[%s8362_s23 + $0xa8] sm:$0xff]  ;;  %v347_v60 = vld [vmem:[%s8383_s12] sm:$0xff] }
  0x1d   : > { %7965 = vmatprep.subr.bf16.mxu0 %v8276_v3  ;;  %3014 = vrot.lane.b32.xlu1 %v2753_v21, %s8277_s25  ;;  %v350_v61 = vld [vmem:[%s8383_s12 + $0x18] sm:$0xff]  ;;  %v2770_v62 = vld [vmem:[%s8362_s23 + $0xb0] sm:$0xff]  ;;  %v352_v1 = vld [vmem:[%s8383_s12 + $0x28] sm:$0xff] }
  0x1e   : > { %v2771_v63 = vld [vmem:[%s8362_s23 + $0xb8] sm:$0xff]  ;;  %v349_v0 = vld [vmem:[%s8383_s12 + $0x10] sm:$0xff]  ;;  %v2772_v2 = vld [vmem:[%s8362_s23 + $0xc0] sm:$0xff] }
  0x1f   : > { %v351_v4 = vld [vmem:[%s8383_s12 + $0x20] sm:$0xff]  ;;  %v354_v5 = vld [vmem:[%s8383_s12 + $0x38] sm:$0xff]  ;;  %v2774_v6 = vld [vmem:[%s8362_s23 + $0xd0] sm:$0xff] }
  0x20   : > { %7967 = vmatpush1.bf16.msra.mxu0 %v7966_v22  ;;  %3016 = vrot.lane.b32.xlu0 %v2754_v25, %s8277_s25  ;;  %v2775_v7 = vld [vmem:[%s8362_s23 + $0xd8] sm:$0xff]  ;;  %v353_v8 = vld [vmem:[%s8383_s12 + $0x30] sm:$0xff]  ;;  %v356_v9 = vld [vmem:[%s8383_s12 + $0x48] sm:$0xff] }
  0x21   : > { %7968 = vmatprep.subr.bf16.mxu0 %v8276_v3  ;;  %3018 = vrot.lane.b32.xlu1 %v2755_v26, %s8277_s25  ;;  %v2776_v10 = vld [vmem:[%s8362_s23 + $0xe0] sm:$0xff]  ;;  %v2777_v11 = vld [vmem:[%s8362_s23 + $0xe8] sm:$0xff]  ;;  %v358_v13 = vld [vmem:[%s8383_s12 + $0x58] sm:$0xff] }
  0x22   : > { %v355_v12 = vld [vmem:[%s8383_s12 + $0x40] sm:$0xff]  ;;  %v2778_v14 = vld [vmem:[%s8362_s23 + $0xf0] sm:$0xff]  ;;  %v2779_v15 = vld [vmem:[%s8362_s23 + $0xf8] sm:$0xff] }
  0x23   : > { %v357_v16 = vld [vmem:[%s8383_s12 + $0x50] sm:$0xff]  ;;  %v360_v17 = vld [vmem:[%s8383_s12 + $0x68] sm:$0xff]  ;;  %v2780_v18 = vld [vmem:[%s8362_s23 + $0x100] sm:$0xff] }
  0x24   : > { %7970 = vmatpush1.bf16.msra.mxu0 %v7969_v27  ;;  %3020 = vrot.lane.b32.xlu0 %v2756_v30, %s8277_s25  ;;  %v2781_v19 = vld [vmem:[%s8362_s23 + $0x108] sm:$0xff]  ;;  %v359_v20 = vld [vmem:[%s8383_s12 + $0x60] sm:$0xff]  ;;  %v362_v21 = vld [vmem:[%s8383_s12 + $0x78] sm:$0xff] }
  0x25   : > { %7971 = vmatprep.subr.bf16.mxu0 %v8276_v3  ;;  %3022 = vrot.lane.b32.xlu1 %v2757_v31, %s8277_s25  ;;  %v2782_v22 = vld [vmem:[%s8362_s23 + $0x110] sm:$0xff]  ;;  %v2783_v23 = vld [vmem:[%s8362_s23 + $0x118] sm:$0xff]  ;;  %v364_v25 = vld [vmem:[%s8383_s12 + $0x88] sm:$0xff] }
  0x26   : > { %v361_v24 = vld [vmem:[%s8383_s12 + $0x70] sm:$0xff]  ;;  %v2784_v26 = vld [vmem:[%s8362_s23 + $0x120] sm:$0xff]  ;;  %v2785_v27 = vld [vmem:[%s8362_s23 + $0x128] sm:$0xff] }
  0x27   : > { %v363_v28 = vld [vmem:[%s8383_s12 + $0x80] sm:$0xff]  ;;  %v366_v29 = vld [vmem:[%s8383_s12 + $0x98] sm:$0xff]  ;;  %v2786_v30 = vld [vmem:[%s8362_s23 + $0x130] sm:$0xff] }
  0x28   : > { %7973 = vmatpush1.bf16.msra.mxu0 %v7972_v32  ;;  %3024 = vrot.lane.b32.xlu0 %v2758_v35, %s8277_s25  ;;  %v2787_v31 = vld [vmem:[%s8362_s23 + $0x138] sm:$0xff]  ;;  %v365_v32 = vld [vmem:[%s8383_s12 + $0x90] sm:$0xff]  ;;  %v368_v33 = vld [vmem:[%s8383_s12 + $0xa8] sm:$0xff] }
  0x29   : > { %7974 = vmatprep.subr.bf16.mxu0 %v8276_v3  ;;  %3026 = vrot.lane.b32.xlu1 %v2759_v36, %s8277_s25  ;;  %v2788_v34 = vld [vmem:[%s8362_s23 + $0x140] sm:$0xff]  ;;  %v2789_v35 = vld [vmem:[%s8362_s23 + $0x148] sm:$0xff]  ;;  %v2790_v38 = vld [vmem:[%s8362_s23 + $0x150] sm:$0xff] }
  0x2a   : > { %v367_v36 = vld [vmem:[%s8383_s12 + $0xa0] sm:$0xff]  ;;  %v2791_v39 = vld [vmem:[%s8362_s23 + $0x158] sm:$0xff]  ;;  %v2793_v43 = vld [vmem:[%s8362_s23 + $0x168] sm:$0xff] }
  0x2b   : > { %v371_v44 = vld [vmem:[%s8383_s12 + $0xc0] sm:$0xff]  ;;  %v373_v48 = vld [vmem:[%s8383_s12 + $0xd0] sm:$0xff]  ;;  %v376_v49 = vld [vmem:[%s8383_s12 + $0xe8] sm:$0xff] }
  0x2c   : > { %7976 = vmatpush1.bf16.msra.mxu0 %v7975_v37  ;;  %3028 = vrot.lane.b32.xlu0 %v2760_v40, %s8277_s25  ;;  %v370_v37 = vld [vmem:[%s8383_s12 + $0xb8] sm:$0xff]  ;;  %v369_v40 = vld [vmem:[%s8383_s12 + $0xb0] sm:$0xff] }
  0x2d   : > { %7977 = vmatprep.subr.bf16.mxu0 %v8276_v3  ;;  %3030 = vrot.lane.b32.xlu1 %v2761_v41, %s8277_s25  ;;  %v372_v41 = vld [vmem:[%s8383_s12 + $0xc8] sm:$0xff]  ;;  %v378_v53 = vld [vmem:[%s8383_s12 + $0xf8] sm:$0xff]  ;;  %v2798_v54 = vld [vmem:[%s8362_s23 + $0x190] sm:$0xff] }
  0x30   : > { %7979 = vmatpush1.bf16.msra.mxu0 %v7978_v42  ;;  %3032 = vrot.lane.b32.xlu0 %v2762_v45, %s8277_s25  ;;  %v2792_v42 = vld [vmem:[%s8362_s23 + $0x160] sm:$0xff]  ;;  %v374_v45 = vld [vmem:[%s8383_s12 + $0xd8] sm:$0xff] }
  0x31   : > { %7980 = vmatprep.subr.bf16.mxu0 %v8276_v3  ;;  %3034 = vrot.lane.b32.xlu1 %v2763_v46, %s8277_s25  ;;  %v2794_v46 = vld [vmem:[%s8362_s23 + $0x170] sm:$0xff] }
  0x34   : > { %7982 = vmatpush1.bf16.msra.mxu0 %v7981_v47  ;;  %3036 = vrot.lane.b32.xlu0 %v2764_v50, %s8277_s25  ;;  %v2795_v47 = vld [vmem:[%s8362_s23 + $0x178] sm:$0xff]  ;;  %v2796_v50 = vld [vmem:[%s8362_s23 + $0x180] sm:$0xff] }
  0x35   : > { %7983 = vmatprep.subr.bf16.mxu0 %v8276_v3  ;;  %3038 = vrot.lane.b32.xlu1 %v2765_v51, %s8277_s25  ;;  %v2797_v51 = vld [vmem:[%s8362_s23 + $0x188] sm:$0xff] }
  0x38   : > { %7985 = vmatpush1.bf16.msra.mxu0 %v7984_v52  ;;  %3040 = vrot.lane.b32.xlu0 %v2766_v55, %s8277_s25  ;;  %v375_v52 = vld [vmem:[%s8383_s12 + $0xe0] sm:$0xff]  ;;  %v2799_v55 = vld [vmem:[%s8362_s23 + $0x198] sm:$0xff] }
  0x39   : > { %7986 = vmatprep.subr.bf16.mxu0 %v8276_v3  ;;  %3042 = vrot.lane.b32.xlu1 %v2767_v56, %s8277_s25  ;;  %v2773_v3 = vld [vmem:[%s8362_s23 + $0xc8] sm:$0xff]  ;;  %v377_v56 = vld [vmem:[%s8383_s12 + $0xf0] sm:$0xff] }
  0x3c   : > { %7988 = vmatpush1.bf16.msra.mxu0 %v7987_v57  ;;  %3044 = vrot.lane.b32.xlu0 %v2768_v58, %s8277_s25  ;;  %v380_v57 = vld [vmem:[%s8383_s12 + $0x108] sm:$0xff]  ;;  %v2800_v58 = vld [vmem:[%s8362_s23 + $0x1a0] sm:$0xff] }
  0x3d   : > { %3046 = vrot.lane.b32.xlu1 %v2769_v59, %s8277_s25  ;;  %v2801_v59 = vld [vmem:[%s8362_s23 + $0x1a8] sm:$0xff] }
  0x3f   : > { %1084 = vmatmul.mubr.f32.vlgmr.msra.gmra.mrb[0].mxu0 %v347_v60  ;;  %v379_v60 = vld [vmem:[%s8383_s12 + $0x100] sm:$0xff] }
  0x40   : > { %7566 = vmatprep.mubr.msk.f32.mxu0 %vm634_vm0, %v350_v61  ;;  %3048 = vrot.lane.b32.xlu0 %v2770_v62, %s8277_s25  ;;  %v382_v61 = vld [vmem:[%s8383_s12 + $0x118] sm:$0xff]  ;;  %v2802_v62 = vld [vmem:[%s8362_s23 + $0x1b0] sm:$0xff] }
  0x41   : > { %3050 = vrot.lane.b32.xlu1 %v2771_v63, %s8277_s25  ;;  %v2803_v63 = vld [vmem:[%s8362_s23 + $0x1b8] sm:$0xff] }
  0x43   : > { %1089 = vmatmul.mubr.f32.gmra.mrb[2].mxu0 %v349_v0  ;;  %v381_v0 = vld [vmem:[%s8383_s12 + $0x110] sm:$0xff] }
  0x44   : > { %7567 = vmatprep.mubr.msk.f32.mxu0 %vm634_vm0, %v352_v1  ;;  %3052 = vrot.lane.b32.xlu0 %v2772_v2, %s8277_s25  ;;  %v384_v1 = vld [vmem:[%s8383_s12 + $0x128] sm:$0xff]  ;;  %v2804_v2 = vld [vmem:[%s8362_s23 + $0x1c0] sm:$0xff] }
  0x45   : > { %3054 = vrot.lane.b32.xlu1 %v2773_v3, %s8277_s25  ;;  %v2805_v3 = vld [vmem:[%s8362_s23 + $0x1c8] sm:$0xff] }
  0x47   : > { %1094 = vmatmul.mubr.f32.gmra.mrb[4].mxu0 %v351_v4  ;;  %v383_v4 = vld [vmem:[%s8383_s12 + $0x120] sm:$0xff] }
  0x48   : > { %7568 = vmatprep.mubr.msk.f32.mxu0 %vm634_vm0, %v354_v5  ;;  %3056 = vrot.lane.b32.xlu0 %v2774_v6, %s8277_s25  ;;  %v386_v5 = vld [vmem:[%s8383_s12 + $0x138] sm:$0xff]  ;;  %v2806_v6 = vld [vmem:[%s8362_s23 + $0x1d0] sm:$0xff] }
  0x49   : > { %3058 = vrot.lane.b32.xlu1 %v2775_v7, %s8277_s25 }
  0x4b   : > { %1099 = vmatmul.mubr.f32.gmra.mrb[6].mxu0 %v353_v8  ;;  %v2807_v8 = vld [vmem:[%s8362_s23 + $0x1d8] sm:$0xff] }
  0x4c   : > { %7569 = vmatprep.mubr.msk.f32.mxu0 %vm634_vm0, %v356_v9  ;;  %3060 = vrot.lane.b32.xlu0 %v2776_v10, %s8277_s25  ;;  %v385_v9 = vld [vmem:[%s8383_s12 + $0x130] sm:$0xff] }
  0x4d   : > { %3062 = vrot.lane.b32.xlu1 %v2777_v11, %s8277_s25  ;;  %v388_v11 = vld [vmem:[%s8383_s12 + $0x148] sm:$0xff] }
  0x4f   : > { %1104 = vmatmul.mubr.f32.gmra.mrb[8].mxu0 %v355_v12  ;;  %v2808_v12 = vld [vmem:[%s8362_s23 + $0x1e0] sm:$0xff] }
  0x50   : > { %7570 = vmatprep.mubr.msk.f32.mxu0 %vm634_vm0, %v358_v13  ;;  %3064 = vrot.lane.b32.xlu0 %v2778_v14, %s8277_s25  ;;  %v2809_v14 = vld [vmem:[%s8362_s23 + $0x1e8] sm:$0xff] }
  0x51   : > { %3066 = vrot.lane.b32.xlu1 %v2779_v15, %s8277_s25  ;;  %v387_v15 = vld [vmem:[%s8383_s12 + $0x140] sm:$0xff] }
  0x53   : > { %1109 = vmatmul.mubr.f32.gmra.mrb[10].mxu0 %v357_v16 }
  0x54   : > { %7571 = vmatprep.mubr.msk.f32.mxu0 %vm634_vm0, %v360_v17  ;;  %3068 = vrot.lane.b32.xlu0 %v2780_v18, %s8277_s25  ;;  %v390_v17 = vld [vmem:[%s8383_s12 + $0x158] sm:$0xff]  ;;  %v2810_v18 = vld [vmem:[%s8362_s23 + $0x1f0] sm:$0xff] }
  0x55   : > { %3070 = vrot.lane.b32.xlu1 %v2781_v19, %s8277_s25 }
  0x57   : > { %1114 = vmatmul.mubr.f32.gmra.mrb[12].mxu0 %v359_v20  ;;  %v2811_v20 = vld [vmem:[%s8362_s23 + $0x1f8] sm:$0xff] }
  0x58   : > { %7572 = vmatprep.mubr.msk.f32.mxu0 %vm634_vm0, %v362_v21  ;;  %3072 = vrot.lane.b32.xlu0 %v2782_v22, %s8277_s25  ;;  %v389_v21 = vld [vmem:[%s8383_s12 + $0x150] sm:$0xff] }
  0x59   : > { %3074 = vrot.lane.b32.xlu1 %v2783_v23, %s8277_s25  ;;  %v392_v23 = vld [vmem:[%s8383_s12 + $0x168] sm:$0xff] }
  0x5b   : > { %1119 = vmatmul.mubr.f32.gmra.mrb[14].mxu0 %v361_v24  ;;  %v2812_v24 = vld [vmem:[%s8362_s23 + $0x200] sm:$0xff] }
  0x5c   : > { %7573 = vmatprep.mubr.msk.f32.mxu0 %vm634_vm0, %v364_v25  ;;  %3076 = vrot.lane.b32.xlu0 %v2784_v26, %s8277_s25  ;;  %v2813_v26 = vld [vmem:[%s8362_s23 + $0x208] sm:$0xff] }
  0x5d   : > { %3078 = vrot.lane.b32.xlu1 %v2785_v27, %s8277_s25  ;;  %v391_v27 = vld [vmem:[%s8383_s12 + $0x160] sm:$0xff] }
  0x5f   : > { %1124 = vmatmul.mubr.f32.gmra.mrb[16].mxu0 %v363_v28 }
  0x60   : > { %7574 = vmatprep.mubr.msk.f32.mxu0 %vm634_vm0, %v366_v29  ;;  %3080 = vrot.lane.b32.xlu0 %v2786_v30, %s8277_s25  ;;  %v394_v29 = vld [vmem:[%s8383_s12 + $0x178] sm:$0xff]  ;;  %v2814_v30 = vld [vmem:[%s8362_s23 + $0x210] sm:$0xff] }
  0x61   : > { %3082 = vrot.lane.b32.xlu1 %v2787_v31, %s8277_s25 }
  0x63   : > { %1129 = vmatmul.mubr.f32.gmra.mrb[18].mxu0 %v365_v32  ;;  %v2815_v32 = vld [vmem:[%s8362_s23 + $0x218] sm:$0xff] }
  0x64   : > { %7575 = vmatprep.mubr.msk.f32.mxu0 %vm634_vm0, %v368_v33  ;;  %3084 = vrot.lane.b32.xlu0 %v2788_v34, %s8277_s25  ;;  %v393_v33 = vld [vmem:[%s8383_s12 + $0x170] sm:$0xff] }
  0x65   : > { %3086 = vrot.lane.b32.xlu1 %v2789_v35, %s8277_s25  ;;  %v396_v35 = vld [vmem:[%s8383_s12 + $0x188] sm:$0xff] }
  0x67   : > { %1134 = vmatmul.mubr.f32.gmra.mrb[20].mxu0 %v367_v36  ;;  %v2816_v36 = vld [vmem:[%s8362_s23 + $0x220] sm:$0xff] }
  0x68   : > { %7576 = vmatprep.mubr.msk.f32.mxu0 %vm634_vm0, %v370_v37  ;;  %3088 = vrot.lane.b32.xlu0 %v2790_v38, %s8277_s25  ;;  %v2817_v38 = vld [vmem:[%s8362_s23 + $0x228] sm:$0xff] }
  0x69   : > { %3090 = vrot.lane.b32.xlu1 %v2791_v39, %s8277_s25  ;;  %v395_v39 = vld [vmem:[%s8383_s12 + $0x180] sm:$0xff] }
  0x6b   : > { %1139 = vmatmul.mubr.f32.gmra.mrb[22].mxu0 %v369_v40 }
  0x6c   : > { %7577 = vmatprep.mubr.msk.f32.mxu0 %vm634_vm0, %v372_v41  ;;  %3092 = vrot.lane.b32.xlu0 %v2792_v42, %s8277_s25  ;;  %v398_v41 = vld [vmem:[%s8383_s12 + $0x198] sm:$0xff]  ;;  %v2818_v42 = vld [vmem:[%s8362_s23 + $0x230] sm:$0xff] }
  0x6d   : > { %3094 = vrot.lane.b32.xlu1 %v2793_v43, %s8277_s25 }
  0x6f   : > { %1144 = vmatmul.mubr.f32.gmra.mrb[24].mxu0 %v371_v44  ;;  %v2819_v44 = vld [vmem:[%s8362_s23 + $0x238] sm:$0xff] }
  0x70   : > { %7578 = vmatprep.mubr.msk.f32.mxu0 %vm634_vm0, %v374_v45  ;;  %3096 = vrot.lane.b32.xlu0 %v2794_v46, %s8277_s25  ;;  %v397_v45 = vld [vmem:[%s8383_s12 + $0x190] sm:$0xff] }
  0x71   : > { %3098 = vrot.lane.b32.xlu1 %v2795_v47, %s8277_s25  ;;  %v400_v47 = vld [vmem:[%s8383_s12 + $0x1a8] sm:$0xff] }
  0x73   : > { %1149 = vmatmul.mubr.f32.gmra.mrb[26].mxu0 %v373_v48  ;;  %v2820_v48 = vld [vmem:[%s8362_s23 + $0x240] sm:$0xff] }
  0x74   : > { %7579 = vmatprep.mubr.msk.f32.mxu0 %vm634_vm0, %v376_v49  ;;  %3100 = vrot.lane.b32.xlu0 %v2796_v50, %s8277_s25  ;;  %v2821_v50 = vld [vmem:[%s8362_s23 + $0x248] sm:$0xff] }
  0x75   : > { %3102 = vrot.lane.b32.xlu1 %v2797_v51, %s8277_s25  ;;  %v399_v51 = vld [vmem:[%s8383_s12 + $0x1a0] sm:$0xff] }
  0x77   : > { %1154 = vmatmul.mubr.f32.gmra.mrb[28].mxu0 %v375_v52 }
  0x78   : > { %7580 = vmatprep.mubr.msk.f32.mxu0 %vm634_vm0, %v378_v53  ;;  %3104 = vrot.lane.b32.xlu0 %v2798_v54, %s8277_s25  ;;  %v402_v53 = vld [vmem:[%s8383_s12 + $0x1b8] sm:$0xff]  ;;  %v2822_v54 = vld [vmem:[%s8362_s23 + $0x250] sm:$0xff] }
  0x79   : > { %3106 = vrot.lane.b32.xlu1 %v2799_v55, %s8277_s25 }
  0x7b   : > { %1159 = vmatmul.mubr.f32.gmra.mrb[30].mxu0 %v377_v56  ;;  %v2823_v56 = vld [vmem:[%s8362_s23 + $0x258] sm:$0xff] }
  0x7c   : > { %7581 = vmatprep.mubr.msk.f32.mxu0 %vm634_vm0, %v380_v57  ;;  %3108 = vrot.lane.b32.xlu0 %v2800_v58, %s8277_s25  ;;  %v401_v57 = vld [vmem:[%s8383_s12 + $0x1b0] sm:$0xff] }
  0x7d   : > { %3110 = vrot.lane.b32.xlu1 %v2801_v59, %s8277_s25  ;;  %v404_v59 = vld [vmem:[%s8383_s12 + $0x1c8] sm:$0xff] }
  0x7f   : > { %1164 = vmatmul.mubr.f32.gmra.mrb[32].mxu0 %v379_v60  ;;  %v2824_v60 = vld [vmem:[%s8362_s23 + $0x260] sm:$0xff] }
  0x80   : > { %7582 = vmatprep.mubr.msk.f32.mxu0 %vm634_vm0, %v382_v61  ;;  %3112 = vrot.lane.b32.xlu0 %v2802_v62, %s8277_s25  ;;  %v2825_v62 = vld [vmem:[%s8362_s23 + $0x268] sm:$0xff] }
  0x81   : > { %3114 = vrot.lane.b32.xlu1 %v2803_v63, %s8277_s25  ;;  %v403_v63 = vld [vmem:[%s8383_s12 + $0x1c0] sm:$0xff] }
  0x83   : > { %1169 = vmatmul.mubr.f32.gmra.mrb[34].mxu0 %v381_v0 }
  0x84   : > { %7583 = vmatprep.mubr.msk.f32.mxu0 %vm634_vm0, %v384_v1  ;;  %3116 = vrot.lane.b32.xlu0 %v2804_v2, %s8277_s25  ;;  %v406_v1 = vld [vmem:[%s8383_s12 + $0x1d8] sm:$0xff]  ;;  %v2826_v2 = vld [vmem:[%s8362_s23 + $0x270] sm:$0xff] }
  0x85   : > { %3118 = vrot.lane.b32.xlu1 %v2805_v3, %s8277_s25 }
  0x86   : > { %v8611_v7 = vpop.permute.xlu0 %3004 }
  0x87   : > { %1174 = vmatmul.mubr.f32.gmra.mrb[36].mxu0 %v383_v4  ;;  %v8616_v10 = vpop.permute.xlu1 %3008  ;;  %v2827_v4 = vld [vmem:[%s8362_s23 + $0x278] sm:$0xff] }
  0x88   : > { %7584 = vmatprep.mubr.msk.f32.mxu0 %vm634_vm0, %v386_v5  ;;  %3120 = vrot.lane.b32.xlu0 %v2806_v6, %s8277_s25  ;;  %v405_v5 = vld [vmem:[%s8383_s12 + $0x1d0] sm:$0xff] }
  0x89   : > { %3122 = vrot.lane.b32.xlu1 %v2807_v8, %s8277_s25  ;;  %v408_v8 = vld [vmem:[%s8383_s12 + $0x1e8] sm:$0xff] }
  0x8a   : > { %v8622_v13 = vpop.permute.xlu0 %3006 }
  0x8b   : > { %1179 = vmatmul.mubr.f32.gmra.mrb[38].mxu0 %v385_v9  ;;  %v8627_v16 = vpop.permute.xlu1 %3010  ;;  %v2828_v9 = vld [vmem:[%s8362_s23 + $0x280] sm:$0xff] }
  0x8c   : > { %7585 = vmatprep.mubr.msk.f32.mxu0 %vm634_vm0, %v388_v11  ;;  %3124 = vrot.lane.b32.xlu0 %v2808_v12, %s8277_s25  ;;  %v2829_v12 = vld [vmem:[%s8362_s23 + $0x288] sm:$0xff] }
  0x8d   : > { %3126 = vrot.lane.b32.xlu1 %v2809_v14, %s8277_s25  ;;  %v407_v14 = vld [vmem:[%s8383_s12 + $0x1e0] sm:$0xff] }
  0x8e   : > { %v8633_v19 = vpop.permute.xlu0 %3012 }
  0x8f   : > { %1184 = vmatmul.mubr.f32.gmra.mrb[40].mxu0 %v387_v15  ;;  %v8638_v22 = vpop.permute.xlu1 %3014 }
  0x90   : > { %7586 = vmatprep.mubr.msk.f32.mxu0 %vm634_vm0, %v390_v17  ;;  %3128 = vrot.lane.b32.xlu0 %v2810_v18, %s8277_s25  ;;  %v410_v17 = vld [vmem:[%s8383_s12 + $0x1f8] sm:$0xff]  ;;  %v2830_v18 = vld [vmem:[%s8362_s23 + $0x290] sm:$0xff] }
  0x91   : > { %3130 = vrot.lane.b32.xlu1 %v2811_v20, %s8277_s25 }
  0x92   : > { %v8644_v25 = vpop.permute.xlu0 %3016 }
  0x93   : > { %1189 = vmatmul.mubr.f32.gmra.mrb[42].mxu0 %v389_v21  ;;  %v8649_v28 = vpop.permute.xlu1 %3018  ;;  %v2831_v21 = vld [vmem:[%s8362_s23 + $0x298] sm:$0xff] }
  0x94   : > { %7587 = vmatprep.mubr.msk.f32.mxu0 %vm634_vm0, %v392_v23  ;;  %3132 = vrot.lane.b32.xlu0 %v2812_v24, %s8277_s25  ;;  %v409_v23 = vld [vmem:[%s8383_s12 + $0x1f0] sm:$0xff] }
  0x95   : > { %3134 = vrot.lane.b32.xlu1 %v2813_v26, %s8277_s25  ;;  %v412_v26 = vld [vmem:[%s8383_s12 + $0x208] sm:$0xff] }
  0x96   : > { %v8655_v31 = vpop.permute.xlu0 %3020 }
  0x97   : > { %1194 = vmatmul.mubr.f32.gmra.mrb[44].mxu0 %v391_v27  ;;  %v8660_v34 = vpop.permute.xlu1 %3022  ;;  %v2832_v27 = vld [vmem:[%s8362_s23 + $0x2a0] sm:$0xff] }
  0x98   : > { %7588 = vmatprep.mubr.msk.f32.mxu0 %vm634_vm0, %v394_v29  ;;  %3136 = vrot.lane.b32.xlu0 %v2814_v30, %s8277_s25  ;;  %v2833_v30 = vld [vmem:[%s8362_s23 + $0x2a8] sm:$0xff] }
  0x99   : > { %3138 = vrot.lane.b32.xlu1 %v2815_v32, %s8277_s25  ;;  %v411_v32 = vld [vmem:[%s8383_s12 + $0x200] sm:$0xff] }
  0x9a   : > { %v8666_v37 = vpop.permute.xlu0 %3024 }
  0x9b   : > { %1199 = vmatmul.mubr.f32.gmra.mrb[46].mxu0 %v393_v33  ;;  %v8671_v40 = vpop.permute.xlu1 %3026 }
  0x9c   : > { %7589 = vmatprep.mubr.msk.f32.mxu0 %vm634_vm0, %v396_v35  ;;  %3140 = vrot.lane.b32.xlu0 %v2816_v36, %s8277_s25  ;;  %v414_v35 = vld [vmem:[%s8383_s12 + $0x218] sm:$0xff]  ;;  %v2834_v36 = vld [vmem:[%s8362_s23 + $0x2b0] sm:$0xff] }
  0x9d   : > { %3142 = vrot.lane.b32.xlu1 %v2817_v38, %s8277_s25 }
  0x9e   : > { %v8677_v43 = vpop.permute.xlu0 %3028 }
  0x9f   : > { %1204 = vmatmul.mubr.f32.gmra.mrb[48].mxu0 %v395_v39  ;;  %v8682_v46 = vpop.permute.xlu1 %3030  ;;  %v2835_v39 = vld [vmem:[%s8362_s23 + $0x2b8] sm:$0xff] }
  0xa0   : > { %7590 = vmatprep.mubr.msk.f32.mxu0 %vm634_vm0, %v398_v41  ;;  %3144 = vrot.lane.b32.xlu0 %v2818_v42, %s8277_s25  ;;  %v413_v41 = vld [vmem:[%s8383_s12 + $0x210] sm:$0xff] }
  0xa1   : > { %3146 = vrot.lane.b32.xlu1 %v2819_v44, %s8277_s25  ;;  %v416_v44 = vld [vmem:[%s8383_s12 + $0x228] sm:$0xff] }
  0xa2   : > { %v8688_v49 = vpop.permute.xlu0 %3032 }
  0xa3   : > { %1209 = vmatmul.mubr.f32.gmra.mrb[50].mxu0 %v397_v45  ;;  %v8693_v52 = vpop.permute.xlu1 %3034  ;;  %v2836_v45 = vld [vmem:[%s8362_s23 + $0x2c0] sm:$0xff] }
  0xa4   : > { %7591 = vmatprep.mubr.msk.f32.mxu0 %vm634_vm0, %v400_v47  ;;  %3148 = vrot.lane.b32.xlu0 %v2820_v48, %s8277_s25  ;;  %v2837_v48 = vld [vmem:[%s8362_s23 + $0x2c8] sm:$0xff] }
  0xa5   : > { %3150 = vrot.lane.b32.xlu1 %v2821_v50, %s8277_s25  ;;  %v415_v50 = vld [vmem:[%s8383_s12 + $0x220] sm:$0xff] }
  0xa6   : > { %v8699_v55 = vpop.permute.xlu0 %3036 }
  0xa7   : > { %1214 = vmatmul.mubr.f32.gmra.mrb[52].mxu0 %v399_v51  ;;  %v8704_v58 = vpop.permute.xlu1 %3038 }
  0xa8   : > { %7592 = vmatprep.mubr.msk.f32.mxu0 %vm634_vm0, %v402_v53  ;;  %3152 = vrot.lane.b32.xlu0 %v2822_v54, %s8277_s25  ;;  %v418_v53 = vld [vmem:[%s8383_s12 + $0x238] sm:$0xff]  ;;  %v2838_v54 = vld [vmem:[%s8362_s23 + $0x2d0] sm:$0xff] }
  0xa9   : > { %3154 = vrot.lane.b32.xlu1 %v2823_v56, %s8277_s25 }
  0xaa   : > { %v8710_v61 = vpop.permute.xlu0 %3040 }
  0xab   : > { %1219 = vmatmul.mubr.f32.gmra.mrb[54].mxu0 %v401_v57  ;;  %v8715_v0 = vpop.permute.xlu1 %3042  ;;  %v2839_v57 = vld [vmem:[%s8362_s23 + $0x2d8] sm:$0xff] }
  0xac   : > { %7593 = vmatprep.mubr.msk.f32.mxu0 %vm634_vm0, %v404_v59  ;;  %3156 = vrot.lane.b32.xlu0 %v2824_v60, %s8277_s25  ;;  %v417_v59 = vld [vmem:[%s8383_s12 + $0x230] sm:$0xff] }
  0xad   : > { %3158 = vrot.lane.b32.xlu1 %v2825_v62, %s8277_s25  ;;  %v420_v62 = vld [vmem:[%s8383_s12 + $0x248] sm:$0xff] }
  0xae   : > { %v8721_v3 = vpop.permute.xlu0 %3044 }
  0xaf   : > { %1224 = vmatmul.mubr.f32.gmra.mrb[56].mxu0 %v403_v63  ;;  %v8726_v6 = vpop.permute.xlu1 %3046  ;;  %v2840_v63 = vld [vmem:[%s8362_s23 + $0x2e0] sm:$0xff] }
  0xb0   : > { %7594 = vmatprep.mubr.msk.f32.mxu0 %vm634_vm0, %v406_v1  ;;  %3160 = vrot.lane.b32.xlu0 %v2826_v2, %s8277_s25  ;;  %v2841_v2 = vld [vmem:[%s8362_s23 + $0x2e8] sm:$0xff] }
  0xb1   : > { %3162 = vrot.lane.b32.xlu1 %v2827_v4, %s8277_s25  ;;  %v419_v4 = vld [vmem:[%s8383_s12 + $0x240] sm:$0xff] }
  0xb2   : > { %v8732_v11 = vpop.permute.xlu0 %3048 }
  0xb3   : > { %1229 = vmatmul.mubr.f32.gmra.mrb[58].mxu0 %v405_v5  ;;  %v8737_v15 = vpop.permute.xlu1 %3050 }
  0xb4   : > { %7595 = vmatprep.mubr.msk.f32.mxu0 %vm634_vm0, %v408_v8  ;;  %3164 = vrot.lane.b32.xlu0 %v2828_v9, %s8277_s25  ;;  %v422_v8 = vld [vmem:[%s8383_s12 + $0x258] sm:$0xff]  ;;  %v2842_v9 = vld [vmem:[%s8362_s23 + $0x2f0] sm:$0xff] }
  0xb5   : > { %3166 = vrot.lane.b32.xlu1 %v2829_v12, %s8277_s25 }
  0xb6   : > { %v8743_v20 = vpop.permute.xlu0 %3052 }
  0xb7   : > { %1234 = vmatmul.mubr.f32.gmra.mrb[60].mxu0 %v407_v14  ;;  %v8748_v24 = vpop.permute.xlu1 %3054  ;;  %v2843_v14 = vld [vmem:[%s8362_s23 + $0x2f8] sm:$0xff] }
  0xb8   : > { %7596 = vmatprep.mubr.msk.f32.mxu0 %vm634_vm0, %v410_v17  ;;  %3168 = vrot.lane.b32.xlu0 %v2830_v18, %s8277_s25  ;;  %v421_v17 = vld [vmem:[%s8383_s12 + $0x250] sm:$0xff] }
  0xb9   : > { %3170 = vrot.lane.b32.xlu1 %v2831_v21, %s8277_s25  ;;  %v424_v21 = vld [vmem:[%s8383_s12 + $0x268] sm:$0xff] }
  0xba   : > { %v8754_v29 = vpop.permute.xlu0 %3056 }
  0xbb   : > { %1239 = vmatmul.mubr.f32.gmra.mrb[62].mxu0 %v409_v23  ;;  %v8759_v33 = vpop.permute.xlu1 %3058  ;;  %v2844_v23 = vld [vmem:[%s8362_s23 + $0x300] sm:$0xff] }
  0xbc   : > { %7597 = vmatprep.mubr.msk.f32.mxu0 %vm634_vm0, %v412_v26  ;;  %3172 = vrot.lane.b32.xlu0 %v2832_v27, %s8277_s25  ;;  %v2845_v27 = vld [vmem:[%s8362_s23 + $0x308] sm:$0xff] }
  0xbd   : > { %3174 = vrot.lane.b32.xlu1 %v2833_v30, %s8277_s25  ;;  %v423_v30 = vld [vmem:[%s8383_s12 + $0x260] sm:$0xff] }
  0xbe   : > { %v8765_v38 = vpop.permute.xlu0 %3060 }
  0xbf   : > { %1244 = vmatmul.mubr.f32.gmra.mrb[64].mxu0 %v411_v32  ;;  %v8770_v42 = vpop.permute.xlu1 %3062 }
  0xc0   : > { %7598 = vmatprep.mubr.msk.f32.mxu0 %vm634_vm0, %v414_v35  ;;  %3176 = vrot.lane.b32.xlu0 %v2834_v36, %s8277_s25  ;;  %v426_v35 = vld [vmem:[%s8383_s12 + $0x278] sm:$0xff]  ;;  %v2846_v36 = vld [vmem:[%s8362_s23 + $0x310] sm:$0xff] }
  0xc1   : > { %3178 = vrot.lane.b32.xlu1 %v2835_v39, %s8277_s25 }
  0xc2   : > { %v8776_v47 = vpop.permute.xlu0 %3064 }
  0xc3   : > { %1249 = vmatmul.mubr.f32.gmra.mrb[66].mxu0 %v413_v41  ;;  %v8781_v51 = vpop.permute.xlu1 %3066  ;;  %v2847_v41 = vld [vmem:[%s8362_s23 + $0x318] sm:$0xff] }
  0xc4   : > { %7599 = vmatprep.mubr.msk.f32.mxu0 %vm634_vm0, %v416_v44  ;;  %3180 = vrot.lane.b32.xlu0 %v2836_v45, %s8277_s25  ;;  %v425_v44 = vld [vmem:[%s8383_s12 + $0x270] sm:$0xff] }
  0xc5   : > { %3182 = vrot.lane.b32.xlu1 %v2837_v48, %s8277_s25  ;;  %v428_v48 = vld [vmem:[%s8383_s12 + $0x288] sm:$0xff] }
  0xc6   : > { %v8787_v56 = vpop.permute.xlu0 %3068 }
  0xc7   : > { %1254 = vmatmul.mubr.f32.gmra.mrb[68].mxu0 %v415_v50  ;;  %v8792_v60 = vpop.permute.xlu1 %3070  ;;  %v2848_v50 = vld [vmem:[%s8362_s23 + $0x320] sm:$0xff] }
  0xc8   : > { %7600 = vmatprep.mubr.msk.f32.mxu0 %vm634_vm0, %v418_v53  ;;  %3184 = vrot.lane.b32.xlu0 %v2838_v54, %s8277_s25  ;;  %v2849_v54 = vld [vmem:[%s8362_s23 + $0x328] sm:$0xff] }
  0xc9   : > { %3186 = vrot.lane.b32.xlu1 %v2839_v57, %s8277_s25  ;;  %v427_v57 = vld [vmem:[%s8383_s12 + $0x280] sm:$0xff] }
  0xca   : > { %v8798_v1 = vpop.permute.xlu0 %3072 }
  0xcb   : > { %1259 = vmatmul.mubr.f32.gmra.mrb[70].mxu0 %v417_v59  ;;  %v8803_v5 = vpop.permute.xlu1 %3074 }
  0xcc   : > { %7601 = vmatprep.mubr.msk.f32.mxu0 %vm634_vm0, %v420_v62  ;;  %3188 = vrot.lane.b32.xlu0 %v2840_v63, %s8277_s25  ;;  %v430_v62 = vld [vmem:[%s8383_s12 + $0x298] sm:$0xff]  ;;  %v2850_v63 = vld [vmem:[%s8362_s23 + $0x330] sm:$0xff] }
  0xcd   : > { %3190 = vrot.lane.b32.xlu1 %v2841_v2, %s8277_s25 }
  0xce   : > { %v8809_v12 = vpop.permute.xlu0 %3076 }
  0xcf   : > { %1264 = vmatmul.mubr.f32.gmra.mrb[72].mxu0 %v419_v4  ;;  %14077 = vst [vmem:[#allocation2_spill] sm:$0xff] %v8809_v12  ;;  %v8814_v18 = vpop.permute.xlu1 %3078  ;;  %v2851_v4 = vld [vmem:[%s8362_s23 + $0x338] sm:$0xff] }
  0xd0   : > { %7602 = vmatprep.mubr.msk.f32.mxu0 %vm634_vm0, %v422_v8  ;;  %14078 = vst [vmem:[#allocation3_spill] sm:$0xff] %v8814_v18  ;;  %3192 = vrot.lane.b32.xlu0 %v2842_v9, %s8277_s25  ;;  %v429_v8 = vld [vmem:[%s8383_s12 + $0x290] sm:$0xff] }
  0xd1   : > { %3194 = vrot.lane.b32.xlu1 %v2843_v14, %s8277_s25  ;;  %v432_v14 = vld [vmem:[%s8383_s12 + $0x2a8] sm:$0xff] }
  0xd2   : > { %v8820_v26 = vpop.permute.xlu0 %3080 }
  0xd3   : > { %1269 = vmatmul.mubr.f32.gmra.mrb[74].mxu0 %v421_v17  ;;  %14079 = vst [vmem:[#allocation4_spill] sm:$0xff] %v8820_v26  ;;  %v8825_v32 = vpop.permute.xlu1 %3082  ;;  %v2852_v17 = vld [vmem:[%s8362_s23 + $0x340] sm:$0xff] }
  0xd4   : > { %7603 = vmatprep.mubr.msk.f32.mxu0 %vm634_vm0, %v424_v21  ;;  %14080 = vst [vmem:[#allocation5_spill] sm:$0xff] %v8825_v32  ;;  %3196 = vrot.lane.b32.xlu0 %v2844_v23, %s8277_s25  ;;  %v2853_v23 = vld [vmem:[%s8362_s23 + $0x348] sm:$0xff] }
  0xd5   : > { %3198 = vrot.lane.b32.xlu1 %v2845_v27, %s8277_s25  ;;  %v431_v27 = vld [vmem:[%s8383_s12 + $0x2a0] sm:$0xff] }
  0xd6   : > { %v8831_v39 = vpop.permute.xlu0 %3084 }
  0xd7   : > { %1274 = vmatmul.mubr.f32.gmra.mrb[76].mxu0 %v423_v30  ;;  %14081 = vst [vmem:[#allocation6_spill] sm:$0xff] %v8831_v39  ;;  %v8836_v45 = vpop.permute.xlu1 %3086  ;;  %v1728_v39 = vld [vmem:[%s13727_s1 + $0x20] sm:$0xff] }
  0xd8   : > { %7604 = vmatprep.mubr.msk.f32.mxu0 %vm634_vm0, %v426_v35  ;;  %14082 = vst [vmem:[#allocation7_spill] sm:$0xff] %v8836_v45  ;;  %3200 = vrot.lane.b32.xlu0 %v2846_v36, %s8277_s25  ;;  %v434_v35 = vld [vmem:[%s8383_s12 + $0x2b8] sm:$0xff]  ;;  %v2854_v36 = vld [vmem:[%s8362_s23 + $0x350] sm:$0xff] }
  0xd9   : > { %3202 = vrot.lane.b32.xlu1 %v2847_v41, %s8277_s25 }
  0xda   : > { %v8842_v53 = vpop.permute.xlu0 %3088 }
  0xdb   : > { %1279 = vmatmul.mubr.f32.gmra.mrb[78].mxu0 %v425_v44  ;;  %14083 = vst [vmem:[#allocation8_spill] sm:$0xff] %v8842_v53  ;;  %v8847_v59 = vpop.permute.xlu1 %3090  ;;  %v2855_v44 = vld [vmem:[%s8362_s23 + $0x358] sm:$0xff]  ;;  %v464_v53 = vld [vmem:[%s8383_s12 + $0x3a8] sm:$0xff] }
  0xdc   : > { %7605 = vmatprep.mubr.msk.f32.mxu0 %vm634_vm0, %v428_v48  ;;  %14084 = vst [vmem:[#allocation9_spill] sm:$0xff] %v8847_v59  ;;  %3204 = vrot.lane.b32.xlu0 %v2848_v50, %s8277_s25  ;;  %v433_v48 = vld [vmem:[%s8383_s12 + $0x2b0] sm:$0xff] }
  0xdd   : > { %3206 = vrot.lane.b32.xlu1 %v2849_v54, %s8277_s25  ;;  %v436_v54 = vld [vmem:[%s8383_s12 + $0x2c8] sm:$0xff] }
  0xde   : > { %v8853_v2 = vpop.permute.xlu0 %3092 }
  0xdf   : > { %1284 = vmatmul.mubr.f32.gmra.mrb[80].mxu0 %v427_v57  ;;  %14085 = vst [vmem:[#allocation10_spill] sm:$0xff] %v8853_v2  ;;  %v8858_v9 = vpop.permute.xlu1 %3094  ;;  %v2856_v57 = vld [vmem:[%s8362_s23 + $0x360] sm:$0xff]  ;;  %v461_v2 = vld [vmem:[%s8383_s12 + $0x390] sm:$0xff] }
  0xe0   : > { %7606 = vmatprep.mubr.msk.f32.mxu0 %vm634_vm0, %v430_v62  ;;  %14086 = vst [vmem:[#allocation11_spill] sm:$0xff] %v8858_v9  ;;  %3208 = vrot.lane.b32.xlu0 %v2850_v63, %s8277_s25  ;;  %v2857_v63 = vld [vmem:[%s8362_s23 + $0x368] sm:$0xff]  ;;  %v462_v9 = vld [vmem:[%s8383_s12 + $0x398] sm:$0xff] }
  0xe1   : > { %3210 = vrot.lane.b32.xlu1 %v2851_v4, %s8277_s25  ;;  %v435_v4 = vld [vmem:[%s8383_s12 + $0x2c0] sm:$0xff] }
  0xe2   : > { %v8864_v21 = vpop.permute.xlu0 %3096 }
  0xe3   : > { %1289 = vmatmul.mubr.f32.gmra.mrb[82].mxu0 %v429_v8  ;;  %14087 = vst [vmem:[#allocation12_spill] sm:$0xff] %v8864_v21  ;;  %v8869_v30 = vpop.permute.xlu1 %3098 }
  0xe4   : > { %7607 = vmatprep.mubr.msk.f32.mxu0 %vm634_vm0, %v432_v14  ;;  %14088 = vst [vmem:[#allocation13_spill] sm:$0xff] %v8869_v30  ;;  %3212 = vrot.lane.b32.xlu0 %v2852_v17, %s8277_s25  ;;  %v438_v14 = vld [vmem:[%s8383_s12 + $0x2d8] sm:$0xff]  ;;  %v2858_v17 = vld [vmem:[%s8362_s23 + $0x370] sm:$0xff] }
  0xe5   : > { %3214 = vrot.lane.b32.xlu1 %v2853_v23, %s8277_s25 }
  0xe6   : > { %v8875_v41 = vpop.permute.xlu0 %3100 }
  0xe7   : > { %1294 = vmatmul.mubr.f32.gmra.mrb[84].mxu0 %v431_v27  ;;  %14089 = vst [vmem:[#allocation14_spill] sm:$0xff] %v8875_v41  ;;  %v8880_v50 = vpop.permute.xlu1 %3102  ;;  %v2859_v27 = vld [vmem:[%s8362_s23 + $0x378] sm:$0xff] }
  0xe8   : > { %7608 = vmatprep.mubr.msk.f32.mxu0 %vm634_vm0, %v434_v35  ;;  %14090 = vst [vmem:[#allocation15_spill] sm:$0xff] %v8880_v50  ;;  %3216 = vrot.lane.b32.xlu0 %v2854_v36, %s8277_s25  ;;  %v437_v35 = vld [vmem:[%s8383_s12 + $0x2d0] sm:$0xff]  ;;  %v460_v50 = vld [vmem:[%s8383_s12 + $0x388] sm:$0xff] }
  0xe9   : > { %3218 = vrot.lane.b32.xlu1 %v2855_v44, %s8277_s25  ;;  %v440_v44 = vld [vmem:[%s8383_s12 + $0x2e8] sm:$0xff] }
  0xea   : > { %v8886_v62 = vpop.permute.xlu0 %3104 }
  0xeb   : > { %1299 = vmatmul.mubr.f32.gmra.mrb[86].mxu0 %v433_v48  ;;  %14091 = vst [vmem:[#allocation16_spill] sm:$0xff] %v8886_v62  ;;  %v8891_v8 = vpop.permute.xlu1 %3106  ;;  %v2860_v48 = vld [vmem:[%s8362_s23 + $0x380] sm:$0xff] }
  0xec   : > { %7609 = vmatprep.mubr.msk.f32.mxu0 %vm634_vm0, %v436_v54  ;;  %14092 = vst [vmem:[#allocation17_spill] sm:$0xff] %v8891_v8  ;;  %3220 = vrot.lane.b32.xlu0 %v2856_v57, %s8277_s25  ;;  %v2861_v57 = vld [vmem:[%s8362_s23 + $0x388] sm:$0xff]  ;;  %v458_v8 = vld [vmem:[%s8383_s12 + $0x378] sm:$0xff] }
  0xed   : > { %3222 = vrot.lane.b32.xlu1 %v2857_v63, %s8277_s25  ;;  %v439_v63 = vld [vmem:[%s8383_s12 + $0x2e0] sm:$0xff] }
  0xee   : > { %v8897_v23 = vpop.permute.xlu0 %3108 }
  0xef   : > { %1304 = vmatmul.mubr.f32.gmra.mrb[88].mxu0 %v435_v4  ;;  %14093 = vst [vmem:[#allocation18_spill] sm:$0xff] %v8897_v23  ;;  %v8902_v36 = vpop.permute.xlu1 %3110 }
  0xf0   : > { %7610 = vmatprep.mubr.msk.f32.mxu0 %vm634_vm0, %v438_v14  ;;  %14094 = vst [vmem:[#allocation19_spill] sm:$0xff] %v8902_v36  ;;  %3224 = vrot.lane.b32.xlu0 %v2858_v17, %s8277_s25  ;;  %v442_v14 = vld [vmem:[%s8383_s12 + $0x2f8] sm:$0xff]  ;;  %v2862_v17 = vld [vmem:[%s8362_s23 + $0x390] sm:$0xff] }
  0xf1   : > { %3226 = vrot.lane.b32.xlu1 %v2859_v27, %s8277_s25  ;;  %v454_v36 = vld [vmem:[%s8383_s12 + $0x358] sm:$0xff] }
  0xf2   : > { %v8908_v54 = vpop.permute.xlu0 %3112 }
  0xf3   : > { %1309 = vmatmul.mubr.f32.gmra.mrb[90].mxu0 %v437_v35  ;;  %14095 = vst [vmem:[#allocation20_spill] sm:$0xff] %v8908_v54  ;;  %v8913_v4 = vpop.permute.xlu1 %3114  ;;  %v2863_v35 = vld [vmem:[%s8362_s23 + $0x398] sm:$0xff] }
  0xf4   : > { %7611 = vmatprep.mubr.msk.f32.mxu0 %vm634_vm0, %v440_v44  ;;  %14096 = vst [vmem:[#allocation21_spill] sm:$0xff] %v8913_v4  ;;  %3228 = vrot.lane.b32.xlu0 %v2860_v48, %s8277_s25  ;;  %v441_v44 = vld [vmem:[%s8383_s12 + $0x2f0] sm:$0xff]  ;;  %v444_v4 = vld [vmem:[%s8383_s12 + $0x308] sm:$0xff]  ;;  %v2864_v48 = vld [vmem:[%s8362_s23 + $0x3a0] sm:$0xff] }
  0xf5   : > { %3230 = vrot.lane.b32.xlu1 %v2861_v57, %s8277_s25 }
  0xf6   : > { %v8919_v27 = vpop.permute.xlu0 %3116 }
  0xf7   : > { %1314 = vmatmul.mubr.f32.gmra.mrb[92].mxu0 %v439_v63  ;;  %14097 = vst [vmem:[#allocation22_spill] sm:$0xff] %v8919_v27  ;;  %v8924_v54 = vpop.permute.xlu1 %3118  ;;  %v2865_v63 = vld [vmem:[%s8362_s23 + $0x3a8] sm:$0xff] }
  0xf8   : > { %7612 = vmatprep.mubr.msk.f32.mxu0 %vm634_vm0, %v442_v14  ;;  %14098 = vst [vmem:[#allocation23_spill] sm:$0xff] %v8924_v54  ;;  %3232 = vrot.lane.b32.xlu0 %v2862_v17, %s8277_s25  ;;  %v443_v14 = vld [vmem:[%s8383_s12 + $0x300] sm:$0xff]  ;;  %v446_v54 = vld [vmem:[%s8383_s12 + $0x318] sm:$0xff]  ;;  %v2866_v17 = vld [vmem:[%s8362_s23 + $0x3b0] sm:$0xff] }
  0xf9   : > { %3234 = vrot.lane.b32.xlu1 %v2863_v35, %s8277_s25 }
  0xfa   : > { %v8930_v57 = vpop.permute.xlu0 %3120 }
  0xfb   : > { %1319 = vmatmul.mubr.f32.gmra.mrb[94].mxu0 %v441_v44  ;;  %14099 = vst [vmem:[#allocation24_spill] sm:$0xff] %v8930_v57  ;;  %v8935_v27 = vpop.permute.xlu1 %3122  ;;  %v2867_v44 = vld [vmem:[%s8362_s23 + $0x3b8] sm:$0xff] }
  0xfc   : > { %7613 = vmatprep.mubr.msk.f32.mxu0 %vm634_vm0, %v444_v4  ;;  %14100 = vst [vmem:[#allocation25_spill] sm:$0xff] %v8935_v27  ;;  %3236 = vrot.lane.b32.xlu0 %v2864_v48, %s8277_s25  ;;  %v445_v4 = vld [vmem:[%s8383_s12 + $0x310] sm:$0xff]  ;;  %v448_v27 = vld [vmem:[%s8383_s12 + $0x328] sm:$0xff]  ;;  %v2868_v48 = vld [vmem:[%s8362_s23 + $0x3c0] sm:$0xff] }
  0xfd   : > { %3238 = vrot.lane.b32.xlu1 %v2865_v63, %s8277_s25 }
  0xfe   : > { %v8941_v35 = vpop.permute.xlu0 %3124 }
  0xff   : > { %1324 = vmatmul.mubr.f32.gmra.mrb[96].mxu0 %v443_v14  ;;  %14101 = vst [vmem:[#allocation26_spill] sm:$0xff] %v8941_v35  ;;  %v8946_v57 = vpop.permute.xlu1 %3126  ;;  %v2869_v14 = vld [vmem:[%s8362_s23 + $0x3c8] sm:$0xff] }
 0x100   : > { %7614 = vmatprep.mubr.msk.f32.mxu0 %vm634_vm0, %v446_v54  ;;  %14102 = vst [vmem:[#allocation27_spill] sm:$0xff] %v8946_v57  ;;  %3240 = vrot.lane.b32.xlu0 %v2866_v17, %s8277_s25  ;;  %v447_v54 = vld [vmem:[%s8383_s12 + $0x320] sm:$0xff]  ;;  %v450_v57 = vld [vmem:[%s8383_s12 + $0x338] sm:$0xff]  ;;  %v2870_v17 = vld [vmem:[%s8362_s23 + $0x3d0] sm:$0xff] }
 0x101   : > { %3242 = vrot.lane.b32.xlu1 %v2867_v44, %s8277_s25 }
 0x102   : > { %v8952_v63 = vpop.permute.xlu0 %3128 }
 0x103   : > { %1329 = vmatmul.mubr.f32.gmra.mrb[98].mxu0 %v445_v4  ;;  %14103 = vst [vmem:[#allocation28_spill] sm:$0xff] %v8952_v63  ;;  %v8957_v35 = vpop.permute.xlu1 %3130  ;;  %v2871_v4 = vld [vmem:[%s8362_s23 + $0x3d8] sm:$0xff] }
 0x104   : > { %7615 = vmatprep.mubr.msk.f32.mxu0 %vm634_vm0, %v448_v27  ;;  %14104 = vst [vmem:[#allocation29_spill] sm:$0xff] %v8957_v35  ;;  %3244 = vrot.lane.b32.xlu0 %v2868_v48, %s8277_s25  ;;  %v449_v27 = vld [vmem:[%s8383_s12 + $0x330] sm:$0xff]  ;;  %v452_v35 = vld [vmem:[%s8383_s12 + $0x348] sm:$0xff]  ;;  %v2872_v48 = vld [vmem:[%s8362_s23 + $0x3e0] sm:$0xff] }
 0x105   : > { %3246 = vrot.lane.b32.xlu1 %v2869_v14, %s8277_s25 }
 0x106   : > { %v8963_v44 = vpop.permute.xlu0 %3132 }
 0x107   : > { %1334 = vmatmul.mubr.f32.gmra.mrb[100].mxu0 %v447_v54  ;;  %14105 = vst [vmem:[#allocation30_spill] sm:$0xff] %v8963_v44  ;;  %v8968_v63 = vpop.permute.xlu1 %3134  ;;  %v2873_v54 = vld [vmem:[%s8362_s23 + $0x3e8] sm:$0xff] }
 0x108   : > { %7616 = vmatprep.mubr.msk.f32.mxu0 %vm634_vm0, %v450_v57  ;;  %14106 = vst [vmem:[#allocation31_spill] sm:$0xff] %v8968_v63  ;;  %3248 = vrot.lane.b32.xlu0 %v2870_v17, %s8277_s25  ;;  %v451_v57 = vld [vmem:[%s8383_s12 + $0x340] sm:$0xff]  ;;  %v2874_v17 = vld [vmem:[%s8362_s23 + $0x3f0] sm:$0xff] }
 0x109   : > { %3250 = vrot.lane.b32.xlu1 %v2871_v4, %s8277_s25 }
 0x10a   : > { %v8974_v14 = vpop.permute.xlu0 %3136 }
 0x10b   : > { %1339 = vmatmul.mubr.f32.gmra.mrb[102].mxu0 %v449_v27  ;;  %14107 = vst [vmem:[#allocation32_spill] sm:$0xff] %v8974_v14  ;;  %v8979_v44 = vpop.permute.xlu1 %3138  ;;  %v2875_v27 = vld [vmem:[%s8362_s23 + $0x3f8] sm:$0xff]  ;;  %v8991_v14 = vld [vmem:[%s13730_s4] ss:$0 sm:$0xff] }
 0x10c   : > { %7617 = vmatprep.mubr.msk.f32.mxu0 %vm634_vm0, %v452_v35  ;;  %14108 = vst [vmem:[#allocation33_spill] sm:$0xff] %v8979_v44  ;;  %3252 = vrot.lane.b32.xlu0 %v2872_v48, %s8277_s25  ;;  %v453_v35 = vld [vmem:[%s8383_s12 + $0x350] sm:$0xff]  ;;  %v456_v48 = vld [vmem:[%s8383_s12 + $0x368] sm:$0xff] }
 0x10d   : > { %3254 = vrot.lane.b32.xlu1 %v2873_v54, %s8277_s25 }
 0x10e   : > { %v8985_v4 = vpop.permute.xlu0 %3140 }
 0x10f   : > { %1344 = vmatmul.mubr.f32.gmra.mrb[104].mxu0 %v451_v57  ;;  %14109 = vst [vmem:[#allocation34_spill] sm:$0xff] %v8985_v4  ;;  %v8995_v44 = vpop.permute.xlu1 %3142  ;;  %v1724_v57 = vld [vmem:[%s13727_s1] sm:$0xff] }
 0x110   : > { %7618 = vmatprep.mubr.msk.f32.mxu0 %vm634_vm0, %v454_v36  ;;  %14110 = vst [vmem:[#allocation35_spill] sm:$0xff] %v8995_v44  ;;  %3256 = vrot.lane.b32.xlu0 %v2874_v17, %s8277_s25  ;;  %v455_v44 = vld [vmem:[%s8383_s12 + $0x360] sm:$0xff] }
 0x111   : > { %3258 = vrot.lane.b32.xlu1 %v2875_v27, %s8277_s25  ;;  %v1725_v27 = vld [vmem:[%s13727_s1 + $0x8] sm:$0xff] }
 0x112   : > { %v1085_v54 = vpop.f32.mrb[0].mxu0  ;;  %v9004_v36 = vpop.permute.xlu0 %3144 }
 0x113   : > { %v1086_v4 = vadd.f32 %v8991_v14, %v1085_v54  ;;  %v1087_v63 = vpop.f32.mrb[1].mxu0  ;;  %1349 = vmatmul.mubr.f32.gmra.mrb[106].mxu0 %v453_v35  ;;  %14111 = vst [vmem:[#allocation36_spill] sm:$0xff] %v9004_v36  ;;  %v9008_v23 = vpop.permute.xlu1 %3146 }
 0x114   : > { %7619 = vmatprep.mubr.msk.f32.mxu0 %vm634_vm0, %v456_v48  ;;  %14112 = vst [vmem:[#allocation37_spill] sm:$0xff] %v9008_v23  ;;  %v457_v48 = vld [vmem:[%s8383_s12 + $0x370] sm:$0xff] }
 0x115   : > { %v9010_v17 = vadd.f32 %v1724_v57, %v1086_v4 }
 0x116   : > { %v1090_v62 = vpop.f32.mrb[2].mxu0  ;;  %v9018_v36 = vpop.permute.xlu0 %3148 }
 0x117   : > { %14113 = vst [vmem:[#allocation38_spill] sm:$0xff] %v9010_v17  ;;  %v1980_v63 = vmax.f32 %v9010_v17, -30.0  ;;  %v1091_v35 = vadd.f32 %v8991_v14, %v1090_v62  ;;  %v1092_v54 = vpop.f32.mrb[3].mxu0  ;;  %1354 = vmatmul.mubr.f32.gmra.mrb[108].mxu0 %v455_v44  ;;  %14114 = vst [vmem:[#allocation39_spill] sm:$0xff] %v9018_v36  ;;  %v9022_v4 = vpop.permute.xlu1 %3150  ;;  %v1726_v62 = vld [vmem:[%s13727_s1 + $0x10] sm:$0xff] }
 0x118   : > { %7620 = vmatprep.mubr.msk.f32.mxu0 %vm634_vm0, %v458_v8  ;;  %14115 = vst [vmem:[#allocation40_spill] sm:$0xff] %v9022_v4 }
 0x119   : > { %v9024_v57 = vadd.f32 %v1725_v27, %v1091_v35  ;;  %v2108_v23 = vmin.f32 %v1980_v63, 20.0  ;;  %v459_v63 = vld [vmem:[%s8383_s12 + $0x380] sm:$0xff] }
 0x11a   : > { %v1095_v41 = vpop.f32.mrb[4].mxu0  ;;  %v9033_v27 = vpop.permute.xlu0 %3152 }
 0x11b   : > { %14116 = vst [vmem:[#allocation41_spill] sm:$0xff] %v9024_v57  ;;  %v1981_v44 = vmax.f32 %v9024_v57, -30.0  ;;  %v1096_v54 = vadd.f32 %v8991_v14, %v1095_v41  ;;  %v1097_v36 = vpop.f32.mrb[5].mxu0  ;;  %1359 = vmatmul.mubr.f32.gmra.mrb[110].mxu0 %v457_v48  ;;  %5180 = vrot.lane.b32.xlu0 %v2108_v23, %s8278_s22  ;;  %v2236_v8 = vmul.f32 0.5, %v2108_v23  ;;  %14117 = vst [vmem:[#allocation42_spill] sm:$0xff] %v9033_v27  ;;  %v9037_v35 = vpop.permute.xlu1 %3154  ;;  %v5961_v23 = vld [vmem:[%s13731_s5 + $0x8] sm:$0xff] }
 0x11c   : > { %7621 = vmatprep.mubr.msk.f32.mxu0 %vm634_vm0, %v460_v50  ;;  %14118 = vst [vmem:[#allocation43_spill] sm:$0xff] %v9037_v35  ;;  %v1727_v36 = vld [vmem:[%s13727_s1 + $0x18] sm:$0xff]  ;;  %v5960_v35 = vld [vmem:[%s13731_s5] sm:$0xff]  ;;  %v5962_v27 = vld [vmem:[%s13731_s5 + $0x10] sm:$0xff] }
 0x11d   : > { %v9039_v4 = vadd.f32 %v1726_v62, %v1096_v54  ;;  %v2364_v30 = vmul.f32 1.442695, %v2236_v8  ;;  %v2109_v21 = vmin.f32 %v1981_v44, 20.0  ;;  %v5963_v50 = vld [vmem:[%s13731_s5 + $0x18] sm:$0xff] }
 0x11e   : > { %v1100_v41 = vpop.f32.mrb[6].mxu0  ;;  %v9054_v8 = vpop.permute.xlu0 %3156 }
 0x11f   : > { %14119 = vst [vmem:[#allocation44_spill] sm:$0xff] %v9039_v4  ;;  %v1982_v48 = vmax.f32 %v9039_v4, -30.0  ;;  %v1101_v62 = vadd.f32 %v8991_v14, %v1100_v41  ;;  %v1102_v44 = vpop.f32.mrb[7].mxu0  ;;  %1364 = vmatmul.mubr.f32.gmra.mrb[112].mxu0 %v459_v63  ;;  %5182 = vrot.lane.b32.xlu1 %v2109_v21, %s8278_s22  ;;  %v2237_v54 = vmul.f32 0.5, %v2109_v21  ;;  %14120 = vst [vmem:[#allocation45_spill] sm:$0xff] %v9054_v8  ;;  %v9064_v41 = vpop.permute.xlu1 %3158  ;;  %8007 = vpow2.f32 %v2364_v30 }
 0x120   : > { %7622 = vmatprep.mubr.msk.f32.mxu0 %vm634_vm0, %v462_v9  ;;  %14121 = vst [vmem:[#allocation46_spill] sm:$0xff] %v9064_v41  ;;  %v7989_v44 = vpack.c.bf16 %v5963_v50, %v5961_v23  ;;  %v7991_v63 = vpack.c.bf16 %v5962_v27, %v5960_v35  ;;  %v463_v27 = vld [vmem:[%s8383_s12 + $0x3a0] sm:$0xff] }
 0x121   : > { %v9066_v21 = vadd.f32 %v1727_v36, %v1101_v62  ;;  %v2366_v8 = vmul.f32 1.442695, %v2237_v54  ;;  %v2110_v59 = vmin.f32 %v1982_v48, 20.0  ;;  %v466_v62 = vld [vmem:[%s8383_s12 + $0x3b8] sm:$0xff]  ;;  %v1729_v54 = vld [vmem:[%s13727_s1 + $0x28] sm:$0xff] }
 0x122   : > { %v1105_v45 = vpop.f32.mrb[8].mxu0  ;;  %7990 = vmatprep.subr.bf16.mxu1 %v7989_v44  ;;  %v9075_v30 = vpop.permute.xlu0 %3160 }
 0x123   : > { %14122 = vst [vmem:[#allocation47_spill] sm:$0xff] %v9066_v21  ;;  %v1983_v9 = vmax.f32 %v9066_v21, -30.0  ;;  %v1106_v41 = vadd.f32 %v8991_v14, %v1105_v45  ;;  %v1107_v23 = vpop.f32.mrb[9].mxu0  ;;  %1369 = vmatmul.mubr.f32.gmra.mrb[114].mxu0 %v461_v2  ;;  %5184 = vrot.lane.b32.xlu0 %v2110_v59, %s8278_s22  ;;  %14123 = vst [vmem:[#allocation48_spill] sm:$0xff] %v9075_v30  ;;  %8009 = vpow2.f32 %v2366_v8  ;;  %v9079_v35 = vpop.permute.xlu1 %3162  ;;  %v2238_v50 = vmul.f32 0.5, %v2110_v59 }
 0x124   : > { %7623 = vmatprep.mubr.msk.f32.mxu0 %vm634_vm0, %v464_v53  ;;  %14124 = vst [vmem:[#allocation49_spill] sm:$0xff] %v9079_v35  ;;  %7992 = vmatpush1.bf16.msra.mxu1 %v7991_v63  ;;  %v13735_v45 = vmov 0.0   ;;  %v468_v35 = vld [vmem:[%s8383_s12 + $0x3c8] sm:$0xff] }
 0x125   : > { %v9081_v36 = vadd.f32 %v1728_v39, %v1106_v41  ;;  %v2111_v48 = vmin.f32 %v1983_v9, 20.0  ;;  %6424 = vmatprep.mubr.f32.mxu1 %v13735_v45  ;;  %v465_v41 = vld [vmem:[%s8383_s12 + $0x3b0] sm:$0xff]  ;;  %v2368_v9 = vmul.f32 1.442695, %v2238_v50 }
 0x126   : > { %v1110_v2 = vpop.f32.mrb[10].mxu0  ;;  %v9091_v39 = vpop.permute.xlu0 %3164 }
 0x127   : > { %14125 = vst [vmem:[#allocation50_spill] sm:$0xff] %v9081_v36  ;;  %v1984_v53 = vmax.f32 %v9081_v36, -30.0  ;;  %v1111_v8 = vadd.f32 %v8991_v14, %v1110_v2  ;;  %v1112_v44 = vpop.f32.mrb[11].mxu0  ;;  %1374 = vmatmul.mubr.f32.gmra.mrb[116].mxu0 %v463_v27  ;;  %5186 = vrot.lane.b32.xlu1 %v2111_v48, %s8278_s22  ;;  %14126 = vst [vmem:[#allocation51_spill] sm:$0xff] %v9091_v39  ;;  %v2239_v59 = vmul.f32 0.5, %v2111_v48  ;;  %v9095_v63 = vpop.permute.xlu1 %3166  ;;  %v1730_v48 = vld [vmem:[%s13727_s1 + $0x30] sm:$0xff]  ;;  %8011 = vpow2.f32 %v2368_v9 }
 0x128   : > { %7624 = vmatprep.mubr.msk.f32.mxu0 %vm634_vm0, %v466_v62  ;;  %14127 = vst [vmem:[#allocation52_spill] sm:$0xff] %v9095_v63 }
 0x129   : > { %v9097_v23 = vadd.f32 %v1729_v54, %v1111_v8  ;;  %v2112_v45 = vmin.f32 %v1984_v53, 20.0  ;;  %v8008_v44 = vpop.eup %8007  ;;  %v2370_v54 = vmul.f32 1.442695, %v2239_v59  ;;  %v467_v53 = vld [vmem:[%s8383_s12 + $0x3c0] sm:$0xff] }
 0x12a   : > { %v1115_v2 = vpop.f32.mrb[12].mxu0  ;;  %v9106_v50 = vpop.permute.xlu0 %3168  ;;  %v3388_v59 = vmul.f32 %v8008_v44, %v8611_v7 }
 0x12b   : > { %14128 = vst [vmem:[#allocation53_spill] sm:$0xff] %v9097_v23  ;;  %v1985_v27 = vmax.f32 %v9097_v23, -30.0  ;;  %v1116_v30 = vadd.f32 %v8991_v14, %v1115_v2  ;;  %1379 = vmatmul.mubr.f32.gmra.mrb[118].mxu0 %v465_v41  ;;  %5188 = vrot.lane.b32.xlu0 %v2112_v45, %s8278_s22  ;;  %v1117_v62 = vpop.f32.mrb[13].mxu0  ;;  %14129 = vst [vmem:[#allocation54_spill] sm:$0xff] %v9106_v50  ;;  %v9110_v8 = vpop.permute.xlu1 %3170  ;;  %v470_v2 = vld [vmem:[%s8383_s12 + $0x3d8] sm:$0xff]  ;;  %8013 = vpow2.f32 %v2370_v54 }
 0x12c   : > { %7625 = vmatprep.mubr.msk.f32.mxu0 %vm634_vm0, %v468_v35  ;;  %14130 = vst [vmem:[#allocation55_spill] sm:$0xff] %v9110_v8  ;;  %v1731_v41 = vld [vmem:[%s13727_s1 + $0x38] sm:$0xff] }
 0x12d   : > { %v2113_v63 = vmin.f32 %v1985_v27, 20.0  ;;  %v8010_v39 = vpop.eup %8009  ;;  %v9113_v32 = vadd.f32 %v1730_v48, %v1116_v30  ;;  %v469_v30 = vld [vmem:[%s8383_s12 + $0x3d0] sm:$0xff]  ;;  %v2240_v48 = vmul.f32 0.5, %v2112_v45  ;;  %v471_v45 = vld [vmem:[%s8383_s12 + $0x3e0] sm:$0xff] }
 0x12e   : > { %v1120_v26 = vpop.f32.mrb[14].mxu0  ;;  %v9121_v62 = vpop.permute.xlu0 %3172  ;;  %v3389_v7 = vmul.f32 %v8010_v39, %v8622_v13 }
 0x12f   : > { %14131 = vst [vmem:[#allocation56_spill] sm:$0xff] %v9113_v32  ;;  %v1121_v35 = vadd.f32 %v8991_v14, %v1120_v26  ;;  %1384 = vmatmul.mubr.f32.gmra.mrb[120].mxu0 %v467_v53  ;;  %5190 = vrot.lane.b32.xlu1 %v2113_v63, %s8278_s22  ;;  %v1122_v9 = vpop.f32.mrb[15].mxu0  ;;  %14132 = vst [vmem:[#allocation57_spill] sm:$0xff] %v9121_v62  ;;  %v9126_v27 = vpop.permute.xlu1 %3174  ;;  %v472_v26 = vld [vmem:[%s8383_s12 + $0x3e8] sm:$0xff]  ;;  %v1986_v53 = vmax.f32 %v9113_v32, -30.0  ;;  %v2620_v62 = vmul.f32 %v8008_v44, %v8008_v44 }
 0x130   : > { %3644 = vrot.lane.b32.xlu0 %v3388_v59, %s8278_s22  ;;  %7626 = vmatprep.mubr.msk.f32.mxu0 %vm634_vm0, %v470_v2  ;;  %14133 = vst [vmem:[#allocation58_spill] sm:$0xff] %v9126_v27  ;;  %v2241_v59 = vmul.f32 0.5, %v2113_v63  ;;  %v2372_v13 = vmul.f32 1.442695, %v2240_v48  ;;  %v2621_v44 = vmul.f32 %v8010_v39, %v8010_v39  ;;  %v1733_v39 = vld [vmem:[%s13727_s1 + $0x48] sm:$0xff] }
 0x131   : > { %v9128_v8 = vadd.f32 %v1731_v41, %v1121_v35 }
 0x132   : > { %v1125_v9 = vpop.f32.mrb[16].mxu0  ;;  %v9134_v2 = vpop.permute.xlu0 %3176  ;;  %8015 = vpow2.f32 %v2372_v13 }
 0x133   : > { %14134 = vst [vmem:[#allocation59_spill] sm:$0xff] %v9128_v8  ;;  %1389 = vmatmul.mubr.f32.gmra.mrb[122].mxu0 %v469_v30  ;;  %3646 = vrot.lane.b32.xlu1 %v3389_v7, %s8278_s22  ;;  %v1127_v54 = vpop.f32.mrb[17].mxu0  ;;  %14135 = vst [vmem:[#allocation60_spill] sm:$0xff] %v9134_v2  ;;  %v9139_v41 = vpop.permute.xlu1 %3178  ;;  %v1987_v35 = vmax.f32 %v9128_v8, -30.0  ;;  %v1126_v27 = vadd.f32 %v8991_v14, %v1125_v9  ;;  %v474_v30 = vld [vmem:[%s8383_s12 + $0x3f8] sm:$0xff]  ;;  %v1732_v7 = vld [vmem:[%s13727_s1 + $0x40] sm:$0xff] }
 0x134   : > { %4412 = vrot.lane.b32.xlu0 %v2620_v62, %s8278_s22  ;;  %7627 = vmatprep.mubr.msk.f32.mxu0 %vm634_vm0, %v472_v26  ;;  %14136 = vst [vmem:[#allocation61_spill] sm:$0xff] %v9139_v41  ;;  %v2114_v54 = vmin.f32 %v1986_v53, 20.0  ;;  %v8012_v62 = vpop.eup %8011  ;;  %v2374_v9 = vmul.f32 1.442695, %v2241_v59  ;;  %v473_v53 = vld [vmem:[%s8383_s12 + $0x3f0] sm:$0xff] }
 0x135   : > { %v3390_v59 = vmul.f32 %v8012_v62, %v8616_v10 }
 0x136   : > { %v1130_v63 = vpop.f32.mrb[18].mxu0  ;;  %v9149_v41 = vpop.permute.xlu0 %3180  ;;  %8017 = vpow2.f32 %v2374_v9  ;;  %v1734_v9 = vld [vmem:[%s13727_s1 + $0x50] sm:$0xff] }
 0x137   : > { %v1131_v26 = vadd.f32 %v8991_v14, %v1130_v63  ;;  %1394 = vmatmul.mubr.f32.gmra.mrb[124].mxu0 %v471_v45  ;;  %4414 = vrot.lane.b32.xlu1 %v2621_v44, %s8278_s22  ;;  %v1132_v48 = vpop.f32.mrb[19].mxu0  ;;  %14137 = vst [vmem:[#allocation62_spill] sm:$0xff] %v9149_v41  ;;  %v9157_v2 = vpop.permute.xlu1 %3182  ;;  %v9159_v45 = vadd.f32 %v1732_v7, %v1126_v27  ;;  %v2115_v44 = vmin.f32 %v1987_v35, 20.0  ;;  %v476_v63 = vld [vmem:[%s8383_s12 + $0x408] sm:$0xff]  ;;  %v475_v27 = vld [vmem:[%s8383_s12 + $0x400] sm:$0xff]  ;;  %v2242_v7 = vmul.f32 0.5, %v2114_v54 }
 0x138   : > { %5192 = vrot.lane.b32.xlu0 %v2114_v54, %s8278_s22  ;;  %7628 = vmatprep.mubr.msk.f32.mxu0 %vm634_vm0, %v474_v30  ;;  %14138 = vst [vmem:[#allocation63_spill] sm:$0xff] %v9157_v2  ;;  %v8014_v48 = vpop.eup %8013 }
 0x139   : > { %14139 = vst [vmem:[#allocation64_spill] sm:$0xff] %v9159_v45  ;;  %v9163_v50 = vadd.f32 %v1733_v39, %v1131_v26  ;;  %v1988_v35 = vmax.f32 %v9159_v45, -30.0  ;;  %v3391_v26 = vmul.f32 %v8014_v48, %v8627_v16  ;;  %v478_v39 = vld [vmem:[%s8383_s12 + $0x418] sm:$0xff] }
 0x13a   : > { %v1135_v41 = vpop.f32.mrb[20].mxu0  ;;  %v9166_v18 = vpop.permute.xlu0 %3184  ;;  %v1735_v16 = vld [vmem:[%s13727_s1 + $0x58] sm:$0xff] }
 0x13b   : > { %14140 = vst [vmem:[#allocation65_spill] sm:$0xff] %v9163_v50  ;;  %1399 = vmatmul.mubr.f32.gmra.mrb[126].mxu0 %v473_v53  ;;  %5194 = vrot.lane.b32.xlu1 %v2115_v44, %s8278_s22  ;;  %v1137_v30 = vpop.f32.mrb[21].mxu0  ;;  %14141 = vst [vmem:[#allocation66_spill] sm:$0xff] %v9166_v18  ;;  %v9171_v13 = vpop.permute.xlu1 %3186  ;;  %v1136_v10 = vadd.f32 %v8991_v14, %v1135_v41 }
 0x13c   : > { %3648 = vrot.lane.b32.xlu0 %v3390_v59, %s8278_s22  ;;  %7629 = vmatprep.mubr.msk.f32.mxu0 %vm634_vm0, %v476_v63  ;;  %14142 = vst [vmem:[#allocation67_spill] sm:$0xff] %v9171_v13  ;;  %v2622_v59 = vmul.f32 %v8012_v62, %v8012_v62  ;;  %v1989_v63 = vmax.f32 %v9163_v50, -30.0  ;;  %v2243_v30 = vmul.f32 0.5, %v2115_v44  ;;  %v477_v62 = vld [vmem:[%s8383_s12 + $0x410] sm:$0xff]  ;;  %v2376_v44 = vmul.f32 1.442695, %v2242_v7 }
 0x13e   : > { %v1140_v53 = vpop.f32.mrb[22].mxu0  ;;  %v9183_v54 = vpop.permute.xlu0 %3188  ;;  %v2378_v50 = vmul.f32 1.442695, %v2243_v30  ;;  %8019 = vpow2.f32 %v2376_v44 }
 0x13f   : > { %v1141_v13 = vadd.f32 %v8991_v14, %v1140_v53  ;;  %1404 = vmatmul.mubr.f32.gmra.mrb[128].mxu0 %v475_v27  ;;  %3650 = vrot.lane.b32.xlu1 %v3391_v26, %s8278_s22  ;;  %v1142_v41 = vpop.f32.mrb[23].mxu0  ;;  %14143 = vst [vmem:[#allocation68_spill] sm:$0xff] %v9183_v54  ;;  %v9191_v18 = vpop.permute.xlu1 %3190  ;;  %v9193_v53 = vadd.f32 %v1734_v9, %v1136_v10  ;;  %v2116_v26 = vmin.f32 %v1988_v35, 20.0  ;;  %v482_v9 = vld [vmem:[%s8383_s12 + $0x438] sm:$0xff] }
 0x140   : > { %4416 = vrot.lane.b32.xlu0 %v2622_v59, %s8278_s22  ;;  %7630 = vmatprep.mubr.msk.f32.mxu0 %vm634_vm0, %v478_v39  ;;  %14144 = vst [vmem:[#allocation69_spill] sm:$0xff] %v9191_v18  ;;  %v2623_v27 = vmul.f32 %v8014_v48, %v8014_v48  ;;  %v480_v41 = vld [vmem:[%s8383_s12 + $0x428] sm:$0xff]  ;;  %v8016_v54 = vpop.eup %8015  ;;  %v2117_v59 = vmin.f32 %v1989_v63, 20.0  ;;  %v479_v48 = vld [vmem:[%s8383_s12 + $0x420] sm:$0xff]  ;;  %8021 = vpow2.f32 %v2378_v50 }
 0x141   : > { %14145 = vst [vmem:[#allocation70_spill] sm:$0xff] %v9193_v53  ;;  %v9196_v45 = vadd.f32 %v1735_v16, %v1141_v13  ;;  %v1990_v7 = vmax.f32 %v9193_v53, -30.0  ;;  %v2244_v10 = vmul.f32 0.5, %v2116_v26  ;;  %v8018_v30 = vpop.eup %8017  ;;  %v1736_v63 = vld [vmem:[%s13727_s1 + $0x60] sm:$0xff] }
 0x142   : > { %v1145_v2 = vpop.f32.mrb[24].mxu0  ;;  %v9199_v12 = vpop.permute.xlu0 %3192 }
 0x143   : > { %14146 = vst [vmem:[#allocation71_spill] sm:$0xff] %v9196_v45  ;;  %1409 = vmatmul.mubr.f32.gmra.mrb[130].mxu0 %v477_v62  ;;  %4418 = vrot.lane.b32.xlu1 %v2623_v27, %s8278_s22  ;;  %v1147_v39 = vpop.f32.mrb[25].mxu0  ;;  %14147 = vst [vmem:[#allocation72_spill] sm:$0xff] %v9199_v12  ;;  %v9204_v35 = vpop.permute.xlu1 %3194  ;;  %v1146_v13 = vadd.f32 %v8991_v14, %v1145_v2  ;;  %v3392_v62 = vmul.f32 %v8016_v54, %v8633_v19  ;;  %v1991_v27 = vmax.f32 %v9196_v45, -30.0  ;;  %v481_v19 = vld [vmem:[%s8383_s12 + $0x430] sm:$0xff] }
 0x144   : > { %5196 = vrot.lane.b32.xlu0 %v2116_v26, %s8278_s22  ;;  %7631 = vmatprep.mubr.msk.f32.mxu0 %vm634_vm0, %v480_v41  ;;  %14148 = vst [vmem:[#allocation73_spill] sm:$0xff] %v9204_v35  ;;  %v2245_v41 = vmul.f32 0.5, %v2117_v59  ;;  %v1737_v39 = vld [vmem:[%s13727_s1 + $0x68] sm:$0xff]  ;;  %v2624_v12 = vmul.f32 %v8016_v54, %v8016_v54 }
 0x145   : > { %v9226_v35 = vadd.f32 %v1736_v63, %v1146_v13  ;;  %v2119_v13 = vmin.f32 %v1991_v27, 20.0  ;;  %v1738_v27 = vld [vmem:[%s13727_s1 + $0x70] sm:$0xff] }
 0x146   : > { %v1150_v16 = vpop.f32.mrb[26].mxu0  ;;  %v9216_v26 = vpop.permute.xlu0 %3196  ;;  %v2382_v45 = vmul.f32 1.442695, %v2245_v41  ;;  %v486_v41 = vld [vmem:[%s8383_s12 + $0x458] sm:$0xff] }
 0x147   : > { %v1151_v44 = vadd.f32 %v8991_v14, %v1150_v16  ;;  %1414 = vmatmul.mubr.f32.gmra.mrb[132].mxu0 %v479_v48  ;;  %5198 = vrot.lane.b32.xlu1 %v2117_v59, %s8278_s22  ;;  %v1152_v2 = vpop.f32.mrb[27].mxu0  ;;  %14149 = vst [vmem:[#allocation74_spill] sm:$0xff] %v9216_v26  ;;  %v9224_v50 = vpop.permute.xlu1 %3198  ;;  %14151 = vst [vmem:[#allocation76_spill] sm:$0xff] %v9226_v35  ;;  %v2380_v48 = vmul.f32 1.442695, %v2244_v10  ;;  %v3393_v59 = vmul.f32 %v8018_v30, %v8638_v22  ;;  %v484_v16 = vld [vmem:[%s8383_s12 + $0x448] sm:$0xff] }
 0x148   : > { %3652 = vrot.lane.b32.xlu0 %v3392_v62, %s8278_s22  ;;  %7632 = vmatprep.mubr.msk.f32.mxu0 %vm634_vm0, %v482_v9  ;;  %14150 = vst [vmem:[#allocation75_spill] sm:$0xff] %v9224_v50  ;;  %v2118_v2 = vmin.f32 %v1990_v7, 20.0  ;;  %v483_v22 = vld [vmem:[%s8383_s12 + $0x440] sm:$0xff]  ;;  %v2625_v10 = vmul.f32 %v8018_v30, %v8018_v30  ;;  %v1992_v54 = vmax.f32 %v9226_v35, -30.0 }
 0x149   : > { %v9230_v18 = vadd.f32 %v1737_v39, %v1151_v44  ;;  %8023 = vpow2.f32 %v2380_v48 }
 0x14a   : > { %v1155_v26 = vpop.f32.mrb[28].mxu0  ;;  %v9233_v62 = vpop.permute.xlu0 %3200  ;;  %v2246_v44 = vmul.f32 0.5, %v2118_v2  ;;  %8025 = vpow2.f32 %v2382_v45 }
 0x14b   : > { %14152 = vst [vmem:[#allocation77_spill] sm:$0xff] %v9230_v18  ;;  %1419 = vmatmul.mubr.f32.gmra.mrb[134].mxu0 %v481_v19  ;;  %3654 = vrot.lane.b32.xlu1 %v3393_v59, %s8278_s22  ;;  %v1157_v9 = vpop.f32.mrb[29].mxu0  ;;  %14153 = vst [vmem:[#allocation78_spill] sm:$0xff] %v9233_v62  ;;  %v9238_v7 = vpop.permute.xlu1 %3202  ;;  %v1156_v63 = vadd.f32 %v8991_v14, %v1155_v26  ;;  %v1993_v19 = vmax.f32 %v9230_v18, -30.0  ;;  %v2247_v26 = vmul.f32 0.5, %v2119_v13 }
 0x14c   : > { %4420 = vrot.lane.b32.xlu0 %v2624_v12, %s8278_s22  ;;  %7633 = vmatprep.mubr.msk.f32.mxu0 %vm634_vm0, %v484_v16  ;;  %14154 = vst [vmem:[#allocation79_spill] sm:$0xff] %v9238_v7  ;;  %v8020_v12 = vpop.eup %8019  ;;  %v1739_v16 = vld [vmem:[%s13727_s1 + $0x78] sm:$0xff]  ;;  %v485_v9 = vld [vmem:[%s8383_s12 + $0x450] sm:$0xff] }
 0x14d   : > { %v8022_v7 = vpop.eup %8021  ;;  %v3394_v62 = vmul.f32 %v8020_v12, %v8644_v25  ;;  %v9265_v50 = vmin.f32 %v1993_v19, 20.0 }
 0x14e   : > { %v1160_v39 = vpop.f32.mrb[30].mxu0  ;;  %v9249_v59 = vpop.permute.xlu0 %3204 }
 0x14f   : > { %v1161_v30 = vadd.f32 %v8991_v14, %v1160_v39  ;;  %1424 = vmatmul.mubr.f32.gmra.mrb[136].mxu0 %v483_v22  ;;  %4422 = vrot.lane.b32.xlu1 %v2625_v10, %s8278_s22  ;;  %v1162_v48 = vpop.f32.mrb[31].mxu0  ;;  %14155 = vst [vmem:[#allocation80_spill] sm:$0xff] %v9249_v59  ;;  %v9257_v45 = vpop.permute.xlu1 %3206  ;;  %v9259_v22 = vmin.f32 %v1992_v54, 20.0  ;;  %v9261_v10 = vadd.f32 %v1738_v27, %v1156_v63  ;;  %v2384_v39 = vmul.f32 1.442695, %v2246_v44  ;;  %v487_v54 = vld [vmem:[%s8383_s12 + $0x460] sm:$0xff] }
 0x150   : > { %5200 = vrot.lane.b32.xlu0 %v2118_v2, %s8278_s22  ;;  %7634 = vmatprep.mubr.msk.f32.mxu0 %vm634_vm0, %v486_v41  ;;  %14156 = vst [vmem:[#allocation81_spill] sm:$0xff] %v9257_v45  ;;  %v488_v48 = vld [vmem:[%s8383_s12 + $0x468] sm:$0xff]  ;;  %v2386_v41 = vmul.f32 1.442695, %v2247_v26  ;;  %v3395_v63 = vmul.f32 %v8022_v7, %v8649_v28  ;;  %v2626_v26 = vmul.f32 %v8020_v12, %v8020_v12  ;;  %v2249_v28 = vmul.f32 0.5, %v9265_v50  ;;  %v489_v12 = vld [vmem:[%s8383_s12 + $0x470] sm:$0xff] }
 0x151   : > { %14157 = vst [vmem:[#allocation82_spill] sm:$0xff] %v9261_v10  ;;  %v9267_v2 = vadd.f32 %v1739_v16, %v1161_v30  ;;  %v2248_v44 = vmul.f32 0.5, %v9259_v22  ;;  %v1994_v27 = vmax.f32 %v9261_v10, -30.0  ;;  %8027 = vpow2.f32 %v2384_v39 }
 0x152   : > { %v1165_v59 = vpop.f32.mrb[32].mxu0  ;;  %v9270_v18 = vpop.permute.xlu0 %3208  ;;  %8029 = vpow2.f32 %v2386_v41  ;;  %v2390_v10 = vmul.f32 1.442695, %v2249_v28 }
 0x153   : > { %14158 = vst [vmem:[#allocation83_spill] sm:$0xff] %v9267_v2  ;;  %1429 = vmatmul.mubr.f32.gmra.mrb[138].mxu0 %v485_v9  ;;  %5202 = vrot.lane.b32.xlu1 %v2119_v13, %s8278_s22  ;;  %v1167_v45 = vpop.f32.mrb[33].mxu0  ;;  %14159 = vst [vmem:[#allocation84_spill] sm:$0xff] %v9270_v18  ;;  %v9276_v25 = vpop.permute.xlu1 %3210  ;;  %v1166_v19 = vadd.f32 %v8991_v14, %v1165_v59  ;;  %v490_v13 = vld [vmem:[%s8383_s12 + $0x478] sm:$0xff]  ;;  %v1995_v9 = vmax.f32 %v9267_v2, -30.0 }
 0x154   : > { %3656 = vrot.lane.b32.xlu0 %v3394_v62, %s8278_s22  ;;  %7635 = vmatprep.mubr.msk.f32.mxu0 %vm634_vm0, %v488_v48  ;;  %14160 = vst [vmem:[#allocation85_spill] sm:$0xff] %v9276_v25  ;;  %v1740_v62 = vld [vmem:[%s13727_s1 + $0x80] sm:$0xff]  ;;  %v8024_v16 = vpop.eup %8023  ;;  %v1741_v48 = vld [vmem:[%s13727_s1 + $0x88] sm:$0xff]  ;;  %v2388_v18 = vmul.f32 1.442695, %v2248_v44 }
 0x155   : > { %v8026_v41 = vpop.eup %8025  ;;  %v3396_v2 = vmul.f32 %v8024_v16, %v8655_v31 }
 0x156   : > { %v1170_v30 = vpop.f32.mrb[34].mxu0  ;;  %v9289_v39 = vpop.permute.xlu0 %3212  ;;  %8031 = vpow2.f32 %v2388_v18 }
 0x157   : > { %v1171_v45 = vadd.f32 %v8991_v14, %v1170_v30  ;;  %1434 = vmatmul.mubr.f32.gmra.mrb[140].mxu0 %v487_v54  ;;  %3658 = vrot.lane.b32.xlu1 %v3395_v63, %s8278_s22  ;;  %v1172_v59 = vpop.f32.mrb[35].mxu0  ;;  %14161 = vst [vmem:[#allocation86_spill] sm:$0xff] %v9289_v39  ;;  %v9297_v25 = vpop.permute.xlu1 %3214  ;;  %v9299_v54 = vmin.f32 %v1994_v27, 20.0  ;;  %v9301_v63 = vadd.f32 %v1740_v62, %v1166_v19  ;;  %8033 = vpow2.f32 %v2390_v10  ;;  %v493_v10 = vld [vmem:[%s8383_s12 + $0x490] sm:$0xff] }
 0x158   : > { %4424 = vrot.lane.b32.xlu0 %v2626_v26, %s8278_s22  ;;  %7636 = vmatprep.mubr.msk.f32.mxu0 %vm634_vm0, %v490_v13  ;;  %14162 = vst [vmem:[#allocation87_spill] sm:$0xff] %v9297_v25  ;;  %v2627_v30 = vmul.f32 %v8022_v7, %v8022_v7  ;;  %v492_v59 = vld [vmem:[%s8383_s12 + $0x488] sm:$0xff]  ;;  %v9305_v26 = vmin.f32 %v1995_v9, 20.0  ;;  %v491_v7 = vld [vmem:[%s8383_s12 + $0x480] sm:$0xff]  ;;  %v3397_v27 = vmul.f32 %v8026_v41, %v8660_v34  ;;  %v494_v9 = vld [vmem:[%s8383_s12 + $0x498] sm:$0xff] }
 0x159   : > { %14163 = vst [vmem:[#allocation88_spill] sm:$0xff] %v9301_v63  ;;  %v9307_v13 = vadd.f32 %v1741_v48, %v1171_v45  ;;  %v2250_v19 = vmul.f32 0.5, %v9299_v54  ;;  %v1996_v62 = vmax.f32 %v9301_v63, -30.0  ;;  %v2628_v48 = vmul.f32 %v8024_v16, %v8024_v16 }
 0x15a   : > { %v1175_v39 = vpop.f32.mrb[36].mxu0  ;;  %v9310_v25 = vpop.permute.xlu0 %3216  ;;  %v2251_v34 = vmul.f32 0.5, %v9305_v26 }
 0x15b   : > { %14164 = vst [vmem:[#allocation89_spill] sm:$0xff] %v9307_v13  ;;  %1439 = vmatmul.mubr.f32.gmra.mrb[142].mxu0 %v489_v12  ;;  %4426 = vrot.lane.b32.xlu1 %v2627_v30, %s8278_s22  ;;  %v1177_v44 = vpop.f32.mrb[37].mxu0  ;;  %14165 = vst [vmem:[#allocation90_spill] sm:$0xff] %v9310_v25  ;;  %v9316_v31 = vpop.permute.xlu1 %3218  ;;  %v1176_v28 = vadd.f32 %v8991_v14, %v1175_v39  ;;  %v1997_v18 = vmax.f32 %v9307_v13, -30.0  ;;  %v2392_v25 = vmul.f32 1.442695, %v2250_v19 }
 0x15c   : > { %3660 = vrot.lane.b32.xlu0 %v3396_v2, %s8278_s22  ;;  %7637 = vmatprep.mubr.msk.f32.mxu0 %vm634_vm0, %v492_v59  ;;  %14166 = vst [vmem:[#allocation91_spill] sm:$0xff] %v9316_v31  ;;  %v1742_v2 = vld [vmem:[%s13727_s1 + $0x90] sm:$0xff]  ;;  %v8028_v12 = vpop.eup %8027  ;;  %v1743_v44 = vld [vmem:[%s13727_s1 + $0x98] sm:$0xff]  ;;  %v2394_v63 = vmul.f32 1.442695, %v2251_v34 }
 0x15d   : > { %v8030_v31 = vpop.eup %8029  ;;  %v3398_v13 = vmul.f32 %v8028_v12, %v8666_v37  ;;  %8035 = vpow2.f32 %v2392_v25 }
 0x15e   : > { %v1180_v45 = vpop.f32.mrb[38].mxu0  ;;  %v9329_v59 = vpop.permute.xlu0 %3220  ;;  %8037 = vpow2.f32 %v2394_v63  ;;  %v497_v63 = vld [vmem:[%s8383_s12 + $0x4b0] sm:$0xff] }
 0x15f   : > { %v1181_v30 = vadd.f32 %v8991_v14, %v1180_v45  ;;  %1444 = vmatmul.mubr.f32.gmra.mrb[144].mxu0 %v491_v7  ;;  %3662 = vrot.lane.b32.xlu1 %v3397_v27, %s8278_s22  ;;  %v1182_v39 = vpop.f32.mrb[39].mxu0  ;;  %14167 = vst [vmem:[#allocation92_spill] sm:$0xff] %v9329_v59  ;;  %v9337_v16 = vpop.permute.xlu1 %3222  ;;  %v9339_v7 = vmin.f32 %v1996_v62, 20.0  ;;  %v9341_v27 = vadd.f32 %v1742_v2, %v1176_v28 }
 0x160   : > { %4428 = vrot.lane.b32.xlu0 %v2628_v48, %s8278_s22  ;;  %7638 = vmatprep.mubr.msk.f32.mxu0 %vm634_vm0, %v494_v9  ;;  %14168 = vst [vmem:[#allocation93_spill] sm:$0xff] %v9337_v16  ;;  %v2629_v45 = vmul.f32 %v8026_v41, %v8026_v41  ;;  %v496_v39 = vld [vmem:[%s8383_s12 + $0x4a8] sm:$0xff]  ;;  %v9345_v48 = vmin.f32 %v1997_v18, 20.0  ;;  %v495_v41 = vld [vmem:[%s8383_s12 + $0x4a0] sm:$0xff]  ;;  %v3399_v62 = vmul.f32 %v8030_v31, %v8671_v40  ;;  %v498_v18 = vld [vmem:[%s8383_s12 + $0x4b8] sm:$0xff] }
 0x161   : > { %14169 = vst [vmem:[#allocation94_spill] sm:$0xff] %v9341_v27  ;;  %v9347_v9 = vadd.f32 %v1743_v44, %v1181_v30  ;;  %v2252_v28 = vmul.f32 0.5, %v9339_v7  ;;  %v1998_v2 = vmax.f32 %v9341_v27, -30.0  ;;  %v2630_v44 = vmul.f32 %v8028_v12, %v8028_v12 }
 0x162   : > { %v1185_v59 = vpop.f32.mrb[40].mxu0  ;;  %v9350_v16 = vpop.permute.xlu0 %3224  ;;  %v2253_v40 = vmul.f32 0.5, %v9345_v48 }
 0x163   : > { %14170 = vst [vmem:[#allocation95_spill] sm:$0xff] %v9347_v9  ;;  %1449 = vmatmul.mubr.f32.gmra.mrb[146].mxu0 %v493_v10  ;;  %4430 = vrot.lane.b32.xlu1 %v2629_v45, %s8278_s22  ;;  %v1187_v19 = vpop.f32.mrb[41].mxu0  ;;  %14171 = vst [vmem:[#allocation96_spill] sm:$0xff] %v9350_v16  ;;  %v9356_v37 = vpop.permute.xlu1 %3226  ;;  %v1186_v34 = vadd.f32 %v8991_v14, %v1185_v59  ;;  %v1999_v25 = vmax.f32 %v9347_v9, -30.0  ;;  %v9377_v16 = vmin.f32 %v1998_v2, 20.0 }
 0x164   : > { %3664 = vrot.lane.b32.xlu0 %v3398_v13, %s8278_s22  ;;  %7639 = vmatprep.mubr.msk.f32.mxu0 %vm634_vm0, %v496_v39  ;;  %14172 = vst [vmem:[#allocation97_spill] sm:$0xff] %v9356_v37  ;;  %v1744_v13 = vld [vmem:[%s13727_s1 + $0xa0] sm:$0xff]  ;;  %v8032_v10 = vpop.eup %8031  ;;  %v1745_v19 = vld [vmem:[%s13727_s1 + $0xa8] sm:$0xff]  ;;  %v2396_v37 = vmul.f32 1.442695, %v2252_v28 }
 0x165   : > { %v8034_v12 = vpop.eup %8033  ;;  %v3400_v9 = vmul.f32 %v8032_v10, %v8677_v43  ;;  %v2398_v27 = vmul.f32 1.442695, %v2253_v40  ;;  %v2254_v43 = vmul.f32 0.5, %v9377_v16 }
 0x166   : > { %v1190_v30 = vpop.f32.mrb[42].mxu0  ;;  %v9369_v39 = vpop.permute.xlu0 %3228  ;;  %8039 = vpow2.f32 %v2396_v37 }
 0x167   : > { %v1191_v45 = vadd.f32 %v8991_v14, %v1190_v30  ;;  %1454 = vmatmul.mubr.f32.gmra.mrb[148].mxu0 %v495_v41  ;;  %3666 = vrot.lane.b32.xlu1 %v3399_v62, %s8278_s22  ;;  %v1192_v59 = vpop.f32.mrb[43].mxu0  ;;  %14173 = vst [vmem:[#allocation98_spill] sm:$0xff] %v9369_v39  ;;  %v9379_v41 = vadd.f32 %v1744_v13, %v1186_v34  ;;  %v500_v30 = vld [vmem:[%s8383_s12 + $0x4c8] sm:$0xff]  ;;  %8041 = vpow2.f32 %v2398_v27  ;;  %v501_v27 = vld [vmem:[%s8383_s12 + $0x4d0] sm:$0xff] }
 0x168   : > { %4432 = vrot.lane.b32.xlu0 %v2630_v44, %s8278_s22  ;;  %7640 = vmatprep.mubr.msk.f32.mxu0 %vm634_vm0, %v498_v18  ;;  %v2631_v62 = vmul.f32 %v8030_v31, %v8030_v31  ;;  %v9382_v59 = vpop.permute.xlu1 %3230  ;;  %v9385_v44 = vmin.f32 %v1999_v25, 20.0  ;;  %v499_v31 = vld [vmem:[%s8383_s12 + $0x4c0] sm:$0xff]  ;;  %v3401_v34 = vmul.f32 %v8034_v12, %v8682_v46  ;;  %v502_v25 = vld [vmem:[%s8383_s12 + $0x4d8] sm:$0xff] }
 0x169   : > { %14174 = vst [vmem:[#allocation99_spill] sm:$0xff] %v9379_v41  ;;  %14175 = vst [vmem:[#allocation100_spill] sm:$0xff] %v9382_v59  ;;  %v9387_v18 = vadd.f32 %v1745_v19, %v1191_v45  ;;  %v2000_v13 = vmax.f32 %v9379_v41, -30.0  ;;  %v1746_v45 = vld [vmem:[%s13727_s1 + $0xb0] sm:$0xff] }
 0x16a   : > { %v1195_v39 = vpop.f32.mrb[44].mxu0  ;;  %v9390_v2 = vpop.permute.xlu0 %3232 }
 0x16b   : > { %14176 = vst [vmem:[#allocation101_spill] sm:$0xff] %v9387_v18  ;;  %1459 = vmatmul.mubr.f32.gmra.mrb[150].mxu0 %v497_v63  ;;  %4434 = vrot.lane.b32.xlu1 %v2631_v62, %s8278_s22  ;;  %v1197_v28 = vpop.f32.mrb[45].mxu0  ;;  %14177 = vst [vmem:[#allocation102_spill] sm:$0xff] %v9390_v2  ;;  %v1196_v40 = vadd.f32 %v8991_v14, %v1195_v39  ;;  %v8036_v63 = vpop.eup %8035  ;;  %v2255_v62 = vmul.f32 0.5, %v9385_v44  ;;  %v2001_v46 = vmax.f32 %v9387_v18, -30.0  ;;  %v9415_v59 = vmin.f32 %v2000_v13, 20.0 }
 0x16c   : > { %3668 = vrot.lane.b32.xlu0 %v3400_v9, %s8278_s22  ;;  %7641 = vmatprep.mubr.msk.f32.mxu0 %vm634_vm0, %v500_v30  ;;  %v2632_v9 = vmul.f32 %v8032_v10, %v8032_v10  ;;  %v9407_v30 = vpop.permute.xlu1 %3234  ;;  %v1747_v28 = vld [vmem:[%s13727_s1 + $0xb8] sm:$0xff]  ;;  %v8038_v10 = vpop.eup %8037  ;;  %v2400_v2 = vmul.f32 1.442695, %v2254_v43  ;;  %v3402_v18 = vmul.f32 %v8036_v63, %v8688_v49 }
 0x16d   : > { %14178 = vst [vmem:[#allocation103_spill] sm:$0xff] %v9407_v30  ;;  %v2402_v41 = vmul.f32 1.442695, %v2255_v62  ;;  %v3403_v13 = vmul.f32 %v8038_v10, %v8693_v52  ;;  %v2256_v49 = vmul.f32 0.5, %v9415_v59 }
 0x16e   : > { %v1200_v19 = vpop.f32.mrb[46].mxu0  ;;  %8043 = vpow2.f32 %v2400_v2 }
 0x16f   : > { %v1201_v37 = vadd.f32 %v8991_v14, %v1200_v19  ;;  %1464 = vmatmul.mubr.f32.gmra.mrb[152].mxu0 %v499_v31  ;;  %3670 = vrot.lane.b32.xlu1 %v3401_v34, %s8278_s22  ;;  %v1202_v39 = vpop.f32.mrb[47].mxu0  ;;  %v9417_v31 = vadd.f32 %v1746_v45, %v1196_v40  ;;  %v2633_v34 = vmul.f32 %v8034_v12, %v8034_v12  ;;  %v9419_v19 = vpop.permute.xlu0 %3236  ;;  %v503_v12 = vld [vmem:[%s8383_s12 + $0x4e0] sm:$0xff]  ;;  %8045 = vpow2.f32 %v2402_v41  ;;  %v505_v41 = vld [vmem:[%s8383_s12 + $0x4f0] sm:$0xff] }
 0x170   : > { %4436 = vrot.lane.b32.xlu0 %v2632_v9, %s8278_s22  ;;  %7642 = vmatprep.mubr.msk.f32.mxu0 %vm634_vm0, %v502_v25  ;;  %14180 = vst [vmem:[#allocation105_spill] sm:$0xff] %v9419_v19  ;;  %v504_v39 = vld [vmem:[%s8383_s12 + $0x4e8] sm:$0xff]  ;;  %v9423_v9 = vmin.f32 %v2001_v46, 20.0  ;;  %v9435_v62 = vpop.permute.xlu1 %3238  ;;  %v506_v46 = vld [vmem:[%s8383_s12 + $0x4f8] sm:$0xff] }
 0x171   : > { %14179 = vst [vmem:[#allocation104_spill] sm:$0xff] %v9417_v31  ;;  %v9425_v25 = vadd.f32 %v1747_v28, %v1201_v37  ;;  %v2002_v40 = vmax.f32 %v9417_v31, -30.0  ;;  %14182 = vst [vmem:[#allocation107_spill] sm:$0xff] %v9435_v62  ;;  %v2634_v28 = vmul.f32 %v8036_v63, %v8036_v63  ;;  %v2404_v62 = vmul.f32 1.442695, %v2256_v49 }
 0x172   : > { %v1205_v30 = vpop.f32.mrb[48].mxu0  ;;  %v2257_v52 = vmul.f32 0.5, %v9423_v9 }
 0x173   : > { %14181 = vst [vmem:[#allocation106_spill] sm:$0xff] %v9425_v25  ;;  %1469 = vmatmul.mubr.f32.gmra.mrb[154].mxu0 %v501_v27  ;;  %4438 = vrot.lane.b32.xlu1 %v2633_v34, %s8278_s22  ;;  %v1207_v43 = vpop.f32.mrb[49].mxu0  ;;  %v1206_v45 = vadd.f32 %v8991_v14, %v1205_v30  ;;  %v8040_v27 = vpop.eup %8039  ;;  %v2003_v2 = vmax.f32 %v9425_v25, -30.0  ;;  %v9453_v19 = vmin.f32 %v2002_v40, 20.0  ;;  %8047 = vpow2.f32 %v2404_v62 }
 0x174   : > { %3672 = vrot.lane.b32.xlu0 %v3402_v18, %s8278_s22  ;;  %7643 = vmatprep.mubr.msk.f32.mxu0 %vm634_vm0, %v504_v39  ;;  %v1748_v18 = vld [vmem:[%s13727_s1 + $0xc0] sm:$0xff]  ;;  %v9445_v30 = vpop.permute.xlu0 %3240  ;;  %v1749_v43 = vld [vmem:[%s13727_s1 + $0xc8] sm:$0xff]  ;;  %v8042_v63 = vpop.eup %8041 }
 0x175   : > { %14183 = vst [vmem:[#allocation108_spill] sm:$0xff] %v9445_v30  ;;  %14184 = vst [vmem:[#allocation109_spill] sm:$0xff] %v9453_v19  ;;  %v2406_v30 = vmul.f32 1.442695, %v2257_v52  ;;  %v9459_v25 = vmin.f32 %v2003_v2, 20.0  ;;  %v9464_v49 = vpop.permute.xlu1 %3242 }
 0x176   : > { %v1210_v37 = vpop.f32.mrb[50].mxu0  ;;  %14187 = vst [vmem:[#allocation112_spill] sm:$0xff] %v9464_v49 }
 0x177   : > { %v1211_v34 = vadd.f32 %v8991_v14, %v1210_v37  ;;  %1474 = vmatmul.mubr.f32.gmra.mrb[156].mxu0 %v503_v12  ;;  %3674 = vrot.lane.b32.xlu1 %v3403_v13, %s8278_s22  ;;  %v1212_v39 = vpop.f32.mrb[51].mxu0  ;;  %v9455_v14 = vadd.f32 %v1748_v18, %v1206_v45  ;;  %v2635_v12 = vmul.f32 %v8038_v10, %v8038_v10  ;;  %v508_v13 = vld [vmem:[%s8383_s12 + $0x508] sm:$0xff]  ;;  %v507_v10 = vld [vmem:[%s8383_s12 + $0x500] sm:$0xff]  ;;  %8049 = vpow2.f32 %v2406_v30 }
 0x178   : > { %4440 = vrot.lane.b32.xlu0 %v2634_v28, %s8278_s22  ;;  %7644 = vmatprep.mubr.msk.f32.mxu0 %vm634_vm0, %v506_v46  ;;  %v3404_v39 = vmul.f32 %v8040_v27, %v8699_v55  ;;  %v3405_v45 = vmul.f32 %v8042_v63, %v8704_v58  ;;  %v2258_v55 = vmul.f32 0.5, %v9453_v19  ;;  %v9475_v18 = vld [vmem:[%s13730_s4] ss:$0 sm:$0xff]  ;;  %v9478_v2 = vpop.permute.xlu0 %3244  ;;  %v1750_v58 = vld [vmem:[%s13727_s1 + $0xd0] sm:$0xff] }
 0x179   : > { %14185 = vst [vmem:[#allocation110_spill] sm:$0xff] %v9455_v14  ;;  %v9461_v28 = vadd.f32 %v1749_v43, %v1211_v34  ;;  %v2004_v46 = vmax.f32 %v9455_v14, -30.0  ;;  %14188 = vst [vmem:[#allocation113_spill] sm:$0xff] %v9478_v2  ;;  %v510_v34 = vld [vmem:[%s8383_s12 + $0x518] sm:$0xff]  ;;  %v2636_v43 = vmul.f32 %v8040_v27, %v8040_v27  ;;  %v509_v27 = vld [vmem:[%s8383_s12 + $0x510] sm:$0xff] }
 0x17a   : > { %v1215_v37 = vpop.f32.mrb[52].mxu0  ;;  %v2408_v2 = vmul.f32 1.442695, %v2258_v55 }
 0x17b   : > { %14186 = vst [vmem:[#allocation111_spill] sm:$0xff] %v9461_v28  ;;  %1479 = vmatmul.mubr.f32.gmra.mrb[158].mxu0 %v505_v41  ;;  %4442 = vrot.lane.b32.xlu1 %v2635_v12, %s8278_s22  ;;  %v1217_v40 = vpop.f32.mrb[53].mxu0  ;;  %v1216_v52 = vadd.f32 %v9475_v18, %v1215_v37  ;;  %v8044_v41 = vpop.eup %8043  ;;  %v2259_v12 = vmul.f32 0.5, %v9459_v25  ;;  %v9494_v49 = vmin.f32 %v2004_v46, 20.0 }
 0x17c   : > { %3676 = vrot.lane.b32.xlu0 %v3404_v39, %s8278_s22  ;;  %7645 = vmatprep.mubr.msk.f32.mxu0 %vm634_vm0, %v508_v13  ;;  %v2005_v13 = vmax.f32 %v9461_v28, -30.0  ;;  %v1751_v40 = vld [vmem:[%s13727_s1 + $0xd8] sm:$0xff]  ;;  %v8046_v30 = vpop.eup %8045  ;;  %v3406_v14 = vmul.f32 %v8044_v41, %v8710_v61  ;;  %v9506_v19 = vpop.permute.xlu0 %3248  ;;  %8051 = vpow2.f32 %v2408_v2 }
 0x17d   : > { %v9496_v28 = vadd.f32 %v1750_v58, %v1216_v52  ;;  %v2410_v31 = vmul.f32 1.442695, %v2259_v12  ;;  %14192 = vst [vmem:[#allocation117_spill] sm:$0xff] %v9506_v19  ;;  %v3407_v46 = vmul.f32 %v8046_v30, %v8715_v0  ;;  %v2260_v61 = vmul.f32 0.5, %v9494_v49  ;;  %v514_v12 = vld [vmem:[%s8383_s12 + $0x538] sm:$0xff] }
 0x17e   : > { %v1220_v62 = vpop.f32.mrb[54].mxu0 }
 0x17f   : > { %v1221_v39 = vadd.f32 %v9475_v18, %v1220_v62  ;;  %1484 = vmatmul.mubr.f32.gmra.mrb[160].mxu0 %v507_v10  ;;  %3678 = vrot.lane.b32.xlu1 %v3405_v45, %s8278_s22  ;;  %v1222_v37 = vpop.f32.mrb[55].mxu0  ;;  %14189 = vst [vmem:[#allocation114_spill] sm:$0xff] %v9496_v28  ;;  %v9498_v10 = vpop.permute.xlu1 %3246  ;;  %v2637_v45 = vmul.f32 %v8042_v63, %v8042_v63  ;;  %v512_v62 = vld [vmem:[%s8383_s12 + $0x528] sm:$0xff]  ;;  %v511_v63 = vld [vmem:[%s8383_s12 + $0x520] sm:$0xff]  ;;  %v2006_v52 = vmax.f32 %v9496_v28, -30.0  ;;  %8053 = vpow2.f32 %v2410_v31 }
 0x180   : > { %4444 = vrot.lane.b32.xlu0 %v2636_v43, %s8278_s22  ;;  %7646 = vmatprep.mubr.msk.f32.mxu0 %vm634_vm0, %v510_v34  ;;  %14190 = vst [vmem:[#allocation115_spill] sm:$0xff] %v9498_v10  ;;  %v9502_v43 = vmin.f32 %v2005_v13, 20.0  ;;  %v1752_v13 = vld [vmem:[%s13727_s1 + $0xe0] sm:$0xff]  ;;  %v2412_v31 = vmul.f32 1.442695, %v2260_v61  ;;  %v9533_v10 = vpop.permute.xlu0 %3252 }
 0x181   : > { %v9504_v34 = vadd.f32 %v1751_v40, %v1221_v39  ;;  %v8048_v40 = vpop.eup %8047  ;;  %14195 = vst [vmem:[#allocation120_spill] sm:$0xff] %v9533_v10 }
 0x182   : > { %v1225_v37 = vpop.f32.mrb[56].mxu0  ;;  %8055 = vpow2.f32 %v2412_v31 }
 0x183   : > { %14191 = vst [vmem:[#allocation116_spill] sm:$0xff] %v9504_v34  ;;  %1489 = vmatmul.mubr.f32.gmra.mrb[162].mxu0 %v509_v27  ;;  %4446 = vrot.lane.b32.xlu1 %v2637_v45, %s8278_s22  ;;  %v1227_v55 = vpop.f32.mrb[57].mxu0  ;;  %v1226_v58 = vadd.f32 %v9475_v18, %v1225_v37  ;;  %v2261_v27 = vmul.f32 0.5, %v9502_v43  ;;  %v2007_v0 = vmax.f32 %v9504_v34, -30.0  ;;  %v9522_v2 = vpop.permute.xlu1 %3250 }
 0x184   : > { %3680 = vrot.lane.b32.xlu0 %v3406_v14, %s8278_s22  ;;  %7647 = vmatprep.mubr.msk.f32.mxu0 %vm634_vm0, %v512_v62  ;;  %v2638_v14 = vmul.f32 %v8044_v41, %v8044_v41  ;;  %14193 = vst [vmem:[#allocation118_spill] sm:$0xff] %v9522_v2  ;;  %v513_v41 = vld [vmem:[%s8383_s12 + $0x530] sm:$0xff]  ;;  %v8050_v37 = vpop.eup %8049  ;;  %v9529_v55 = vmin.f32 %v2006_v52, 20.0  ;;  %v9559_v31 = vpop.permute.xlu0 %3256 }
 0x185   : > { %v9531_v19 = vadd.f32 %v1752_v13, %v1226_v58  ;;  %v9540_v2 = vmin.f32 %v2007_v0, 20.0  ;;  %v515_v58 = vld [vmem:[%s8383_s12 + $0x540] sm:$0xff]  ;;  %14198 = vst [vmem:[#allocation123_spill] sm:$0xff] %v9559_v31 }
 0x186   : > { %v1230_v39 = vpop.f32.mrb[58].mxu0 }
 0x187   : > { %1494 = vmatmul.mubr.f32.gmra.mrb[164].mxu0 %v511_v63  ;;  %3682 = vrot.lane.b32.xlu1 %v3407_v46, %s8278_s22  ;;  %v1232_v45 = vpop.f32.mrb[59].mxu0  ;;  %v1231_v62 = vadd.f32 %v9475_v18, %v1230_v39  ;;  %14194 = vst [vmem:[#allocation119_spill] sm:$0xff] %v9531_v19  ;;  %v1753_v63 = vld [vmem:[%s13727_s1 + $0xe8] sm:$0xff]  ;;  %v2639_v46 = vmul.f32 %v8046_v30, %v8046_v30  ;;  %v2008_v13 = vmax.f32 %v9531_v19, -30.0 }
 0x188   : > { %4448 = vrot.lane.b32.xlu0 %v2638_v14, %s8278_s22  ;;  %7648 = vmatprep.mubr.msk.f32.mxu0 %vm634_vm0, %v514_v12  ;;  %v516_v39 = vld [vmem:[%s8383_s12 + $0x548] sm:$0xff]  ;;  %v3408_v14 = vmul.f32 %v8048_v40, %v8721_v3  ;;  %v2414_v12 = vmul.f32 1.442695, %v2261_v27  ;;  %v3409_v30 = vmul.f32 %v8050_v37, %v8726_v6  ;;  %v2262_v3 = vmul.f32 0.5, %v9529_v55  ;;  %v9551_v27 = vpop.permute.xlu1 %3254 }
 0x189   : > { %v9543_v52 = vadd.f32 %v1753_v63, %v1231_v62  ;;  %14197 = vst [vmem:[#allocation122_spill] sm:$0xff] %v9551_v27  ;;  %v1754_v62 = vld [vmem:[%s13727_s1 + $0xf0] sm:$0xff]  ;;  %v2263_v6 = vmul.f32 0.5, %v9540_v2  ;;  %v9567_v10 = vmin.f32 %v2008_v13, 20.0 }
 0x18a   : > { %v1235_v45 = vpop.f32.mrb[60].mxu0  ;;  %8057 = vpow2.f32 %v2414_v12  ;;  %v2416_v12 = vmul.f32 1.442695, %v2262_v3 }
 0x18b   : > { %1499 = vmatmul.mubr.f32.gmra.mrb[166].mxu0 %v513_v41  ;;  %4450 = vrot.lane.b32.xlu1 %v2639_v46, %s8278_s22  ;;  %v1237_v61 = vpop.f32.mrb[61].mxu0  ;;  %14196 = vst [vmem:[#allocation121_spill] sm:$0xff] %v9543_v52  ;;  %v1236_v0 = vadd.f32 %v9475_v18, %v1235_v45  ;;  %v518_v41 = vld [vmem:[%s8383_s12 + $0x558] sm:$0xff]  ;;  %v2640_v46 = vmul.f32 %v8048_v40, %v8048_v40  ;;  %v2009_v45 = vmax.f32 %v9543_v52, -30.0  ;;  %v517_v40 = vld [vmem:[%s8383_s12 + $0x550] sm:$0xff] }
 0x18c   : > { %3684 = vrot.lane.b32.xlu0 %v3408_v14, %s8278_s22  ;;  %7649 = vmatprep.mubr.msk.f32.mxu0 %vm634_vm0, %v516_v39  ;;  %v8052_v39 = vpop.eup %8051  ;;  %8059 = vpow2.f32 %v2416_v12 }
 0x18d   : > { %v8054_v27 = vpop.eup %8053  ;;  %v9569_v19 = vadd.f32 %v1754_v62, %v1236_v0  ;;  %v9579_v13 = vmin.f32 %v2009_v45, 20.0 }
 0x18e   : > { %v1240_v63 = vpop.f32.mrb[62].mxu0  ;;  %v3411_v62 = vmul.f32 %v8054_v27, %v8737_v15 }
 0x18f   : > { %1504 = vmatmul.mubr.f32.gmra.mrb[168].mxu0 %v515_v58  ;;  %3686 = vrot.lane.b32.xlu1 %v3409_v30, %s8278_s22  ;;  %v1242_v14 = vpop.f32.mrb[63].mxu0  ;;  %v1241_v61 = vadd.f32 %v9475_v18, %v1240_v63  ;;  %14199 = vst [vmem:[#allocation124_spill] sm:$0xff] %v9569_v19  ;;  %v1755_v58 = vld [vmem:[%s13727_s1 + $0xf8] sm:$0xff]  ;;  %v2641_v30 = vmul.f32 %v8050_v37, %v8050_v37  ;;  %v519_v37 = vld [vmem:[%s8383_s12 + $0x560] sm:$0xff]  ;;  %v2265_v12 = vmul.f32 0.5, %v9579_v13 }
 0x190   : > { %4452 = vrot.lane.b32.xlu0 %v2640_v46, %s8278_s22  ;;  %7650 = vmatprep.mubr.msk.f32.mxu0 %vm634_vm0, %v518_v41  ;;  %v520_v14 = vld [vmem:[%s8383_s12 + $0x568] sm:$0xff]  ;;  %v3410_v63 = vmul.f32 %v8052_v39, %v8732_v11  ;;  %v2418_v46 = vmul.f32 1.442695, %v2263_v6  ;;  %v9576_v41 = vpop.permute.xlu1 %3258  ;;  %v2264_v11 = vmul.f32 0.5, %v9567_v10  ;;  %v2010_v6 = vmax.f32 %v9569_v19, -30.0 }
 0x191   : > { %14200 = vst [vmem:[#allocation125_spill] sm:$0xff] %v9576_v41  ;;  %v9581_v0 = vadd.f32 %v1755_v58, %v1241_v61  ;;  %v1756_v61 = vld [vmem:[%s13727_s1 + $0x100] sm:$0xff]  ;;  %v521_v41 = vld [vmem:[%s8383_s12 + $0x570] sm:$0xff] }
 0x192   : > { %v1245_v31 = vpop.f32.mrb[64].mxu0  ;;  %8061 = vpow2.f32 %v2418_v46  ;;  %v9603_v19 = vmin.f32 %v2010_v6, 20.0  ;;  %v2422_v6 = vmul.f32 1.442695, %v2265_v12 }
 0x193   : > { %1509 = vmatmul.mubr.f32.gmra.mrb[170].mxu0 %v517_v40  ;;  %4454 = vrot.lane.b32.xlu1 %v2641_v30, %s8278_s22  ;;  %v1247_v3 = vpop.f32.mrb[65].mxu0  ;;  %14201 = vst [vmem:[#allocation126_spill] sm:$0xff] %v9581_v0  ;;  %v9589_v40 = vpop.permute.xlu0 %5180  ;;  %v1246_v45 = vadd.f32 %v9475_v18, %v1245_v31  ;;  %v522_v30 = vld [vmem:[%s8383_s12 + $0x578] sm:$0xff] }
 0x194   : > { %3688 = vrot.lane.b32.xlu0 %v3410_v63, %s8278_s22  ;;  %7651 = vmatprep.mubr.msk.f32.mxu0 %vm634_vm0, %v520_v14  ;;  %14202 = vst [vmem:[#allocation127_spill] sm:$0xff] %v9589_v40  ;;  %v2642_v14 = vmul.f32 %v8052_v39, %v8052_v39  ;;  %v8056_v63 = vpop.eup %8055  ;;  %v2011_v3 = vmax.f32 %v9581_v0, -30.0  ;;  %v2420_v39 = vmul.f32 1.442695, %v2264_v11  ;;  %v9605_v46 = vpop.permute.xlu1 %5182 }
 0x195   : > { %v8058_v40 = vpop.eup %8057  ;;  %14203 = vst [vmem:[#allocation128_spill] sm:$0xff] %v9605_v46 }
 0x196   : > { %v1250_v58 = vpop.f32.mrb[66].mxu0  ;;  %v9617_v46 = vmin.f32 %v2011_v3, 20.0  ;;  %8063 = vpow2.f32 %v2420_v39 }
 0x197   : > { %1514 = vmatmul.mubr.f32.gmra.mrb[172].mxu0 %v519_v37  ;;  %3690 = vrot.lane.b32.xlu1 %v3411_v62, %s8278_s22  ;;  %v1252_v15 = vpop.f32.mrb[67].mxu0  ;;  %v1251_v31 = vadd.f32 %v9475_v18, %v1250_v58  ;;  %v9607_v37 = vadd.f32 %v1756_v61, %v1246_v45  ;;  %v9609_v62 = vpop.permute.xlu0 %5184  ;;  %v1757_v58 = vld [vmem:[%s13727_s1 + $0x108] sm:$0xff]  ;;  %v523_v61 = vld [vmem:[%s8383_s12 + $0x580] sm:$0xff]  ;;  %8065 = vpow2.f32 %v2422_v6  ;;  %v1759_v6 = vld [vmem:[%s13727_s1 + $0x118] sm:$0xff] }
 0x198   : > { %4456 = vrot.lane.b32.xlu0 %v2642_v14, %s8278_s22  ;;  %7652 = vmatprep.mubr.msk.f32.mxu0 %vm634_vm0, %v522_v30  ;;  %14205 = vst [vmem:[#allocation130_spill] sm:$0xff] %v9609_v62  ;;  %v2643_v15 = vmul.f32 %v8054_v27, %v8054_v27  ;;  %v524_v14 = vld [vmem:[%s8383_s12 + $0x588] sm:$0xff]  ;;  %v3412_v30 = vmul.f32 %v8056_v63, %v8743_v20  ;;  %v2266_v20 = vmul.f32 0.5, %v9603_v19 }
 0x199   : > { %14204 = vst [vmem:[#allocation129_spill] sm:$0xff] %v9607_v37  ;;  %v9619_v45 = vadd.f32 %v1757_v58, %v1251_v31  ;;  %v3413_v27 = vmul.f32 %v8058_v40, %v8748_v24  ;;  %v9627_v62 = vpop.permute.xlu1 %5186  ;;  %v526_v31 = vld [vmem:[%s8383_s12 + $0x598] sm:$0xff]  ;;  %v1758_v58 = vld [vmem:[%s13727_s1 + $0x110] sm:$0xff]  ;;  %v8060_v24 = vpop.eup %8059 }
 0x19a   : > { %v1255_v0 = vpop.f32.mrb[68].mxu0  ;;  %14207 = vst [vmem:[#allocation132_spill] sm:$0xff] %v9627_v62 }
 0x19b   : > { %1519 = vmatmul.mubr.f32.gmra.mrb[174].mxu0 %v521_v41  ;;  %4458 = vrot.lane.b32.xlu1 %v2643_v15, %s8278_s22  ;;  %v1257_v11 = vpop.f32.mrb[69].mxu0  ;;  %14206 = vst [vmem:[#allocation131_spill] sm:$0xff] %v9619_v45  ;;  %v2012_v41 = vmax.f32 %v9607_v37, -30.0  ;;  %v1256_v12 = vadd.f32 %v9475_v18, %v1255_v0  ;;  %v2013_v0 = vmax.f32 %v9619_v45, -30.0 }
 0x19c   : > { %3692 = vrot.lane.b32.xlu0 %v3412_v30, %s8278_s22  ;;  %7653 = vmatprep.mubr.msk.f32.mxu0 %vm634_vm0, %v524_v14  ;;  %v2644_v14 = vmul.f32 %v8056_v63, %v8056_v63  ;;  %v2267_v30 = vmul.f32 0.5, %v9617_v46  ;;  %v8062_v62 = vpop.eup %8061  ;;  %v2424_v63 = vmul.f32 1.442695, %v2266_v20 }
 0x19d   : > { %v9630_v3 = vpop.permute.xlu0 %5188  ;;  %v9643_v37 = vmin.f32 %v2012_v41, 20.0 }
 0x19e   : > { %14208 = vst [vmem:[#allocation133_spill] sm:$0xff] %v9630_v3  ;;  %v1260_v15 = vpop.f32.mrb[70].mxu0  ;;  %v525_v3 = vld [vmem:[%s8383_s12 + $0x590] sm:$0xff]  ;;  %8067 = vpow2.f32 %v2424_v63  ;;  %v14213_v63 = vmov 0.0  }
 0x19f   : > { %1524 = vmatmul.mubr.f32.gmra.mrb[176].mxu0 %v523_v61  ;;  %3694 = vrot.lane.b32.xlu1 %v3413_v27, %s8278_s22  ;;  %v1262_v39 = vpop.f32.mrb[71].mxu0  ;;  %v1261_v11 = vadd.f32 %v9475_v18, %v1260_v15  ;;  %v9645_v61 = vadd.f32 %v1758_v58, %v1256_v12  ;;  %v528_v15 = vld [vmem:[%s8383_s12 + $0x5a8] sm:$0xff]  ;;  %v2426_v12 = vmul.f32 1.442695, %v2267_v30  ;;  %v9656_v58 = vmin.f32 %v2013_v0, 20.0  ;;  %v530_v0 = vld [vmem:[%s8383_s12 + $0x5b8] sm:$0xff] }
 0x1a0   : > { %4460 = vrot.lane.b32.xlu0 %v2644_v14, %s8278_s22  ;;  %7654 = vmatprep.mubr.msk.f32.mxu0 %vm634_vm0, %v526_v31  ;;  %v2645_v39 = vmul.f32 %v8058_v40, %v8058_v40  ;;  %v3414_v31 = vmul.f32 %v8060_v24, %v8754_v29  ;;  %v527_v40 = vld [vmem:[%s8383_s12 + $0x5a0] sm:$0xff]  ;;  %v3415_v29 = vmul.f32 %v8062_v62, %v8759_v33 }
 0x1a1   : > { %14209 = vst [vmem:[#allocation134_spill] sm:$0xff] %v9645_v61  ;;  %v9650_v27 = vpop.permute.xlu1 %5190  ;;  %v9658_v52 = vadd.f32 %v1759_v6, %v1261_v11  ;;  %v1760_v11 = vld [vmem:[%s13727_s1 + $0x120] sm:$0xff]  ;;  %8069 = vpow2.f32 %v2426_v12  ;;  %v532_v12 = vld [vmem:[%s8383_s12 + $0x5c8] sm:$0xff] }
 0x1a2   : > { %14210 = vst [vmem:[#allocation135_spill] sm:$0xff] %v9650_v27  ;;  %v3645_v45 = vpop.permute.xlu0 %3644  ;;  %v1265_v14 = vpop.f32.mrb[72].mxu0 }
 0x1a3   : > { %v4028_v20 = vadd.f32 %v3645_v45, %v9010_v17  ;;  %1529 = vmatmul.mubr.f32.gmra.mrb[178].mxu0 %v525_v3  ;;  %4462 = vrot.lane.b32.xlu1 %v2645_v39, %s8278_s22  ;;  %v1267_v41 = vpop.f32.mrb[73].mxu0  ;;  %14211 = vst [vmem:[#allocation136_spill] sm:$0xff] %v9658_v52  ;;  %v2268_v45 = vmul.f32 0.5, %v9643_v37  ;;  %v2014_v3 = vmax.f32 %v9645_v61, -30.0  ;;  %v1266_v39 = vadd.f32 %v9475_v18, %v1265_v14 }
 0x1a4   : > { %3696 = vrot.lane.b32.xlu0 %v3414_v31, %s8278_s22  ;;  %7655 = vmatprep.mubr.msk.f32.mxu0 %vm634_vm0, %v528_v15  ;;  %v2646_v31 = vmul.f32 %v8060_v24, %v8060_v24  ;;  %v8064_v41 = vpop.eup %8063  ;;  %v2015_v27 = vmax.f32 %v9658_v52, -30.0 }
 0x1a5   : > { %7821 = vmatmul.mubr.msk.f32.vlgmr.msra.gmra.mrb[0].mxu1 %vm5692_vm1, %v4028_v20  ;;  %v3647_v30 = vpop.permute.xlu1 %3646  ;;  %v2269_v20 = vmul.f32 0.5, %v9656_v58  ;;  %v9684_v24 = vadd.f32 %v1760_v11, %v1266_v39 }
 0x1a6   : > { %v4029_v6 = vadd.f32 %v3647_v30, %v9024_v57  ;;  %v9673_v15 = vpop.permute.xlu0 %4412  ;;  %v1270_v33 = vpop.f32.mrb[74].mxu0  ;;  %6430 = vmatprep.mubr.f32.mxu1 %v14213_v63  ;;  %v529_v30 = vld [vmem:[%s8383_s12 + $0x5b0] sm:$0xff]  ;;  %v9682_v57 = vmin.f32 %v2014_v3, 20.0 }
 0x1a7   : > { %14212 = vst [vmem:[#allocation137_spill] sm:$0xff] %v9673_v15  ;;  %1534 = vmatmul.mubr.f32.gmra.mrb[180].mxu0 %v527_v40  ;;  %3698 = vrot.lane.b32.xlu1 %v3415_v29, %s8278_s22  ;;  %v1272_v14 = vpop.f32.mrb[75].mxu0  ;;  %v2428_v15 = vmul.f32 1.442695, %v2268_v45  ;;  %14214 = vst [vmem:[#allocation138_spill] sm:$0xff] %v9684_v24  ;;  %v2647_v29 = vmul.f32 %v8062_v62, %v8062_v62  ;;  %v1271_v45 = vadd.f32 %v9475_v18, %v1270_v33  ;;  %v1761_v62 = vld [vmem:[%s13727_s1 + $0x128] sm:$0xff] }
 0x1a8   : > { %4464 = vrot.lane.b32.xlu0 %v2646_v31, %s8278_s22  ;;  %7656 = vmatprep.mubr.msk.f32.mxu0 %vm634_vm0, %v530_v0  ;;  %v8066_v14 = vpop.eup %8065  ;;  %v3416_v31 = vmul.f32 %v8064_v41, %v8765_v38  ;;  %v2430_v39 = vmul.f32 1.442695, %v2269_v20  ;;  %v9696_v0 = vmin.f32 %v2015_v27, 20.0  ;;  %v531_v38 = vld [vmem:[%s8383_s12 + $0x5c0] sm:$0xff]  ;;  %v2270_v11 = vmul.f32 0.5, %v9682_v57  ;;  %v534_v20 = vld [vmem:[%s8383_s12 + $0x5d8] sm:$0xff] }
 0x1a9   : > { %7822 = vmatmul.mubr.msk.f32.gmra.mrb[2].mxu1 %vm5692_vm1, %v4029_v6  ;;  %v9687_v40 = vpop.permute.xlu1 %4414  ;;  %8071 = vpow2.f32 %v2428_v15  ;;  %v2016_v6 = vmax.f32 %v9684_v24, -30.0  ;;  %v3417_v27 = vmul.f32 %v8066_v14, %v8770_v42  ;;  %v533_v42 = vld [vmem:[%s8383_s12 + $0x5d0] sm:$0xff] }
 0x1aa   : > { %14215 = vst [vmem:[#allocation139_spill] sm:$0xff] %v9687_v40  ;;  %v9690_v17 = vpop.permute.xlu0 %5192  ;;  %v1275_v52 = vpop.f32.mrb[76].mxu0  ;;  %6436 = vmatprep.mubr.f32.mxu1 %v14213_v63  ;;  %v9710_v40 = vadd.f32 %v1761_v62, %v1271_v45  ;;  %8073 = vpow2.f32 %v2430_v39  ;;  %v1762_v39 = vld [vmem:[%s13727_s1 + $0x130] sm:$0xff] }
 0x1ab   : > { %14216 = vst [vmem:[#allocation140_spill] sm:$0xff] %v9690_v17  ;;  %1539 = vmatmul.mubr.f32.gmra.mrb[182].mxu0 %v529_v30  ;;  %4466 = vrot.lane.b32.xlu1 %v2647_v29, %s8278_s22  ;;  %v1277_v3 = vpop.f32.mrb[77].mxu0  ;;  %v8068_v17 = vpop.eup %8067  ;;  %v1276_v45 = vadd.f32 %v9475_v18, %v1275_v52 }
 0x1ac   : > { %3700 = vrot.lane.b32.xlu0 %v3416_v31, %s8278_s22  ;;  %7657 = vmatprep.mubr.msk.f32.mxu0 %vm634_vm0, %v532_v12  ;;  %v2648_v3 = vmul.f32 %v8064_v41, %v8064_v41  ;;  %14218 = vst [vmem:[#allocation142_spill] sm:$0xff] %v9710_v40  ;;  %v2271_v31 = vmul.f32 0.5, %v9696_v0  ;;  %v9718_v41 = vmin.f32 %v2016_v6, 20.0  ;;  %v3418_v6 = vmul.f32 %v8068_v17, %v8776_v47 }
 0x1ad   : > { %v9706_v33 = vpop.permute.xlu1 %5194  ;;  %v2017_v52 = vmax.f32 %v9710_v40, -30.0 }
 0x1ae   : > { %14217 = vst [vmem:[#allocation141_spill] sm:$0xff] %v9706_v33  ;;  %v3649_v30 = vpop.permute.xlu0 %3648  ;;  %v1280_v29 = vpop.f32.mrb[78].mxu0  ;;  %v2432_v33 = vmul.f32 1.442695, %v2270_v11 }
 0x1af   : > { %v4030_v12 = vadd.f32 %v3649_v30, %v9039_v4  ;;  %1544 = vmatmul.mubr.f32.gmra.mrb[184].mxu0 %v531_v38  ;;  %3702 = vrot.lane.b32.xlu1 %v3417_v27, %s8278_s22  ;;  %v1282_v15 = vpop.f32.mrb[79].mxu0  ;;  %v2649_v38 = vmul.f32 %v8066_v14, %v8066_v14  ;;  %v536_v27 = vld [vmem:[%s8383_s12 + $0x5e8] sm:$0xff]  ;;  %v8070_v30 = vpop.eup %8069 }
 0x1b0   : > { %4468 = vrot.lane.b32.xlu0 %v2648_v3, %s8278_s22  ;;  %7658 = vmatprep.mubr.msk.f32.mxu0 %vm634_vm0, %v534_v20  ;;  %v535_v15 = vld [vmem:[%s8383_s12 + $0x5e0] sm:$0xff]  ;;  %8075 = vpow2.f32 %v2432_v33  ;;  %v9747_v33 = vmin.f32 %v2017_v52, 20.0 }
 0x1b1   : > { %7823 = vmatmul.mubr.msk.f32.gmra.mrb[4].mxu1 %vm5692_vm1, %v4030_v12  ;;  %v3651_v62 = vpop.permute.xlu1 %3650  ;;  %v2434_v12 = vmul.f32 1.442695, %v2271_v31 }
 0x1b2   : > { %v4031_v3 = vadd.f32 %v3651_v62, %v9066_v21  ;;  %v9727_v20 = vpop.permute.xlu0 %4416  ;;  %v1285_v11 = vpop.f32.mrb[80].mxu0  ;;  %6442 = vmatprep.mubr.f32.mxu1 %v14213_v63  ;;  %v2272_v62 = vmul.f32 0.5, %v9718_v41 }
 0x1b3   : > { %14219 = vst [vmem:[#allocation143_spill] sm:$0xff] %v9727_v20  ;;  %1549 = vmatmul.mubr.f32.gmra.mrb[186].mxu0 %v533_v42  ;;  %4470 = vrot.lane.b32.xlu1 %v2649_v38, %s8278_s22  ;;  %v1287_v14 = vpop.f32.mrb[81].mxu0  ;;  %v9737_v20 = vadd.f32 %v1762_v39, %v1276_v45  ;;  %v3419_v42 = vmul.f32 %v8070_v30, %v8781_v51  ;;  %v538_v38 = vld [vmem:[%s8383_s12 + $0x5f8] sm:$0xff]  ;;  %8077 = vpow2.f32 %v2434_v12 }
 0x1b4   : > { %3704 = vrot.lane.b32.xlu0 %v3418_v6, %s8278_s22  ;;  %7659 = vmatprep.mubr.msk.f32.mxu0 %vm634_vm0, %v536_v27  ;;  %v2650_v6 = vmul.f32 %v8068_v17, %v8068_v17  ;;  %v8072_v27 = vpop.eup %8071  ;;  %v1281_v45 = vadd.f32 %v9475_v18, %v1280_v29  ;;  %v1763_v51 = vld [vmem:[%s13727_s1 + $0x138] sm:$0xff]  ;;  %v537_v17 = vld [vmem:[%s8383_s12 + $0x5f0] sm:$0xff] }
 0x1b5   : > { %14220 = vst [vmem:[#allocation144_spill] sm:$0xff] %v9737_v20  ;;  %7824 = vmatmul.mubr.msk.f32.gmra.mrb[6].mxu1 %vm5692_vm1, %v4031_v3  ;;  %v9740_v47 = vpop.permute.xlu1 %4418  ;;  %v2436_v3 = vmul.f32 1.442695, %v2272_v62  ;;  %v2018_v52 = vmax.f32 %v9737_v20, -30.0  ;;  %v8074_v12 = vpop.eup %8073  ;;  %v2273_v62 = vmul.f32 0.5, %v9747_v33 }
 0x1b6   : > { %14221 = vst [vmem:[#allocation145_spill] sm:$0xff] %v9740_v47  ;;  %v9744_v14 = vpop.permute.xlu0 %5196  ;;  %v1290_v31 = vpop.f32.mrb[82].mxu0  ;;  %6448 = vmatprep.mubr.f32.mxu1 %v14213_v63  ;;  %v9767_v21 = vadd.f32 %v1763_v51, %v1281_v45  ;;  %v3421_v51 = vmul.f32 %v8074_v12, %v8792_v60 }
 0x1b7   : > { %14222 = vst [vmem:[#allocation146_spill] sm:$0xff] %v9744_v14  ;;  %1554 = vmatmul.mubr.f32.gmra.mrb[188].mxu0 %v535_v15  ;;  %3706 = vrot.lane.b32.xlu1 %v3419_v42, %s8278_s22  ;;  %v1292_v39 = vpop.f32.mrb[83].mxu0  ;;  %v1286_v14 = vadd.f32 %v9475_v18, %v1285_v11  ;;  %v2651_v15 = vmul.f32 %v8070_v30, %v8070_v30  ;;  %v540_v42 = vld [vmem:[%s8383_s12 + $0x608] sm:$0xff]  ;;  %8079 = vpow2.f32 %v2436_v3  ;;  %v9774_v4 = vmin.f32 %v2018_v52, 20.0 }
 0x1b8   : > { %4472 = vrot.lane.b32.xlu0 %v2650_v6, %s8278_s22  ;;  %7660 = vmatprep.mubr.msk.f32.mxu0 %vm634_vm0, %v538_v38  ;;  %v1764_v39 = vld [vmem:[%s13727_s1 + $0x140] sm:$0xff]  ;;  %v3420_v38 = vmul.f32 %v8072_v27, %v8787_v56  ;;  %14224 = vst [vmem:[#allocation148_spill] sm:$0xff] %v9767_v21  ;;  %v2438_v52 = vmul.f32 1.442695, %v2273_v62  ;;  %v1291_v60 = vadd.f32 %v9475_v18, %v1290_v31  ;;  %v1765_v62 = vld [vmem:[%s13727_s1 + $0x148] sm:$0xff] }
 0x1b9   : > { %v9759_v29 = vpop.permute.xlu1 %5198  ;;  %v9776_v56 = vadd.f32 %v1764_v39, %v1286_v14  ;;  %v2019_v14 = vmax.f32 %v9767_v21, -30.0  ;;  %v541_v39 = vld [vmem:[%s8383_s12 + $0x610] sm:$0xff]  ;;  %v2653_v31 = vmul.f32 %v8074_v12, %v8074_v12 }
 0x1ba   : > { %14223 = vst [vmem:[#allocation147_spill] sm:$0xff] %v9759_v29  ;;  %v3653_v47 = vpop.permute.xlu0 %3652  ;;  %v1295_v6 = vpop.f32.mrb[84].mxu0  ;;  %v539_v29 = vld [vmem:[%s8383_s12 + $0x600] sm:$0xff]  ;;  %8081 = vpow2.f32 %v2438_v52 }
 0x1bb   : > { %v4032_v11 = vadd.f32 %v3653_v47, %v9081_v36  ;;  %1559 = vmatmul.mubr.f32.gmra.mrb[190].mxu0 %v537_v17  ;;  %4474 = vrot.lane.b32.xlu1 %v2651_v15, %s8278_s22  ;;  %v1297_v30 = vpop.f32.mrb[85].mxu0  ;;  %14225 = vst [vmem:[#allocation149_spill] sm:$0xff] %v9776_v56  ;;  %v542_v47 = vld [vmem:[%s8383_s12 + $0x618] sm:$0xff]  ;;  %v8076_v3 = vpop.eup %8075 }
 0x1bc   : > { %3708 = vrot.lane.b32.xlu0 %v3420_v38, %s8278_s22  ;;  %7661 = vmatprep.mubr.msk.f32.mxu0 %vm634_vm0, %v540_v42  ;;  %v2652_v30 = vmul.f32 %v8072_v27, %v8072_v27  ;;  %v2274_v27 = vmul.f32 0.5, %v9774_v4 }
 0x1bd   : > { %7825 = vmatmul.mubr.msk.f32.gmra.mrb[8].mxu1 %vm5692_vm1, %v4032_v11  ;;  %v3655_v45 = vpop.permute.xlu1 %3654  ;;  %v2020_v11 = vmax.f32 %v9776_v56, -30.0 }
 0x1be   : > { %v4033_v17 = vadd.f32 %v3655_v45, %v9097_v23  ;;  %v9782_v15 = vpop.permute.xlu0 %4420  ;;  %v1300_v38 = vpop.f32.mrb[86].mxu0  ;;  %6454 = vmatprep.mubr.f32.mxu1 %v14213_v63  ;;  %v3422_v23 = vmul.f32 %v8076_v3, %v8798_v1 }
 0x1bf   : > { %14226 = vst [vmem:[#allocation150_spill] sm:$0xff] %v9782_v15  ;;  %1564 = vmatmul.mubr.f32.gmra.mrb[192].mxu0 %v539_v29  ;;  %3710 = vrot.lane.b32.xlu1 %v3421_v51, %s8278_s22  ;;  %v1302_v42 = vpop.f32.mrb[87].mxu0  ;;  %v1296_v29 = vadd.f32 %v9475_v18, %v1295_v6  ;;  %v544_v51 = vld [vmem:[%s8383_s12 + $0x628] sm:$0xff]  ;;  %v9808_v6 = vmin.f32 %v2019_v14, 20.0  ;;  %v9816_v36 = vmin.f32 %v2020_v11, 20.0  ;;  %v546_v14 = vld [vmem:[%s8383_s12 + $0x638] sm:$0xff] }
 0x1c0   : > { %4476 = vrot.lane.b32.xlu0 %v2652_v30, %s8278_s22  ;;  %7662 = vmatprep.mubr.msk.f32.mxu0 %vm634_vm0, %v542_v47  ;;  %v8078_v30 = vpop.eup %8077  ;;  %v1766_v47 = vld [vmem:[%s13727_s1 + $0x150] sm:$0xff] }
 0x1c1   : > { %7826 = vmatmul.mubr.msk.f32.gmra.mrb[10].mxu1 %vm5692_vm1, %v4033_v17  ;;  %v9798_v45 = vpop.permute.xlu1 %4422  ;;  %v9811_v17 = vadd.f32 %v1765_v62, %v1291_v60  ;;  %v9818_v1 = vadd.f32 %v1766_v47, %v1296_v29  ;;  %v3423_v52 = vmul.f32 %v8078_v30, %v8803_v5  ;;  %v2654_v60 = vmul.f32 %v8076_v3, %v8076_v3  ;;  %v8080_v62 = vpop.eup %8079  ;;  %v545_v5 = vld [vmem:[%s8383_s12 + $0x630] sm:$0xff] }
 0x1c2   : > { %14227 = vst [vmem:[#allocation151_spill] sm:$0xff] %v9798_v45  ;;  %v9804_v42 = vpop.permute.xlu0 %5200  ;;  %v1305_v15 = vpop.f32.mrb[88].mxu0  ;;  %6460 = vmatprep.mubr.f32.mxu1 %v14213_v63  ;;  %v2440_v45 = vmul.f32 1.442695, %v2274_v27  ;;  %v1301_v29 = vadd.f32 %v9475_v18, %v1300_v38  ;;  %v2655_v3 = vmul.f32 %v8078_v30, %v8078_v30  ;;  %v2276_v47 = vmul.f32 0.5, %v9816_v36  ;;  %v1768_v30 = vld [vmem:[%s13727_s1 + $0x160] sm:$0xff] }
 0x1c3   : > { %14228 = vst [vmem:[#allocation152_spill] sm:$0xff] %v9804_v42  ;;  %1569 = vmatmul.mubr.f32.gmra.mrb[194].mxu0 %v541_v39  ;;  %4478 = vrot.lane.b32.xlu1 %v2653_v31, %s8278_s22  ;;  %v1307_v12 = vpop.f32.mrb[89].mxu0  ;;  %14229 = vst [vmem:[#allocation153_spill] sm:$0xff] %v9811_v17  ;;  %v543_v42 = vld [vmem:[%s8383_s12 + $0x620] sm:$0xff]  ;;  %v2021_v11 = vmax.f32 %v9811_v17, -30.0 }
 0x1c4   : > { %3712 = vrot.lane.b32.xlu0 %v3422_v23, %s8278_s22  ;;  %7663 = vmatprep.mubr.msk.f32.mxu0 %vm634_vm0, %v544_v51  ;;  %14230 = vst [vmem:[#allocation154_spill] sm:$0xff] %v9818_v1  ;;  %v2275_v23 = vmul.f32 0.5, %v9808_v6  ;;  %8083 = vpow2.f32 %v2440_v45  ;;  %v2022_v12 = vmax.f32 %v9818_v1, -30.0 }
 0x1c5   : > { %v9820_v56 = vpop.permute.xlu1 %5202 }
 0x1c6   : > { %14231 = vst [vmem:[#allocation155_spill] sm:$0xff] %v9820_v56  ;;  %v3657_v39 = vpop.permute.xlu0 %3656  ;;  %v1310_v31 = vpop.f32.mrb[90].mxu0 }
 0x1c7   : > { %v4034_v51 = vadd.f32 %v3657_v39, %v9113_v32  ;;  %1574 = vmatmul.mubr.f32.gmra.mrb[196].mxu0 %v543_v42  ;;  %3714 = vrot.lane.b32.xlu1 %v3423_v52, %s8278_s22  ;;  %v1312_v27 = vpop.f32.mrb[91].mxu0  ;;  %v1767_v42 = vld [vmem:[%s13727_s1 + $0x158] sm:$0xff]  ;;  %v1306_v52 = vadd.f32 %v9475_v18, %v1305_v15  ;;  %v548_v39 = vld [vmem:[%s8383_s12 + $0x648] sm:$0xff]  ;;  %v2442_v15 = vmul.f32 1.442695, %v2275_v23  ;;  %v9849_v32 = vmin.f32 %v2021_v11, 20.0 }
 0x1c8   : > { %4480 = vrot.lane.b32.xlu0 %v2654_v60, %s8278_s22  ;;  %7664 = vmatprep.mubr.msk.f32.mxu0 %vm634_vm0, %v546_v14  ;;  %v14233_v27 = vld [vmem:[#allocation2_spill] sm:$0xff]  ;;  %v9851_v1 = vadd.f32 %v1767_v42, %v1301_v29  ;;  %v550_v11 = vld [vmem:[%s8383_s12 + $0x658] sm:$0xff] }
 0x1c9   : > { %7827 = vmatmul.mubr.msk.f32.gmra.mrb[12].mxu1 %vm5692_vm1, %v4034_v51  ;;  %v3659_v38 = vpop.permute.xlu1 %3658  ;;  %v3424_v56 = vmul.f32 %v8080_v62, %v14233_v27  ;;  %v9856_v27 = vmin.f32 %v2022_v12, 20.0  ;;  %v9858_v17 = vadd.f32 %v1768_v30, %v1306_v52  ;;  %8085 = vpow2.f32 %v2442_v15  ;;  %v14239_v30 = vld [vmem:[#allocation3_spill] sm:$0xff] }
 0x1ca   : > { %v4035_v45 = vadd.f32 %v3659_v38, %v9128_v8  ;;  %v9844_v14 = vpop.permute.xlu0 %4424  ;;  %v1315_v60 = vpop.f32.mrb[92].mxu0  ;;  %6466 = vmatprep.mubr.f32.mxu1 %v14213_v63  ;;  %14234 = vst [vmem:[#allocation2_spill] sm:$0xff] %v9851_v1  ;;  %v547_v38 = vld [vmem:[%s8383_s12 + $0x640] sm:$0xff]  ;;  %v2444_v8 = vmul.f32 1.442695, %v2276_v47  ;;  %v2277_v12 = vmul.f32 0.5, %v9849_v32 }
 0x1cb   : > { %14232 = vst [vmem:[#allocation156_spill] sm:$0xff] %v9844_v14  ;;  %1579 = vmatmul.mubr.f32.gmra.mrb[198].mxu0 %v545_v5  ;;  %4482 = vrot.lane.b32.xlu1 %v2655_v3, %s8278_s22  ;;  %v1317_v51 = vpop.f32.mrb[93].mxu0  ;;  %v8082_v14 = vpop.eup %8081  ;;  %14235 = vst [vmem:[#allocation157_spill] sm:$0xff] %v9856_v27  ;;  %v2656_v3 = vmul.f32 %v8080_v62, %v8080_v62  ;;  %v2023_v52 = vmax.f32 %v9851_v1, -30.0  ;;  %v549_v62 = vld [vmem:[%s8383_s12 + $0x650] sm:$0xff]  ;;  %v2278_v15 = vmul.f32 0.5, %v9856_v27 }
 0x1cc   : > { %3716 = vrot.lane.b32.xlu0 %v3424_v56, %s8278_s22  ;;  %7665 = vmatprep.mubr.msk.f32.mxu0 %vm634_vm0, %v548_v39  ;;  %14236 = vst [vmem:[#allocation158_spill] sm:$0xff] %v9858_v17  ;;  %v14238_v56 = vld [vmem:[#allocation64_spill] sm:$0xff]  ;;  %v1311_v39 = vadd.f32 %v9475_v18, %v1310_v31  ;;  %8087 = vpow2.f32 %v2444_v8  ;;  %v1769_v51 = vld [vmem:[%s13727_s1 + $0x168] sm:$0xff]  ;;  %v14240_v8 = vld [vmem:[#allocation65_spill] sm:$0xff] }
 0x1cd   : > { %7828 = vmatmul.mubr.msk.f32.gmra.mrb[14].mxu1 %vm5692_vm1, %v4035_v45  ;;  %v9861_v23 = vpop.permute.xlu1 %4426  ;;  %v3425_v45 = vmul.f32 %v8082_v14, %v14239_v30 }
 0x1ce   : > { %14237 = vst [vmem:[#allocation159_spill] sm:$0xff] %v9861_v23  ;;  %v3661_v5 = vpop.permute.xlu0 %3660  ;;  %v1320_v29 = vpop.f32.mrb[94].mxu0  ;;  %6472 = vmatprep.mubr.f32.mxu1 %v14213_v63 }
 0x1cf   : > { %v4036_v42 = vadd.f32 %v3661_v5, %v14238_v56  ;;  %1584 = vmatmul.mubr.f32.gmra.mrb[200].mxu0 %v547_v38  ;;  %5206 = vrot.lane.b32.xlu1 %v9265_v50, %s8278_s22  ;;  %v1322_v47 = vpop.f32.mrb[95].mxu0  ;;  %v2024_v50 = vmax.f32 %v9858_v17, -30.0  ;;  %v1316_v38 = vadd.f32 %v9475_v18, %v1315_v60  ;;  %v552_v5 = vld [vmem:[%s8383_s12 + $0x668] sm:$0xff]  ;;  %v9890_v23 = vpop.eup %8083  ;;  %v9893_v56 = vmin.f32 %v2023_v52, 20.0  ;;  %v554_v52 = vld [vmem:[%s8383_s12 + $0x678] sm:$0xff] }
 0x1d0   : > { %4484 = vrot.lane.b32.xlu0 %v2656_v3, %s8278_s22  ;;  %7666 = vmatprep.mubr.msk.f32.mxu0 %vm634_vm0, %v550_v11  ;;  %v1770_v11 = vld [vmem:[%s13727_s1 + $0x170] sm:$0xff]  ;;  %v9895_v17 = vadd.f32 %v1769_v51, %v1311_v39 }
 0x1d1   : > { %7829 = vmatmul.mubr.msk.f32.gmra.mrb[16].mxu1 %vm5692_vm1, %v4036_v42  ;;  %v3663_v31 = vpop.permute.xlu1 %3662  ;;  %v2446_v42 = vmul.f32 1.442695, %v2277_v12  ;;  %v9903_v27 = vadd.f32 %v1770_v11, %v1316_v38  ;;  %v2657_v12 = vmul.f32 %v8082_v14, %v8082_v14  ;;  %v14246_v51 = vld [vmem:[#allocation4_spill] sm:$0xff]  ;;  %v2279_v38 = vmul.f32 0.5, %v9893_v56 }
 0x1d2   : > { %v4037_v3 = vadd.f32 %v3663_v31, %v14240_v8  ;;  %v9887_v47 = vpop.permute.xlu0 %4428  ;;  %v1325_v30 = vpop.f32.mrb[96].mxu0  ;;  %6478 = vmatprep.mubr.f32.mxu1 %v14213_v63  ;;  %14242 = vst [vmem:[#allocation160_spill] sm:$0xff] %v9895_v17  ;;  %v551_v31 = vld [vmem:[%s8383_s12 + $0x660] sm:$0xff]  ;;  %v9901_v8 = vmin.f32 %v2024_v50, 20.0  ;;  %v2025_v14 = vmax.f32 %v9895_v17, -30.0  ;;  %v553_v11 = vld [vmem:[%s8383_s12 + $0x670] sm:$0xff] }
 0x1d3   : > { %14241 = vst [vmem:[#allocation3_spill] sm:$0xff] %v9887_v47  ;;  %1589 = vmatmul.mubr.f32.gmra.mrb[202].mxu0 %v549_v62  ;;  %3718 = vrot.lane.b32.xlu1 %v3425_v45, %s8278_s22  ;;  %v1327_v60 = vpop.f32.mrb[97].mxu0  ;;  %v2448_v47 = vmul.f32 1.442695, %v2278_v15  ;;  %14244 = vst [vmem:[#allocation162_spill] sm:$0xff] %v9903_v27  ;;  %8089 = vpow2.f32 %v2446_v42  ;;  %v1771_v42 = vld [vmem:[%s13727_s1 + $0x178] sm:$0xff] }
 0x1d4   : > { %5204 = vrot.lane.b32.xlu0 %v9259_v22, %s8278_s22  ;;  %7667 = vmatprep.mubr.msk.f32.mxu0 %vm634_vm0, %v552_v5  ;;  %14243 = vst [vmem:[#allocation161_spill] sm:$0xff] %v9901_v8  ;;  %v3426_v22 = vmul.f32 %v9890_v23, %v14246_v51  ;;  %v1321_v5 = vadd.f32 %v9475_v18, %v1320_v29  ;;  %v2280_v60 = vmul.f32 0.5, %v9901_v8 }
 0x1d5   : > { %7830 = vmatmul.mubr.msk.f32.gmra.mrb[18].mxu1 %vm5692_vm1, %v4037_v3  ;;  %v9906_v62 = vpop.permute.xlu1 %4430  ;;  %v9920_v3 = vpop.eup %8085  ;;  %8091 = vpow2.f32 %v2448_v47 }
 0x1d6   : > { %14245 = vst [vmem:[#allocation163_spill] sm:$0xff] %v9906_v62  ;;  %v3665_v39 = vpop.permute.xlu0 %3664  ;;  %v1330_v45 = vpop.f32.mrb[98].mxu0  ;;  %6484 = vmatprep.mubr.f32.mxu1 %v14213_v63  ;;  %v2452_v8 = vmul.f32 1.442695, %v2280_v60 }
 0x1d7   : > { %v4038_v15 = vadd.f32 %v3665_v39, %v9193_v53  ;;  %1594 = vmatmul.mubr.f32.gmra.mrb[204].mxu0 %v551_v31  ;;  %4486 = vrot.lane.b32.xlu1 %v2657_v12, %s8278_s22  ;;  %v1332_v50 = vpop.f32.mrb[99].mxu0  ;;  %v2026_v31 = vmax.f32 %v9903_v27, -30.0  ;;  %v1326_v12 = vadd.f32 %v9475_v18, %v1325_v30  ;;  %v556_v39 = vld [vmem:[%s8383_s12 + $0x688] sm:$0xff]  ;;  %v2450_v30 = vmul.f32 1.442695, %v2279_v38  ;;  %v14254_v38 = vld [vmem:[#allocation5_spill] sm:$0xff] }
 0x1d8   : > { %3720 = vrot.lane.b32.xlu0 %v3426_v22, %s8278_s22  ;;  %7668 = vmatprep.mubr.msk.f32.mxu0 %vm634_vm0, %v554_v52  ;;  %v1772_v52 = vld [vmem:[%s13727_s1 + $0x180] sm:$0xff]  ;;  %v9936_v22 = vpop.eup %8087  ;;  %v14248_v50 = vld [vmem:[#allocation71_spill] sm:$0xff]  ;;  %v9943_v53 = vadd.f32 %v1771_v42, %v1321_v5  ;;  %v558_v5 = vld [vmem:[%s8383_s12 + $0x698] sm:$0xff] }
 0x1d9   : > { %7831 = vmatmul.mubr.msk.f32.gmra.mrb[20].mxu1 %vm5692_vm1, %v4038_v15  ;;  %v3667_v29 = vpop.permute.xlu1 %3666  ;;  %v9941_v15 = vmin.f32 %v2025_v14, 20.0  ;;  %v9949_v27 = vmin.f32 %v2026_v31, 20.0  ;;  %v3427_v14 = vmul.f32 %v9920_v3, %v14254_v38  ;;  %8093 = vpow2.f32 %v2450_v30 }
 0x1da   : > { %v9933_v47 = vpop.permute.xlu0 %4432  ;;  %v1335_v51 = vpop.f32.mrb[100].mxu0  ;;  %6490 = vmatprep.mubr.f32.mxu1 %v14213_v63  ;;  %v4039_v62 = vadd.f32 %v3667_v29, %v14248_v50  ;;  %14250 = vst [vmem:[#allocation165_spill] sm:$0xff] %v9943_v53  ;;  %v9951_v29 = vadd.f32 %v1772_v52, %v1326_v12  ;;  %v2027_v12 = vmax.f32 %v9943_v53, -30.0  ;;  %v9969_v52 = vld [vmem:[%s13730_s4] ss:$0 sm:$0xff]  ;;  %8095 = vpow2.f32 %v2452_v8  ;;  %v1774_v8 = vld [vmem:[%s13727_s1 + $0x190] sm:$0xff] }
 0x1db   : > { %14247 = vst [vmem:[#allocation4_spill] sm:$0xff] %v9933_v47  ;;  %1599 = vmatmul.mubr.f32.gmra.mrb[206].mxu0 %v553_v11  ;;  %5210 = vrot.lane.b32.xlu1 %v9305_v26, %s8278_s22  ;;  %v1337_v18 = vpop.f32.mrb[101].mxu0  ;;  %14249 = vst [vmem:[#allocation164_spill] sm:$0xff] %v9941_v15  ;;  %v555_v47 = vld [vmem:[%s8383_s12 + $0x680] sm:$0xff]  ;;  %v2281_v31 = vmul.f32 0.5, %v9941_v15  ;;  %v2282_v38 = vmul.f32 0.5, %v9949_v27 }
 0x1dc   : > { %5208 = vrot.lane.b32.xlu0 %v9299_v54, %s8278_s22  ;;  %7669 = vmatprep.mubr.msk.f32.mxu0 %vm634_vm0, %v556_v39  ;;  %14251 = vst [vmem:[#allocation166_spill] sm:$0xff] %v9949_v27  ;;  %14252 = vst [vmem:[#allocation167_spill] sm:$0xff] %v9951_v29  ;;  %v14255_v54 = vld [vmem:[#allocation6_spill] sm:$0xff]  ;;  %v1331_v18 = vadd.f32 %v9969_v52, %v1330_v45  ;;  %v2028_v30 = vmax.f32 %v9951_v29, -30.0  ;;  %v560_v45 = vld [vmem:[%s8383_s12 + $0x6a8] sm:$0xff]  ;;  %v9996_v27 = vmin.f32 %v2027_v12, 20.0 }
 0x1dd   : > { %7832 = vmatmul.mubr.msk.f32.gmra.mrb[22].mxu1 %vm5692_vm1, %v4039_v62  ;;  %v9954_v26 = vpop.permute.xlu1 %4434  ;;  %v3428_v39 = vmul.f32 %v9936_v22, %v14255_v54  ;;  %v2454_v50 = vmul.f32 1.442695, %v2281_v31  ;;  %v2456_v29 = vmul.f32 1.442695, %v2282_v38  ;;  %v14263_v31 = vld [vmem:[#allocation7_spill] sm:$0xff]  ;;  %v14265_v38 = vld [vmem:[#allocation82_spill] sm:$0xff] }
 0x1de   : > { %14253 = vst [vmem:[#allocation168_spill] sm:$0xff] %v9954_v26  ;;  %v3669_v11 = vpop.permute.xlu0 %3668  ;;  %v1340_v42 = vpop.f32.mrb[102].mxu0  ;;  %6496 = vmatprep.mubr.f32.mxu1 %v14213_v63  ;;  %v14257_v26 = vld [vmem:[#allocation77_spill] sm:$0xff]  ;;  %14258 = vst [vmem:[#allocation6_spill] sm:$0xff] %v9996_v27  ;;  %v10004_v53 = vmin.f32 %v2028_v30, 20.0 }
 0x1df   : > { %v4040_v60 = vadd.f32 %v3669_v11, %v9226_v35  ;;  %1604 = vmatmul.mubr.f32.gmra.mrb[208].mxu0 %v555_v47  ;;  %3722 = vrot.lane.b32.xlu1 %v3427_v14, %s8278_s22  ;;  %v1342_v62 = vpop.f32.mrb[103].mxu0  ;;  %v557_v47 = vld [vmem:[%s8383_s12 + $0x690] sm:$0xff]  ;;  %v1773_v14 = vld [vmem:[%s13727_s1 + $0x188] sm:$0xff]  ;;  %v1336_v11 = vadd.f32 %v9969_v52, %v1335_v51  ;;  %8097 = vpow2.f32 %v2454_v50  ;;  %v1775_v50 = vld [vmem:[%s13727_s1 + $0x198] sm:$0xff] }
 0x1e0   : > { %3724 = vrot.lane.b32.xlu0 %v3428_v39, %s8278_s22  ;;  %7670 = vmatprep.mubr.msk.f32.mxu0 %vm634_vm0, %v558_v5  ;;  %v9983_v39 = vpop.eup %8089  ;;  %v9998_v15 = vadd.f32 %v1773_v14, %v1331_v18  ;;  %14260 = vst [vmem:[#allocation170_spill] sm:$0xff] %v10004_v53  ;;  %v562_v18 = vld [vmem:[%s8383_s12 + $0x6b8] sm:$0xff]  ;;  %8099 = vpow2.f32 %v2456_v29  ;;  %v1776_v29 = vld [vmem:[%s13727_s1 + $0x1a0] sm:$0xff] }
 0x1e1   : > { %7833 = vmatmul.mubr.msk.f32.gmra.mrb[24].mxu1 %vm5692_vm1, %v4040_v60  ;;  %v3671_v54 = vpop.permute.xlu1 %3670  ;;  %v9991_v35 = vpop.eup %8091  ;;  %v3429_v12 = vmul.f32 %v9983_v39, %v14263_v31  ;;  %v561_v31 = vld [vmem:[%s8383_s12 + $0x6b0] sm:$0xff] }
 0x1e2   : > { %v9988_v5 = vpop.permute.xlu0 %4436  ;;  %v1345_v62 = vpop.f32.mrb[104].mxu0  ;;  %6502 = vmatprep.mubr.f32.mxu1 %v14213_v63  ;;  %v4041_v51 = vadd.f32 %v3671_v54, %v14257_v26  ;;  %14259 = vst [vmem:[#allocation169_spill] sm:$0xff] %v9998_v15  ;;  %v10006_v54 = vadd.f32 %v1774_v8, %v1336_v11  ;;  %v2283_v8 = vmul.f32 0.5, %v9996_v27 }
 0x1e3   : > { %14256 = vst [vmem:[#allocation5_spill] sm:$0xff] %v9988_v5  ;;  %1609 = vmatmul.mubr.f32.gmra.mrb[210].mxu0 %v557_v47  ;;  %5214 = vrot.lane.b32.xlu1 %v9345_v48, %s8278_s22  ;;  %v1347_v60 = vpop.f32.mrb[105].mxu0  ;;  %v559_v5 = vld [vmem:[%s8383_s12 + $0x6a0] sm:$0xff] }
 0x1e4   : > { %5212 = vrot.lane.b32.xlu0 %v9339_v7, %s8278_s22  ;;  %7671 = vmatprep.mubr.msk.f32.mxu0 %vm634_vm0, %v560_v45  ;;  %14261 = vst [vmem:[#allocation171_spill] sm:$0xff] %v10006_v54  ;;  %v14264_v7 = vld [vmem:[#allocation8_spill] sm:$0xff]  ;;  %v1341_v60 = vadd.f32 %v9969_v52, %v1340_v42  ;;  %v564_v42 = vld [vmem:[%s8383_s12 + $0x6c8] sm:$0xff] }
 0x1e5   : > { %7834 = vmatmul.mubr.msk.f32.gmra.mrb[26].mxu1 %vm5692_vm1, %v4041_v51  ;;  %v10009_v48 = vpop.permute.xlu1 %4438  ;;  %v3430_v45 = vmul.f32 %v9991_v35, %v14264_v7  ;;  %v2029_v51 = vmax.f32 %v9998_v15, -30.0 }
 0x1e6   : > { %14262 = vst [vmem:[#allocation172_spill] sm:$0xff] %v10009_v48  ;;  %v3673_v47 = vpop.permute.xlu0 %3672  ;;  %v1350_v14 = vpop.f32.mrb[106].mxu0  ;;  %6508 = vmatprep.mubr.f32.mxu1 %v14213_v63  ;;  %v10048_v27 = vadd.f32 %v1775_v50, %v1341_v60  ;;  %v566_v60 = vld [vmem:[%s8383_s12 + $0x6d8] sm:$0xff] }
 0x1e7   : > { %v4042_v30 = vadd.f32 %v3673_v47, %v14265_v38  ;;  %1614 = vmatmul.mubr.f32.gmra.mrb[212].mxu0 %v559_v5  ;;  %3726 = vrot.lane.b32.xlu1 %v3429_v12, %s8278_s22  ;;  %v1352_v11 = vpop.f32.mrb[107].mxu0  ;;  %v2284_v47 = vmul.f32 0.5, %v10004_v53  ;;  %v2030_v5 = vmax.f32 %v10006_v54, -30.0  ;;  %v1346_v12 = vadd.f32 %v9969_v52, %v1345_v62 }
 0x1e8   : > { %3728 = vrot.lane.b32.xlu0 %v3430_v45, %s8278_s22  ;;  %7672 = vmatprep.mubr.msk.f32.mxu0 %vm634_vm0, %v562_v18  ;;  %v10033_v45 = vpop.eup %8093  ;;  %v14266_v18 = vld [vmem:[#allocation83_spill] sm:$0xff]  ;;  %v10046_v53 = vmin.f32 %v2029_v51, 20.0  ;;  %14269 = vst [vmem:[#allocation173_spill] sm:$0xff] %v10048_v27 }
 0x1e9   : > { %7835 = vmatmul.mubr.msk.f32.gmra.mrb[28].mxu1 %vm5692_vm1, %v4042_v30  ;;  %v3675_v7 = vpop.permute.xlu1 %3674  ;;  %v10042_v26 = vpop.eup %8095  ;;  %v2458_v30 = vmul.f32 1.442695, %v2283_v8  ;;  %v10056_v54 = vadd.f32 %v1776_v29, %v1346_v12  ;;  %v14273_v8 = vld [vmem:[#allocation9_spill] sm:$0xff] }
 0x1ea   : > { %v4043_v11 = vadd.f32 %v3675_v7, %v14266_v18  ;;  %v10039_v48 = vpop.permute.xlu0 %4440  ;;  %v1355_v38 = vpop.f32.mrb[108].mxu0  ;;  %6514 = vmatprep.mubr.f32.mxu1 %v14213_v63  ;;  %14268 = vst [vmem:[#allocation8_spill] sm:$0xff] %v10046_v53  ;;  %v563_v7 = vld [vmem:[%s8383_s12 + $0x6c0] sm:$0xff]  ;;  %v2460_v18 = vmul.f32 1.442695, %v2284_v47  ;;  %v3431_v51 = vmul.f32 %v10033_v45, %v14273_v8  ;;  %v14275_v47 = vld [vmem:[#allocation88_spill] sm:$0xff] }
 0x1eb   : > { %14267 = vst [vmem:[#allocation7_spill] sm:$0xff] %v10039_v48  ;;  %1619 = vmatmul.mubr.f32.gmra.mrb[214].mxu0 %v561_v31  ;;  %5218 = vrot.lane.b32.xlu1 %v9385_v44, %s8278_s22  ;;  %v1357_v62 = vpop.f32.mrb[109].mxu0  ;;  %v10054_v48 = vmin.f32 %v2030_v5, 20.0  ;;  %14271 = vst [vmem:[#allocation175_spill] sm:$0xff] %v10056_v54  ;;  %8101 = vpow2.f32 %v2458_v30  ;;  %v2285_v29 = vmul.f32 0.5, %v10046_v53  ;;  %v565_v8 = vld [vmem:[%s8383_s12 + $0x6d0] sm:$0xff] }
 0x1ec   : > { %5216 = vrot.lane.b32.xlu0 %v9377_v16, %s8278_s22  ;;  %7673 = vmatprep.mubr.msk.f32.mxu0 %vm634_vm0, %v564_v42  ;;  %v14274_v16 = vld [vmem:[#allocation10_spill] sm:$0xff]  ;;  %v1351_v62 = vadd.f32 %v9969_v52, %v1350_v14  ;;  %8103 = vpow2.f32 %v2460_v18  ;;  %v1777_v30 = vld [vmem:[%s13727_s1 + $0x1a8] sm:$0xff]  ;;  %v1778_v18 = vld [vmem:[%s13727_s1 + $0x1b0] sm:$0xff] }
 0x1ed   : > { %14270 = vst [vmem:[#allocation174_spill] sm:$0xff] %v10054_v48  ;;  %7836 = vmatmul.mubr.msk.f32.gmra.mrb[30].mxu1 %vm5692_vm1, %v4043_v11  ;;  %v10059_v44 = vpop.permute.xlu1 %4442  ;;  %v3432_v42 = vmul.f32 %v10042_v26, %v14274_v16  ;;  %v2031_v11 = vmax.f32 %v10048_v27, -30.0  ;;  %v568_v14 = vld [vmem:[%s8383_s12 + $0x6e8] sm:$0xff] }
 0x1ee   : > { %14272 = vst [vmem:[#allocation176_spill] sm:$0xff] %v10059_v44  ;;  %v3677_v31 = vpop.permute.xlu0 %3676  ;;  %v1360_v50 = vpop.f32.mrb[110].mxu0  ;;  %6520 = vmatprep.mubr.f32.mxu1 %v14213_v63 }
 0x1ef   : > { %v4044_v5 = vadd.f32 %v3677_v31, %v14275_v47  ;;  %1624 = vmatmul.mubr.f32.gmra.mrb[216].mxu0 %v563_v7  ;;  %3730 = vrot.lane.b32.xlu1 %v3431_v51, %s8278_s22  ;;  %v1362_v12 = vpop.f32.mrb[111].mxu0  ;;  %v2286_v31 = vmul.f32 0.5, %v10054_v48  ;;  %v2032_v7 = vmax.f32 %v10056_v54, -30.0  ;;  %v1356_v51 = vadd.f32 %v9969_v52, %v1355_v38 }
 0x1f0   : > { %3732 = vrot.lane.b32.xlu0 %v3432_v42, %s8278_s22  ;;  %7674 = vmatprep.mubr.msk.f32.mxu0 %vm634_vm0, %v566_v60  ;;  %v10083_v42 = vpop.eup %8097  ;;  %v14276_v60 = vld [vmem:[#allocation89_spill] sm:$0xff]  ;;  %v10096_v53 = vmin.f32 %v2031_v11, 20.0  ;;  %v10098_v54 = vadd.f32 %v1777_v30, %v1351_v62 }
 0x1f1   : > { %7837 = vmatmul.mubr.msk.f32.gmra.mrb[32].mxu1 %vm5692_vm1, %v4044_v5  ;;  %v3679_v16 = vpop.permute.xlu1 %3678  ;;  %v10092_v48 = vpop.eup %8099  ;;  %v2462_v5 = vmul.f32 1.442695, %v2285_v29  ;;  %v10106_v27 = vadd.f32 %v1778_v18, %v1356_v51  ;;  %v14283_v29 = vld [vmem:[#allocation11_spill] sm:$0xff]  ;;  %v570_v62 = vld [vmem:[%s8383_s12 + $0x6f8] sm:$0xff] }
 0x1f2   : > { %v4045_v12 = vadd.f32 %v3679_v16, %v14276_v60  ;;  %v10089_v44 = vpop.permute.xlu0 %4444  ;;  %v1365_v47 = vpop.f32.mrb[112].mxu0  ;;  %6526 = vmatprep.mubr.f32.mxu1 %v14213_v63  ;;  %14278 = vst [vmem:[#allocation10_spill] sm:$0xff] %v10096_v53  ;;  %14279 = vst [vmem:[#allocation177_spill] sm:$0xff] %v10098_v54  ;;  %v567_v16 = vld [vmem:[%s8383_s12 + $0x6e0] sm:$0xff]  ;;  %v2464_v60 = vmul.f32 1.442695, %v2286_v31  ;;  %v3433_v11 = vmul.f32 %v10083_v42, %v14283_v29 }
 0x1f3   : > { %14277 = vst [vmem:[#allocation9_spill] sm:$0xff] %v10089_v44  ;;  %1629 = vmatmul.mubr.f32.gmra.mrb[218].mxu0 %v565_v8  ;;  %5222 = vrot.lane.b32.xlu1 %v9423_v9, %s8278_s22  ;;  %v1367_v38 = vpop.f32.mrb[113].mxu0  ;;  %v10104_v44 = vmin.f32 %v2032_v7, 20.0  ;;  %14281 = vst [vmem:[#allocation179_spill] sm:$0xff] %v10106_v27  ;;  %v14285_v31 = vld [vmem:[#allocation94_spill] sm:$0xff]  ;;  %8105 = vpow2.f32 %v2462_v5  ;;  %v2287_v18 = vmul.f32 0.5, %v10096_v53 }
 0x1f4   : > { %5220 = vrot.lane.b32.xlu0 %v9415_v59, %s8278_s22  ;;  %7675 = vmatprep.mubr.msk.f32.mxu0 %vm634_vm0, %v568_v14  ;;  %v14284_v59 = vld [vmem:[#allocation12_spill] sm:$0xff]  ;;  %v1361_v38 = vadd.f32 %v9969_v52, %v1360_v50  ;;  %8107 = vpow2.f32 %v2464_v60  ;;  %v1779_v5 = vld [vmem:[%s13727_s1 + $0x1b8] sm:$0xff]  ;;  %v572_v50 = vld [vmem:[%s8383_s12 + $0x708] sm:$0xff] }
 0x1f5   : > { %14280 = vst [vmem:[#allocation178_spill] sm:$0xff] %v10104_v44  ;;  %7838 = vmatmul.mubr.msk.f32.gmra.mrb[34].mxu1 %vm5692_vm1, %v4045_v12  ;;  %v10109_v9 = vpop.permute.xlu1 %4446  ;;  %v3434_v14 = vmul.f32 %v10092_v48, %v14284_v59  ;;  %v2033_v12 = vmax.f32 %v10098_v54, -30.0  ;;  %v569_v29 = vld [vmem:[%s8383_s12 + $0x6f0] sm:$0xff]  ;;  %v1780_v60 = vld [vmem:[%s13727_s1 + $0x1c0] sm:$0xff] }
 0x1f6   : > { %14282 = vst [vmem:[#allocation180_spill] sm:$0xff] %v10109_v9  ;;  %v3681_v8 = vpop.permute.xlu0 %3680  ;;  %v1370_v30 = vpop.f32.mrb[114].mxu0  ;;  %6532 = vmatprep.mubr.f32.mxu1 %v14213_v63 }
 0x1f7   : > { %v4046_v7 = vadd.f32 %v3681_v8, %v14285_v31  ;;  %1634 = vmatmul.mubr.f32.gmra.mrb[220].mxu0 %v567_v16  ;;  %3734 = vrot.lane.b32.xlu1 %v3433_v11, %s8278_s22  ;;  %v1372_v51 = vpop.f32.mrb[115].mxu0  ;;  %v2288_v8 = vmul.f32 0.5, %v10104_v44  ;;  %v2034_v16 = vmax.f32 %v10106_v27, -30.0  ;;  %v1366_v11 = vadd.f32 %v9969_v52, %v1365_v47 }
 0x1f8   : > { %3736 = vrot.lane.b32.xlu0 %v3434_v14, %s8278_s22  ;;  %7676 = vmatprep.mubr.msk.f32.mxu0 %vm634_vm0, %v570_v62  ;;  %v10133_v14 = vpop.eup %8101  ;;  %v14286_v62 = vld [vmem:[#allocation95_spill] sm:$0xff]  ;;  %v10146_v53 = vmin.f32 %v2033_v12, 20.0  ;;  %v10148_v27 = vadd.f32 %v1779_v5, %v1361_v38  ;;  %v574_v38 = vld [vmem:[%s8383_s12 + $0x718] sm:$0xff] }
 0x1f9   : > { %7839 = vmatmul.mubr.msk.f32.gmra.mrb[36].mxu1 %vm5692_vm1, %v4046_v7  ;;  %v3683_v59 = vpop.permute.xlu1 %3682  ;;  %v10142_v44 = vpop.eup %8103  ;;  %v2466_v7 = vmul.f32 1.442695, %v2287_v18  ;;  %v10154_v54 = vmin.f32 %v2034_v16, 20.0  ;;  %v10156_v15 = vadd.f32 %v1780_v60, %v1366_v11  ;;  %v14294_v18 = vld [vmem:[#allocation13_spill] sm:$0xff] }
 0x1fa   : > { %v4047_v51 = vadd.f32 %v3683_v59, %v14286_v62  ;;  %v10139_v9 = vpop.permute.xlu0 %4448  ;;  %v1375_v31 = vpop.f32.mrb[116].mxu0  ;;  %6538 = vmatprep.mubr.f32.mxu1 %v14213_v63  ;;  %14288 = vst [vmem:[#allocation12_spill] sm:$0xff] %v10146_v53  ;;  %14289 = vst [vmem:[#allocation181_spill] sm:$0xff] %v10148_v27  ;;  %v14290_v59 = vld [vmem:[#allocation109_spill] sm:$0xff]  ;;  %v571_v62 = vld [vmem:[%s8383_s12 + $0x700] sm:$0xff]  ;;  %v3435_v12 = vmul.f32 %v10133_v14, %v14294_v18  ;;  %v2289_v60 = vmul.f32 0.5, %v10146_v53 }
 0x1fb   : > { %14287 = vst [vmem:[#allocation11_spill] sm:$0xff] %v10139_v9  ;;  %1639 = vmatmul.mubr.f32.gmra.mrb[222].mxu0 %v569_v29  ;;  %5226 = vrot.lane.b32.xlu1 %v9459_v25, %s8278_s22  ;;  %v1377_v47 = vpop.f32.mrb[117].mxu0  ;;  %v2468_v9 = vmul.f32 1.442695, %v2288_v8  ;;  %14291 = vst [vmem:[#allocation109_spill] sm:$0xff] %v10154_v54  ;;  %v14296_v8 = vld [vmem:[#allocation99_spill] sm:$0xff]  ;;  %8109 = vpow2.f32 %v2466_v7 }
 0x1fc   : > { %5224 = vrot.lane.b32.xlu0 %v14290_v59, %s8278_s22  ;;  %7677 = vmatprep.mubr.msk.f32.mxu0 %vm634_vm0, %v572_v50  ;;  %14292 = vst [vmem:[#allocation182_spill] sm:$0xff] %v10156_v15  ;;  %v14295_v47 = vld [vmem:[#allocation14_spill] sm:$0xff]  ;;  %v1371_v59 = vadd.f32 %v9969_v52, %v1370_v30  ;;  %v573_v18 = vld [vmem:[%s8383_s12 + $0x710] sm:$0xff]  ;;  %v1781_v7 = vld [vmem:[%s13727_s1 + $0x1c8] sm:$0xff] }
 0x1fd   : > { %7840 = vmatmul.mubr.msk.f32.gmra.mrb[38].mxu1 %vm5692_vm1, %v4047_v51  ;;  %v10159_v25 = vpop.permute.xlu1 %4450  ;;  %v3436_v50 = vmul.f32 %v10142_v44, %v14295_v47  ;;  %v2035_v51 = vmax.f32 %v10148_v27, -30.0  ;;  %8111 = vpow2.f32 %v2468_v9  ;;  %v576_v30 = vld [vmem:[%s8383_s12 + $0x728] sm:$0xff]  ;;  %v1782_v9 = vld [vmem:[%s13727_s1 + $0x1d0] sm:$0xff] }
 0x1fe   : > { %14293 = vst [vmem:[#allocation183_spill] sm:$0xff] %v10159_v25  ;;  %v3685_v29 = vpop.permute.xlu0 %3684  ;;  %v1380_v5 = vpop.f32.mrb[118].mxu0  ;;  %6544 = vmatprep.mubr.f32.mxu1 %v14213_v63 }
 0x1ff   : > { %v4048_v16 = vadd.f32 %v3685_v29, %v14296_v8  ;;  %1644 = vmatmul.mubr.f32.gmra.mrb[224].mxu0 %v571_v62  ;;  %3738 = vrot.lane.b32.xlu1 %v3435_v12, %s8278_s22  ;;  %v1382_v11 = vpop.f32.mrb[119].mxu0  ;;  %v2290_v29 = vmul.f32 0.5, %v10154_v54  ;;  %v2036_v62 = vmax.f32 %v10156_v15, -30.0  ;;  %v1376_v12 = vadd.f32 %v9969_v52, %v1375_v31 }
 0x200   : > { %3740 = vrot.lane.b32.xlu0 %v3436_v50, %s8278_s22  ;;  %7678 = vmatprep.mubr.msk.f32.mxu0 %vm634_vm0, %v574_v38  ;;  %v10183_v50 = vpop.eup %8105  ;;  %v14297_v38 = vld [vmem:[#allocation101_spill] sm:$0xff]  ;;  %v10196_v53 = vmin.f32 %v2035_v51, 20.0  ;;  %v10198_v15 = vadd.f32 %v1781_v7, %v1371_v59 }
 0x201   : > { %7841 = vmatmul.mubr.msk.f32.gmra.mrb[40].mxu1 %vm5692_vm1, %v4048_v16  ;;  %v3687_v47 = vpop.permute.xlu1 %3686  ;;  %v10192_v54 = vpop.eup %8107  ;;  %v2470_v16 = vmul.f32 1.442695, %v2289_v60  ;;  %v10206_v27 = vadd.f32 %v1782_v9, %v1376_v12  ;;  %v14304_v60 = vld [vmem:[#allocation15_spill] sm:$0xff]  ;;  %v578_v59 = vld [vmem:[%s8383_s12 + $0x738] sm:$0xff] }
 0x202   : > { %v4049_v11 = vadd.f32 %v3687_v47, %v14297_v38  ;;  %v10189_v25 = vpop.permute.xlu0 %4452  ;;  %v1385_v8 = vpop.f32.mrb[120].mxu0  ;;  %6550 = vmatprep.mubr.f32.mxu1 %v14213_v63  ;;  %14299 = vst [vmem:[#allocation14_spill] sm:$0xff] %v10196_v53  ;;  %14300 = vst [vmem:[#allocation184_spill] sm:$0xff] %v10198_v15  ;;  %v575_v47 = vld [vmem:[%s8383_s12 + $0x720] sm:$0xff]  ;;  %v2472_v38 = vmul.f32 1.442695, %v2290_v29  ;;  %v3437_v51 = vmul.f32 %v10183_v50, %v14304_v60 }
 0x203   : > { %14298 = vst [vmem:[#allocation13_spill] sm:$0xff] %v10189_v25  ;;  %1649 = vmatmul.mubr.f32.gmra.mrb[226].mxu0 %v573_v18  ;;  %5230 = vrot.lane.b32.xlu1 %v9502_v43, %s8278_s22  ;;  %v1387_v31 = vpop.f32.mrb[121].mxu0  ;;  %v10204_v25 = vmin.f32 %v2036_v62, 20.0  ;;  %14302 = vst [vmem:[#allocation186_spill] sm:$0xff] %v10206_v27  ;;  %v14306_v29 = vld [vmem:[#allocation104_spill] sm:$0xff]  ;;  %8113 = vpow2.f32 %v2470_v16  ;;  %v2291_v9 = vmul.f32 0.5, %v10196_v53 }
 0x204   : > { %5228 = vrot.lane.b32.xlu0 %v9494_v49, %s8278_s22  ;;  %7679 = vmatprep.mubr.msk.f32.mxu0 %vm634_vm0, %v576_v30  ;;  %v14305_v49 = vld [vmem:[#allocation16_spill] sm:$0xff]  ;;  %v1381_v31 = vadd.f32 %v9969_v52, %v1380_v5  ;;  %8115 = vpow2.f32 %v2472_v38  ;;  %v1783_v16 = vld [vmem:[%s13727_s1 + $0x1d8] sm:$0xff]  ;;  %v580_v5 = vld [vmem:[%s8383_s12 + $0x748] sm:$0xff] }
 0x205   : > { %14301 = vst [vmem:[#allocation185_spill] sm:$0xff] %v10204_v25  ;;  %7842 = vmatmul.mubr.msk.f32.gmra.mrb[42].mxu1 %vm5692_vm1, %v4049_v11  ;;  %v10209_v43 = vpop.permute.xlu1 %4454  ;;  %v3438_v30 = vmul.f32 %v10192_v54, %v14305_v49  ;;  %v2037_v11 = vmax.f32 %v10198_v15, -30.0  ;;  %v577_v60 = vld [vmem:[%s8383_s12 + $0x730] sm:$0xff]  ;;  %v1784_v38 = vld [vmem:[%s13727_s1 + $0x1e0] sm:$0xff] }
 0x206   : > { %14303 = vst [vmem:[#allocation187_spill] sm:$0xff] %v10209_v43  ;;  %v3689_v18 = vpop.permute.xlu0 %3688  ;;  %v1390_v7 = vpop.f32.mrb[122].mxu0  ;;  %6556 = vmatprep.mubr.f32.mxu1 %v14213_v63 }
 0x207   : > { %v4050_v62 = vadd.f32 %v3689_v18, %v14306_v29  ;;  %1654 = vmatmul.mubr.f32.gmra.mrb[228].mxu0 %v575_v47  ;;  %3742 = vrot.lane.b32.xlu1 %v3437_v51, %s8278_s22  ;;  %v1392_v12 = vpop.f32.mrb[123].mxu0  ;;  %v2292_v18 = vmul.f32 0.5, %v10204_v25  ;;  %v2038_v47 = vmax.f32 %v10206_v27, -30.0  ;;  %v1386_v51 = vadd.f32 %v9969_v52, %v1385_v8 }
 0x208   : > { %3744 = vrot.lane.b32.xlu0 %v3438_v30, %s8278_s22  ;;  %7680 = vmatprep.mubr.msk.f32.mxu0 %vm634_vm0, %v578_v59  ;;  %v10233_v30 = vpop.eup %8109  ;;  %v14307_v59 = vld [vmem:[#allocation106_spill] sm:$0xff]  ;;  %v10246_v53 = vmin.f32 %v2037_v11, 20.0  ;;  %v10248_v27 = vadd.f32 %v1783_v16, %v1381_v31  ;;  %v582_v31 = vld [vmem:[%s8383_s12 + $0x758] sm:$0xff] }
 0x209   : > { %7843 = vmatmul.mubr.msk.f32.gmra.mrb[44].mxu1 %vm5692_vm1, %v4050_v62  ;;  %v3691_v49 = vpop.permute.xlu1 %3690  ;;  %v10242_v25 = vpop.eup %8111  ;;  %v2474_v62 = vmul.f32 1.442695, %v2291_v9  ;;  %v10256_v15 = vadd.f32 %v1784_v38, %v1386_v51  ;;  %v14315_v9 = vld [vmem:[#allocation17_spill] sm:$0xff] }
 0x20a   : > { %v4051_v12 = vadd.f32 %v3691_v49, %v14307_v59  ;;  %v10239_v43 = vpop.permute.xlu0 %4456  ;;  %v1395_v29 = vpop.f32.mrb[124].mxu0  ;;  %6562 = vmatprep.mubr.f32.mxu1 %v14213_v63  ;;  %14309 = vst [vmem:[#allocation16_spill] sm:$0xff] %v10242_v25  ;;  %14310 = vst [vmem:[#allocation188_spill] sm:$0xff] %v10246_v53  ;;  %v579_v49 = vld [vmem:[%s8383_s12 + $0x740] sm:$0xff]  ;;  %v2476_v59 = vmul.f32 1.442695, %v2292_v18  ;;  %v3439_v11 = vmul.f32 %v10233_v30, %v14315_v9 }
 0x20b   : > { %14308 = vst [vmem:[#allocation15_spill] sm:$0xff] %v10239_v43  ;;  %1659 = vmatmul.mubr.f32.gmra.mrb[230].mxu0 %v577_v60  ;;  %5234 = vrot.lane.b32.xlu1 %v9540_v2, %s8278_s22  ;;  %v1397_v8 = vpop.f32.mrb[125].mxu0  ;;  %14311 = vst [vmem:[#allocation189_spill] sm:$0xff] %v10248_v27  ;;  %v10254_v43 = vmin.f32 %v2038_v47, 20.0  ;;  %v14317_v18 = vld [vmem:[#allocation110_spill] sm:$0xff]  ;;  %8117 = vpow2.f32 %v2474_v62  ;;  %v2293_v38 = vmul.f32 0.5, %v10246_v53 }
 0x20c   : > { %5232 = vrot.lane.b32.xlu0 %v9529_v55, %s8278_s22  ;;  %7681 = vmatprep.mubr.msk.f32.mxu0 %vm634_vm0, %v580_v5  ;;  %14313 = vst [vmem:[#allocation191_spill] sm:$0xff] %v10256_v15  ;;  %v14316_v55 = vld [vmem:[#allocation18_spill] sm:$0xff]  ;;  %v1391_v8 = vadd.f32 %v9969_v52, %v1390_v7  ;;  %v581_v9 = vld [vmem:[%s8383_s12 + $0x750] sm:$0xff]  ;;  %8119 = vpow2.f32 %v2476_v59  ;;  %v1785_v62 = vld [vmem:[%s13727_s1 + $0x1e8] sm:$0xff] }
 0x20d   : > { %14312 = vst [vmem:[#allocation190_spill] sm:$0xff] %v10254_v43  ;;  %7844 = vmatmul.mubr.msk.f32.gmra.mrb[46].mxu1 %vm5692_vm1, %v4051_v12  ;;  %v10259_v2 = vpop.permute.xlu1 %4458  ;;  %v3440_v5 = vmul.f32 %v10242_v25, %v14316_v55  ;;  %v2039_v12 = vmax.f32 %v10248_v27, -30.0  ;;  %v584_v7 = vld [vmem:[%s8383_s12 + $0x768] sm:$0xff]  ;;  %v1786_v59 = vld [vmem:[%s13727_s1 + $0x1f0] sm:$0xff] }
 0x20e   : > { %14314 = vst [vmem:[#allocation192_spill] sm:$0xff] %v10259_v2  ;;  %v3693_v60 = vpop.permute.xlu0 %3692  ;;  %v1400_v16 = vpop.f32.mrb[126].mxu0  ;;  %6568 = vmatprep.mubr.f32.mxu1 %v14213_v63 }
 0x20f   : > { %v4052_v47 = vadd.f32 %v3693_v60, %v14317_v18  ;;  %1664 = vmatmul.mubr.f32.gmra.mrb[232].mxu0 %v579_v49  ;;  %3746 = vrot.lane.b32.xlu1 %v3439_v11, %s8278_s22  ;;  %v1402_v51 = vpop.f32.mrb[127].mxu0  ;;  %v2294_v60 = vmul.f32 0.5, %v10254_v43  ;;  %v2040_v49 = vmax.f32 %v10256_v15, -30.0  ;;  %v1396_v11 = vadd.f32 %v9969_v52, %v1395_v29 }
 0x210   : > { %3748 = vrot.lane.b32.xlu0 %v3440_v5, %s8278_s22  ;;  %7682 = vmatprep.mubr.msk.f32.mxu0 %vm634_vm0, %v582_v31  ;;  %v10283_v5 = vpop.eup %8113  ;;  %v14318_v31 = vld [vmem:[#allocation111_spill] sm:$0xff]  ;;  %v10296_v53 = vmin.f32 %v2039_v12, 20.0  ;;  %v10298_v15 = vadd.f32 %v1785_v62, %v1391_v8  ;;  %v586_v8 = vld [vmem:[%s8383_s12 + $0x778] sm:$0xff] }
 0x211   : > { %7845 = vmatmul.mubr.msk.f32.gmra.mrb[48].mxu1 %vm5692_vm1, %v4052_v47  ;;  %v3695_v55 = vpop.permute.xlu1 %3694  ;;  %v10292_v43 = vpop.eup %8115  ;;  %v2478_v47 = vmul.f32 1.442695, %v2293_v38  ;;  %v10306_v25 = vadd.f32 %v1786_v59, %v1396_v11  ;;  %v14325_v38 = vld [vmem:[#allocation19_spill] sm:$0xff] }
 0x212   : > { %v4053_v51 = vadd.f32 %v3695_v55, %v14318_v31  ;;  %v10289_v2 = vpop.permute.xlu0 %4460  ;;  %v1405_v18 = vpop.f32.mrb[128].mxu0  ;;  %6574 = vmatprep.mubr.f32.mxu1 %v14213_v63  ;;  %14320 = vst [vmem:[#allocation18_spill] sm:$0xff] %v10296_v53  ;;  %14321 = vst [vmem:[#allocation193_spill] sm:$0xff] %v10298_v15  ;;  %v583_v55 = vld [vmem:[%s8383_s12 + $0x760] sm:$0xff]  ;;  %v2480_v31 = vmul.f32 1.442695, %v2294_v60  ;;  %v3441_v12 = vmul.f32 %v10283_v5, %v14325_v38 }
 0x213   : > { %14319 = vst [vmem:[#allocation17_spill] sm:$0xff] %v10289_v2  ;;  %1669 = vmatmul.mubr.f32.gmra.mrb[234].mxu0 %v581_v9  ;;  %5238 = vrot.lane.b32.xlu1 %v9579_v13, %s8278_s22  ;;  %v1407_v29 = vpop.f32.mrb[129].mxu0  ;;  %v10304_v2 = vmin.f32 %v2040_v49, 20.0  ;;  %14323 = vst [vmem:[#allocation195_spill] sm:$0xff] %v10306_v25  ;;  %8121 = vpow2.f32 %v2478_v47  ;;  %v2295_v11 = vmul.f32 0.5, %v10296_v53  ;;  %v2041_v59 = vmax.f32 %v10298_v15, -30.0 }
 0x214   : > { %5236 = vrot.lane.b32.xlu0 %v9567_v10, %s8278_s22  ;;  %7683 = vmatprep.mubr.msk.f32.mxu0 %vm634_vm0, %v584_v7  ;;  %v14326_v10 = vld [vmem:[#allocation20_spill] sm:$0xff]  ;;  %8123 = vpow2.f32 %v2480_v31  ;;  %v1787_v47 = vld [vmem:[%s13727_s1 + $0x1f8] sm:$0xff]  ;;  %v1788_v31 = vld [vmem:[%s13727_s1 + $0x200] sm:$0xff] }
 0x215   : > { %14322 = vst [vmem:[#allocation194_spill] sm:$0xff] %v10304_v2  ;;  %7846 = vmatmul.mubr.msk.f32.gmra.mrb[50].mxu1 %vm5692_vm1, %v4053_v51  ;;  %v10309_v13 = vpop.permute.xlu1 %4462  ;;  %v3442_v7 = vmul.f32 %v10292_v43, %v14326_v10  ;;  %v1401_v51 = vadd.f32 %v9969_v52, %v1400_v16  ;;  %v585_v29 = vld [vmem:[%s8383_s12 + $0x770] sm:$0xff]  ;;  %v2296_v38 = vmul.f32 0.5, %v10304_v2  ;;  %v588_v16 = vld [vmem:[%s8383_s12 + $0x788] sm:$0xff]  ;;  %v10333_v10 = vpop.eup %8117 }
 0x216   : > { %14324 = vst [vmem:[#allocation196_spill] sm:$0xff] %v10309_v13  ;;  %v3697_v9 = vpop.permute.xlu0 %3696  ;;  %v1410_v62 = vpop.f32.mrb[130].mxu0  ;;  %6580 = vmatprep.mubr.f32.mxu1 %v14213_v63  ;;  %14327 = vst [vmem:[#allocation19_spill] sm:$0xff] %v10333_v10 }
 0x217   : > { %v4054_v60 = vadd.f32 %v3697_v9, %v9496_v28  ;;  %1674 = vmatmul.mubr.f32.gmra.mrb[236].mxu0 %v583_v55  ;;  %3750 = vrot.lane.b32.xlu1 %v3441_v12, %s8278_s22  ;;  %v1412_v49 = vpop.f32.mrb[131].mxu0  ;;  %v2042_v55 = vmax.f32 %v10306_v25, -30.0  ;;  %v1406_v12 = vadd.f32 %v9969_v52, %v1405_v18  ;;  %v10342_v13 = vpop.eup %8119  ;;  %v10346_v28 = vmin.f32 %v2041_v59, 20.0 }
 0x218   : > { %3752 = vrot.lane.b32.xlu0 %v3442_v7, %s8278_s22  ;;  %7684 = vmatprep.mubr.msk.f32.mxu0 %vm634_vm0, %v586_v8  ;;  %14329 = vst [vmem:[#allocation197_spill] sm:$0xff] %v10342_v13  ;;  %v10348_v2 = vadd.f32 %v1787_v47, %v1401_v51  ;;  %v590_v51 = vld [vmem:[%s8383_s12 + $0x798] sm:$0xff] }
 0x219   : > { %7847 = vmatmul.mubr.msk.f32.gmra.mrb[52].mxu1 %vm5692_vm1, %v4054_v60  ;;  %v3699_v9 = vpop.permute.xlu1 %3698  ;;  %v2482_v60 = vmul.f32 1.442695, %v2295_v11  ;;  %14330 = vst [vmem:[#allocation198_spill] sm:$0xff] %v10346_v28  ;;  %v10356_v53 = vadd.f32 %v1788_v31, %v1406_v12  ;;  %v14335_v11 = vld [vmem:[#allocation21_spill] sm:$0xff]  ;;  %v2297_v31 = vmul.f32 0.5, %v10346_v28 }
 0x21a   : > { %v4055_v8 = vadd.f32 %v3699_v9, %v9504_v34  ;;  %v10339_v7 = vpop.permute.xlu0 %4464  ;;  %v1415_v49 = vpop.f32.mrb[132].mxu0  ;;  %6586 = vmatprep.mubr.f32.mxu1 %v14213_v63  ;;  %14331 = vst [vmem:[#allocation199_spill] sm:$0xff] %v10348_v2  ;;  %v587_v9 = vld [vmem:[%s8383_s12 + $0x780] sm:$0xff]  ;;  %v2484_v34 = vmul.f32 1.442695, %v2296_v38  ;;  %v3443_v59 = vmul.f32 %v10333_v10, %v14335_v11  ;;  %v14337_v38 = vld [vmem:[#allocation119_spill] sm:$0xff] }
 0x21b   : > { %14328 = vst [vmem:[#allocation20_spill] sm:$0xff] %v10339_v7  ;;  %1679 = vmatmul.mubr.f32.gmra.mrb[238].mxu0 %v585_v29  ;;  %5242 = vrot.lane.b32.xlu1 %v9617_v46, %s8278_s22  ;;  %v1417_v18 = vpop.f32.mrb[133].mxu0  ;;  %v10354_v7 = vmin.f32 %v2042_v55, 20.0  ;;  %14333 = vst [vmem:[#allocation201_spill] sm:$0xff] %v10356_v53  ;;  %8125 = vpow2.f32 %v2482_v60  ;;  %v589_v11 = vld [vmem:[%s8383_s12 + $0x790] sm:$0xff]  ;;  %v1789_v60 = vld [vmem:[%s13727_s1 + $0x208] sm:$0xff] }
 0x21c   : > { %5240 = vrot.lane.b32.xlu0 %v9603_v19, %s8278_s22  ;;  %7685 = vmatprep.mubr.msk.f32.mxu0 %vm634_vm0, %v588_v16  ;;  %v14336_v19 = vld [vmem:[#allocation22_spill] sm:$0xff]  ;;  %v1411_v18 = vadd.f32 %v9969_v52, %v1410_v62  ;;  %8127 = vpow2.f32 %v2484_v34  ;;  %v592_v62 = vld [vmem:[%s8383_s12 + $0x7a8] sm:$0xff]  ;;  %v1790_v34 = vld [vmem:[%s13727_s1 + $0x210] sm:$0xff] }
 0x21d   : > { %14332 = vst [vmem:[#allocation200_spill] sm:$0xff] %v10354_v7  ;;  %7848 = vmatmul.mubr.msk.f32.gmra.mrb[54].mxu1 %vm5692_vm1, %v4055_v8  ;;  %v10359_v46 = vpop.permute.xlu1 %4466  ;;  %v3444_v16 = vmul.f32 %v10342_v13, %v14336_v19  ;;  %v2043_v8 = vmax.f32 %v10348_v2, -30.0 }
 0x21e   : > { %14334 = vst [vmem:[#allocation202_spill] sm:$0xff] %v10359_v46  ;;  %v3701_v29 = vpop.permute.xlu0 %3700  ;;  %v1420_v47 = vpop.f32.mrb[134].mxu0  ;;  %6592 = vmatprep.mubr.f32.mxu1 %v14213_v63  ;;  %v10398_v13 = vadd.f32 %v1789_v60, %v1411_v18  ;;  %v594_v18 = vld [vmem:[%s8383_s12 + $0x7b8] sm:$0xff] }
 0x21f   : > { %v4056_v55 = vadd.f32 %v3701_v29, %v14337_v38  ;;  %1684 = vmatmul.mubr.f32.gmra.mrb[240].mxu0 %v587_v9  ;;  %3754 = vrot.lane.b32.xlu1 %v3443_v59, %s8278_s22  ;;  %v1422_v12 = vpop.f32.mrb[135].mxu0  ;;  %v2298_v29 = vmul.f32 0.5, %v10354_v7  ;;  %v2044_v9 = vmax.f32 %v10356_v53, -30.0  ;;  %v1416_v59 = vadd.f32 %v9969_v52, %v1415_v49 }
 0x220   : > { %3756 = vrot.lane.b32.xlu0 %v3444_v16, %s8278_s22  ;;  %7686 = vmatprep.mubr.msk.f32.mxu0 %vm634_vm0, %v590_v51  ;;  %v10383_v16 = vpop.eup %8121  ;;  %v14339_v51 = vld [vmem:[#allocation121_spill] sm:$0xff]  ;;  %v10396_v28 = vmin.f32 %v2043_v8, 20.0  ;;  %14343 = vst [vmem:[#allocation205_spill] sm:$0xff] %v10398_v13 }
 0x221   : > { %7849 = vmatmul.mubr.msk.f32.gmra.mrb[56].mxu1 %vm5692_vm1, %v4056_v55  ;;  %v3703_v19 = vpop.permute.xlu1 %3702  ;;  %14338 = vst [vmem:[#allocation21_spill] sm:$0xff] %v10383_v16  ;;  %v10392_v7 = vpop.eup %8123  ;;  %v2486_v55 = vmul.f32 1.442695, %v2297_v31  ;;  %v10406_v10 = vadd.f32 %v1790_v34, %v1416_v59  ;;  %v14347_v31 = vld [vmem:[#allocation23_spill] sm:$0xff] }
 0x222   : > { %v4057_v12 = vadd.f32 %v3703_v19, %v14339_v51  ;;  %v10389_v46 = vpop.permute.xlu0 %4468  ;;  %v1425_v38 = vpop.f32.mrb[136].mxu0  ;;  %6598 = vmatprep.mubr.f32.mxu1 %v14213_v63  ;;  %14341 = vst [vmem:[#allocation203_spill] sm:$0xff] %v10392_v7  ;;  %14342 = vst [vmem:[#allocation204_spill] sm:$0xff] %v10396_v28  ;;  %v591_v19 = vld [vmem:[%s8383_s12 + $0x7a0] sm:$0xff]  ;;  %v2488_v51 = vmul.f32 1.442695, %v2298_v29  ;;  %v3445_v8 = vmul.f32 %v10383_v16, %v14347_v31 }
 0x223   : > { %14340 = vst [vmem:[#allocation22_spill] sm:$0xff] %v10389_v46  ;;  %1689 = vmatmul.mubr.f32.gmra.mrb[242].mxu0 %v589_v11  ;;  %5246 = vrot.lane.b32.xlu1 %v9656_v58, %s8278_s22  ;;  %v1427_v49 = vpop.f32.mrb[137].mxu0  ;;  %v10404_v46 = vmin.f32 %v2044_v9, 20.0  ;;  %14345 = vst [vmem:[#allocation207_spill] sm:$0xff] %v10406_v10  ;;  %v14349_v29 = vld [vmem:[#allocation124_spill] sm:$0xff]  ;;  %8129 = vpow2.f32 %v2486_v55  ;;  %v2299_v34 = vmul.f32 0.5, %v10396_v28 }
 0x224   : > { %5244 = vrot.lane.b32.xlu0 %v9643_v37, %s8278_s22  ;;  %7687 = vmatprep.mubr.msk.f32.mxu0 %vm634_vm0, %v592_v62  ;;  %v14348_v37 = vld [vmem:[#allocation24_spill] sm:$0xff]  ;;  %v1421_v49 = vadd.f32 %v9969_v52, %v1420_v47  ;;  %8131 = vpow2.f32 %v2488_v51  ;;  %v1791_v55 = vld [vmem:[%s13727_s1 + $0x218] sm:$0xff]  ;;  %v596_v47 = vld [vmem:[%s8383_s12 + $0x7c8] sm:$0xff] }
 0x225   : > { %14344 = vst [vmem:[#allocation206_spill] sm:$0xff] %v10404_v46  ;;  %7850 = vmatmul.mubr.msk.f32.gmra.mrb[58].mxu1 %vm5692_vm1, %v4057_v12  ;;  %v10409_v58 = vpop.permute.xlu1 %4470  ;;  %v3446_v62 = vmul.f32 %v10392_v7, %v14348_v37  ;;  %v2045_v12 = vmax.f32 %v10398_v13, -30.0  ;;  %v593_v31 = vld [vmem:[%s8383_s12 + $0x7b0] sm:$0xff]  ;;  %v1792_v51 = vld [vmem:[%s13727_s1 + $0x220] sm:$0xff] }
 0x226   : > { %14346 = vst [vmem:[#allocation208_spill] sm:$0xff] %v10409_v58  ;;  %v3705_v11 = vpop.permute.xlu0 %3704  ;;  %v1430_v60 = vpop.f32.mrb[138].mxu0  ;;  %6604 = vmatprep.mubr.f32.mxu1 %v14213_v63  ;;  %v10448_v7 = vadd.f32 %v1791_v55, %v1421_v49  ;;  %v598_v49 = vld [vmem:[%s8383_s12 + $0x7d8] sm:$0xff] }
 0x227   : > { %v4058_v9 = vadd.f32 %v3705_v11, %v14349_v29  ;;  %1694 = vmatmul.mubr.f32.gmra.mrb[244].mxu0 %v591_v19  ;;  %3758 = vrot.lane.b32.xlu1 %v3445_v8, %s8278_s22  ;;  %v1432_v59 = vpop.f32.mrb[139].mxu0  ;;  %v2300_v11 = vmul.f32 0.5, %v10404_v46  ;;  %v2046_v19 = vmax.f32 %v10406_v10, -30.0  ;;  %v1426_v8 = vadd.f32 %v9969_v52, %v1425_v38 }
 0x228   : > { %3760 = vrot.lane.b32.xlu0 %v3446_v62, %s8278_s22  ;;  %7688 = vmatprep.mubr.msk.f32.mxu0 %vm634_vm0, %v594_v18  ;;  %v10433_v62 = vpop.eup %8125  ;;  %v14351_v18 = vld [vmem:[#allocation126_spill] sm:$0xff]  ;;  %v10446_v28 = vmin.f32 %v2045_v12, 20.0  ;;  %14355 = vst [vmem:[#allocation211_spill] sm:$0xff] %v10448_v7 }
 0x229   : > { %7851 = vmatmul.mubr.msk.f32.gmra.mrb[60].mxu1 %vm5692_vm1, %v4058_v9  ;;  %v3707_v37 = vpop.permute.xlu1 %3706  ;;  %14350 = vst [vmem:[#allocation23_spill] sm:$0xff] %v10433_v62  ;;  %v10442_v46 = vpop.eup %8127  ;;  %v2490_v9 = vmul.f32 1.442695, %v2299_v34  ;;  %v10456_v16 = vadd.f32 %v1792_v51, %v1426_v8  ;;  %v14359_v34 = vld [vmem:[#allocation25_spill] sm:$0xff] }
 0x22a   : > { %v4059_v59 = vadd.f32 %v3707_v37, %v14351_v18  ;;  %v10439_v58 = vpop.permute.xlu0 %4472  ;;  %v1435_v29 = vpop.f32.mrb[140].mxu0  ;;  %6610 = vmatprep.mubr.f32.mxu1 %v14213_v63  ;;  %14353 = vst [vmem:[#allocation209_spill] sm:$0xff] %v10442_v46  ;;  %14354 = vst [vmem:[#allocation210_spill] sm:$0xff] %v10446_v28  ;;  %v595_v37 = vld [vmem:[%s8383_s12 + $0x7c0] sm:$0xff]  ;;  %v2492_v18 = vmul.f32 1.442695, %v2300_v11  ;;  %v3447_v12 = vmul.f32 %v10433_v62, %v14359_v34 }
 0x22b   : > { %14352 = vst [vmem:[#allocation24_spill] sm:$0xff] %v10439_v58  ;;  %1699 = vmatmul.mubr.f32.gmra.mrb[246].mxu0 %v593_v31  ;;  %5250 = vrot.lane.b32.xlu1 %v9696_v0, %s8278_s22  ;;  %v1437_v38 = vpop.f32.mrb[141].mxu0  ;;  %v10454_v58 = vmin.f32 %v2046_v19, 20.0  ;;  %14357 = vst [vmem:[#allocation213_spill] sm:$0xff] %v10456_v16  ;;  %v14361_v11 = vld [vmem:[#allocation129_spill] sm:$0xff]  ;;  %8133 = vpow2.f32 %v2490_v9  ;;  %v2301_v51 = vmul.f32 0.5, %v10446_v28 }
 0x22c   : > { %5248 = vrot.lane.b32.xlu0 %v9682_v57, %s8278_s22  ;;  %7689 = vmatprep.mubr.msk.f32.mxu0 %vm634_vm0, %v596_v47  ;;  %v14360_v57 = vld [vmem:[#allocation26_spill] sm:$0xff]  ;;  %v1431_v38 = vadd.f32 %v9969_v52, %v1430_v60  ;;  %v597_v34 = vld [vmem:[%s8383_s12 + $0x7d0] sm:$0xff]  ;;  %8135 = vpow2.f32 %v2492_v18  ;;  %v1793_v9 = vld [vmem:[%s13727_s1 + $0x228] sm:$0xff] }
 0x22d   : > { %14356 = vst [vmem:[#allocation212_spill] sm:$0xff] %v10454_v58  ;;  %7852 = vmatmul.mubr.msk.f32.gmra.mrb[62].mxu1 %vm5692_vm1, %v4059_v59  ;;  %v10459_v0 = vpop.permute.xlu1 %4474  ;;  %v3448_v47 = vmul.f32 %v10442_v46, %v14360_v57  ;;  %v2047_v59 = vmax.f32 %v10448_v7, -30.0  ;;  %v600_v60 = vld [vmem:[%s8383_s12 + $0x7e8] sm:$0xff]  ;;  %v1794_v18 = vld [vmem:[%s13727_s1 + $0x230] sm:$0xff]  ;;  %v2494_v28 = vmul.f32 1.442695, %v2301_v51 }
 0x22e   : > { %14358 = vst [vmem:[#allocation214_spill] sm:$0xff] %v10459_v0  ;;  %v3709_v31 = vpop.permute.xlu0 %3708  ;;  %v1440_v55 = vpop.f32.mrb[142].mxu0  ;;  %6616 = vmatprep.mubr.f32.mxu1 %v14213_v63 }
 0x22f   : > { %v4060_v19 = vadd.f32 %v3709_v31, %v14361_v11  ;;  %1704 = vmatmul.mubr.f32.gmra.mrb[248].mxu0 %v595_v37  ;;  %3762 = vrot.lane.b32.xlu1 %v3447_v12, %s8278_s22  ;;  %v1442_v8 = vpop.f32.mrb[143].mxu0  ;;  %v2302_v31 = vmul.f32 0.5, %v10454_v58  ;;  %v2048_v37 = vmax.f32 %v10456_v16, -30.0  ;;  %v1436_v12 = vadd.f32 %v9969_v52, %v1435_v29 }
 0x230   : > { %3764 = vrot.lane.b32.xlu0 %v3448_v47, %s8278_s22  ;;  %7690 = vmatprep.mubr.msk.f32.mxu0 %vm634_vm0, %v598_v49  ;;  %v10483_v8 = vpop.eup %8129  ;;  %v14362_v49 = vld [vmem:[#allocation131_spill] sm:$0xff]  ;;  %v2658_v58 = vmul.f32 %v9890_v23, %v9890_v23  ;;  %v10498_v46 = vmin.f32 %v2047_v59, 20.0  ;;  %v599_v23 = vld [vmem:[%s8383_s12 + $0x7e0] sm:$0xff]  ;;  %v602_v59 = vld [vmem:[%s8383_s12 + $0x7f8] sm:$0xff]  ;;  %8137 = vpow2.f32 %v2494_v28 }
 0x231   : > { %7853 = vmatmul.mubr.msk.f32.gmra.mrb[64].mxu1 %vm5692_vm1, %v4060_v19  ;;  %v3711_v57 = vpop.permute.xlu1 %3710  ;;  %v10494_v29 = vpop.eup %8131  ;;  %v10507_v62 = vadd.f32 %v1794_v18, %v1436_v12  ;;  %v1795_v28 = vld [vmem:[%s13727_s1 + $0x238] sm:$0xff] }
 0x232   : > { %v4061_v47 = vadd.f32 %v3711_v57, %v14362_v49  ;;  %v10489_v0 = vpop.permute.xlu0 %4476  ;;  %v1445_v11 = vpop.f32.mrb[144].mxu0  ;;  %6622 = vmatprep.mubr.f32.mxu1 %v14213_v63  ;;  %14364 = vst [vmem:[#allocation26_spill] sm:$0xff] %v10498_v46  ;;  %v10500_v57 = vadd.f32 %v1793_v9, %v1431_v38  ;;  %v2496_v49 = vmul.f32 1.442695, %v2302_v31  ;;  %v2303_v12 = vmul.f32 0.5, %v10498_v46 }
 0x233   : > { %14363 = vst [vmem:[#allocation25_spill] sm:$0xff] %v10489_v0  ;;  %1709 = vmatmul.mubr.f32.gmra.mrb[250].mxu0 %v597_v34  ;;  %5252 = vrot.lane.b32.xlu1 %v9718_v41, %s8278_s22  ;;  %v1447_v19 = vpop.f32.mrb[145].mxu0  ;;  %v10505_v0 = vmin.f32 %v2048_v37, 20.0  ;;  %14367 = vst [vmem:[#allocation217_spill] sm:$0xff] %v10507_v62  ;;  %v14369_v41 = vld [vmem:[#allocation27_spill] sm:$0xff] }
 0x234   : > { %14365 = vst [vmem:[#allocation215_spill] sm:$0xff] %v10500_v57  ;;  %4488 = vrot.lane.b32.xlu0 %v2658_v58, %s8278_s22  ;;  %7691 = vmatprep.mubr.msk.f32.mxu0 %vm634_vm0, %v600_v60  ;;  %v3449_v51 = vmul.f32 %v10483_v8, %v14369_v41  ;;  %v14370_v58 = vld [vmem:[#allocation28_spill] sm:$0xff]  ;;  %v2049_v18 = vmax.f32 %v10500_v57, -30.0  ;;  %8139 = vpow2.f32 %v2496_v49  ;;  %v1796_v49 = vld [vmem:[%s13727_s1 + $0x240] sm:$0xff] }
 0x235   : > { %14366 = vst [vmem:[#allocation216_spill] sm:$0xff] %v10505_v0  ;;  %7854 = vmatmul.mubr.msk.f32.gmra.mrb[66].mxu1 %vm5692_vm1, %v4061_v47  ;;  %v10510_v34 = vpop.permute.xlu1 %4478  ;;  %v3450_v60 = vmul.f32 %v10494_v29, %v14370_v58  ;;  %v1441_v47 = vadd.f32 %v9969_v52, %v1440_v55  ;;  %v601_v19 = vld [vmem:[%s8383_s12 + $0x7f0] sm:$0xff]  ;;  %v2304_v41 = vmul.f32 0.5, %v10505_v0  ;;  %s10900_s12 = scalar_lea.vmem %s13733_s7, %s7951_s24 }
 0x236   : > { %14368 = vst [vmem:[#allocation218_spill] sm:$0xff] %v10510_v34  ;;  %v3713_v38 = vpop.permute.xlu0 %3712  ;;  %v1450_v9 = vpop.f32.mrb[146].mxu0  ;;  %6628 = vmatprep.mubr.f32.mxu1 %v14213_v63  ;;  %v2659_v34 = vmul.f32 %v9920_v3, %v9920_v3  ;;  %v10553_v0 = vmin.f32 %v2049_v18, 20.0  ;;  %v14381_v18 = vld [vmem:[#allocation30_spill] sm:$0xff] }
 0x237   : > { %v4062_v31 = vadd.f32 %v3713_v38, %v9645_v61  ;;  %1714 = vmatmul.mubr.f32.gmra.mrb[252].mxu0 %v599_v23  ;;  %3766 = vrot.lane.b32.xlu1 %v3449_v51, %s8278_s22  ;;  %v1452_v37 = vpop.f32.mrb[147].mxu0  ;;  %v2050_v23 = vmax.f32 %v10507_v62, -30.0  ;;  %v10534_v51 = vld [vmem:[%s13730_s4] ss:$0 sm:$0xff]  ;;  %v14372_v38 = vld [vmem:[#allocation136_spill] sm:$0xff]  ;;  %v10555_v46 = vadd.f32 %v1795_v28, %v1441_v47 }
 0x238   : > { %3768 = vrot.lane.b32.xlu0 %v3450_v60, %s8278_s22  ;;  %7692 = vmatprep.mubr.msk.f32.mxu0 %vm634_vm0, %v602_v59  ;;  %v1446_v52 = vadd.f32 %v10534_v51, %v1445_v11  ;;  %v10538_v59 = vpop.eup %8133  ;;  %v2498_v61 = vmul.f32 1.442695, %v2303_v12  ;;  %14375 = vst [vmem:[#allocation220_spill] sm:$0xff] %v10553_v0 }
 0x239   : > { %7855 = vmatmul.mubr.msk.f32.gmra.mrb[68].mxu1 %vm5692_vm1, %v4062_v31  ;;  %v3715_v55 = vpop.permute.xlu1 %3714  ;;  %14371 = vst [vmem:[#allocation27_spill] sm:$0xff] %v10538_v59  ;;  %v10549_v11 = vpop.eup %8135  ;;  %14376 = vst [vmem:[#allocation221_spill] sm:$0xff] %v10555_v46  ;;  %v2051_v28 = vmax.f32 %v10555_v46, -30.0 }
 0x23a   : > { %v4063_v58 = vadd.f32 %v3715_v55, %v14372_v38  ;;  %v10544_v60 = vpop.permute.xlu0 %4480  ;;  %v1455_v37 = vpop.f32.mrb[148].mxu0  ;;  %6634 = vmatprep.mubr.f32.mxu1 %v14213_v63  ;;  %14374 = vst [vmem:[#allocation219_spill] sm:$0xff] %v10549_v11  ;;  %v2500_v55 = vmul.f32 1.442695, %v2304_v41  ;;  %v10558_v38 = vmin.f32 %v2050_v23, 20.0  ;;  %v10560_v3 = vadd.f32 %v1796_v49, %v1446_v52 }
 0x23b   : > { %14373 = vst [vmem:[#allocation28_spill] sm:$0xff] %v10544_v60  ;;  %1719 = vmatmul.mubr.f32.gmra.mrb[254].mxu0 %v601_v19  ;;  %5254 = vrot.lane.b32.xlu1 %v9747_v33, %s8278_s22  ;;  %v1457_v31 = vpop.f32.mrb[149].mxu0  ;;  %v14380_v19 = vld [vmem:[#allocation29_spill] sm:$0xff]  ;;  %v3452_v47 = vmul.f32 %v10549_v11, %v14381_v18  ;;  %8141 = vpow2.f32 %v2498_v61  ;;  %v2305_v23 = vmul.f32 0.5, %v10553_v0  ;;  %v1451_v52 = vadd.f32 %v10534_v51, %v1450_v9  ;;  %v1798_v9 = vld [vmem:[%s13727_s1 + $0x250] sm:$0xff]  ;;  %v14390_v0 = vld [vmem:[#allocation31_spill] sm:$0xff] }
 0x23c   : > { %4490 = vrot.lane.b32.xlu0 %v2659_v34, %s8278_s22  ;;  %14377 = vst [vmem:[#allocation222_spill] sm:$0xff] %v10558_v38  ;;  %14378 = vst [vmem:[#allocation223_spill] sm:$0xff] %v10560_v3  ;;  %v3451_v33 = vmul.f32 %v10538_v59, %v14380_v19  ;;  %8143 = vpow2.f32 %v2500_v55  ;;  %v2306_v49 = vmul.f32 0.5, %v10558_v38  ;;  %v1797_v19 = vld [vmem:[%s13727_s1 + $0x248] sm:$0xff] }
 0x23d   : > { %7856 = vmatmul.mubr.msk.f32.gmra.mrb[70].mxu1 %vm5692_vm1, %v4063_v58  ;;  %v10563_v60 = vpop.permute.xlu1 %4482  ;;  %v2052_v58 = vmax.f32 %v10560_v3, -30.0 }
 0x23e   : > { %14379 = vst [vmem:[#allocation224_spill] sm:$0xff] %v10563_v60  ;;  %v3717_v31 = vpop.permute.xlu0 %3716  ;;  %v1460_v12 = vpop.f32.mrb[150].mxu0  ;;  %6640 = vmatprep.mubr.f32.mxu1 %v14213_v63  ;;  %v10599_v60 = vmin.f32 %v2051_v28, 20.0  ;;  %v14392_v28 = vld [vmem:[#allocation32_spill] sm:$0xff] }
 0x23f   : > { %v4064_v34 = vadd.f32 %v3717_v31, %v9684_v24  ;;  %3770 = vrot.lane.b32.xlu1 %v3451_v33, %s8278_s22  ;;  %v1462_v41 = vpop.f32.mrb[151].mxu0  ;;  %v1456_v33 = vadd.f32 %v10534_v51, %v1455_v37  ;;  %v10585_v31 = vpop.eup %8137  ;;  %v10601_v24 = vadd.f32 %v1797_v19, %v1451_v52  ;;  %v10604_v38 = vmin.f32 %v2052_v58, 20.0 }
 0x240   : > { %3772 = vrot.lane.b32.xlu0 %v3452_v47, %s8278_s22  ;;  %14383 = vst [vmem:[#allocation30_spill] sm:$0xff] %v10585_v31  ;;  %v2660_v47 = vmul.f32 %v9936_v22, %v9936_v22  ;;  %v10595_v41 = vpop.eup %8139  ;;  %14386 = vst [vmem:[#allocation227_spill] sm:$0xff] %v10599_v60  ;;  %v3453_v11 = vmul.f32 %v10585_v31, %v14390_v0 }
 0x241   : > { %7857 = vmatmul.mubr.msk.f32.gmra.mrb[72].mxu1 %vm5692_vm1, %v4064_v34  ;;  %v10583_v61 = vpop.permute.xlu1 %5206  ;;  %14385 = vst [vmem:[#allocation226_spill] sm:$0xff] %v10595_v41  ;;  %v2502_v34 = vmul.f32 1.442695, %v2305_v23  ;;  %14387 = vst [vmem:[#allocation228_spill] sm:$0xff] %v10601_v24  ;;  %v3454_v52 = vmul.f32 %v10595_v41, %v14392_v28  ;;  %v2053_v58 = vmax.f32 %v10601_v24, -30.0  ;;  %v2308_v0 = vmul.f32 0.5, %v10604_v38 }
 0x242   : > { %14382 = vst [vmem:[#allocation29_spill] sm:$0xff] %v10583_v61  ;;  %v10590_v55 = vpop.permute.xlu0 %4484  ;;  %v1465_v18 = vpop.f32.mrb[152].mxu0  ;;  %6646 = vmatprep.mubr.f32.mxu1 %v14213_v63  ;;  %14388 = vst [vmem:[#allocation229_spill] sm:$0xff] %v10604_v38  ;;  %v10606_v61 = vadd.f32 %v1798_v9, %v1456_v33  ;;  %v1461_v33 = vadd.f32 %v10534_v51, %v1460_v12 }
 0x243   : > { %14384 = vst [vmem:[#allocation225_spill] sm:$0xff] %v10590_v55  ;;  %5256 = vrot.lane.b32.xlu1 %v9774_v4, %s8278_s22  ;;  %v1467_v37 = vpop.f32.mrb[153].mxu0  ;;  %v2504_v55 = vmul.f32 1.442695, %v2306_v49  ;;  %8145 = vpow2.f32 %v2502_v34  ;;  %v2307_v49 = vmul.f32 0.5, %v10599_v60 }
 0x244   : > { %4492 = vrot.lane.b32.xlu0 %v2660_v47, %s8278_s22  ;;  %14389 = vst [vmem:[#allocation230_spill] sm:$0xff] %v10606_v61  ;;  %v2054_v9 = vmax.f32 %v10606_v61, -30.0  ;;  %v1466_v47 = vadd.f32 %v10534_v51, %v1465_v18  ;;  %v2508_v38 = vmul.f32 1.442695, %v2308_v0 }
 0x245   : > { %v3719_v22 = vpop.permute.xlu1 %3718  ;;  %8147 = vpow2.f32 %v2504_v55  ;;  %v10630_v12 = vpop.eup %8141 }
 0x246   : > { %v4065_v59 = vadd.f32 %v3719_v22, %v9710_v40  ;;  %v10611_v4 = vpop.permute.xlu0 %5204  ;;  %v1470_v23 = vpop.f32.mrb[154].mxu0  ;;  %14394 = vst [vmem:[#allocation231_spill] sm:$0xff] %v10630_v12  ;;  %v2661_v22 = vmul.f32 %v9983_v39, %v9983_v39  ;;  %v10647_v60 = vmin.f32 %v2054_v9, 20.0 }
 0x247   : > { %14391 = vst [vmem:[#allocation31_spill] sm:$0xff] %v10611_v4  ;;  %3774 = vrot.lane.b32.xlu1 %v3453_v11, %s8278_s22  ;;  %v1472_v19 = vpop.f32.mrb[155].mxu0  ;;  %v1799_v11 = vld [vmem:[%s13727_s1 + $0x258] sm:$0xff]  ;;  %v10637_v28 = vpop.eup %8143 }
 0x248   : > { %3776 = vrot.lane.b32.xlu0 %v3454_v52, %s8278_s22  ;;  %7858 = vmatmul.mubr.msk.f32.gmra.mrb[74].mxu1 %vm5692_vm1, %v4065_v59  ;;  %v1800_v59 = vld [vmem:[%s13727_s1 + $0x260] sm:$0xff]  ;;  %14395 = vst [vmem:[#allocation232_spill] sm:$0xff] %v10637_v28  ;;  %v2506_v19 = vmul.f32 1.442695, %v2307_v49  ;;  %v10644_v40 = vadd.f32 %v1799_v11, %v1461_v33  ;;  %14398 = vst [vmem:[#allocation235_spill] sm:$0xff] %v10647_v60 }
 0x249   : > { %v10627_v37 = vpop.permute.xlu1 %4486  ;;  %6652 = vmatprep.mubr.f32.mxu1 %v14213_v63  ;;  %v10649_v4 = vadd.f32 %v1800_v59, %v1466_v47  ;;  %v1471_v47 = vadd.f32 %v10534_v51, %v1470_v23  ;;  %v2310_v59 = vmul.f32 0.5, %v10647_v60  ;;  %v1802_v23 = vld [vmem:[%s13727_s1 + $0x270] sm:$0xff] }
 0x24a   : > { %14393 = vst [vmem:[#allocation32_spill] sm:$0xff] %v10627_v37  ;;  %v3721_v55 = vpop.permute.xlu0 %3720  ;;  %v1475_v34 = vpop.f32.mrb[156].mxu0  ;;  %v10642_v37 = vmin.f32 %v2053_v58, 20.0  ;;  %14397 = vst [vmem:[#allocation234_spill] sm:$0xff] %v10644_v40  ;;  %v14403_v58 = vld [vmem:[#allocation34_spill] sm:$0xff]  ;;  %8149 = vpow2.f32 %v2506_v19  ;;  %v2055_v11 = vmax.f32 %v10644_v40, -30.0 }
 0x24b   : > { %v4066_v52 = vadd.f32 %v3721_v55, %v9737_v20  ;;  %5258 = vrot.lane.b32.xlu1 %v9808_v6, %s8278_s22  ;;  %v1477_v18 = vpop.f32.mrb[157].mxu0  ;;  %14399 = vst [vmem:[#allocation236_spill] sm:$0xff] %v10649_v4  ;;  %v14401_v55 = vld [vmem:[#allocation33_spill] sm:$0xff]  ;;  %v3456_v33 = vmul.f32 %v10637_v28, %v14403_v58  ;;  %8151 = vpow2.f32 %v2508_v38  ;;  %v14411_v28 = vld [vmem:[#allocation35_spill] sm:$0xff] }
 0x24c   : > { %14396 = vst [vmem:[#allocation233_spill] sm:$0xff] %v10642_v37  ;;  %4494 = vrot.lane.b32.xlu0 %v2661_v22, %s8278_s22  ;;  %v3455_v6 = vmul.f32 %v10630_v12, %v14401_v55  ;;  %v2309_v9 = vmul.f32 0.5, %v10642_v37  ;;  %v2056_v22 = vmax.f32 %v10649_v4, -30.0  ;;  %v1476_v55 = vadd.f32 %v10534_v51, %v1475_v34 }
 0x24d   : > { %7859 = vmatmul.mubr.msk.f32.gmra.mrb[76].mxu1 %vm5692_vm1, %v4066_v52  ;;  %v10652_v39 = vpop.permute.xlu1 %5210  ;;  %v1801_v52 = vld [vmem:[%s13727_s1 + $0x268] sm:$0xff]  ;;  %v10684_v37 = vmin.f32 %v2055_v11, 20.0 }
 0x24e   : > { %14400 = vst [vmem:[#allocation237_spill] sm:$0xff] %v10652_v39  ;;  %v10656_v18 = vpop.permute.xlu0 %5208  ;;  %v1480_v49 = vpop.f32.mrb[158].mxu0  ;;  %6658 = vmatprep.mubr.f32.mxu1 %v14213_v63  ;;  %v2510_v60 = vmul.f32 1.442695, %v2309_v9  ;;  %v10686_v39 = vadd.f32 %v1801_v52, %v1471_v47  ;;  %v14412_v9 = vld [vmem:[#allocation149_spill] sm:$0xff] }
 0x24f   : > { %14402 = vst [vmem:[#allocation33_spill] sm:$0xff] %v10656_v18  ;;  %3778 = vrot.lane.b32.xlu1 %v3455_v6, %s8278_s22  ;;  %v1482_v0 = vpop.f32.mrb[159].mxu0  ;;  %v10672_v6 = vpop.eup %8145  ;;  %14406 = vst [vmem:[#allocation239_spill] sm:$0xff] %v10684_v37  ;;  %v10692_v18 = vadd.f32 %v1802_v23, %v1476_v55  ;;  %v2311_v55 = vmul.f32 0.5, %v10684_v37  ;;  %v1803_v23 = vld [vmem:[%s13727_s1 + $0x278] sm:$0xff] }
 0x250   : > { %3780 = vrot.lane.b32.xlu0 %v3456_v33, %s8278_s22  ;;  %14404 = vst [vmem:[#allocation34_spill] sm:$0xff] %v10672_v6  ;;  %v2662_v0 = vmul.f32 %v9991_v35, %v9991_v35  ;;  %v10680_v20 = vpop.eup %8147  ;;  %14407 = vst [vmem:[#allocation240_spill] sm:$0xff] %v10686_v39  ;;  %8153 = vpow2.f32 %v2510_v60 }
 0x251   : > { %v3723_v19 = vpop.permute.xlu1 %3722  ;;  %14405 = vst [vmem:[#allocation238_spill] sm:$0xff] %v10680_v20  ;;  %14409 = vst [vmem:[#allocation242_spill] sm:$0xff] %v10692_v18 }
 0x252   : > { %v4067_v58 = vadd.f32 %v3723_v19, %v9767_v21  ;;  %v3725_v38 = vpop.permute.xlu0 %3724  ;;  %v1485_v33 = vpop.f32.mrb[160].mxu0  ;;  %v2512_v19 = vmul.f32 1.442695, %v2310_v59  ;;  %v10690_v21 = vmin.f32 %v2056_v22, 20.0  ;;  %v1481_v59 = vadd.f32 %v10534_v51, %v1480_v49 }
 0x253   : > { %5260 = vrot.lane.b32.xlu1 %v9816_v36, %s8278_s22  ;;  %v1487_v34 = vpop.f32.mrb[161].mxu0  ;;  %v3457_v36 = vmul.f32 %v10672_v6, %v14411_v28  ;;  %v4068_v11 = vadd.f32 %v3725_v38, %v14412_v9  ;;  %v2057_v28 = vmax.f32 %v10686_v39, -30.0  ;;  %v2058_v49 = vmax.f32 %v10692_v18, -30.0 }
 0x254   : > { %4496 = vrot.lane.b32.xlu0 %v2662_v0, %s8278_s22  ;;  %7860 = vmatmul.mubr.msk.f32.gmra.mrb[78].mxu1 %vm5692_vm1, %v4067_v58  ;;  %14408 = vst [vmem:[#allocation241_spill] sm:$0xff] %v10690_v21  ;;  %v14414_v0 = vld [vmem:[#allocation36_spill] sm:$0xff]  ;;  %8155 = vpow2.f32 %v2512_v19  ;;  %v2312_v38 = vmul.f32 0.5, %v10690_v21  ;;  %v1486_v34 = vadd.f32 %v10534_v51, %v1485_v33  ;;  %v2663_v19 = vmul.f32 %v10033_v45, %v10033_v45 }
 0x255   : > { %v10694_v35 = vpop.permute.xlu1 %5214  ;;  %6664 = vmatprep.mubr.f32.mxu1 %v14213_v63  ;;  %v3458_v58 = vmul.f32 %v10680_v20, %v14414_v0  ;;  %v1804_v0 = vld [vmem:[%s13727_s1 + $0x280] sm:$0xff]  ;;  %v10727_v37 = vadd.f32 %v1803_v23, %v1481_v59  ;;  %v14423_v59 = vld [vmem:[#allocation37_spill] sm:$0xff] }
 0x256   : > { %14410 = vst [vmem:[#allocation243_spill] sm:$0xff] %v10694_v35  ;;  %v10700_v47 = vpop.permute.xlu0 %5212  ;;  %v1490_v52 = vpop.f32.mrb[162].mxu0  ;;  %v2514_v35 = vmul.f32 1.442695, %v2311_v55  ;;  %v10737_v20 = vadd.f32 %v1804_v0, %v1486_v34 }
 0x257   : > { %14413 = vst [vmem:[#allocation35_spill] sm:$0xff] %v10700_v47  ;;  %3782 = vrot.lane.b32.xlu1 %v3457_v36, %s8278_s22  ;;  %v1492_v22 = vpop.f32.mrb[163].mxu0  ;;  %v10717_v36 = vpop.eup %8149  ;;  %14418 = vst [vmem:[#allocation245_spill] sm:$0xff] %v10727_v37  ;;  %v10731_v47 = vmin.f32 %v2057_v28, 20.0 }
 0x258   : > { %3784 = vrot.lane.b32.xlu0 %v3458_v58, %s8278_s22  ;;  %7861 = vmatmul.mubr.msk.f32.gmra.mrb[80].mxu1 %vm5692_vm1, %v4068_v11  ;;  %14415 = vst [vmem:[#allocation36_spill] sm:$0xff] %v10717_v36  ;;  %v14416_v22 = vld [vmem:[#allocation153_spill] sm:$0xff]  ;;  %v10725_v21 = vpop.eup %8151  ;;  %14421 = vst [vmem:[#allocation248_spill] sm:$0xff] %v10737_v20  ;;  %v3459_v23 = vmul.f32 %v10717_v36, %v14423_v59  ;;  %8157 = vpow2.f32 %v2514_v35  ;;  %v1806_v35 = vld [vmem:[%s13727_s1 + $0x290] sm:$0xff] }
 0x259   : > { %v3727_v60 = vpop.permute.xlu1 %3726  ;;  %6670 = vmatprep.mubr.f32.mxu1 %v14213_v63  ;;  %14417 = vst [vmem:[#allocation244_spill] sm:$0xff] %v10725_v21  ;;  %14419 = vst [vmem:[#allocation246_spill] sm:$0xff] %v10731_v47  ;;  %v2313_v0 = vmul.f32 0.5, %v10731_v47 }
 0x25a   : > { %v4069_v58 = vadd.f32 %v3727_v60, %v14416_v22  ;;  %v3729_v9 = vpop.permute.xlu0 %3728  ;;  %v1495_v11 = vpop.f32.mrb[164].mxu0  ;;  %v2516_v60 = vmul.f32 1.442695, %v2312_v38  ;;  %v10735_v22 = vmin.f32 %v2058_v49, 20.0  ;;  %v2059_v38 = vmax.f32 %v10727_v37, -30.0 }
 0x25b   : > { %5262 = vrot.lane.b32.xlu1 %v9849_v32, %s8278_s22  ;;  %v1497_v33 = vpop.f32.mrb[165].mxu0  ;;  %v14424_v32 = vld [vmem:[#allocation154_spill] sm:$0xff]  ;;  %v1491_v49 = vadd.f32 %v10534_v51, %v1490_v52  ;;  %v1496_v59 = vadd.f32 %v10534_v51, %v1495_v11  ;;  %v2060_v52 = vmax.f32 %v10737_v20, -30.0 }
 0x25c   : > { %4498 = vrot.lane.b32.xlu0 %v2663_v19, %s8278_s22  ;;  %7862 = vmatmul.mubr.msk.f32.gmra.mrb[82].mxu1 %vm5692_vm1, %v4069_v58  ;;  %14420 = vst [vmem:[#allocation247_spill] sm:$0xff] %v10735_v22  ;;  %v4070_v55 = vadd.f32 %v3729_v9, %v14424_v32  ;;  %v14426_v19 = vld [vmem:[#allocation39_spill] sm:$0xff]  ;;  %8159 = vpow2.f32 %v2516_v60  ;;  %v2664_v60 = vmul.f32 %v10042_v26, %v10042_v26 }
 0x25d   : > { %v10739_v45 = vpop.permute.xlu1 %5218  ;;  %6676 = vmatprep.mubr.f32.mxu1 %v14213_v63  ;;  %v3460_v58 = vmul.f32 %v10725_v21, %v14426_v19  ;;  %v1805_v9 = vld [vmem:[%s13727_s1 + $0x288] sm:$0xff]  ;;  %v2314_v19 = vmul.f32 0.5, %v10735_v22  ;;  %v10772_v22 = vmin.f32 %v2059_v38, 20.0  ;;  %v2518_v21 = vmul.f32 1.442695, %v2313_v0  ;;  %v14435_v38 = vld [vmem:[#allocation40_spill] sm:$0xff] }
 0x25e   : > { %14422 = vst [vmem:[#allocation249_spill] sm:$0xff] %v10739_v45  ;;  %v10745_v28 = vpop.permute.xlu0 %5216  ;;  %v1500_v33 = vpop.f32.mrb[166].mxu0  ;;  %v10774_v47 = vadd.f32 %v1805_v9, %v1491_v49  ;;  %v14431_v45 = vld [vmem:[#allocation157_spill] sm:$0xff]  ;;  %v10778_v36 = vadd.f32 %v1806_v35, %v1496_v59  ;;  %v14436_v9 = vld [vmem:[#allocation158_spill] sm:$0xff] }
 0x25f   : > { %14425 = vst [vmem:[#allocation37_spill] sm:$0xff] %v10745_v28  ;;  %3786 = vrot.lane.b32.xlu1 %v3459_v23, %s8278_s22  ;;  %v1502_v34 = vpop.f32.mrb[167].mxu0  ;;  %14429 = vst [vmem:[#allocation251_spill] sm:$0xff] %v10772_v22  ;;  %v14438_v59 = vld [vmem:[#allocation42_spill] sm:$0xff]  ;;  %8161 = vpow2.f32 %v2518_v21  ;;  %v5966_v21 = vlaneseq }
 0x260   : > { %3788 = vrot.lane.b32.xlu0 %v3460_v58, %s8278_s22  ;;  %7863 = vmatmul.mubr.msk.f32.gmra.mrb[84].mxu1 %vm5692_vm1, %v4070_v55  ;;  %v10765_v34 = vpop.eup %8153  ;;  %14430 = vst [vmem:[#allocation252_spill] sm:$0xff] %v10774_v47  ;;  %14432 = vst [vmem:[#allocation157_spill] sm:$0xff] %v10778_v36 }
 0x261   : > { %v3731_v23 = vpop.permute.xlu1 %3730  ;;  %6682 = vmatprep.mubr.f32.mxu1 %v14213_v63  ;;  %14427 = vst [vmem:[#allocation39_spill] sm:$0xff] %v10765_v34  ;;  %v10770_v55 = vpop.eup %8155  ;;  %v3461_v49 = vmul.f32 %v10765_v34, %v14435_v38  ;;  %v1501_v38 = vadd.f32 %v10534_v51, %v1500_v33  ;;  %v1808_v33 = vld [vmem:[%s13727_s1 + $0x2a0] sm:$0xff] }
 0x262   : > { %v4071_v11 = vadd.f32 %v3731_v23, %v9851_v1  ;;  %v3733_v32 = vpop.permute.xlu0 %3732  ;;  %v1505_v58 = vpop.f32.mrb[168].mxu0  ;;  %14428 = vst [vmem:[#allocation250_spill] sm:$0xff] %v10770_v55  ;;  %v2520_v23 = vmul.f32 1.442695, %v2314_v19  ;;  %v10782_v1 = vmin.f32 %v2060_v52, 20.0  ;;  %v3462_v35 = vmul.f32 %v10770_v55, %v14438_v59  ;;  %v1807_v59 = vld [vmem:[%s13727_s1 + $0x298] sm:$0xff] }
 0x263   : > { %5264 = vrot.lane.b32.xlu1 %v14431_v45, %s8278_s22  ;;  %v1507_v28 = vpop.f32.mrb[169].mxu0  ;;  %v4072_v45 = vadd.f32 %v3733_v32, %v14436_v9  ;;  %v2061_v19 = vmax.f32 %v10774_v47, -30.0  ;;  %v1506_v9 = vadd.f32 %v10534_v51, %v1505_v58  ;;  %v10823_v34 = vadd.f32 %v1807_v59, %v1501_v38  ;;  %v14449_v59 = vld [vmem:[#allocation45_spill] sm:$0xff] }
 0x264   : > { %4500 = vrot.lane.b32.xlu0 %v2664_v60, %s8278_s22  ;;  %7864 = vmatmul.mubr.msk.f32.gmra.mrb[86].mxu1 %vm5692_vm1, %v4071_v11  ;;  %14433 = vst [vmem:[#allocation253_spill] sm:$0xff] %v10782_v1  ;;  %v2315_v11 = vmul.f32 0.5, %v10772_v22  ;;  %v2062_v60 = vmax.f32 %v10778_v36, -30.0  ;;  %8163 = vpow2.f32 %v2520_v23  ;;  %v2316_v32 = vmul.f32 0.5, %v10782_v1 }
 0x265   : > { %v10784_v26 = vpop.permute.xlu1 %5222  ;;  %6688 = vmatprep.mubr.f32.mxu1 %v14213_v63  ;;  %v2665_v1 = vmul.f32 %v10083_v42, %v10083_v42  ;;  %14443 = vst [vmem:[#allocation258_spill] sm:$0xff] %v10823_v34 }
 0x266   : > { %14434 = vst [vmem:[#allocation254_spill] sm:$0xff] %v10784_v26  ;;  %v10790_v28 = vpop.permute.xlu0 %5220  ;;  %v1510_v0 = vpop.f32.mrb[170].mxu0  ;;  %v2522_v58 = vmul.f32 1.442695, %v2315_v11  ;;  %v10817_v26 = vmin.f32 %v2061_v19, 20.0  ;;  %v10821_v55 = vmin.f32 %v2062_v60, 20.0 }
 0x267   : > { %14437 = vst [vmem:[#allocation40_spill] sm:$0xff] %v10790_v28  ;;  %3790 = vrot.lane.b32.xlu1 %v3461_v49, %s8278_s22  ;;  %v1512_v52 = vpop.f32.mrb[171].mxu0  ;;  %v14446_v11 = vld [vmem:[#allocation43_spill] sm:$0xff] }
 0x268   : > { %3792 = vrot.lane.b32.xlu0 %v3462_v35, %s8278_s22  ;;  %7865 = vmatmul.mubr.msk.f32.gmra.mrb[88].mxu1 %vm5692_vm1, %v4072_v45  ;;  %v10807_v52 = vpop.eup %8157  ;;  %14441 = vst [vmem:[#allocation256_spill] sm:$0xff] %v10817_v26  ;;  %14442 = vst [vmem:[#allocation257_spill] sm:$0xff] %v10821_v55  ;;  %8165 = vpow2.f32 %v2522_v58  ;;  %v1809_v58 = vld [vmem:[%s13727_s1 + $0x2a8] sm:$0xff] }
 0x269   : > { %v3735_v49 = vpop.permute.xlu1 %3734  ;;  %6694 = vmatprep.mubr.f32.mxu1 %v14213_v63  ;;  %14439 = vst [vmem:[#allocation42_spill] sm:$0xff] %v10807_v52  ;;  %v10815_v22 = vpop.eup %8159  ;;  %v3463_v19 = vmul.f32 %v10807_v52, %v14446_v11 }
 0x26a   : > { %v4073_v23 = vadd.f32 %v3735_v49, %v9895_v17  ;;  %v3737_v45 = vpop.permute.xlu0 %3736  ;;  %v1515_v35 = vpop.f32.mrb[172].mxu0  ;;  %14440 = vst [vmem:[#allocation255_spill] sm:$0xff] %v10815_v22  ;;  %v2524_v49 = vmul.f32 1.442695, %v2316_v32  ;;  %v10827_v17 = vadd.f32 %v1808_v33, %v1506_v9  ;;  %v2317_v9 = vmul.f32 0.5, %v10817_v26 }
 0x26b   : > { %5266 = vrot.lane.b32.xlu1 %v9893_v56, %s8278_s22  ;;  %v1517_v28 = vpop.f32.mrb[173].mxu0  ;;  %v5967_v56 = vshrl.u32 %v5966_v21, 7  ;;  %v2318_v33 = vmul.f32 0.5, %v10821_v55  ;;  %v1511_v21 = vadd.f32 %v10534_v51, %v1510_v0  ;;  %v1516_v11 = vadd.f32 %v10534_v51, %v1515_v35  ;;  %v1810_v0 = vld [vmem:[%s13727_s1 + $0x2b0] sm:$0xff]  ;;  %v5964_v35 = vld [vmem:[%s13732_s6] sm:$0x3] }
 0x26c   : > { %4502 = vrot.lane.b32.xlu0 %v2665_v1, %s8278_s22  ;;  %7866 = vmatmul.mubr.msk.f32.gmra.mrb[90].mxu1 %vm5692_vm1, %v4073_v23  ;;  %14444 = vst [vmem:[#allocation259_spill] sm:$0xff] %v10827_v17  ;;  %v14447_v28 = vld [vmem:[#allocation162_spill] sm:$0xff]  ;;  %v3464_v1 = vmul.f32 %v10815_v22, %v14449_v59  ;;  %v2063_v23 = vmax.f32 %v10823_v34, -30.0  ;;  %8167 = vpow2.f32 %v2524_v49  ;;  %v2666_v55 = vmul.f32 %v10092_v48, %v10092_v48  ;;  %v14453_v22 = vld [vmem:[#allocation161_spill] sm:$0xff] }
 0x26d   : > { %v10829_v42 = vpop.permute.xlu1 %5226  ;;  %6700 = vmatprep.mubr.f32.mxu1 %v14213_v63  ;;  %v4074_v60 = vadd.f32 %v3737_v45, %v14447_v28  ;;  %v2064_v45 = vmax.f32 %v10827_v17, -30.0  ;;  %v5968_v59 = vsub.s32 0, %v5967_v56  ;;  %v5972_v26 = vsub.s32 1, %v5967_v56 }
 0x26e   : > { %14445 = vst [vmem:[#allocation260_spill] sm:$0xff] %v10829_v42  ;;  %v10835_v6 = vpop.permute.xlu0 %5224  ;;  %v1520_v38 = vpop.f32.mrb[174].mxu0  ;;  %v2528_v12 = vmul.f32 1.442695, %v2318_v33  ;;  %v10867_v41 = vmin.f32 %v2063_v23, 20.0  ;;  %v14460_v33 = vld [vmem:[#allocation167_spill] sm:$0xff] }
 0x26f   : > { %14448 = vst [vmem:[#allocation43_spill] sm:$0xff] %v10835_v6  ;;  %3794 = vrot.lane.b32.xlu1 %v3463_v19, %s8278_s22  ;;  %v1522_v32 = vpop.f32.mrb[175].mxu0  ;;  %v2526_v6 = vmul.f32 1.442695, %v2317_v9  ;;  %v10873_v48 = vmin.f32 %v2064_v45, 20.0  ;;  %v14459_v9 = vld [vmem:[#allocation46_spill] sm:$0xff] }
 0x270   : > { %3796 = vrot.lane.b32.xlu0 %v3464_v1, %s8278_s22  ;;  %7867 = vmatmul.mubr.msk.f32.gmra.mrb[92].mxu1 %vm5692_vm1, %v4074_v60  ;;  %v10852_v32 = vpop.eup %8161  ;;  %v14451_v60 = vld [vmem:[#allocation165_spill] sm:$0xff]  ;;  %14454 = vst [vmem:[#allocation161_spill] sm:$0xff] %v10867_v41 }
 0x271   : > { %v3739_v19 = vpop.permute.xlu1 %3738  ;;  %6706 = vmatprep.mubr.f32.mxu1 %v14213_v63  ;;  %14450 = vst [vmem:[#allocation45_spill] sm:$0xff] %v10852_v32  ;;  %v10863_v42 = vpop.eup %8163  ;;  %14456 = vst [vmem:[#allocation263_spill] sm:$0xff] %v10873_v48  ;;  %8169 = vpow2.f32 %v2526_v6 }
 0x272   : > { %v4075_v49 = vadd.f32 %v3739_v19, %v14451_v60  ;;  %v3741_v1 = vpop.permute.xlu0 %3740  ;;  %v1525_v28 = vpop.f32.mrb[176].mxu0  ;;  %14452 = vst [vmem:[#allocation261_spill] sm:$0xff] %v10863_v42  ;;  %v10869_v19 = vadd.f32 %v1809_v58, %v1511_v21  ;;  %v10875_v60 = vadd.f32 %v1810_v0, %v1516_v11  ;;  %v14462_v58 = vld [vmem:[#allocation48_spill] sm:$0xff]  ;;  %v10889_v11 = vrot.slane %v5964_v35, %v5972_v26 }
 0x273   : > { %5268 = vrot.lane.b32.xlu1 %v14453_v22, %s8278_s22  ;;  %v1527_v52 = vpop.f32.mrb[177].mxu0  ;;  %v3465_v22 = vmul.f32 %v10852_v32, %v14459_v9  ;;  %v4076_v23 = vadd.f32 %v3741_v1, %v14460_v33  ;;  %v3466_v45 = vmul.f32 %v10863_v42, %v14462_v58  ;;  %8171 = vpow2.f32 %v2528_v12  ;;  %v10904_v6 = vpop.eup %8165  ;;  %v14464_v33 = vld [vmem:[#allocation169_spill] sm:$0xff] }
 0x274   : > { %14455 = vst [vmem:[#allocation262_spill] sm:$0xff] %v10869_v19  ;;  %4504 = vrot.lane.b32.xlu0 %v2666_v55, %s8278_s22  ;;  %7868 = vmatmul.mubr.msk.f32.gmra.mrb[94].mxu1 %vm5692_vm1, %v4075_v49  ;;  %14457 = vst [vmem:[#allocation264_spill] sm:$0xff] %v10875_v60  ;;  %v10881_v52 = vrot.slane %v5964_v35, %v5968_v59  ;;  %v2319_v59 = vmul.f32 0.5, %v10867_v41  ;;  %v2065_v49 = vmax.f32 %v10869_v19, -30.0  ;;  %v2320_v12 = vmul.f32 0.5, %v10873_v48 }
 0x275   : > { %v10877_v56 = vpop.permute.xlu1 %5230  ;;  %6712 = vmatprep.mubr.f32.mxu1 %v14213_v63  ;;  %v1521_v9 = vadd.f32 %v10534_v51, %v1520_v38  ;;  %14463 = vst [vmem:[#allocation48_spill] sm:$0xff] %v10904_v6  ;;  %v2066_v26 = vmax.f32 %v10875_v60, -30.0  ;;  %v1811_v38 = vld [vmem:[%s13727_s1 + $0x2b8] sm:$0xff]  ;;  %v1526_v35 = vadd.f32 %v10534_v51, %v1525_v28  ;;  %v2667_v28 = vmul.f32 %v10133_v14, %v10133_v14 }
 0x276   : > { %14458 = vst [vmem:[#allocation265_spill] sm:$0xff] %v10877_v56  ;;  %v10885_v21 = vpop.permute.xlu0 %5228  ;;  %v1530_v55 = vpop.f32.mrb[178].mxu0  ;;  %v2530_v32 = vmul.f32 1.442695, %v2319_v59  ;;  %v10926_v60 = vmin.f32 %v2065_v49, 20.0  ;;  %v14469_v14 = vld [vmem:[#allocation49_spill] sm:$0xff] }
 0x277   : > { %14461 = vst [vmem:[#allocation46_spill] sm:$0xff] %v10885_v21  ;;  %3798 = vrot.lane.b32.xlu1 %v3465_v22, %s8278_s22  ;;  %v1532_v0 = vpop.f32.mrb[179].mxu0  ;;  %v10921_v21 = vpop.eup %8167  ;;  %v10928_v31 = vadd.f32 %v1811_v38, %v1521_v9  ;;  %v14473_v38 = vld [vmem:[#allocation171_spill] sm:$0xff] }
 0x278   : > { %v6426_v1 = vpop.f32.mrb[0].mxu1  ;;  %3800 = vrot.lane.b32.xlu0 %v3466_v45, %s8278_s22  ;;  %7869 = vmatmul.mubr.msk.f32.gmra.mrb[96].mxu1 %vm5692_vm1, %v4076_v23  ;;  %v1812_v23 = vld [vmem:[%s13727_s1 + $0x2c0] sm:$0xff]  ;;  %14465 = vst [vmem:[#allocation266_spill] sm:$0xff] %v10921_v21  ;;  %8173 = vpow2.f32 %v2530_v32 }
 0x279   : > { %v6427_v22 = vadd.f32 %v6426_v1, %v10881_v52  ;;  %v6428_v58 = vpop.f32.mrb[1].mxu1  ;;  %v3743_v45 = vpop.permute.xlu1 %3742  ;;  %6718 = vmatprep.mubr.f32.mxu1 %v14213_v63  ;;  %v14466_v1 = vld [vmem:[#allocation164_spill] sm:$0xff]  ;;  %14468 = vst [vmem:[#allocation267_spill] sm:$0xff] %v10928_v31 }
 0x27a   : > { %v6429_v0 = vadd.f32 %v6428_v58, %v10889_v11  ;;  %v4077_v48 = vadd.f32 %v3743_v45, %v14464_v33  ;;  %v3745_v41 = vpop.permute.xlu0 %3744  ;;  %v1535_v56 = vpop.f32.mrb[180].mxu0  ;;  %14467 = vst [vmem:[#allocation164_spill] sm:$0xff] %v10926_v60  ;;  %v2532_v45 = vmul.f32 1.442695, %v2320_v12  ;;  %v10936_v33 = vmin.f32 %v2066_v26, 20.0  ;;  %v14475_v12 = vld [vmem:[#allocation51_spill] sm:$0xff] }
 0x27b   : > { %7193 = vst [vmem:[%s10900_s12] sm:$0xff] %v6427_v22  ;;  %5270 = vrot.lane.b32.xlu1 %v14466_v1, %s8278_s22  ;;  %v1537_v42 = vpop.f32.mrb[181].mxu0  ;;  %v3467_v22 = vmul.f32 %v10904_v6, %v14469_v14  ;;  %v3468_v26 = vmul.f32 %v10921_v21, %v14475_v12  ;;  %v2067_v14 = vmax.f32 %v10928_v31, -30.0 }
 0x27c   : > { %7194 = vst.msk [vmem:[%s10900_s12 + $0x8] sm:$0xff] %vm634_vm0, %v6429_v0  ;;  %v6432_v58 = vpop.f32.mrb[2].mxu1  ;;  %4506 = vrot.lane.b32.xlu0 %v2667_v28, %s8278_s22  ;;  %7870 = vmatmul.mubr.msk.f32.gmra.mrb[98].mxu1 %vm5692_vm1, %v4077_v48  ;;  %14470 = vst [vmem:[#allocation49_spill] sm:$0xff] %v10936_v33  ;;  %v10938_v42 = vadd.f32 %v1812_v23, %v1526_v35  ;;  %v4078_v0 = vadd.f32 %v3745_v41, %v14473_v38  ;;  %v1813_v41 = vld [vmem:[%s13727_s1 + $0x2c8] sm:$0xff]  ;;  %8175 = vpow2.f32 %v2532_v45 }
 0x27d   : > { %v6433_v59 = vadd.f32 %v6432_v58, %v10881_v52  ;;  %v6434_v49 = vpop.f32.mrb[3].mxu1  ;;  %v10941_v9 = vpop.permute.xlu1 %5234  ;;  %6724 = vmatprep.mubr.f32.mxu1 %v14213_v63  ;;  %v1531_v35 = vadd.f32 %v10534_v51, %v1530_v55  ;;  %v2321_v58 = vmul.f32 0.5, %v10926_v60  ;;  %v2668_v45 = vmul.f32 %v10142_v44, %v10142_v44 }
 0x27e   : > { %14471 = vst [vmem:[#allocation268_spill] sm:$0xff] %v10938_v42  ;;  %14472 = vst [vmem:[#allocation269_spill] sm:$0xff] %v10941_v9  ;;  %v6435_v48 = vadd.f32 %v6434_v49, %v10889_v11  ;;  %v10946_v28 = vpop.permute.xlu0 %5232  ;;  %v1540_v1 = vpop.f32.mrb[182].mxu0  ;;  %v2068_v32 = vmax.f32 %v10938_v42, -30.0 }
 0x27f   : > { %14474 = vst [vmem:[#allocation270_spill] sm:$0xff] %v10946_v28  ;;  %7195 = vst [vmem:[%s10900_s12 + $0x10] sm:$0xff] %v6433_v59  ;;  %3802 = vrot.lane.b32.xlu1 %v3467_v22, %s8278_s22  ;;  %v1542_v23 = vpop.f32.mrb[183].mxu0  ;;  %v10962_v55 = vpop.eup %8169  ;;  %v2322_v22 = vmul.f32 0.5, %v10936_v33  ;;  %v1536_v59 = vadd.f32 %v10534_v51, %v1535_v56  ;;  %v10976_v33 = vadd.f32 %v1813_v41, %v1531_v35  ;;  %v14480_v56 = vld [vmem:[#allocation166_spill] sm:$0xff]  ;;  %v10980_v28 = vmin.f32 %v2067_v14, 20.0 }
 0x280   : > { %7196 = vst.msk [vmem:[%s10900_s12 + $0x18] sm:$0xff] %vm634_vm0, %v6435_v48  ;;  %3804 = vrot.lane.b32.xlu0 %v3468_v26, %s8278_s22  ;;  %7871 = vmatmul.mubr.msk.f32.gmra.mrb[100].mxu1 %vm5692_vm1, %v4078_v0  ;;  %14476 = vst [vmem:[#allocation51_spill] sm:$0xff] %v10962_v55  ;;  %v10968_v12 = vpop.eup %8171  ;;  %v1814_v48 = vld [vmem:[%s13727_s1 + $0x2d0] sm:$0xff]  ;;  %v14478_v26 = vld [vmem:[#allocation173_spill] sm:$0xff]  ;;  %v2534_v9 = vmul.f32 1.442695, %v2321_v58 }
 0x281   : > { %v3747_v49 = vpop.permute.xlu1 %3746  ;;  %6730 = vmatprep.mubr.f32.mxu1 %v14213_v63  ;;  %14477 = vst [vmem:[#allocation271_spill] sm:$0xff] %v10968_v12  ;;  %14479 = vst [vmem:[#allocation272_spill] sm:$0xff] %v10976_v33  ;;  %v2536_v6 = vmul.f32 1.442695, %v2322_v22  ;;  %v10986_v44 = vmin.f32 %v2068_v32, 20.0  ;;  %v10988_v35 = vadd.f32 %v1814_v48, %v1536_v59  ;;  %v14486_v14 = vld [vmem:[#allocation175_spill] sm:$0xff] }
 0x282   : > { %v4079_v0 = vadd.f32 %v3747_v49, %v14478_v26  ;;  %v3749_v23 = vpop.permute.xlu0 %3748  ;;  %v1545_v38 = vpop.f32.mrb[184].mxu0  ;;  %14481 = vst [vmem:[#allocation166_spill] sm:$0xff] %v10980_v28  ;;  %v14482_v49 = vld [vmem:[#allocation52_spill] sm:$0xff]  ;;  %v14488_v22 = vld [vmem:[#allocation54_spill] sm:$0xff]  ;;  %v2069_v59 = vmax.f32 %v10976_v33, -30.0  ;;  %8177 = vpow2.f32 %v2534_v9 }
 0x283   : > { %5272 = vrot.lane.b32.xlu1 %v14480_v56, %s8278_s22  ;;  %v1547_v60 = vpop.f32.mrb[185].mxu0  ;;  %v3469_v26 = vmul.f32 %v10962_v55, %v14482_v49  ;;  %14483 = vst [vmem:[#allocation52_spill] sm:$0xff] %v10986_v44  ;;  %14484 = vst [vmem:[#allocation273_spill] sm:$0xff] %v10988_v35  ;;  %v3470_v32 = vmul.f32 %v10968_v12, %v14488_v22  ;;  %8179 = vpow2.f32 %v2536_v6  ;;  %v2070_v9 = vmax.f32 %v10988_v35, -30.0  ;;  %v14494_v55 = vld [vmem:[#allocation6_spill] sm:$0xff] }
 0x284   : > { %v6438_v21 = vpop.f32.mrb[4].mxu1  ;;  %4508 = vrot.lane.b32.xlu0 %v2668_v45, %s8278_s22  ;;  %7872 = vmatmul.mubr.msk.f32.gmra.mrb[102].mxu1 %vm5692_vm1, %v4079_v0  ;;  %v4080_v45 = vadd.f32 %v3749_v23, %v14486_v14  ;;  %v1815_v23 = vld [vmem:[%s13727_s1 + $0x2d8] sm:$0xff]  ;;  %v11028_v12 = vmin.f32 %v2069_v59, 20.0 }
 0x285   : > { %v6439_v41 = vadd.f32 %v6438_v21, %v10881_v52  ;;  %v6440_v60 = vpop.f32.mrb[5].mxu1  ;;  %v10991_v58 = vpop.permute.xlu1 %5238  ;;  %6736 = vmatprep.mubr.f32.mxu1 %v14213_v63  ;;  %v1541_v21 = vadd.f32 %v10534_v51, %v1540_v1  ;;  %v2324_v1 = vmul.f32 0.5, %v10986_v44 }
 0x286   : > { %14485 = vst [vmem:[#allocation274_spill] sm:$0xff] %v10991_v58  ;;  %v6441_v0 = vadd.f32 %v6440_v60, %v10889_v11  ;;  %v10996_v56 = vpop.permute.xlu0 %5236  ;;  %v1550_v49 = vpop.f32.mrb[186].mxu0  ;;  %v2323_v58 = vmul.f32 0.5, %v10980_v28  ;;  %v1546_v60 = vadd.f32 %v10534_v51, %v1545_v38  ;;  %v2669_v28 = vmul.f32 %v10183_v50, %v10183_v50  ;;  %14492 = vst [vmem:[#allocation277_spill] sm:$0xff] %v11028_v12 }
 0x287   : > { %14487 = vst [vmem:[#allocation275_spill] sm:$0xff] %v10996_v56  ;;  %7197 = vst [vmem:[%s10900_s12 + $0x20] sm:$0xff] %v6439_v41  ;;  %3806 = vrot.lane.b32.xlu1 %v3469_v26, %s8278_s22  ;;  %v1552_v48 = vpop.f32.mrb[187].mxu0  ;;  %v1816_v26 = vld [vmem:[%s13727_s1 + $0x2e0] sm:$0xff]  ;;  %v2540_v50 = vmul.f32 1.442695, %v2324_v1 }
 0x288   : > { %7198 = vst.msk [vmem:[%s10900_s12 + $0x28] sm:$0xff] %vm634_vm0, %v6441_v0  ;;  %v6444_v22 = vpop.f32.mrb[6].mxu1  ;;  %3808 = vrot.lane.b32.xlu0 %v3470_v32, %s8278_s22  ;;  %7873 = vmatmul.mubr.msk.f32.gmra.mrb[104].mxu1 %vm5692_vm1, %v4080_v45  ;;  %v11020_v0 = vpop.eup %8173  ;;  %v14490_v45 = vld [vmem:[#allocation177_spill] sm:$0xff]  ;;  %v2538_v33 = vmul.f32 1.442695, %v2323_v58 }
 0x289   : > { %v6445_v41 = vadd.f32 %v6444_v22, %v10881_v52  ;;  %v6446_v38 = vpop.f32.mrb[7].mxu1  ;;  %v3751_v48 = vpop.permute.xlu1 %3750  ;;  %6742 = vmatprep.mubr.f32.mxu1 %v14213_v63  ;;  %14489 = vst [vmem:[#allocation54_spill] sm:$0xff] %v11020_v0  ;;  %v11030_v22 = vadd.f32 %v1815_v23, %v1541_v21  ;;  %v14498_v21 = vld [vmem:[#allocation55_spill] sm:$0xff] }
 0x28a   : > { %v6447_v6 = vadd.f32 %v6446_v38, %v10889_v11  ;;  %v4081_v32 = vadd.f32 %v3751_v48, %v14490_v45  ;;  %v3753_v14 = vpop.permute.xlu0 %3752  ;;  %v1555_v44 = vpop.f32.mrb[188].mxu0  ;;  %v11035_v38 = vadd.f32 %v1816_v26, %v1546_v60  ;;  %v11041_v48 = vmin.f32 %v2070_v9, 20.0  ;;  %v14501_v26 = vld [vmem:[#allocation57_spill] sm:$0xff] }
 0x28b   : > { %v11026_v56 = vpop.eup %8175  ;;  %14493 = vst [vmem:[#allocation278_spill] sm:$0xff] %v11030_v22  ;;  %7199 = vst [vmem:[%s10900_s12 + $0x30] sm:$0xff] %v6445_v41  ;;  %5274 = vrot.lane.b32.xlu1 %v14494_v55, %s8278_s22  ;;  %v1557_v35 = vpop.f32.mrb[189].mxu0  ;;  %v3471_v23 = vmul.f32 %v11020_v0, %v14498_v21  ;;  %v14499_v55 = vld [vmem:[#allocation179_spill] sm:$0xff]  ;;  %v2325_v41 = vmul.f32 0.5, %v11028_v12  ;;  %v2071_v1 = vmax.f32 %v11030_v22, -30.0  ;;  %v1551_v9 = vadd.f32 %v10534_v51, %v1550_v49 }
 0x28c   : > { %14491 = vst [vmem:[#allocation276_spill] sm:$0xff] %v11026_v56  ;;  %14495 = vst [vmem:[#allocation6_spill] sm:$0xff] %v11035_v38  ;;  %4510 = vrot.lane.b32.xlu0 %v2669_v28, %s8278_s22  ;;  %7874 = vmatmul.mubr.msk.f32.gmra.mrb[106].mxu1 %vm5692_vm1, %v4081_v32  ;;  %v4082_v35 = vadd.f32 %v3753_v14, %v14499_v55  ;;  %v3472_v28 = vmul.f32 %v11026_v56, %v14501_v26  ;;  %8181 = vpow2.f32 %v2538_v33  ;;  %v1817_v14 = vld [vmem:[%s13727_s1 + $0x2e8] sm:$0xff]  ;;  %v11067_v55 = vpop.eup %8177  ;;  %v14507_v0 = vld [vmem:[#allocation170_spill] sm:$0xff] }
 0x28d   : > { %7200 = vst.msk [vmem:[%s10900_s12 + $0x38] sm:$0xff] %vm634_vm0, %v6447_v6  ;;  %14496 = vst [vmem:[#allocation279_spill] sm:$0xff] %v11041_v48  ;;  %v11043_v59 = vpop.permute.xlu1 %5242  ;;  %6748 = vmatprep.mubr.f32.mxu1 %v14213_v63  ;;  %v2072_v32 = vmax.f32 %v11035_v38, -30.0  ;;  %8183 = vpow2.f32 %v2540_v50  ;;  %v2326_v26 = vmul.f32 0.5, %v11041_v48  ;;  %v1556_v49 = vadd.f32 %v10534_v51, %v1555_v44  ;;  %v11076_v12 = vpop.eup %8179 }
 0x28e   : > { %14497 = vst [vmem:[#allocation280_spill] sm:$0xff] %v11043_v59  ;;  %v11049_v58 = vpop.permute.xlu0 %5240  ;;  %v1560_v60 = vpop.f32.mrb[190].mxu0  ;;  %14502 = vst [vmem:[#allocation57_spill] sm:$0xff] %v11067_v55  ;;  %v2542_v59 = vmul.f32 1.442695, %v2325_v41  ;;  %v11078_v56 = vmin.f32 %v2071_v1, 20.0 }
 0x28f   : > { %14500 = vst [vmem:[#allocation55_spill] sm:$0xff] %v11049_v58  ;;  %3810 = vrot.lane.b32.xlu1 %v3471_v23, %s8278_s22  ;;  %v1562_v6 = vpop.f32.mrb[191].mxu0  ;;  %14504 = vst [vmem:[#allocation281_spill] sm:$0xff] %v11076_v12  ;;  %v11080_v58 = vadd.f32 %v1817_v14, %v1551_v9 }
 0x290   : > { %v6450_v21 = vpop.f32.mrb[8].mxu1  ;;  %3812 = vrot.lane.b32.xlu0 %v3472_v28, %s8278_s22  ;;  %7875 = vmatmul.mubr.msk.f32.gmra.mrb[108].mxu1 %vm5692_vm1, %v4082_v35  ;;  %v1818_v28 = vld [vmem:[%s13727_s1 + $0x2f0] sm:$0xff]  ;;  %v14503_v35 = vld [vmem:[#allocation181_spill] sm:$0xff]  ;;  %14505 = vst [vmem:[#allocation282_spill] sm:$0xff] %v11078_v56  ;;  %8185 = vpow2.f32 %v2542_v59 }
 0x291   : > { %v6451_v23 = vadd.f32 %v6450_v21, %v10881_v52  ;;  %v6452_v33 = vpop.f32.mrb[9].mxu1  ;;  %v3755_v6 = vpop.permute.xlu1 %3754  ;;  %6754 = vmatprep.mubr.f32.mxu1 %v14213_v63  ;;  %v2670_v21 = vmul.f32 %v10192_v54, %v10192_v54  ;;  %14506 = vst [vmem:[#allocation283_spill] sm:$0xff] %v11080_v58  ;;  %v2544_v54 = vmul.f32 1.442695, %v2326_v26  ;;  %v11091_v41 = vadd.f32 %v1818_v28, %v1556_v49  ;;  %v14514_v49 = vld [vmem:[#allocation60_spill] sm:$0xff] }
 0x292   : > { %v6453_v50 = vadd.f32 %v6452_v33, %v10889_v11  ;;  %v4083_v45 = vadd.f32 %v3755_v6, %v14503_v35  ;;  %v3757_v48 = vpop.permute.xlu0 %3756  ;;  %v1565_v44 = vpop.f32.mrb[192].mxu0  ;;  %v11085_v33 = vmin.f32 %v2072_v32, 20.0  ;;  %v14512_v32 = vld [vmem:[#allocation182_spill] sm:$0xff]  ;;  %v3474_v28 = vmul.f32 %v11076_v12, %v14514_v49  ;;  %v14516_v49 = vld [vmem:[#allocation184_spill] sm:$0xff] }
 0x293   : > { %7201 = vst [vmem:[%s10900_s12 + $0x40] sm:$0xff] %v6451_v23  ;;  %5276 = vrot.lane.b32.xlu1 %v14507_v0, %s8278_s22  ;;  %v1567_v38 = vpop.f32.mrb[193].mxu0  ;;  %14509 = vst [vmem:[#allocation284_spill] sm:$0xff] %v11091_v41  ;;  %v14511_v0 = vld [vmem:[#allocation58_spill] sm:$0xff]  ;;  %v4084_v23 = vadd.f32 %v3757_v48, %v14512_v32  ;;  %8187 = vpow2.f32 %v2544_v54  ;;  %v2074_v59 = vmax.f32 %v11091_v41, -30.0  ;;  %v2671_v54 = vmul.f32 %v10233_v30, %v10233_v30 }
 0x294   : > { %14508 = vst [vmem:[#allocation170_spill] sm:$0xff] %v11085_v33  ;;  %7202 = vst.msk [vmem:[%s10900_s12 + $0x48] sm:$0xff] %vm634_vm0, %v6453_v50  ;;  %v6456_v6 = vpop.f32.mrb[10].mxu1  ;;  %4512 = vrot.lane.b32.xlu0 %v2670_v21, %s8278_s22  ;;  %7876 = vmatmul.mubr.msk.f32.gmra.mrb[110].mxu1 %vm5692_vm1, %v4083_v45  ;;  %v3473_v38 = vmul.f32 %v11067_v55, %v14511_v0  ;;  %v2327_v21 = vmul.f32 0.5, %v11078_v56  ;;  %v1561_v0 = vadd.f32 %v10534_v51, %v1560_v60  ;;  %v14520_v56 = vld [vmem:[#allocation8_spill] sm:$0xff] }
 0x295   : > { %v6457_v1 = vadd.f32 %v6456_v6, %v10881_v52  ;;  %v6458_v9 = vpop.f32.mrb[11].mxu1  ;;  %v11094_v14 = vpop.permute.xlu1 %5246  ;;  %6760 = vmatprep.mubr.f32.mxu1 %v14213_v63  ;;  %v2073_v6 = vmax.f32 %v11080_v58, -30.0  ;;  %v2328_v48 = vmul.f32 0.5, %v11085_v33  ;;  %v1566_v60 = vadd.f32 %v10534_v51, %v1565_v44 }
 0x296   : > { %14510 = vst [vmem:[#allocation285_spill] sm:$0xff] %v11094_v14  ;;  %v6459_v50 = vadd.f32 %v6458_v9, %v10889_v11  ;;  %v11101_v45 = vpop.permute.xlu0 %5244  ;;  %v1570_v26 = vpop.f32.mrb[194].mxu0  ;;  %v1819_v9 = vld [vmem:[%s13727_s1 + $0x2f8] sm:$0xff]  ;;  %v2546_v33 = vmul.f32 1.442695, %v2327_v21 }
 0x297   : > { %14513 = vst [vmem:[#allocation58_spill] sm:$0xff] %v11101_v45  ;;  %7203 = vst [vmem:[%s10900_s12 + $0x50] sm:$0xff] %v6457_v1  ;;  %3814 = vrot.lane.b32.xlu1 %v3473_v38, %s8278_s22  ;;  %v1572_v35 = vpop.f32.mrb[195].mxu0  ;;  %v1820_v38 = vld [vmem:[%s13727_s1 + $0x300] sm:$0xff]  ;;  %v11131_v51 = vmin.f32 %v2073_v6, 20.0  ;;  %v11133_v44 = vadd.f32 %v1819_v9, %v1561_v0  ;;  %v14524_v9 = vld [vmem:[#allocation61_spill] sm:$0xff] }
 0x298   : > { %7204 = vst.msk [vmem:[%s10900_s12 + $0x58] sm:$0xff] %vm634_vm0, %v6459_v50  ;;  %3816 = vrot.lane.b32.xlu0 %v3474_v28, %s8278_s22  ;;  %7877 = vmatmul.mubr.msk.f32.gmra.mrb[112].mxu1 %vm5692_vm1, %v4084_v23  ;;  %v11121_v35 = vpop.eup %8181  ;;  %v2548_v12 = vmul.f32 1.442695, %v2328_v48  ;;  %v11141_v30 = vadd.f32 %v1820_v38, %v1566_v60  ;;  %v14527_v38 = vld [vmem:[#allocation62_spill] sm:$0xff]  ;;  %8189 = vpow2.f32 %v2546_v33  ;;  %v1821_v33 = vld [vmem:[%s13727_s1 + $0x308] sm:$0xff] }
 0x299   : > { %v3759_v1 = vpop.permute.xlu1 %3758  ;;  %6766 = vmatprep.mubr.f32.mxu1 %v14213_v63  ;;  %14515 = vst [vmem:[#allocation60_spill] sm:$0xff] %v11121_v35  ;;  %v11129_v23 = vpop.eup %8183  ;;  %14518 = vst [vmem:[#allocation287_spill] sm:$0xff] %v11131_v51 }
 0x29a   : > { %v4085_v50 = vadd.f32 %v3759_v1, %v14516_v49  ;;  %v3761_v32 = vpop.permute.xlu0 %3760  ;;  %v1575_v28 = vpop.f32.mrb[196].mxu0  ;;  %14517 = vst [vmem:[#allocation286_spill] sm:$0xff] %v11129_v23  ;;  %14519 = vst [vmem:[#allocation288_spill] sm:$0xff] %v11133_v44  ;;  %v11139_v1 = vmin.f32 %v2074_v59, 20.0  ;;  %v2075_v49 = vmax.f32 %v11133_v44, -30.0  ;;  %8191 = vpow2.f32 %v2548_v12 }
 0x29b   : > { %5278 = vrot.lane.b32.xlu1 %v14520_v56, %s8278_s22  ;;  %v1577_v14 = vpop.f32.mrb[197].mxu0  ;;  %14522 = vst [vmem:[#allocation289_spill] sm:$0xff] %v11141_v30  ;;  %v3475_v56 = vmul.f32 %v11121_v35, %v14524_v9  ;;  %v11160_v9 = vld [vmem:[%s13730_s4] ss:$0 sm:$0xff] }
 0x29c   : > { %v6462_v45 = vpop.f32.mrb[12].mxu1  ;;  %4514 = vrot.lane.b32.xlu0 %v2671_v54, %s8278_s22  ;;  %7878 = vmatmul.mubr.msk.f32.gmra.mrb[114].mxu1 %vm5692_vm1, %v4085_v50  ;;  %14521 = vst [vmem:[#allocation8_spill] sm:$0xff] %v11139_v1  ;;  %v14525_v14 = vld [vmem:[#allocation186_spill] sm:$0xff]  ;;  %v3476_v54 = vmul.f32 %v11129_v23, %v14527_v38  ;;  %v1576_v12 = vadd.f32 %v11160_v9, %v1575_v28  ;;  %v14529_v23 = vld [vmem:[#allocation16_spill] sm:$0xff] }
 0x29d   : > { %v6463_v21 = vadd.f32 %v6462_v45, %v10881_v52  ;;  %v6464_v6 = vpop.f32.mrb[13].mxu1  ;;  %v11144_v0 = vpop.permute.xlu1 %5250  ;;  %6772 = vmatprep.mubr.f32.mxu1 %v14213_v63  ;;  %v4086_v48 = vadd.f32 %v3761_v32, %v14525_v14  ;;  %v2329_v45 = vmul.f32 0.5, %v11131_v51  ;;  %v1571_v32 = vadd.f32 %v11160_v9, %v1570_v26 }
 0x29e   : > { %14523 = vst [vmem:[#allocation290_spill] sm:$0xff] %v11144_v0  ;;  %v6465_v50 = vadd.f32 %v6464_v6, %v10889_v11  ;;  %v11151_v59 = vpop.permute.xlu0 %5248  ;;  %v1580_v60 = vpop.f32.mrb[198].mxu0  ;;  %v2330_v26 = vmul.f32 0.5, %v11139_v1  ;;  %v2672_v28 = vmul.f32 %v14529_v23, %v14529_v23  ;;  %v14534_v23 = vld [vmem:[#allocation63_spill] sm:$0xff] }
 0x29f   : > { %14526 = vst [vmem:[#allocation61_spill] sm:$0xff] %v11151_v59  ;;  %7205 = vst [vmem:[%s10900_s12 + $0x60] sm:$0xff] %v6463_v21  ;;  %3818 = vrot.lane.b32.xlu1 %v3475_v56, %s8278_s22  ;;  %v1582_v6 = vpop.f32.mrb[199].mxu0  ;;  %v11172_v14 = vpop.eup %8185  ;;  %v2076_v21 = vmax.f32 %v11141_v30, -30.0  ;;  %v11188_v59 = vmin.f32 %v2075_v49, 20.0  ;;  %v11190_v55 = vadd.f32 %v1821_v33, %v1571_v32  ;;  %v14533_v30 = vld [vmem:[#allocation174_spill] sm:$0xff] }
 0x2a0   : > { %7206 = vst.msk [vmem:[%s10900_s12 + $0x68] sm:$0xff] %vm634_vm0, %v6465_v50  ;;  %v6468_v38 = vpop.f32.mrb[14].mxu1  ;;  %3820 = vrot.lane.b32.xlu0 %v3476_v54, %s8278_s22  ;;  %7879 = vmatmul.mubr.msk.f32.gmra.mrb[116].mxu1 %vm5692_vm1, %v4086_v48  ;;  %14528 = vst [vmem:[#allocation62_spill] sm:$0xff] %v11172_v14  ;;  %v1822_v48 = vld [vmem:[%s13727_s1 + $0x310] sm:$0xff]  ;;  %v11186_v35 = vpop.eup %8187 }
 0x2a1   : > { %v6469_v56 = vadd.f32 %v6468_v38, %v10881_v52  ;;  %v6470_v6 = vpop.f32.mrb[15].mxu1  ;;  %v3763_v51 = vpop.permute.xlu1 %3762  ;;  %6778 = vmatprep.mubr.f32.mxu1 %v14213_v63  ;;  %14530 = vst [vmem:[#allocation16_spill] sm:$0xff] %v11186_v35  ;;  %v2550_v38 = vmul.f32 1.442695, %v2329_v45  ;;  %14531 = vst [vmem:[#allocation291_spill] sm:$0xff] %v11188_v59  ;;  %v11201_v49 = vmin.f32 %v2076_v21, 20.0  ;;  %v11203_v32 = vadd.f32 %v1822_v48, %v1576_v12 }
 0x2a2   : > { %v6471_v50 = vadd.f32 %v6470_v6, %v10889_v11  ;;  %v4087_v54 = vadd.f32 %v3763_v51, %v10248_v27  ;;  %v3765_v1 = vpop.permute.xlu0 %3764  ;;  %v1585_v0 = vpop.f32.mrb[200].mxu0  ;;  %14532 = vst [vmem:[#allocation292_spill] sm:$0xff] %v11190_v55  ;;  %v3477_v6 = vmul.f32 %v11172_v14, %v14534_v23  ;;  %v2552_v45 = vmul.f32 1.442695, %v2330_v26  ;;  %v14540_v23 = vld [vmem:[#allocation66_spill] sm:$0xff] }
 0x2a3   : > { %7207 = vst [vmem:[%s10900_s12 + $0x70] sm:$0xff] %v6469_v56  ;;  %5280 = vrot.lane.b32.xlu1 %v14533_v30, %s8278_s22  ;;  %v1587_v44 = vpop.f32.mrb[201].mxu0  ;;  %14535 = vst [vmem:[#allocation174_spill] sm:$0xff] %v11201_v49  ;;  %v14538_v56 = vld [vmem:[#allocation191_spill] sm:$0xff]  ;;  %v3478_v21 = vmul.f32 %v11186_v35, %v14540_v23  ;;  %8193 = vpow2.f32 %v2550_v38  ;;  %v2331_v12 = vmul.f32 0.5, %v11188_v59  ;;  %v2077_v48 = vmax.f32 %v11190_v55, -30.0  ;;  %v11227_v38 = vpop.eup %8189 }
 0x2a4   : > { %7208 = vst.msk [vmem:[%s10900_s12 + $0x78] sm:$0xff] %vm634_vm0, %v6471_v50  ;;  %v6474_v51 = vpop.f32.mrb[16].mxu1  ;;  %4516 = vrot.lane.b32.xlu0 %v2672_v28, %s8278_s22  ;;  %7880 = vmatmul.mubr.msk.f32.gmra.mrb[118].mxu1 %vm5692_vm1, %v4087_v54  ;;  %14536 = vst [vmem:[#allocation63_spill] sm:$0xff] %v11203_v32  ;;  %v4088_v50 = vadd.f32 %v3765_v1, %v14538_v56  ;;  %v1823_v1 = vld [vmem:[%s13727_s1 + $0x318] sm:$0xff]  ;;  %8195 = vpow2.f32 %v2552_v45  ;;  %v2673_v56 = vmul.f32 %v10283_v5, %v10283_v5 }
 0x2a5   : > { %v6475_v33 = vadd.f32 %v6474_v51, %v10881_v52  ;;  %v6476_v30 = vpop.f32.mrb[17].mxu1  ;;  %v11206_v44 = vpop.permute.xlu1 %5252  ;;  %6784 = vmatprep.mubr.f32.mxu1 %v14213_v63  ;;  %v1581_v51 = vadd.f32 %v11160_v9, %v1580_v60  ;;  %14541 = vst [vmem:[#allocation66_spill] sm:$0xff] %v11227_v38  ;;  %v2332_v60 = vmul.f32 0.5, %v11201_v49  ;;  %v2554_v35 = vmul.f32 1.442695, %v2331_v12 }
 0x2a6   : > { %14537 = vst [vmem:[#allocation293_spill] sm:$0xff] %v11206_v44  ;;  %v6477_v54 = vadd.f32 %v6476_v30, %v10889_v11  ;;  %v11211_v28 = vpop.permute.xlu0 %4488  ;;  %v1590_v26 = vpop.f32.mrb[202].mxu0  ;;  %v11243_v14 = vmin.f32 %v2077_v48, 20.0 }
 0x2a7   : > { %14539 = vst [vmem:[#allocation294_spill] sm:$0xff] %v11211_v28  ;;  %7209 = vst [vmem:[%s10900_s12 + $0x80] sm:$0xff] %v6475_v33  ;;  %3822 = vrot.lane.b32.xlu1 %v3477_v6, %s8278_s22  ;;  %v1592_v27 = vpop.f32.mrb[203].mxu0  ;;  %v2078_v33 = vmax.f32 %v11203_v32, -30.0  ;;  %v11245_v44 = vadd.f32 %v1823_v1, %v1581_v51  ;;  %v14545_v28 = vld [vmem:[#allocation10_spill] sm:$0xff]  ;;  %8197 = vpow2.f32 %v2554_v35 }
 0x2a8   : > { %7210 = vst.msk [vmem:[%s10900_s12 + $0x88] sm:$0xff] %vm634_vm0, %v6477_v54  ;;  %v6480_v30 = vpop.f32.mrb[18].mxu1  ;;  %3824 = vrot.lane.b32.xlu0 %v3478_v21, %s8278_s22  ;;  %7881 = vmatmul.mubr.msk.f32.gmra.mrb[120].mxu1 %vm5692_vm1, %v4088_v50  ;;  %v1586_v27 = vadd.f32 %v11160_v9, %v1585_v0  ;;  %v11233_v54 = vpop.eup %8191  ;;  %v1824_v50 = vld [vmem:[%s13727_s1 + $0x320] sm:$0xff]  ;;  %14543 = vst [vmem:[#allocation296_spill] sm:$0xff] %v11243_v14  ;;  %v2556_v12 = vmul.f32 1.442695, %v2332_v60 }
 0x2a9   : > { %v6482_v6 = vpop.f32.mrb[19].mxu1  ;;  %v3767_v23 = vpop.permute.xlu1 %3766  ;;  %6790 = vmatprep.mubr.f32.mxu1 %v14213_v63  ;;  %14542 = vst [vmem:[#allocation295_spill] sm:$0xff] %v11233_v54  ;;  %v6481_v45 = vadd.f32 %v6480_v30, %v10881_v52  ;;  %14544 = vst [vmem:[#allocation297_spill] sm:$0xff] %v11245_v44  ;;  %v11256_v48 = vmin.f32 %v2078_v33, 20.0 }
 0x2aa   : > { %v6483_v21 = vadd.f32 %v6482_v6, %v10889_v11  ;;  %v4089_v49 = vadd.f32 %v3767_v23, %v10298_v15  ;;  %v3769_v59 = vpop.permute.xlu0 %3768  ;;  %v1595_v0 = vpop.f32.mrb[204].mxu0  ;;  %v14546_v6 = vld [vmem:[#allocation67_spill] sm:$0xff]  ;;  %v11258_v51 = vadd.f32 %v1824_v50, %v1586_v27  ;;  %v2333_v27 = vmul.f32 0.5, %v11243_v14 }
 0x2ab   : > { %5282 = vrot.lane.b32.xlu1 %v14545_v28, %s8278_s22  ;;  %v1597_v32 = vpop.f32.mrb[205].mxu0  ;;  %7211 = vst [vmem:[%s10900_s12 + $0x90] sm:$0xff] %v6481_v45  ;;  %v3479_v5 = vmul.f32 %v11227_v38, %v14546_v6  ;;  %14547 = vst [vmem:[#allocation10_spill] sm:$0xff] %v11256_v48  ;;  %v14549_v45 = vld [vmem:[#allocation68_spill] sm:$0xff]  ;;  %v2079_v50 = vmax.f32 %v11245_v44, -30.0  ;;  %8199 = vpow2.f32 %v2556_v12  ;;  %v14554_v38 = vld [vmem:[#allocation178_spill] sm:$0xff] }
 0x2ac   : > { %7212 = vst.msk [vmem:[%s10900_s12 + $0x98] sm:$0xff] %vm634_vm0, %v6483_v21  ;;  %v6486_v30 = vpop.f32.mrb[20].mxu1  ;;  %4518 = vrot.lane.b32.xlu0 %v2673_v56, %s8278_s22  ;;  %7882 = vmatmul.mubr.msk.f32.gmra.mrb[122].mxu1 %vm5692_vm1, %v4089_v49  ;;  %14548 = vst [vmem:[#allocation67_spill] sm:$0xff] %v11258_v51  ;;  %v4090_v56 = vadd.f32 %v3769_v59, %v10306_v25  ;;  %v3480_v33 = vmul.f32 %v11233_v54, %v14549_v45  ;;  %v1825_v59 = vld [vmem:[%s13727_s1 + $0x328] sm:$0xff]  ;;  %v2558_v25 = vmul.f32 1.442695, %v2333_v27 }
 0x2ad   : > { %v6487_v28 = vadd.f32 %v6486_v30, %v10881_v52  ;;  %v6488_v32 = vpop.f32.mrb[21].mxu1  ;;  %v11261_v1 = vpop.permute.xlu1 %5254  ;;  %6796 = vmatprep.mubr.f32.mxu1 %v14213_v63  ;;  %v1591_v21 = vadd.f32 %v11160_v9, %v1590_v26  ;;  %v2334_v26 = vmul.f32 0.5, %v11256_v48  ;;  %v11298_v15 = vmin.f32 %v2079_v50, 20.0 }
 0x2ae   : > { %v6489_v49 = vadd.f32 %v6488_v32, %v10889_v11  ;;  %v11266_v23 = vpop.permute.xlu0 %4490  ;;  %v1600_v60 = vpop.f32.mrb[206].mxu0  ;;  %8201 = vpow2.f32 %v2558_v25 }
 0x2af   : > { %7213 = vst [vmem:[%s10900_s12 + $0xa0] sm:$0xff] %v6487_v28  ;;  %3826 = vrot.lane.b32.xlu1 %v3479_v5, %s8278_s22  ;;  %v1602_v30 = vpop.f32.mrb[207].mxu0  ;;  %v11282_v35 = vpop.eup %8193  ;;  %v2080_v28 = vmax.f32 %v11258_v51, -30.0  ;;  %v1596_v5 = vadd.f32 %v11160_v9, %v1595_v0  ;;  %v2674_v0 = vmul.f32 %v10292_v43, %v10292_v43  ;;  %14552 = vst [vmem:[#allocation299_spill] sm:$0xff] %v11298_v15  ;;  %v14555_v43 = vld [vmem:[#allocation69_spill] sm:$0xff] }
 0x2b0   : > { %7214 = vst.msk [vmem:[%s10900_s12 + $0xa8] sm:$0xff] %vm634_vm0, %v6489_v49  ;;  %v6492_v6 = vpop.f32.mrb[22].mxu1  ;;  %3828 = vrot.lane.b32.xlu0 %v3480_v33, %s8278_s22  ;;  %7883 = vmatmul.mubr.msk.f32.gmra.mrb[124].mxu1 %vm5692_vm1, %v4090_v56  ;;  %14550 = vst [vmem:[#allocation68_spill] sm:$0xff] %v11282_v35  ;;  %v1826_v49 = vld [vmem:[%s13727_s1 + $0x330] sm:$0xff]  ;;  %v11296_v14 = vpop.eup %8195  ;;  %v11300_v54 = vadd.f32 %v1825_v59, %v1591_v21  ;;  %v2560_v27 = vmul.f32 1.442695, %v2334_v26 }
 0x2b1   : > { %v6494_v32 = vpop.f32.mrb[23].mxu1  ;;  %v3771_v45 = vpop.permute.xlu1 %3770  ;;  %6802 = vmatprep.mubr.f32.mxu1 %v14213_v63  ;;  %v6493_v56 = vadd.f32 %v6492_v6, %v10881_v52  ;;  %14551 = vst [vmem:[#allocation298_spill] sm:$0xff] %v11296_v14  ;;  %v11311_v50 = vmin.f32 %v2080_v28, 20.0  ;;  %v11313_v21 = vadd.f32 %v1826_v49, %v1596_v5  ;;  %v2335_v5 = vmul.f32 0.5, %v11298_v15 }
 0x2b2   : > { %v6495_v12 = vadd.f32 %v6494_v32, %v10889_v11  ;;  %v4091_v33 = vadd.f32 %v3771_v45, %v10348_v2  ;;  %v3773_v30 = vpop.permute.xlu0 %3772  ;;  %v1605_v48 = vpop.f32.mrb[208].mxu0  ;;  %14553 = vst [vmem:[#allocation300_spill] sm:$0xff] %v11300_v54  ;;  %v3481_v45 = vmul.f32 %v11282_v35, %v14555_v43  ;;  %v2081_v49 = vmax.f32 %v11300_v54, -30.0 }
 0x2b3   : > { %5284 = vrot.lane.b32.xlu1 %v14554_v38, %s8278_s22  ;;  %v1607_v6 = vpop.f32.mrb[209].mxu0  ;;  %7215 = vst [vmem:[%s10900_s12 + $0xb0] sm:$0xff] %v6493_v56  ;;  %14556 = vst [vmem:[#allocation178_spill] sm:$0xff] %v11311_v50  ;;  %v11337_v25 = vpop.eup %8197  ;;  %8203 = vpow2.f32 %v2560_v27 }
 0x2b4   : > { %7216 = vst.msk [vmem:[%s10900_s12 + $0xb8] sm:$0xff] %vm634_vm0, %v6495_v12  ;;  %v6498_v32 = vpop.f32.mrb[24].mxu1  ;;  %4520 = vrot.lane.b32.xlu0 %v2674_v0, %s8278_s22  ;;  %7884 = vmatmul.mubr.msk.f32.gmra.mrb[126].mxu1 %vm5692_vm1, %v4091_v33  ;;  %14557 = vst [vmem:[#allocation69_spill] sm:$0xff] %v11313_v21  ;;  %v4092_v12 = vadd.f32 %v3773_v30, %v10356_v53  ;;  %v14560_v6 = vld [vmem:[#allocation72_spill] sm:$0xff]  ;;  %v1827_v30 = vld [vmem:[%s13727_s1 + $0x338] sm:$0xff]  ;;  %v11353_v35 = vmin.f32 %v2081_v49, 20.0 }
 0x2b5   : > { %v6499_v38 = vadd.f32 %v6498_v32, %v10881_v52  ;;  %v6500_v59 = vpop.f32.mrb[25].mxu1  ;;  %v11316_v56 = vpop.permute.xlu1 %5256  ;;  %6808 = vmatprep.mubr.f32.mxu1 %v14213_v63  ;;  %v3482_v28 = vmul.f32 %v11296_v14, %v14560_v6  ;;  %v1601_v32 = vadd.f32 %v11160_v9, %v1600_v60  ;;  %14561 = vst [vmem:[#allocation72_spill] sm:$0xff] %v11337_v25  ;;  %v2336_v60 = vmul.f32 0.5, %v11311_v50  ;;  %v14562_v53 = vld [vmem:[#allocation19_spill] sm:$0xff] }
 0x2b6   : > { %14558 = vst [vmem:[#allocation301_spill] sm:$0xff] %v11316_v56  ;;  %v6501_v33 = vadd.f32 %v6500_v59, %v10889_v11  ;;  %v11321_v0 = vpop.permute.xlu0 %4492  ;;  %v1610_v26 = vpop.f32.mrb[210].mxu0  ;;  %v2562_v14 = vmul.f32 1.442695, %v2335_v5  ;;  %14564 = vst [vmem:[#allocation303_spill] sm:$0xff] %v11353_v35 }
 0x2b7   : > { %14559 = vst [vmem:[#allocation302_spill] sm:$0xff] %v11321_v0  ;;  %7217 = vst [vmem:[%s10900_s12 + $0xc0] sm:$0xff] %v6499_v38  ;;  %3830 = vrot.lane.b32.xlu1 %v3481_v45, %s8278_s22  ;;  %v1612_v43 = vpop.f32.mrb[211].mxu0  ;;  %v2082_v38 = vmax.f32 %v11313_v21, -30.0  ;;  %v1606_v45 = vadd.f32 %v11160_v9, %v1605_v48  ;;  %v2675_v48 = vmul.f32 %v14562_v53, %v14562_v53  ;;  %v11351_v2 = vpop.eup %8199  ;;  %v14566_v0 = vld [vmem:[#allocation12_spill] sm:$0xff]  ;;  %v14567_v53 = vld [vmem:[#allocation73_spill] sm:$0xff] }
 0x2b8   : > { %7218 = vst.msk [vmem:[%s10900_s12 + $0xc8] sm:$0xff] %vm634_vm0, %v6501_v33  ;;  %v6504_v59 = vpop.f32.mrb[26].mxu1  ;;  %3832 = vrot.lane.b32.xlu0 %v3482_v28, %s8278_s22  ;;  %7885 = vmatmul.mubr.msk.f32.gmra.mrb[128].mxu1 %vm5692_vm1, %v4092_v12  ;;  %v1828_v33 = vld [vmem:[%s13727_s1 + $0x340] sm:$0xff]  ;;  %14563 = vst [vmem:[#allocation19_spill] sm:$0xff] %v11351_v2  ;;  %v11355_v56 = vadd.f32 %v1827_v30, %v1601_v32  ;;  %v2564_v5 = vmul.f32 1.442695, %v2336_v60  ;;  %8205 = vpow2.f32 %v2562_v14  ;;  %v11392_v14 = vpop.eup %8201 }
 0x2b9   : > { %v6506_v6 = vpop.f32.mrb[27].mxu1  ;;  %v3775_v43 = vpop.permute.xlu1 %3774  ;;  %6814 = vmatprep.mubr.f32.mxu1 %v14213_v63  ;;  %v6505_v12 = vadd.f32 %v6504_v59, %v10881_v52  ;;  %v11366_v49 = vmin.f32 %v2082_v38, 20.0  ;;  %v11368_v32 = vadd.f32 %v1828_v33, %v1606_v45  ;;  %v2337_v45 = vmul.f32 0.5, %v11353_v35 }
 0x2ba   : > { %v6507_v27 = vadd.f32 %v6506_v6, %v10889_v11  ;;  %v4093_v28 = vadd.f32 %v3775_v43, %v10398_v13  ;;  %v3777_v50 = vpop.permute.xlu0 %3776  ;;  %v1615_v15 = vpop.f32.mrb[212].mxu0  ;;  %14565 = vst [vmem:[#allocation304_spill] sm:$0xff] %v11355_v56  ;;  %v3483_v43 = vmul.f32 %v11337_v25, %v14567_v53  ;;  %v2083_v33 = vmax.f32 %v11355_v56, -30.0 }
 0x2bb   : > { %5286 = vrot.lane.b32.xlu1 %v14566_v0, %s8278_s22  ;;  %v1617_v59 = vpop.f32.mrb[213].mxu0  ;;  %7219 = vst [vmem:[%s10900_s12 + $0xd0] sm:$0xff] %v6505_v12  ;;  %14568 = vst [vmem:[#allocation12_spill] sm:$0xff] %v11366_v49  ;;  %8207 = vpow2.f32 %v2564_v5 }
 0x2bc   : > { %7220 = vst.msk [vmem:[%s10900_s12 + $0xd8] sm:$0xff] %vm634_vm0, %v6507_v27  ;;  %v6510_v6 = vpop.f32.mrb[28].mxu1  ;;  %4522 = vrot.lane.b32.xlu0 %v2675_v48, %s8278_s22  ;;  %7886 = vmatmul.mubr.msk.f32.gmra.mrb[130].mxu1 %vm5692_vm1, %v4093_v28  ;;  %14569 = vst [vmem:[#allocation73_spill] sm:$0xff] %v11368_v32  ;;  %v4094_v27 = vadd.f32 %v3777_v50, %v10406_v10  ;;  %v14572_v59 = vld [vmem:[#allocation74_spill] sm:$0xff]  ;;  %v1829_v50 = vld [vmem:[%s13727_s1 + $0x348] sm:$0xff]  ;;  %v11408_v25 = vmin.f32 %v2083_v33, 20.0 }
 0x2bd   : > { %v6511_v0 = vadd.f32 %v6510_v6, %v10881_v52  ;;  %v6512_v30 = vpop.f32.mrb[29].mxu1  ;;  %v11371_v12 = vpop.permute.xlu1 %5258  ;;  %6820 = vmatprep.mubr.f32.mxu1 %v14213_v63  ;;  %v3484_v38 = vmul.f32 %v11351_v2, %v14572_v59  ;;  %v1611_v6 = vadd.f32 %v11160_v9, %v1610_v26  ;;  %14573 = vst [vmem:[#allocation74_spill] sm:$0xff] %v11392_v14  ;;  %v2338_v26 = vmul.f32 0.5, %v11366_v49  ;;  %v14574_v10 = vld [vmem:[#allocation197_spill] sm:$0xff] }
 0x2be   : > { %14570 = vst [vmem:[#allocation305_spill] sm:$0xff] %v11371_v12  ;;  %v6513_v28 = vadd.f32 %v6512_v30, %v10889_v11  ;;  %v11376_v48 = vpop.permute.xlu0 %4494  ;;  %v1620_v60 = vpop.f32.mrb[214].mxu0  ;;  %v2566_v2 = vmul.f32 1.442695, %v2337_v45  ;;  %14576 = vst [vmem:[#allocation307_spill] sm:$0xff] %v11408_v25 }
 0x2bf   : > { %14571 = vst [vmem:[#allocation306_spill] sm:$0xff] %v11376_v48  ;;  %7221 = vst [vmem:[%s10900_s12 + $0xe0] sm:$0xff] %v6511_v0  ;;  %3834 = vrot.lane.b32.xlu1 %v3483_v43, %s8278_s22  ;;  %v1622_v53 = vpop.f32.mrb[215].mxu0  ;;  %v2084_v0 = vmax.f32 %v11368_v32, -30.0  ;;  %v1616_v43 = vadd.f32 %v11160_v9, %v1615_v15  ;;  %v2676_v15 = vmul.f32 %v14574_v10, %v14574_v10  ;;  %v11406_v13 = vpop.eup %8203  ;;  %v14578_v48 = vld [vmem:[#allocation109_spill] sm:$0xff]  ;;  %v14579_v10 = vld [vmem:[#allocation75_spill] sm:$0xff] }
 0x2c0   : > { %7222 = vst.msk [vmem:[%s10900_s12 + $0xe8] sm:$0xff] %vm634_vm0, %v6513_v28  ;;  %v6516_v30 = vpop.f32.mrb[30].mxu1  ;;  %3836 = vrot.lane.b32.xlu0 %v3484_v38, %s8278_s22  ;;  %7887 = vmatmul.mubr.msk.f32.gmra.mrb[132].mxu1 %vm5692_vm1, %v4094_v27  ;;  %v1830_v28 = vld [vmem:[%s13727_s1 + $0x350] sm:$0xff]  ;;  %14575 = vst [vmem:[#allocation197_spill] sm:$0xff] %v11406_v13  ;;  %v11410_v12 = vadd.f32 %v1829_v50, %v1611_v6  ;;  %v2568_v45 = vmul.f32 1.442695, %v2338_v26  ;;  %8209 = vpow2.f32 %v2566_v2 }
 0x2c1   : > { %v6518_v59 = vpop.f32.mrb[31].mxu1  ;;  %v3779_v53 = vpop.permute.xlu1 %3778  ;;  %6826 = vmatprep.mubr.f32.mxu1 %v14213_v63  ;;  %v6517_v27 = vadd.f32 %v6516_v30, %v10881_v52  ;;  %v11421_v33 = vmin.f32 %v2084_v0, 20.0  ;;  %v11423_v6 = vadd.f32 %v1830_v28, %v1616_v43  ;;  %v2339_v43 = vmul.f32 0.5, %v11408_v25 }
 0x2c2   : > { %v6519_v5 = vadd.f32 %v6518_v59, %v10889_v11  ;;  %v4095_v38 = vadd.f32 %v3779_v53, %v10448_v7  ;;  %v3781_v49 = vpop.permute.xlu0 %3780  ;;  %v1625_v35 = vpop.f32.mrb[216].mxu0  ;;  %14577 = vst [vmem:[#allocation308_spill] sm:$0xff] %v11410_v12  ;;  %v3485_v53 = vmul.f32 %v11392_v14, %v14579_v10  ;;  %v2085_v28 = vmax.f32 %v11410_v12, -30.0 }
 0x2c3   : > { %5288 = vrot.lane.b32.xlu1 %v14578_v48, %s8278_s22  ;;  %v1627_v30 = vpop.f32.mrb[217].mxu0  ;;  %7223 = vst [vmem:[%s10900_s12 + $0xf0] sm:$0xff] %v6517_v27  ;;  %14580 = vst [vmem:[#allocation109_spill] sm:$0xff] %v11421_v33  ;;  %v11447_v2 = vpop.eup %8205  ;;  %8211 = vpow2.f32 %v2568_v45 }
 0x2c4   : > { %7224 = vst.msk [vmem:[%s10900_s12 + $0xf8] sm:$0xff] %vm634_vm0, %v6519_v5  ;;  %v6522_v59 = vpop.f32.mrb[32].mxu1  ;;  %4524 = vrot.lane.b32.xlu0 %v2676_v15, %s8278_s22  ;;  %7888 = vmatmul.mubr.msk.f32.gmra.mrb[134].mxu1 %vm5692_vm1, %v4095_v38  ;;  %14581 = vst [vmem:[#allocation75_spill] sm:$0xff] %v11423_v6  ;;  %v4096_v5 = vadd.f32 %v3781_v49, %v10456_v16  ;;  %v14584_v30 = vld [vmem:[#allocation78_spill] sm:$0xff]  ;;  %v1831_v49 = vld [vmem:[%s13727_s1 + $0x358] sm:$0xff]  ;;  %v11463_v14 = vmin.f32 %v2085_v28, 20.0 }
 0x2c5   : > { %v6523_v48 = vadd.f32 %v6522_v59, %v10881_v52  ;;  %v6524_v50 = vpop.f32.mrb[33].mxu1  ;;  %v11426_v27 = vpop.permute.xlu1 %5260  ;;  %6832 = vmatprep.mubr.f32.mxu1 %v14213_v63  ;;  %v3486_v0 = vmul.f32 %v11406_v13, %v14584_v30  ;;  %v1621_v59 = vadd.f32 %v11160_v9, %v1620_v60  ;;  %14585 = vst [vmem:[#allocation78_spill] sm:$0xff] %v11447_v2  ;;  %v2340_v60 = vmul.f32 0.5, %v11421_v33  ;;  %v14586_v16 = vld [vmem:[#allocation21_spill] sm:$0xff] }
 0x2c6   : > { %14582 = vst [vmem:[#allocation309_spill] sm:$0xff] %v11426_v27  ;;  %v6525_v38 = vadd.f32 %v6524_v50, %v10889_v11  ;;  %v11431_v15 = vpop.permute.xlu0 %4496  ;;  %v1630_v26 = vpop.f32.mrb[218].mxu0  ;;  %v2570_v13 = vmul.f32 1.442695, %v2339_v43  ;;  %14588 = vst [vmem:[#allocation311_spill] sm:$0xff] %v11463_v14 }
 0x2c7   : > { %14583 = vst [vmem:[#allocation310_spill] sm:$0xff] %v11431_v15  ;;  %7225 = vst [vmem:[%s10900_s12 + $0x100] sm:$0xff] %v6523_v48  ;;  %3838 = vrot.lane.b32.xlu1 %v3485_v53, %s8278_s22  ;;  %v1632_v10 = vpop.f32.mrb[219].mxu0  ;;  %v2086_v48 = vmax.f32 %v11423_v6, -30.0  ;;  %v1626_v53 = vadd.f32 %v11160_v9, %v1625_v35  ;;  %v2677_v35 = vmul.f32 %v14586_v16, %v14586_v16  ;;  %v11461_v7 = vpop.eup %8207  ;;  %v14590_v15 = vld [vmem:[#allocation14_spill] sm:$0xff]  ;;  %v14591_v16 = vld [vmem:[#allocation79_spill] sm:$0xff] }
 0x2c8   : > { %7226 = vst.msk [vmem:[%s10900_s12 + $0x108] sm:$0xff] %vm634_vm0, %v6525_v38  ;;  %v6528_v50 = vpop.f32.mrb[34].mxu1  ;;  %3840 = vrot.lane.b32.xlu0 %v3486_v0, %s8278_s22  ;;  %7889 = vmatmul.mubr.msk.f32.gmra.mrb[136].mxu1 %vm5692_vm1, %v4096_v5  ;;  %v1832_v38 = vld [vmem:[%s13727_s1 + $0x360] sm:$0xff]  ;;  %14587 = vst [vmem:[#allocation21_spill] sm:$0xff] %v11461_v7  ;;  %v11465_v27 = vadd.f32 %v1831_v49, %v1621_v59  ;;  %v2572_v43 = vmul.f32 1.442695, %v2340_v60  ;;  %8213 = vpow2.f32 %v2570_v13 }
 0x2c9   : > { %v6530_v30 = vpop.f32.mrb[35].mxu1  ;;  %v3783_v10 = vpop.permute.xlu1 %3782  ;;  %6838 = vmatprep.mubr.f32.mxu1 %v14213_v63  ;;  %v6529_v5 = vadd.f32 %v6528_v50, %v10881_v52  ;;  %v11476_v28 = vmin.f32 %v2086_v48, 20.0  ;;  %v11478_v59 = vadd.f32 %v1832_v38, %v1626_v53  ;;  %v2341_v53 = vmul.f32 0.5, %v11463_v14 }
 0x2ca   : > { %v6531_v45 = vadd.f32 %v6530_v30, %v10889_v11  ;;  %v4097_v0 = vadd.f32 %v3783_v10, %v10500_v57  ;;  %v3785_v33 = vpop.permute.xlu0 %3784  ;;  %v1635_v25 = vpop.f32.mrb[220].mxu0  ;;  %14589 = vst [vmem:[#allocation312_spill] sm:$0xff] %v11465_v27  ;;  %v3487_v10 = vmul.f32 %v11447_v2, %v14591_v16  ;;  %v2087_v38 = vmax.f32 %v11465_v27, -30.0 }
 0x2cb   : > { %5290 = vrot.lane.b32.xlu1 %v14590_v15, %s8278_s22  ;;  %v1637_v50 = vpop.f32.mrb[221].mxu0  ;;  %7227 = vst [vmem:[%s10900_s12 + $0x110] sm:$0xff] %v6529_v5  ;;  %14592 = vst [vmem:[#allocation14_spill] sm:$0xff] %v11476_v28  ;;  %v11502_v13 = vpop.eup %8209  ;;  %8215 = vpow2.f32 %v2572_v43 }
 0x2cc   : > { %7228 = vst.msk [vmem:[%s10900_s12 + $0x118] sm:$0xff] %vm634_vm0, %v6531_v45  ;;  %v6534_v30 = vpop.f32.mrb[36].mxu1  ;;  %4526 = vrot.lane.b32.xlu0 %v2677_v35, %s8278_s22  ;;  %7890 = vmatmul.mubr.msk.f32.gmra.mrb[138].mxu1 %vm5692_vm1, %v4097_v0  ;;  %14593 = vst [vmem:[#allocation79_spill] sm:$0xff] %v11478_v59  ;;  %v4098_v45 = vadd.f32 %v3785_v33, %v10507_v62  ;;  %v14596_v50 = vld [vmem:[#allocation80_spill] sm:$0xff]  ;;  %v1833_v33 = vld [vmem:[%s13727_s1 + $0x368] sm:$0xff]  ;;  %v11518_v2 = vmin.f32 %v2087_v38, 20.0 }
 0x2cd   : > { %v6535_v15 = vadd.f32 %v6534_v30, %v10881_v52  ;;  %v6536_v49 = vpop.f32.mrb[37].mxu1  ;;  %v11481_v5 = vpop.permute.xlu1 %5262  ;;  %6844 = vmatprep.mubr.f32.mxu1 %v14213_v63  ;;  %v3488_v48 = vmul.f32 %v11461_v7, %v14596_v50  ;;  %v1631_v30 = vadd.f32 %v11160_v9, %v1630_v26  ;;  %14597 = vst [vmem:[#allocation80_spill] sm:$0xff] %v11502_v13  ;;  %v2342_v26 = vmul.f32 0.5, %v11476_v28  ;;  %v14598_v62 = vld [vmem:[#allocation203_spill] sm:$0xff] }
 0x2ce   : > { %14594 = vst [vmem:[#allocation313_spill] sm:$0xff] %v11481_v5  ;;  %v6537_v0 = vadd.f32 %v6536_v49, %v10889_v11  ;;  %v11486_v35 = vpop.permute.xlu0 %4498  ;;  %v1640_v60 = vpop.f32.mrb[222].mxu0  ;;  %v2574_v7 = vmul.f32 1.442695, %v2341_v53  ;;  %14600 = vst [vmem:[#allocation315_spill] sm:$0xff] %v11518_v2 }
 0x2cf   : > { %14595 = vst [vmem:[#allocation314_spill] sm:$0xff] %v11486_v35  ;;  %7229 = vst [vmem:[%s10900_s12 + $0x120] sm:$0xff] %v6535_v15  ;;  %3842 = vrot.lane.b32.xlu1 %v3487_v10, %s8278_s22  ;;  %v1642_v16 = vpop.f32.mrb[223].mxu0  ;;  %v2088_v15 = vmax.f32 %v11478_v59, -30.0  ;;  %v1636_v10 = vadd.f32 %v11160_v9, %v1635_v25  ;;  %v2678_v25 = vmul.f32 %v14598_v62, %v14598_v62  ;;  %v11516_v57 = vpop.eup %8211  ;;  %v14602_v35 = vld [vmem:[#allocation185_spill] sm:$0xff] }
 0x2d0   : > { %7230 = vst.msk [vmem:[%s10900_s12 + $0x128] sm:$0xff] %vm634_vm0, %v6537_v0  ;;  %v6540_v49 = vpop.f32.mrb[38].mxu1  ;;  %3844 = vrot.lane.b32.xlu0 %v3488_v48, %s8278_s22  ;;  %7891 = vmatmul.mubr.msk.f32.gmra.mrb[140].mxu1 %vm5692_vm1, %v4098_v45  ;;  %v1834_v0 = vld [vmem:[%s13727_s1 + $0x370] sm:$0xff]  ;;  %14599 = vst [vmem:[#allocation203_spill] sm:$0xff] %v11516_v57  ;;  %v11520_v5 = vadd.f32 %v1833_v33, %v1631_v30  ;;  %v14603_v62 = vld [vmem:[#allocation81_spill] sm:$0xff]  ;;  %8217 = vpow2.f32 %v2574_v7 }
 0x2d1   : > { %v6542_v50 = vpop.f32.mrb[39].mxu1  ;;  %v3787_v16 = vpop.permute.xlu1 %3786  ;;  %6850 = vmatprep.mubr.f32.mxu1 %v14213_v63  ;;  %v6541_v45 = vadd.f32 %v6540_v49, %v10881_v52  ;;  %v2576_v53 = vmul.f32 1.442695, %v2342_v26  ;;  %v11531_v38 = vmin.f32 %v2088_v15, 20.0  ;;  %v11533_v30 = vadd.f32 %v1834_v0, %v1636_v10 }
 0x2d2   : > { %v6543_v43 = vadd.f32 %v6542_v50, %v10889_v11  ;;  %v4099_v48 = vadd.f32 %v3787_v16, %v10555_v46  ;;  %v3789_v28 = vpop.permute.xlu0 %3788  ;;  %v1645_v14 = vpop.f32.mrb[224].mxu0  ;;  %14601 = vst [vmem:[#allocation316_spill] sm:$0xff] %v11520_v5  ;;  %v3489_v16 = vmul.f32 %v11502_v13, %v14603_v62  ;;  %v2343_v10 = vmul.f32 0.5, %v11518_v2 }
 0x2d3   : > { %5292 = vrot.lane.b32.xlu1 %v14602_v35, %s8278_s22  ;;  %v1647_v49 = vpop.f32.mrb[225].mxu0  ;;  %7231 = vst [vmem:[%s10900_s12 + $0x130] sm:$0xff] %v6541_v45  ;;  %14604 = vst [vmem:[#allocation185_spill] sm:$0xff] %v11531_v38  ;;  %v2089_v0 = vmax.f32 %v11520_v5, -30.0  ;;  %v11557_v7 = vpop.eup %8213  ;;  %8219 = vpow2.f32 %v2576_v53 }
 0x2d4   : > { %7232 = vst.msk [vmem:[%s10900_s12 + $0x138] sm:$0xff] %vm634_vm0, %v6543_v43  ;;  %v6546_v50 = vpop.f32.mrb[40].mxu1  ;;  %4528 = vrot.lane.b32.xlu0 %v2678_v25, %s8278_s22  ;;  %7892 = vmatmul.mubr.msk.f32.gmra.mrb[142].mxu1 %vm5692_vm1, %v4099_v48  ;;  %14605 = vst [vmem:[#allocation81_spill] sm:$0xff] %v11533_v30  ;;  %v4100_v43 = vadd.f32 %v3789_v28, %v10560_v3  ;;  %v14608_v49 = vld [vmem:[#allocation84_spill] sm:$0xff]  ;;  %v1835_v28 = vld [vmem:[%s13727_s1 + $0x378] sm:$0xff] }
 0x2d5   : > { %v6547_v35 = vadd.f32 %v6546_v50, %v10881_v52  ;;  %v6548_v33 = vpop.f32.mrb[41].mxu1  ;;  %v11536_v45 = vpop.permute.xlu1 %5264  ;;  %6856 = vmatprep.mubr.f32.mxu1 %v14213_v63  ;;  %v3490_v15 = vmul.f32 %v11516_v57, %v14608_v49  ;;  %v1641_v50 = vadd.f32 %v11160_v9, %v1640_v60  ;;  %14609 = vst [vmem:[#allocation84_spill] sm:$0xff] %v11557_v7  ;;  %v2344_v60 = vmul.f32 0.5, %v11531_v38  ;;  %v14610_v3 = vld [vmem:[#allocation23_spill] sm:$0xff] }
 0x2d6   : > { %14606 = vst [vmem:[#allocation317_spill] sm:$0xff] %v11536_v45  ;;  %v6549_v48 = vadd.f32 %v6548_v33, %v10889_v11  ;;  %v11541_v25 = vpop.permute.xlu0 %4500  ;;  %v1650_v26 = vpop.f32.mrb[226].mxu0  ;;  %v2578_v57 = vmul.f32 1.442695, %v2343_v10  ;;  %v11573_v13 = vmin.f32 %v2089_v0, 20.0 }
 0x2d7   : > { %14607 = vst [vmem:[#allocation318_spill] sm:$0xff] %v11541_v25  ;;  %7233 = vst [vmem:[%s10900_s12 + $0x140] sm:$0xff] %v6547_v35  ;;  %3846 = vrot.lane.b32.xlu1 %v3489_v16, %s8278_s22  ;;  %v1652_v62 = vpop.f32.mrb[227].mxu0  ;;  %v2090_v35 = vmax.f32 %v11533_v30, -30.0  ;;  %v1646_v16 = vadd.f32 %v11160_v9, %v1645_v14  ;;  %v2679_v14 = vmul.f32 %v14610_v3, %v14610_v3  ;;  %v11571_v46 = vpop.eup %8215  ;;  %v14614_v25 = vld [vmem:[#allocation188_spill] sm:$0xff]  ;;  %v14615_v3 = vld [vmem:[#allocation85_spill] sm:$0xff] }
 0x2d8   : > { %7234 = vst.msk [vmem:[%s10900_s12 + $0x148] sm:$0xff] %vm634_vm0, %v6549_v48  ;;  %v6552_v33 = vpop.f32.mrb[42].mxu1  ;;  %3848 = vrot.lane.b32.xlu0 %v3490_v15, %s8278_s22  ;;  %7893 = vmatmul.mubr.msk.f32.gmra.mrb[144].mxu1 %vm5692_vm1, %v4100_v43  ;;  %v1836_v48 = vld [vmem:[%s13727_s1 + $0x380] sm:$0xff]  ;;  %14611 = vst [vmem:[#allocation23_spill] sm:$0xff] %v11571_v46  ;;  %v11575_v45 = vadd.f32 %v1835_v28, %v1641_v50  ;;  %v2580_v10 = vmul.f32 1.442695, %v2344_v60  ;;  %8221 = vpow2.f32 %v2578_v57 }
 0x2d9   : > { %v6554_v49 = vpop.f32.mrb[43].mxu1  ;;  %v3791_v62 = vpop.permute.xlu1 %3790  ;;  %6862 = vmatprep.mubr.f32.mxu1 %v14213_v63  ;;  %v6553_v43 = vadd.f32 %v6552_v33, %v10881_v52  ;;  %14612 = vst [vmem:[#allocation319_spill] sm:$0xff] %v11573_v13  ;;  %v11586_v0 = vmin.f32 %v2090_v35, 20.0  ;;  %v11588_v50 = vadd.f32 %v1836_v48, %v1646_v16  ;;  %v2345_v16 = vmul.f32 0.5, %v11573_v13 }
 0x2da   : > { %v6555_v53 = vadd.f32 %v6554_v49, %v10889_v11  ;;  %v4101_v15 = vadd.f32 %v3791_v62, %v10601_v24  ;;  %v3793_v38 = vpop.permute.xlu0 %3792  ;;  %v1655_v2 = vpop.f32.mrb[228].mxu0  ;;  %14613 = vst [vmem:[#allocation320_spill] sm:$0xff] %v11575_v45  ;;  %v3491_v62 = vmul.f32 %v11557_v7, %v14615_v3  ;;  %v2091_v48 = vmax.f32 %v11575_v45, -30.0 }
 0x2db   : > { %5294 = vrot.lane.b32.xlu1 %v14614_v25, %s8278_s22  ;;  %v1657_v33 = vpop.f32.mrb[229].mxu0  ;;  %7235 = vst [vmem:[%s10900_s12 + $0x150] sm:$0xff] %v6553_v43  ;;  %14616 = vst [vmem:[#allocation188_spill] sm:$0xff] %v11586_v0  ;;  %v11612_v57 = vpop.eup %8217  ;;  %8223 = vpow2.f32 %v2580_v10 }
 0x2dc   : > { %7236 = vst.msk [vmem:[%s10900_s12 + $0x158] sm:$0xff] %vm634_vm0, %v6555_v53  ;;  %v6558_v49 = vpop.f32.mrb[44].mxu1  ;;  %4530 = vrot.lane.b32.xlu0 %v2679_v14, %s8278_s22  ;;  %7894 = vmatmul.mubr.msk.f32.gmra.mrb[146].mxu1 %vm5692_vm1, %v4101_v15  ;;  %14617 = vst [vmem:[#allocation85_spill] sm:$0xff] %v11588_v50  ;;  %v4102_v53 = vadd.f32 %v3793_v38, %v10606_v61  ;;  %v14620_v33 = vld [vmem:[#allocation86_spill] sm:$0xff]  ;;  %v1837_v38 = vld [vmem:[%s13727_s1 + $0x388] sm:$0xff]  ;;  %v11628_v7 = vmin.f32 %v2091_v48, 20.0 }
 0x2dd   : > { %v6559_v25 = vadd.f32 %v6558_v49, %v10881_v52  ;;  %v6560_v28 = vpop.f32.mrb[45].mxu1  ;;  %v11591_v43 = vpop.permute.xlu1 %5266  ;;  %6868 = vmatprep.mubr.f32.mxu1 %v14213_v63  ;;  %v3492_v35 = vmul.f32 %v11571_v46, %v14620_v33  ;;  %v1651_v49 = vadd.f32 %v11160_v9, %v1650_v26  ;;  %14621 = vst [vmem:[#allocation86_spill] sm:$0xff] %v11612_v57  ;;  %v2346_v26 = vmul.f32 0.5, %v11586_v0  ;;  %v14622_v61 = vld [vmem:[#allocation209_spill] sm:$0xff] }
 0x2de   : > { %14618 = vst [vmem:[#allocation321_spill] sm:$0xff] %v11591_v43  ;;  %v6561_v15 = vadd.f32 %v6560_v28, %v10889_v11  ;;  %v11596_v14 = vpop.permute.xlu0 %4502  ;;  %v1660_v60 = vpop.f32.mrb[230].mxu0  ;;  %v2582_v46 = vmul.f32 1.442695, %v2345_v16  ;;  %14624 = vst [vmem:[#allocation323_spill] sm:$0xff] %v11628_v7 }
 0x2df   : > { %14619 = vst [vmem:[#allocation322_spill] sm:$0xff] %v11596_v14  ;;  %7237 = vst [vmem:[%s10900_s12 + $0x160] sm:$0xff] %v6559_v25  ;;  %3850 = vrot.lane.b32.xlu1 %v3491_v62, %s8278_s22  ;;  %v1662_v3 = vpop.f32.mrb[231].mxu0  ;;  %v2092_v25 = vmax.f32 %v11588_v50, -30.0  ;;  %v1656_v62 = vadd.f32 %v11160_v9, %v1655_v2  ;;  %v2680_v2 = vmul.f32 %v14622_v61, %v14622_v61  ;;  %v11626_v24 = vpop.eup %8219  ;;  %v14626_v14 = vld [vmem:[#allocation190_spill] sm:$0xff]  ;;  %v14627_v61 = vld [vmem:[#allocation87_spill] sm:$0xff] }
 0x2e0   : > { %7238 = vst.msk [vmem:[%s10900_s12 + $0x168] sm:$0xff] %vm634_vm0, %v6561_v15  ;;  %v6564_v28 = vpop.f32.mrb[46].mxu1  ;;  %3852 = vrot.lane.b32.xlu0 %v3492_v35, %s8278_s22  ;;  %7895 = vmatmul.mubr.msk.f32.gmra.mrb[148].mxu1 %vm5692_vm1, %v4102_v53  ;;  %v1838_v15 = vld [vmem:[%s13727_s1 + $0x390] sm:$0xff]  ;;  %14623 = vst [vmem:[#allocation209_spill] sm:$0xff] %v11626_v24  ;;  %v11630_v43 = vadd.f32 %v1837_v38, %v1651_v49  ;;  %v2584_v16 = vmul.f32 1.442695, %v2346_v26  ;;  %8225 = vpow2.f32 %v2582_v46 }
 0x2e1   : > { %v6566_v33 = vpop.f32.mrb[47].mxu1  ;;  %v3795_v3 = vpop.permute.xlu1 %3794  ;;  %6874 = vmatprep.mubr.f32.mxu1 %v14213_v63  ;;  %v6565_v53 = vadd.f32 %v6564_v28, %v10881_v52  ;;  %v11641_v48 = vmin.f32 %v2092_v25, 20.0  ;;  %v11643_v49 = vadd.f32 %v1838_v15, %v1656_v62  ;;  %v2347_v62 = vmul.f32 0.5, %v11628_v7 }
 0x2e2   : > { %v6567_v10 = vadd.f32 %v6566_v33, %v10889_v11  ;;  %v4103_v35 = vadd.f32 %v3795_v3, %v10644_v40  ;;  %v3797_v0 = vpop.permute.xlu0 %3796  ;;  %v1665_v13 = vpop.f32.mrb[232].mxu0  ;;  %14625 = vst [vmem:[#allocation324_spill] sm:$0xff] %v11630_v43  ;;  %v3493_v3 = vmul.f32 %v11612_v57, %v14627_v61  ;;  %v2093_v15 = vmax.f32 %v11630_v43, -30.0 }
 0x2e3   : > { %5296 = vrot.lane.b32.xlu1 %v14626_v14, %s8278_s22  ;;  %v1667_v28 = vpop.f32.mrb[233].mxu0  ;;  %7239 = vst [vmem:[%s10900_s12 + $0x170] sm:$0xff] %v6565_v53  ;;  %14628 = vst [vmem:[#allocation190_spill] sm:$0xff] %v11641_v48  ;;  %v11667_v46 = vpop.eup %8221  ;;  %8227 = vpow2.f32 %v2584_v16 }
 0x2e4   : > { %7240 = vst.msk [vmem:[%s10900_s12 + $0x178] sm:$0xff] %vm634_vm0, %v6567_v10  ;;  %v6570_v33 = vpop.f32.mrb[48].mxu1  ;;  %4532 = vrot.lane.b32.xlu0 %v2680_v2, %s8278_s22  ;;  %7896 = vmatmul.mubr.msk.f32.gmra.mrb[150].mxu1 %vm5692_vm1, %v4103_v35  ;;  %14629 = vst [vmem:[#allocation87_spill] sm:$0xff] %v11643_v49  ;;  %v4104_v10 = vadd.f32 %v3797_v0, %v10649_v4  ;;  %v14631_v28 = vld [vmem:[#allocation90_spill] sm:$0xff]  ;;  %v1839_v0 = vld [vmem:[%s13727_s1 + $0x398] sm:$0xff]  ;;  %v11683_v40 = vmin.f32 %v2093_v15, 20.0 }
 0x2e5   : > { %v6571_v14 = vadd.f32 %v6570_v33, %v10881_v52  ;;  %v6572_v38 = vpop.f32.mrb[49].mxu1  ;;  %v11646_v53 = vpop.permute.xlu1 %5268  ;;  %6880 = vmatprep.mubr.f32.mxu1 %v14213_v63  ;;  %v3494_v25 = vmul.f32 %v11626_v24, %v14631_v28  ;;  %v1661_v33 = vadd.f32 %v11160_v9, %v1660_v60  ;;  %14632 = vst [vmem:[#allocation90_spill] sm:$0xff] %v11667_v46  ;;  %v2348_v60 = vmul.f32 0.5, %v11641_v48 }
 0x2e6   : > { %14630 = vst [vmem:[#allocation325_spill] sm:$0xff] %v11646_v53  ;;  %v6573_v35 = vadd.f32 %v6572_v38, %v10889_v11  ;;  %v11651_v2 = vpop.permute.xlu0 %4504  ;;  %v1670_v26 = vpop.f32.mrb[234].mxu0  ;;  %v2586_v24 = vmul.f32 1.442695, %v2347_v62  ;;  %14634 = vst [vmem:[#allocation327_spill] sm:$0xff] %v11683_v40  ;;  %v14636_v53 = vld [vmem:[#allocation18_spill] sm:$0xff] }
 0x2e7   : > { %7241 = vst [vmem:[%s10900_s12 + $0x180] sm:$0xff] %v6571_v14  ;;  %3854 = vrot.lane.b32.xlu1 %v3493_v3, %s8278_s22  ;;  %v1672_v61 = vpop.f32.mrb[235].mxu0  ;;  %v2094_v14 = vmax.f32 %v11643_v49, -30.0  ;;  %v1666_v3 = vadd.f32 %v11160_v9, %v1665_v13  ;;  %v2681_v13 = vmul.f32 %v10483_v8, %v10483_v8  ;;  %v11681_v4 = vpop.eup %8223  ;;  %v11685_v57 = vadd.f32 %v1839_v0, %v1661_v33  ;;  %v14637_v8 = vld [vmem:[#allocation91_spill] sm:$0xff] }
 0x2e8   : > { %7242 = vst.msk [vmem:[%s10900_s12 + $0x188] sm:$0xff] %vm634_vm0, %v6573_v35  ;;  %v6576_v38 = vpop.f32.mrb[50].mxu1  ;;  %3856 = vrot.lane.b32.xlu0 %v3494_v25, %s8278_s22  ;;  %7897 = vmatmul.mubr.msk.f32.gmra.mrb[152].mxu1 %vm5692_vm1, %v4104_v10  ;;  %v1840_v35 = vld [vmem:[%s13727_s1 + $0x3a0] sm:$0xff]  ;;  %14633 = vst [vmem:[#allocation326_spill] sm:$0xff] %v11681_v4  ;;  %v2588_v62 = vmul.f32 1.442695, %v2348_v60  ;;  %8229 = vpow2.f32 %v2586_v24 }
 0x2e9   : > { %v6578_v28 = vpop.f32.mrb[51].mxu1  ;;  %v3799_v61 = vpop.permute.xlu1 %3798  ;;  %6886 = vmatprep.mubr.f32.mxu1 %v14213_v63  ;;  %v6577_v10 = vadd.f32 %v6576_v38, %v10881_v52  ;;  %14635 = vst [vmem:[#allocation328_spill] sm:$0xff] %v11685_v57  ;;  %v11696_v15 = vmin.f32 %v2094_v14, 20.0  ;;  %v11698_v33 = vadd.f32 %v1840_v35, %v1666_v3  ;;  %v2349_v3 = vmul.f32 0.5, %v11683_v40 }
 0x2ea   : > { %v6579_v16 = vadd.f32 %v6578_v28, %v10889_v11  ;;  %v4105_v25 = vadd.f32 %v3799_v61, %v10686_v39  ;;  %v3801_v48 = vpop.permute.xlu0 %3800  ;;  %v1675_v7 = vpop.f32.mrb[236].mxu0  ;;  %v3495_v61 = vmul.f32 %v11667_v46, %v14637_v8  ;;  %v2095_v35 = vmax.f32 %v11685_v57, -30.0 }
 0x2eb   : > { %5298 = vrot.lane.b32.xlu1 %v14636_v53, %s8278_s22  ;;  %v1677_v38 = vpop.f32.mrb[237].mxu0  ;;  %7243 = vst [vmem:[%s10900_s12 + $0x190] sm:$0xff] %v6577_v10  ;;  %14638 = vst [vmem:[#allocation18_spill] sm:$0xff] %v11696_v15  ;;  %v11722_v24 = vpop.eup %8225  ;;  %8231 = vpow2.f32 %v2588_v62  ;;  %v1842_v62 = vld [vmem:[%s13727_s1 + $0x3b0] sm:$0xff] }
 0x2ec   : > { %7244 = vst.msk [vmem:[%s10900_s12 + $0x198] sm:$0xff] %vm634_vm0, %v6579_v16  ;;  %v6582_v28 = vpop.f32.mrb[52].mxu1  ;;  %4534 = vrot.lane.b32.xlu0 %v2681_v13, %s8278_s22  ;;  %7898 = vmatmul.mubr.msk.f32.gmra.mrb[154].mxu1 %vm5692_vm1, %v4105_v25  ;;  %14639 = vst [vmem:[#allocation91_spill] sm:$0xff] %v11698_v33  ;;  %v4106_v16 = vadd.f32 %v3801_v48, %v10692_v18  ;;  %v14642_v38 = vld [vmem:[#allocation92_spill] sm:$0xff]  ;;  %v1841_v48 = vld [vmem:[%s13727_s1 + $0x3a8] sm:$0xff]  ;;  %v11743_v46 = vmin.f32 %v2095_v35, 20.0 }
 0x2ed   : > { %v6583_v53 = vadd.f32 %v6582_v28, %v10881_v52  ;;  %v6584_v0 = vpop.f32.mrb[53].mxu1  ;;  %v11701_v10 = vpop.permute.xlu1 %5270  ;;  %6892 = vmatprep.mubr.f32.mxu1 %v14213_v63  ;;  %v3496_v14 = vmul.f32 %v11681_v4, %v14642_v38  ;;  %v1671_v28 = vadd.f32 %v11160_v9, %v1670_v26  ;;  %14643 = vst [vmem:[#allocation92_spill] sm:$0xff] %v11722_v24  ;;  %v2350_v9 = vmul.f32 0.5, %v11696_v15 }
 0x2ee   : > { %14640 = vst [vmem:[#allocation329_spill] sm:$0xff] %v11701_v10  ;;  %v6585_v25 = vadd.f32 %v6584_v0, %v10889_v11  ;;  %v11706_v13 = vpop.permute.xlu0 %4506  ;;  %v1680_v60 = vpop.f32.mrb[238].mxu0  ;;  %v2096_v26 = vmax.f32 %v11698_v33, -30.0  ;;  %v2590_v18 = vmul.f32 1.442695, %v2349_v3  ;;  %14645 = vst [vmem:[#allocation332_spill] sm:$0xff] %v11743_v46 }
 0x2ef   : > { %14641 = vst [vmem:[#allocation330_spill] sm:$0xff] %v11706_v13  ;;  %7245 = vst [vmem:[%s10900_s12 + $0x1a0] sm:$0xff] %v6583_v53  ;;  %3858 = vrot.lane.b32.xlu1 %v3495_v61, %s8278_s22  ;;  %v1682_v8 = vpop.f32.mrb[239].mxu0  ;;  %v11729_v61 = vld [vmem:[%s13730_s4] ss:$0 sm:$0xff]  ;;  %v11741_v4 = vpop.eup %8227  ;;  %v11745_v39 = vadd.f32 %v1841_v48, %v1671_v28 }
 0x2f0   : > { %7246 = vst.msk [vmem:[%s10900_s12 + $0x1a8] sm:$0xff] %vm634_vm0, %v6585_v25  ;;  %v6588_v0 = vpop.f32.mrb[54].mxu1  ;;  %3860 = vrot.lane.b32.xlu0 %v3496_v14, %s8278_s22  ;;  %7899 = vmatmul.mubr.msk.f32.gmra.mrb[156].mxu1 %vm5692_vm1, %v4106_v16  ;;  %v1676_v53 = vadd.f32 %v11729_v61, %v1675_v7  ;;  %v2682_v7 = vmul.f32 %v10494_v29, %v10494_v29  ;;  %14644 = vst [vmem:[#allocation331_spill] sm:$0xff] %v11741_v4  ;;  %v14647_v10 = vld [vmem:[#allocation194_spill] sm:$0xff]  ;;  %v14648_v29 = vld [vmem:[#allocation93_spill] sm:$0xff]  ;;  %v11756_v35 = vmin.f32 %v2096_v26, 20.0 }
 0x2f1   : > { %v6590_v25 = vpop.f32.mrb[55].mxu1  ;;  %v3803_v38 = vpop.permute.xlu1 %3802  ;;  %6898 = vmatprep.mubr.f32.mxu1 %v14213_v63  ;;  %v6589_v16 = vadd.f32 %v6588_v0, %v10881_v52  ;;  %14646 = vst [vmem:[#allocation333_spill] sm:$0xff] %v11745_v39  ;;  %v2592_v3 = vmul.f32 1.442695, %v2350_v9  ;;  %v14653_v9 = vld [vmem:[#allocation96_spill] sm:$0xff]  ;;  %8233 = vpow2.f32 %v2590_v18 }
 0x2f2   : > { %v6591_v14 = vadd.f32 %v6590_v25, %v10889_v11  ;;  %v4107_v8 = vadd.f32 %v3803_v38, %v10727_v37  ;;  %v3805_v15 = vpop.permute.xlu0 %3804  ;;  %v1685_v40 = vpop.f32.mrb[240].mxu0  ;;  %v3497_v38 = vmul.f32 %v11722_v24, %v14648_v29  ;;  %14649 = vst [vmem:[#allocation194_spill] sm:$0xff] %v11756_v35  ;;  %v11758_v28 = vadd.f32 %v1842_v62, %v1676_v53 }
 0x2f3   : > { %5300 = vrot.lane.b32.xlu1 %v14647_v10, %s8278_s22  ;;  %v1687_v0 = vpop.f32.mrb[241].mxu0  ;;  %7247 = vst [vmem:[%s10900_s12 + $0x1b0] sm:$0xff] %v6589_v16  ;;  %v3498_v26 = vmul.f32 %v11741_v4, %v14653_v9  ;;  %v2351_v53 = vmul.f32 0.5, %v11743_v46  ;;  %v2097_v62 = vmax.f32 %v11745_v39, -30.0  ;;  %v1681_v29 = vadd.f32 %v11729_v61, %v1680_v60  ;;  %v14655_v4 = vld [vmem:[#allocation27_spill] sm:$0xff] }
 0x2f4   : > { %7248 = vst.msk [vmem:[%s10900_s12 + $0x1b8] sm:$0xff] %vm634_vm0, %v6591_v14  ;;  %v6594_v25 = vpop.f32.mrb[56].mxu1  ;;  %4536 = vrot.lane.b32.xlu0 %v2682_v7, %s8278_s22  ;;  %7900 = vmatmul.mubr.msk.f32.gmra.mrb[158].mxu1 %vm5692_vm1, %v4107_v8  ;;  %14650 = vst [vmem:[#allocation93_spill] sm:$0xff] %v11758_v28  ;;  %v4108_v14 = vadd.f32 %v3805_v15, %v10737_v20  ;;  %8235 = vpow2.f32 %v2592_v3  ;;  %v2352_v18 = vmul.f32 0.5, %v11756_v35  ;;  %v2098_v9 = vmax.f32 %v11758_v28, -30.0  ;;  %v1844_v3 = vld [vmem:[%s13727_s1 + $0x3c0] sm:$0xff] }
 0x2f5   : > { %v6595_v10 = vadd.f32 %v6594_v25, %v10881_v52  ;;  %v6596_v48 = vpop.f32.mrb[57].mxu1  ;;  %v11761_v16 = vpop.permute.xlu1 %5272  ;;  %6904 = vmatprep.mubr.f32.mxu1 %v14213_v63  ;;  %v1686_v60 = vadd.f32 %v11729_v61, %v1685_v40  ;;  %v2683_v40 = vmul.f32 %v14655_v4, %v14655_v4  ;;  %v2594_v24 = vmul.f32 1.442695, %v2351_v53  ;;  %v14660_v4 = vld [vmem:[#allocation97_spill] sm:$0xff] }
 0x2f6   : > { %14651 = vst [vmem:[#allocation334_spill] sm:$0xff] %v11761_v16  ;;  %v6597_v8 = vadd.f32 %v6596_v48, %v10889_v11  ;;  %v11766_v7 = vpop.permute.xlu0 %4508  ;;  %v1690_v0 = vpop.f32.mrb[242].mxu0  ;;  %v11798_v37 = vmin.f32 %v2097_v62, 20.0  ;;  %v14658_v16 = vld [vmem:[#allocation198_spill] sm:$0xff]  ;;  %v2596_v62 = vmul.f32 1.442695, %v2352_v18 }
 0x2f7   : > { %14652 = vst [vmem:[#allocation335_spill] sm:$0xff] %v11766_v7  ;;  %7249 = vst [vmem:[%s10900_s12 + $0x1c0] sm:$0xff] %v6595_v10  ;;  %3862 = vrot.lane.b32.xlu1 %v3497_v38, %s8278_s22  ;;  %v1692_v25 = vpop.f32.mrb[243].mxu0  ;;  %v11779_v48 = vpop.eup %8229  ;;  %v1843_v38 = vld [vmem:[%s13727_s1 + $0x3b8] sm:$0xff]  ;;  %v14665_v18 = vld [vmem:[#allocation98_spill] sm:$0xff]  ;;  %8237 = vpow2.f32 %v2594_v24 }
 0x2f8   : > { %7250 = vst.msk [vmem:[%s10900_s12 + $0x1c8] sm:$0xff] %vm634_vm0, %v6597_v8  ;;  %v6600_v15 = vpop.f32.mrb[58].mxu1  ;;  %3864 = vrot.lane.b32.xlu0 %v3498_v26, %s8278_s22  ;;  %7901 = vmatmul.mubr.msk.f32.gmra.mrb[160].mxu1 %vm5692_vm1, %v4108_v14  ;;  %14654 = vst [vmem:[#allocation96_spill] sm:$0xff] %v11779_v48  ;;  %v11796_v20 = vpop.eup %8231  ;;  %v11802_v13 = vadd.f32 %v1843_v38, %v1681_v29  ;;  %v3499_v53 = vmul.f32 %v11779_v48, %v14660_v4  ;;  %8239 = vpow2.f32 %v2596_v62  ;;  %v1846_v62 = vld [vmem:[%s13727_s1 + $0x3d0] sm:$0xff] }
 0x2f9   : > { %v6602_v10 = vpop.f32.mrb[59].mxu1  ;;  %v3807_v8 = vpop.permute.xlu1 %3806  ;;  %6910 = vmatprep.mubr.f32.mxu1 %v14213_v63  ;;  %v6601_v14 = vadd.f32 %v6600_v15, %v10881_v52  ;;  %14656 = vst [vmem:[#allocation27_spill] sm:$0xff] %v11796_v20  ;;  %14657 = vst [vmem:[#allocation336_spill] sm:$0xff] %v11798_v37  ;;  %v14669_v48 = vld [vmem:[#allocation200_spill] sm:$0xff] }
 0x2fa   : > { %v6603_v26 = vadd.f32 %v6602_v10, %v10889_v11  ;;  %v4109_v25 = vadd.f32 %v3807_v8, %v10774_v47  ;;  %v3809_v35 = vpop.permute.xlu0 %3808  ;;  %v1695_v46 = vpop.f32.mrb[244].mxu0  ;;  %14659 = vst [vmem:[#allocation198_spill] sm:$0xff] %v11802_v13  ;;  %v11811_v10 = vmin.f32 %v2098_v9, 20.0  ;;  %v11813_v8 = vadd.f32 %v1844_v3, %v1686_v60 }
 0x2fb   : > { %5302 = vrot.lane.b32.xlu1 %v14658_v16, %s8278_s22  ;;  %v1697_v7 = vpop.f32.mrb[245].mxu0  ;;  %7251 = vst [vmem:[%s10900_s12 + $0x1d0] sm:$0xff] %v6601_v14  ;;  %v4110_v38 = vadd.f32 %v3809_v35, %v10778_v36  ;;  %v3500_v9 = vmul.f32 %v11796_v20, %v14665_v18  ;;  %v2353_v60 = vmul.f32 0.5, %v11798_v37  ;;  %v11834_v4 = vpop.eup %8233  ;;  %v14667_v37 = vld [vmem:[#allocation219_spill] sm:$0xff] }
 0x2fc   : > { %7252 = vst.msk [vmem:[%s10900_s12 + $0x1d8] sm:$0xff] %vm634_vm0, %v6603_v26  ;;  %v6606_v15 = vpop.f32.mrb[60].mxu1  ;;  %4538 = vrot.lane.b32.xlu0 %v2683_v40, %s8278_s22  ;;  %7902 = vmatmul.mubr.msk.f32.gmra.mrb[162].mxu1 %vm5692_vm1, %v4109_v25  ;;  %14661 = vst [vmem:[#allocation97_spill] sm:$0xff] %v11811_v10  ;;  %v2099_v40 = vmax.f32 %v11802_v13, -30.0  ;;  %v2354_v24 = vmul.f32 0.5, %v11811_v10 }
 0x2fd   : > { %14662 = vst [vmem:[#allocation337_spill] sm:$0xff] %v11813_v8  ;;  %v6607_v16 = vadd.f32 %v6606_v15, %v10881_v52  ;;  %v6608_v7 = vpop.f32.mrb[61].mxu1  ;;  %v11816_v29 = vpop.permute.xlu1 %5274  ;;  %6916 = vmatprep.mubr.f32.mxu1 %v14213_v63  ;;  %v1691_v15 = vadd.f32 %v11729_v61, %v1690_v0  ;;  %14666 = vst [vmem:[#allocation98_spill] sm:$0xff] %v11834_v4  ;;  %v1696_v0 = vadd.f32 %v11729_v61, %v1695_v46 }
 0x2fe   : > { %14663 = vst [vmem:[#allocation338_spill] sm:$0xff] %v11816_v29  ;;  %v6609_v14 = vadd.f32 %v6608_v7, %v10889_v11  ;;  %v11821_v26 = vpop.permute.xlu0 %4510  ;;  %v1700_v25 = vpop.f32.mrb[246].mxu0  ;;  %v2684_v46 = vmul.f32 %v14667_v37, %v14667_v37  ;;  %v2598_v36 = vmul.f32 1.442695, %v2353_v60  ;;  %v14672_v37 = vld [vmem:[#allocation100_spill] sm:$0xff] }
 0x2ff   : > { %14664 = vst [vmem:[#allocation339_spill] sm:$0xff] %v11821_v26  ;;  %7253 = vst [vmem:[%s10900_s12 + $0x1e0] sm:$0xff] %v6607_v16  ;;  %3866 = vrot.lane.b32.xlu1 %v3499_v53, %s8278_s22  ;;  %v1702_v3 = vpop.f32.mrb[247].mxu0  ;;  %v2100_v16 = vmax.f32 %v11813_v8, -30.0  ;;  %v1845_v53 = vld [vmem:[%s13727_s1 + $0x3c8] sm:$0xff]  ;;  %v11851_v20 = vpop.eup %8235  ;;  %v11855_v8 = vmin.f32 %v2099_v40, 20.0  ;;  %v3501_v60 = vmul.f32 %v11834_v4, %v14672_v37 }
 0x300   : > { %7254 = vst.msk [vmem:[%s10900_s12 + $0x1e8] sm:$0xff] %vm634_vm0, %v6609_v14  ;;  %v6612_v35 = vpop.f32.mrb[62].mxu1  ;;  %3868 = vrot.lane.b32.xlu0 %v3500_v9, %s8278_s22  ;;  %7903 = vmatmul.mubr.msk.f32.gmra.mrb[164].mxu1 %vm5692_vm1, %v4110_v38  ;;  %14668 = vst [vmem:[#allocation219_spill] sm:$0xff] %v11851_v20  ;;  %v11857_v29 = vadd.f32 %v1845_v53, %v1691_v15  ;;  %8241 = vpow2.f32 %v2598_v36 }
 0x301   : > { %v6614_v7 = vpop.f32.mrb[63].mxu1  ;;  %v3811_v14 = vpop.permute.xlu1 %3810  ;;  %6922 = vmatprep.mubr.f32.mxu1 %v14213_v63  ;;  %v6613_v38 = vadd.f32 %v6612_v35, %v10881_v52  ;;  %14670 = vst [vmem:[#allocation200_spill] sm:$0xff] %v11855_v8 }
 0x302   : > { %v6615_v18 = vadd.f32 %v6614_v7, %v10889_v11  ;;  %v4111_v9 = vadd.f32 %v3811_v14, %v10823_v34  ;;  %v3813_v3 = vpop.permute.xlu0 %3812  ;;  %v1705_v10 = vpop.f32.mrb[248].mxu0  ;;  %14671 = vst [vmem:[#allocation340_spill] sm:$0xff] %v11857_v29  ;;  %v2600_v7 = vmul.f32 1.442695, %v2354_v24  ;;  %v11866_v14 = vmin.f32 %v2100_v16, 20.0  ;;  %v14677_v24 = vld [vmem:[#allocation102_spill] sm:$0xff] }
 0x303   : > { %5304 = vrot.lane.b32.xlu1 %v14669_v48, %s8278_s22  ;;  %v1707_v47 = vpop.f32.mrb[249].mxu0  ;;  %7255 = vst [vmem:[%s10900_s12 + $0x1f0] sm:$0xff] %v6613_v38  ;;  %v4112_v53 = vadd.f32 %v3813_v3, %v10827_v17  ;;  %v3502_v16 = vmul.f32 %v11851_v20, %v14677_v24  ;;  %v11889_v37 = vpop.eup %8237  ;;  %v14681_v17 = vld [vmem:[#allocation204_spill] sm:$0xff] }
 0x304   : > { %7256 = vst.msk [vmem:[%s10900_s12 + $0x1f8] sm:$0xff] %vm634_vm0, %v6615_v18  ;;  %v6618_v35 = vpop.f32.mrb[64].mxu1  ;;  %4540 = vrot.lane.b32.xlu0 %v2684_v46, %s8278_s22  ;;  %7904 = vmatmul.mubr.msk.f32.gmra.mrb[166].mxu1 %vm5692_vm1, %v4111_v9  ;;  %14673 = vst [vmem:[#allocation100_spill] sm:$0xff] %v11866_v14  ;;  %v11868_v47 = vadd.f32 %v1846_v62, %v1696_v0  ;;  %v2355_v62 = vmul.f32 0.5, %v11855_v8  ;;  %v2101_v46 = vmax.f32 %v11857_v29, -30.0  ;;  %8243 = vpow2.f32 %v2600_v7  ;;  %v1848_v7 = vld [vmem:[%s13727_s1 + $0x3e0] sm:$0xff]  ;;  %v11906_v20 = vpop.eup %8239 }
 0x305   : > { %v6619_v48 = vadd.f32 %v6618_v35, %v10881_v52  ;;  %v6620_v40 = vpop.f32.mrb[65].mxu1  ;;  %v11871_v15 = vpop.permute.xlu1 %5276  ;;  %6928 = vmatprep.mubr.f32.mxu1 %v14213_v63  ;;  %v1701_v35 = vadd.f32 %v11729_v61, %v1700_v25  ;;  %14678 = vst [vmem:[#allocation102_spill] sm:$0xff] %v11889_v37  ;;  %v2356_v36 = vmul.f32 0.5, %v11866_v14  ;;  %v1706_v25 = vadd.f32 %v11729_v61, %v1705_v10  ;;  %v14679_v8 = vld [vmem:[#allocation30_spill] sm:$0xff] }
 0x306   : > { %14674 = vst [vmem:[#allocation341_spill] sm:$0xff] %v11868_v47  ;;  %14675 = vst [vmem:[#allocation342_spill] sm:$0xff] %v11871_v15  ;;  %v6621_v38 = vadd.f32 %v6620_v40, %v10889_v11  ;;  %v11876_v18 = vpop.permute.xlu0 %4512  ;;  %v1710_v9 = vpop.f32.mrb[250].mxu0  ;;  %v2685_v10 = vmul.f32 %v14679_v8, %v14679_v8  ;;  %v2602_v34 = vmul.f32 1.442695, %v2355_v62  ;;  %v14684_v8 = vld [vmem:[#allocation103_spill] sm:$0xff] }
 0x307   : > { %14676 = vst [vmem:[#allocation343_spill] sm:$0xff] %v11876_v18  ;;  %7257 = vst [vmem:[%s10900_s12 + $0x200] sm:$0xff] %v6619_v48  ;;  %3870 = vrot.lane.b32.xlu1 %v3501_v60, %s8278_s22  ;;  %v1712_v0 = vpop.f32.mrb[251].mxu0  ;;  %v2102_v60 = vmax.f32 %v11868_v47, -30.0  ;;  %v1847_v48 = vld [vmem:[%s13727_s1 + $0x3d8] sm:$0xff]  ;;  %v11910_v47 = vmin.f32 %v2101_v46, 20.0 }
 0x308   : > { %7258 = vst.msk [vmem:[%s10900_s12 + $0x208] sm:$0xff] %vm634_vm0, %v6621_v38  ;;  %v6624_v3 = vpop.f32.mrb[66].mxu1  ;;  %3872 = vrot.lane.b32.xlu0 %v3502_v16, %s8278_s22  ;;  %7905 = vmatmul.mubr.msk.f32.gmra.mrb[168].mxu1 %vm5692_vm1, %v4112_v53  ;;  %14680 = vst [vmem:[#allocation30_spill] sm:$0xff] %v11906_v20  ;;  %v11912_v29 = vadd.f32 %v1847_v48, %v1701_v35  ;;  %v14688_v48 = vld [vmem:[#allocation264_spill] sm:$0xff]  ;;  %8245 = vpow2.f32 %v2602_v34  ;;  %v14699_v18 = vld [vmem:[#allocation50_spill] sm:$0xff] }
 0x309   : > { %v6626_v40 = vpop.f32.mrb[67].mxu1  ;;  %v3815_v38 = vpop.permute.xlu1 %3814  ;;  %6934 = vmatprep.mubr.f32.mxu1 %v14213_v63  ;;  %v6625_v53 = vadd.f32 %v6624_v3, %v10881_v52  ;;  %14682 = vst [vmem:[#allocation204_spill] sm:$0xff] %v11910_v47 }
 0x30a   : > { %v6627_v24 = vadd.f32 %v6626_v40, %v10889_v11  ;;  %v4113_v16 = vadd.f32 %v3815_v38, %v10869_v19  ;;  %v3817_v0 = vpop.permute.xlu0 %3816  ;;  %v1715_v14 = vpop.f32.mrb[252].mxu0  ;;  %14683 = vst [vmem:[#allocation344_spill] sm:$0xff] %v11912_v29  ;;  %v3503_v40 = vmul.f32 %v11889_v37, %v14684_v8  ;;  %v2604_v38 = vmul.f32 1.442695, %v2356_v36  ;;  %v14690_v36 = vld [vmem:[#allocation105_spill] sm:$0xff]  ;;  %v14696_v19 = vld [vmem:[#allocation139_spill] sm:$0xff] }
 0x30b   : > { %5306 = vrot.lane.b32.xlu1 %v14681_v17, %s8278_s22  ;;  %v1717_v4 = vpop.f32.mrb[253].mxu0  ;;  %7259 = vst [vmem:[%s10900_s12 + $0x210] sm:$0xff] %v6625_v53  ;;  %v11921_v17 = vmin.f32 %v2102_v60, 20.0  ;;  %v4114_v53 = vadd.f32 %v3817_v0, %v14688_v48  ;;  %v3504_v60 = vmul.f32 %v11906_v20, %v14690_v36  ;;  %v2357_v0 = vmul.f32 0.5, %v11910_v47  ;;  %v14694_v47 = vld [vmem:[#allocation226_spill] sm:$0xff] }
 0x30c   : > { %7260 = vst.msk [vmem:[%s10900_s12 + $0x218] sm:$0xff] %vm634_vm0, %v6627_v24  ;;  %v6630_v3 = vpop.f32.mrb[68].mxu1  ;;  %4542 = vrot.lane.b32.xlu0 %v2685_v10, %s8278_s22  ;;  %7906 = vmatmul.mubr.msk.f32.gmra.mrb[170].mxu1 %vm5692_vm1, %v4113_v16  ;;  %v11923_v4 = vadd.f32 %v1848_v7, %v1706_v25  ;;  %v14691_v25 = vld [vmem:[#allocation38_spill] sm:$0xff]  ;;  %v1711_v48 = vadd.f32 %v11729_v61, %v1710_v9  ;;  %8247 = vpow2.f32 %v2604_v38 }
 0x30d   : > { %14685 = vst [vmem:[#allocation103_spill] sm:$0xff] %v11921_v17  ;;  %v6631_v62 = vadd.f32 %v6630_v3, %v10881_v52  ;;  %v6632_v46 = vpop.f32.mrb[69].mxu1  ;;  %v11926_v35 = vpop.permute.xlu1 %5278  ;;  %6940 = vmatprep.mubr.f32.mxu1 %v14213_v63  ;;  %v4156_v7 = vmul.f32 %v14691_v25, %v14691_v25  ;;  %v14692_v3 = vld [vmem:[#allocation41_spill] sm:$0xff]  ;;  %v1716_v9 = vadd.f32 %v11729_v61, %v1715_v14 }
 0x30e   : > { %14686 = vst [vmem:[#allocation345_spill] sm:$0xff] %v11923_v4  ;;  %14687 = vst [vmem:[#allocation346_spill] sm:$0xff] %v11926_v35  ;;  %v6633_v24 = vadd.f32 %v6632_v46, %v10889_v11  ;;  %v11931_v16 = vpop.permute.xlu0 %4514  ;;  %v11933_v10 = vpop.f32.mrb[254].mxu0  ;;  %v4157_v8 = vmul.f32 %v14692_v3, %v14692_v3  ;;  %v2103_v46 = vmax.f32 %v11912_v29, -30.0  ;;  %v2104_v34 = vmax.f32 %v11923_v4, -30.0  ;;  %v14697_v29 = vld [vmem:[#allocation44_spill] sm:$0xff] }
 0x30f   : > { %14689 = vst [vmem:[#allocation347_spill] sm:$0xff] %v11931_v16  ;;  %7261 = vst [vmem:[%s10900_s12 + $0x220] sm:$0xff] %v6631_v62  ;;  %3874 = vrot.lane.b32.xlu1 %v3503_v40, %s8278_s22  ;;  %v1722_v37 = vpop.f32.mrb[255].mxu0  ;;  %v11950_v25 = vpop.eup %8241  ;;  %v2358_v40 = vmul.f32 0.5, %v11921_v17  ;;  %v2686_v14 = vmul.f32 %v14694_v47, %v14694_v47  ;;  %v4158_v35 = vmul.f32 %v14697_v29, %v14697_v29  ;;  %v14698_v16 = vld [vmem:[#allocation47_spill] sm:$0xff] }
 0x310   : > { %7262 = vst.msk [vmem:[%s10900_s12 + $0x228] sm:$0xff] %vm634_vm0, %v6633_v24  ;;  %v6636_v36 = vpop.f32.mrb[70].mxu1  ;;  %3876 = vrot.lane.b32.xlu0 %v3504_v60, %s8278_s22  ;;  %7907 = vmatmul.mubr.msk.f32.gmra.mrb[172].mxu1 %vm5692_vm1, %v4114_v53  ;;  %14693 = vst [vmem:[#allocation105_spill] sm:$0xff] %v11950_v25  ;;  %v1849_v37 = vld [vmem:[%s13727_s1 + $0x3e8] sm:$0xff]  ;;  %v1850_v53 = vld [vmem:[%s13727_s1 + $0x3f0] sm:$0xff]  ;;  %v11967_v20 = vpop.eup %8243  ;;  %v4797_v4 = vadd.f32 %v14696_v19, %v4157_v8  ;;  %v4159_v15 = vmul.f32 %v14698_v16, %v14698_v16  ;;  %v11989_v8 = vmin.f32 %v2104_v34, 20.0 }
 0x311   : > { %v6638_v62 = vpop.f32.mrb[71].mxu1  ;;  %v3819_v24 = vpop.permute.xlu1 %3818  ;;  %6946 = vmatprep.mubr.f32.mxu1 %v14213_v63  ;;  %v6637_v38 = vadd.f32 %v6636_v36, %v10881_v52  ;;  %14695 = vst [vmem:[#allocation38_spill] sm:$0xff] %v11967_v20  ;;  %v4160_v36 = vmul.f32 %v14699_v18, %v14699_v18  ;;  %v11980_v47 = vadd.f32 %v1849_v37, %v1711_v48  ;;  %v14703_v29 = vld [vmem:[#allocation107_spill] sm:$0xff]  ;;  %v2608_v18 = vmul.f32 1.442695, %v2358_v40  ;;  %v14709_v34 = vld [vmem:[#allocation108_spill] sm:$0xff] }
 0x312   : > { %v6639_v60 = vadd.f32 %v6638_v62, %v10889_v11  ;;  %v4115_v3 = vadd.f32 %v3819_v24, %v10928_v31  ;;  %v3821_v17 = vpop.permute.xlu0 %3820  ;;  %v14700_v62 = vld [vmem:[#allocation206_spill] sm:$0xff]  ;;  %v2606_v24 = vmul.f32 1.442695, %v2357_v0  ;;  %v11978_v31 = vmin.f32 %v2103_v46, 20.0  ;;  %14704 = vst [vmem:[#allocation139_spill] sm:$0xff] %v11989_v8 }
 0x313   : > { %5308 = vrot.lane.b32.xlu1 %v14700_v62, %s8278_s22  ;;  %14702 = vst [vmem:[#allocation226_spill] sm:$0xff] %v11980_v47  ;;  %7263 = vst [vmem:[%s10900_s12 + $0x230] sm:$0xff] %v6637_v38  ;;  %v3505_v16 = vmul.f32 %v11950_v25, %v14703_v29  ;;  %v11991_v0 = vadd.f32 %v1850_v53, %v1716_v9  ;;  %v14707_v38 = vld [vmem:[#allocation137_spill] sm:$0xff]  ;;  %v3506_v9 = vmul.f32 %v11967_v20, %v14709_v34  ;;  %v14710_v62 = vld [vmem:[#allocation143_spill] sm:$0xff] }
 0x314   : > { %14701 = vst [vmem:[#allocation41_spill] sm:$0xff] %v11978_v31  ;;  %7264 = vst.msk [vmem:[%s10900_s12 + $0x238] sm:$0xff] %vm634_vm0, %v6639_v60  ;;  %v6642_v19 = vpop.f32.mrb[72].mxu1  ;;  %4544 = vrot.lane.b32.xlu0 %v2686_v14, %s8278_s22  ;;  %7908 = vmatmul.mubr.msk.f32.gmra.mrb[174].mxu1 %vm5692_vm1, %v4115_v3  ;;  %v4796_v60 = vadd.f32 %v14707_v38, %v4156_v7  ;;  %v4116_v3 = vadd.f32 %v3821_v17, %v10938_v42  ;;  %v7694_v53 = vadd.f32 -1.0, %v4797_v4  ;;  %v14711_v29 = vld [vmem:[#allocation53_spill] sm:$0xff]  ;;  %v14715_v38 = vld [vmem:[#allocation64_spill] sm:$0xff] }
 0x315   : > { %14705 = vst [vmem:[#allocation44_spill] sm:$0xff] %v11991_v0  ;;  %v6643_v48 = vadd.f32 %v6642_v19, %v10881_v52  ;;  %v6644_v46 = vpop.f32.mrb[73].mxu1  ;;  %v11994_v37 = vpop.permute.xlu1 %5280  ;;  %6952 = vmatprep.mubr.f32.mxu1 %v14213_v63  ;;  %v4798_v19 = vadd.f32 %v14710_v62, %v4158_v35  ;;  %v4161_v25 = vmul.f32 %v14711_v29, %v14711_v29  ;;  %8249 = vpow2.f32 %v2606_v24  ;;  %v14713_v35 = vld [vmem:[#allocation59_spill] sm:$0xff]  ;;  %v14720_v20 = vld [vmem:[#allocation145_spill] sm:$0xff] }
 0x316   : > { %14706 = vst [vmem:[#allocation47_spill] sm:$0xff] %v11994_v37  ;;  %v6645_v14 = vadd.f32 %v6644_v46, %v10889_v11  ;;  %v12000_v40 = vpop.permute.xlu0 %4516  ;;  %v14712_v37 = vld [vmem:[#allocation56_spill] sm:$0xff]  ;;  %v2359_v17 = vmul.f32 0.5, %v11978_v31  ;;  %v2105_v7 = vmax.f32 %v11980_v47, -30.0  ;;  %v1721_v4 = vadd.f32 %v11729_v61, %v11933_v10  ;;  %v12031_v10 = vpop.eup %8245 }
 0x317   : > { %14708 = vst [vmem:[#allocation50_spill] sm:$0xff] %v12000_v40  ;;  %v12009_v26 = vmul.f32 %v14712_v37, %v14712_v37  ;;  %7265 = vst [vmem:[%s10900_s12 + $0x240] sm:$0xff] %v6643_v48  ;;  %3878 = vrot.lane.b32.xlu1 %v3505_v16, %s8278_s22  ;;  %v12023_v46 = vmul.f32 %v14713_v35, %v14713_v35  ;;  %8251 = vpow2.f32 %v2608_v18  ;;  %v2360_v24 = vmul.f32 0.5, %v11989_v8  ;;  %v1851_v48 = vld [vmem:[%s13727_s1 + $0x3f8] sm:$0xff]  ;;  %v12040_v29 = vpop.eup %8247  ;;  %v14719_v35 = vld [vmem:[#allocation128_spill] sm:$0xff] }
 0x318   : > { %7266 = vst.msk [vmem:[%s10900_s12 + $0x248] sm:$0xff] %vm634_vm0, %v6645_v14  ;;  %3880 = vrot.lane.b32.xlu0 %v3506_v9, %s8278_s22  ;;  %7909 = vmatmul.mubr.msk.f32.gmra.mrb[176].mxu1 %vm5692_vm1, %v4116_v3  ;;  %v2106_v16 = vmax.f32 %v11991_v0, -30.0  ;;  %14714 = vst [vmem:[#allocation206_spill] sm:$0xff] %v12031_v10  ;;  %v7693_v37 = vadd.f32 -1.0, %v4796_v60  ;;  %v12035_v3 = vmul.f32 %v14715_v38, %v14715_v38  ;;  %v14716_v14 = vld [vmem:[#allocation272_spill] sm:$0xff]  ;;  %v14717_v9 = vld [vmem:[#allocation231_spill] sm:$0xff] }
 0x319   : > { %v3823_v61 = vpop.permute.xlu1 %3822  ;;  %6958 = vmatprep.mubr.f32.mxu1 %v14213_v63  ;;  %v2687_v62 = vmul.f32 %v14717_v9, %v14717_v9  ;;  %14718 = vst [vmem:[#allocation107_spill] sm:$0xff] %v12040_v29  ;;  %v5565_v8 = vsub.f32 %v7694_v53, %v14719_v35  ;;  %v7695_v31 = vadd.f32 -1.0, %v4798_v19  ;;  %v4799_v42 = vadd.f32 %v14720_v20, %v4159_v15  ;;  %v14721_v0 = vld [vmem:[#allocation150_spill] sm:$0xff]  ;;  %v14726_v19 = vld [vmem:[#allocation112_spill] sm:$0xff]  ;;  %v14730_v35 = vld [vmem:[#allocation113_spill] sm:$0xff] }
 0x31a   : > { %v4117_v18 = vadd.f32 %v3823_v61, %v14716_v14  ;;  %v3825_v34 = vpop.permute.xlu0 %3824  ;;  %v4800_v47 = vadd.f32 %v14721_v0, %v4160_v36  ;;  %v14722_v60 = vld [vmem:[#allocation210_spill] sm:$0xff]  ;;  %v2610_v40 = vmul.f32 1.442695, %v2359_v17  ;;  %v12047_v61 = vmin.f32 %v2105_v7, 20.0  ;;  %v14727_v7 = vld [vmem:[#allocation65_spill] sm:$0xff] }
 0x31b   : > { %5310 = vrot.lane.b32.xlu1 %v14722_v60, %s8278_s22  ;;  %v6648_v38 = vpop.f32.mrb[74].mxu1  ;;  %v12049_v14 = vadd.f32 %v1851_v48, %v1721_v4  ;;  %v2612_v20 = vmul.f32 1.442695, %v2360_v24  ;;  %v12054_v15 = vmin.f32 %v2106_v16, 20.0  ;;  %v3507_v17 = vmul.f32 %v12031_v10, %v14726_v19  ;;  %v14728_v48 = vld [vmem:[#allocation70_spill] sm:$0xff]  ;;  %v14729_v24 = vld [vmem:[#allocation273_spill] sm:$0xff] }
 0x31c   : > { %14723 = vst [vmem:[#allocation137_spill] sm:$0xff] %v12047_v61  ;;  %v6649_v9 = vadd.f32 %v6648_v38, %v10881_v52  ;;  %4546 = vrot.lane.b32.xlu0 %v2687_v62, %s8278_s22  ;;  %v6650_v53 = vpop.f32.mrb[75].mxu1  ;;  %7910 = vmatmul.mubr.msk.f32.gmra.mrb[178].mxu1 %vm5692_vm1, %v4117_v18  ;;  %v12064_v4 = vmul.f32 %v14727_v7, %v14727_v7  ;;  %v14731_v38 = vld [vmem:[#allocation127_spill] sm:$0xff]  ;;  %v5694_v19 = vsel %vm5692_vm1, %v5565_v8, 0.0  ;;  %v7696_v10 = vadd.f32 -1.0, %v4799_v42 }
 0x31d   : > { %14724 = vst [vmem:[#allocation108_spill] sm:$0xff] %v12054_v15  ;;  %v6651_v36 = vadd.f32 %v6650_v53, %v10889_v11  ;;  %v12057_v0 = vpop.permute.xlu1 %5282  ;;  %6964 = vmatprep.mubr.f32.mxu1 %v14213_v63  ;;  %v12068_v18 = vmul.f32 %v14728_v48, %v14728_v48  ;;  %v4118_v16 = vadd.f32 %v3825_v34, %v14729_v24  ;;  %v14733_v48 = vld [vmem:[#allocation130_spill] sm:$0xff]  ;;  %8253 = vpow2.f32 %v2610_v40  ;;  %v14734_v40 = vld [vmem:[#allocation156_spill] sm:$0xff] }
 0x31e   : > { %14725 = vst [vmem:[#allocation143_spill] sm:$0xff] %v12057_v0  ;;  %7267 = vst [vmem:[%s10900_s12 + $0x250] sm:$0xff] %v6649_v9  ;;  %v12072_v62 = vpop.permute.xlu0 %4518  ;;  %v3508_v60 = vmul.f32 %v12040_v29, %v14730_v35  ;;  %v5564_v53 = vsub.f32 %v7693_v37, %v14731_v38  ;;  %v14732_v0 = vld [vmem:[#allocation151_spill] sm:$0xff]  ;;  %v5566_v13 = vsub.f32 %v7695_v31, %v14733_v48  ;;  %v2361_v34 = vmul.f32 0.5, %v12047_v61  ;;  %v14737_v38 = vld [vmem:[#allocation132_spill] sm:$0xff] }
 0x31f   : > { %v4801_v7 = vadd.f32 %v14732_v0, %v4161_v25  ;;  %7268 = vst.msk [vmem:[%s10900_s12 + $0x258] sm:$0xff] %vm634_vm0, %v6651_v36  ;;  %3882 = vrot.lane.b32.xlu1 %v3507_v17, %s8278_s22  ;;  %v2107_v9 = vmax.f32 %v12049_v14, -30.0  ;;  %v7697_v8 = vadd.f32 -1.0, %v4800_v47  ;;  %8255 = vpow2.f32 %v2612_v20  ;;  %v12090_v31 = vpop.eup %8249  ;;  %v14738_v61 = vld [vmem:[#allocation159_spill] sm:$0xff] }
 0x320   : > { %v6654_v24 = vpop.f32.mrb[76].mxu1  ;;  %3884 = vrot.lane.b32.xlu0 %v3508_v60, %s8278_s22  ;;  %7911 = vmatmul.mubr.msk.f32.gmra.mrb[180].mxu1 %vm5692_vm1, %v4118_v16  ;;  %v2362_v42 = vmul.f32 0.5, %v12054_v15  ;;  %v4802_v0 = vadd.f32 %v14734_v40, %v12009_v26  ;;  %v14735_v16 = vld [vmem:[#allocation232_spill] sm:$0xff]  ;;  %v5567_v48 = vsub.f32 %v7696_v10, %v14737_v38  ;;  %v4803_v29 = vadd.f32 %v14738_v61, %v12023_v46  ;;  %v14741_v10 = vld [vmem:[#allocation133_spill] sm:$0xff]  ;;  %v14742_v46 = vld [vmem:[#allocation3_spill] sm:$0xff] }
 0x321   : > { %v6655_v25 = vadd.f32 %v6654_v24, %v10881_v52  ;;  %v6656_v37 = vpop.f32.mrb[77].mxu1  ;;  %v3827_v36 = vpop.permute.xlu1 %3826  ;;  %6970 = vmatprep.mubr.f32.mxu1 %v14213_v63  ;;  %v2688_v35 = vmul.f32 %v14735_v16, %v14735_v16  ;;  %v5693_v24 = vsel %vm5692_vm1, %v5564_v53, 0.0  ;;  %v7698_v15 = vadd.f32 -1.0, %v4801_v7  ;;  %v14739_v26 = vld [vmem:[#allocation212_spill] sm:$0xff]  ;;  %v14745_v16 = vld [vmem:[#allocation6_spill] sm:$0xff]  ;;  %v14747_v38 = vld [vmem:[#allocation135_spill] sm:$0xff] }
 0x322   : > { %v6657_v17 = vadd.f32 %v6656_v37, %v10889_v11  ;;  %v4119_v47 = vadd.f32 %v3827_v36, %v11030_v22  ;;  %v3829_v20 = vpop.permute.xlu0 %3828  ;;  %v12098_v60 = vpop.eup %8251  ;;  %v5695_v37 = vadd.f32 %v5694_v19, %v5693_v24  ;;  %v5696_v36 = vsel %vm5692_vm1, %v5566_v13, 0.0  ;;  %v14743_v19 = vld [vmem:[#allocation115_spill] sm:$0xff] }
 0x323   : > { %14736 = vst [vmem:[#allocation53_spill] sm:$0xff] %v12098_v60  ;;  %7269 = vst [vmem:[%s10900_s12 + $0x260] sm:$0xff] %v6655_v25  ;;  %5312 = vrot.lane.b32.xlu1 %v14739_v26, %s8278_s22  ;;  %v2614_v40 = vmul.f32 1.442695, %v2361_v34  ;;  %v12108_v22 = vmin.f32 %v2107_v9, 20.0  ;;  %v5568_v53 = vsub.f32 %v7697_v8, %v14741_v10  ;;  %v4804_v61 = vadd.f32 %v14742_v46, %v12035_v3  ;;  %v14744_v9 = vld [vmem:[#allocation71_spill] sm:$0xff] }
 0x324   : > { %7270 = vst.msk [vmem:[%s10900_s12 + $0x268] sm:$0xff] %vm634_vm0, %v6657_v17  ;;  %4548 = vrot.lane.b32.xlu0 %v2688_v35, %s8278_s22  ;;  %7912 = vmatmul.mubr.msk.f32.gmra.mrb[182].mxu1 %vm5692_vm1, %v4119_v47  ;;  %v2616_v7 = vmul.f32 1.442695, %v2362_v42  ;;  %v3509_v13 = vmul.f32 %v12090_v31, %v14743_v19  ;;  %v7699_v34 = vadd.f32 -1.0, %v4802_v0  ;;  %v4167_v17 = vmul.f32 %v14744_v9, %v14744_v9  ;;  %v14746_v8 = vld [vmem:[#allocation117_spill] sm:$0xff]  ;;  %v14748_v0 = vld [vmem:[#allocation163_spill] sm:$0xff] }
 0x325   : > { %14740 = vst [vmem:[#allocation56_spill] sm:$0xff] %v12108_v22  ;;  %v12117_v25 = vpop.permute.xlu1 %5284  ;;  %6976 = vmatprep.mubr.f32.mxu1 %v14213_v63  ;;  %v4120_v35 = vadd.f32 %v3829_v20, %v14745_v16  ;;  %v3510_v24 = vmul.f32 %v12098_v60, %v14746_v8  ;;  %v5697_v3 = vadd.f32 %v5696_v36, %v5695_v37  ;;  %v5698_v42 = vsel %vm5692_vm1, %v5567_v48, 0.0  ;;  %v14751_v8 = vld [vmem:[#allocation4_spill] sm:$0xff]  ;;  %v14945_v16 = vld [vmem:[#allocation181_spill] sm:$0xff] }
 0x326   : > { %v12125_v47 = vpop.permute.xlu0 %4520  ;;  %v5569_v26 = vsub.f32 %v7698_v15, %v14747_v38  ;;  %v7700_v10 = vadd.f32 -1.0, %v4803_v29  ;;  %v4805_v19 = vadd.f32 %v14748_v0, %v12064_v4  ;;  %8257 = vpow2.f32 %v2614_v40  ;;  %v14750_v40 = vld [vmem:[#allocation140_spill] sm:$0xff] }
 0x327   : > { %3886 = vrot.lane.b32.xlu1 %v3509_v13, %s8278_s22  ;;  %v6660_v46 = vpop.f32.mrb[78].mxu1  ;;  %v2363_v20 = vmul.f32 0.5, %v12108_v22  ;;  %v5700_v15 = vsel %vm5692_vm1, %v5568_v53, 0.0  ;;  %v7701_v29 = vadd.f32 -1.0, %v4804_v61  ;;  %8259 = vpow2.f32 %v2616_v7  ;;  %v12141_v4 = vpop.eup %8253  ;;  %v14752_v53 = vld [vmem:[#allocation34_spill] sm:$0xff] }
 0x328   : > { %v6661_v9 = vadd.f32 %v6660_v46, %v10881_v52  ;;  %3888 = vrot.lane.b32.xlu0 %v3510_v24, %s8278_s22  ;;  %v6662_v37 = vpop.f32.mrb[79].mxu1  ;;  %7913 = vmatmul.mubr.msk.f32.gmra.mrb[184].mxu1 %vm5692_vm1, %v4120_v35  ;;  %14749 = vst [vmem:[#allocation59_spill] sm:$0xff] %v12141_v4  ;;  %v5570_v13 = vsub.f32 %v7699_v34, %v14750_v40  ;;  %v5702_v0 = vsel %vm5692_vm1, %v5569_v26, 0.0  ;;  %v14755_v34 = vld [vmem:[#allocation26_spill] sm:$0xff]  ;;  %v14756_v40 = vld [vmem:[#allocation168_spill] sm:$0xff] }
 0x329   : > { %v6663_v48 = vadd.f32 %v6662_v37, %v10889_v11  ;;  %v3831_v36 = vpop.permute.xlu1 %3830  ;;  %6982 = vmatprep.mubr.f32.mxu1 %v14213_v63  ;;  %v4806_v24 = vadd.f32 %v14751_v8, %v12068_v18  ;;  %v2689_v61 = vmul.f32 %v14752_v53, %v14752_v53  ;;  %v12150_v7 = vpop.eup %8255  ;;  %v5699_v46 = vadd.f32 %v5698_v42, %v5697_v3  ;;  %v14754_v37 = vld [vmem:[#allocation141_spill] sm:$0xff]  ;;  %v14757_v26 = vld [vmem:[#allocation146_spill] sm:$0xff] }
 0x32a   : > { %7271 = vst [vmem:[%s10900_s12 + $0x270] sm:$0xff] %v6661_v9  ;;  %v4121_v35 = vadd.f32 %v3831_v36, %v11080_v58  ;;  %v3833_v38 = vpop.permute.xlu0 %3832  ;;  %14753 = vst [vmem:[#allocation64_spill] sm:$0xff] %v12150_v7  ;;  %v5571_v22 = vsub.f32 %v7700_v10, %v14754_v37  ;;  %v7702_v9 = vadd.f32 -1.0, %v4805_v19  ;;  %v4807_v36 = vadd.f32 %v14756_v40, %v4167_v17  ;;  %v14758_v19 = vld [vmem:[#allocation118_spill] sm:$0xff]  ;;  %v14760_v40 = vld [vmem:[#allocation76_spill] sm:$0xff] }
 0x32b   : > { %7272 = vst.msk [vmem:[%s10900_s12 + $0x278] sm:$0xff] %vm634_vm0, %v6663_v48  ;;  %5314 = vrot.lane.b32.xlu1 %v14755_v34, %s8278_s22  ;;  %v6666_v18 = vpop.f32.mrb[80].mxu1  ;;  %v2618_v8 = vmul.f32 1.442695, %v2363_v20  ;;  %v5701_v42 = vadd.f32 %v5700_v15, %v5699_v46  ;;  %v5572_v10 = vsub.f32 %v7701_v29, %v14757_v26  ;;  %v3511_v34 = vmul.f32 %v12141_v4, %v14758_v19  ;;  %v14759_v15 = vld [vmem:[#allocation120_spill] sm:$0xff]  ;;  %v14806_v4 = vld [vmem:[#allocation42_spill] sm:$0xff] }
 0x32c   : > { %v6667_v53 = vadd.f32 %v6666_v18, %v10881_v52  ;;  %4550 = vrot.lane.b32.xlu0 %v2689_v61, %s8278_s22  ;;  %v6668_v3 = vpop.f32.mrb[81].mxu1  ;;  %7914 = vmatmul.mubr.msk.f32.gmra.mrb[186].mxu1 %vm5692_vm1, %v4121_v35  ;;  %v5704_v17 = vsel %vm5692_vm1, %v5570_v13, 0.0  ;;  %v7703_v20 = vadd.f32 -1.0, %v4806_v24  ;;  %v4122_v61 = vadd.f32 %v3833_v38, %v11091_v41  ;;  %v14761_v24 = vld [vmem:[#allocation147_spill] sm:$0xff]  ;;  %v14879_v58 = vld [vmem:[#allocation60_spill] sm:$0xff] }
 0x32d   : > { %v6669_v48 = vadd.f32 %v6668_v3, %v10889_v11  ;;  %v12164_v37 = vpop.permute.xlu1 %5286  ;;  %6988 = vmatprep.mubr.f32.mxu1 %v14213_v63  ;;  %v3512_v29 = vmul.f32 %v12150_v7, %v14759_v15  ;;  %v5703_v46 = vadd.f32 %v5702_v0, %v5701_v42  ;;  %v5706_v18 = vsel %vm5692_vm1, %v5571_v22, 0.0 }
 0x32e   : > { %7273 = vst [vmem:[%s10900_s12 + $0x280] sm:$0xff] %v6667_v53  ;;  %v12172_v35 = vpop.permute.xlu0 %4522  ;;  %v4168_v3 = vmul.f32 %v14760_v40, %v14760_v40  ;;  %v5573_v38 = vsub.f32 %v7702_v9, %v14761_v24  ;;  %v7704_v53 = vadd.f32 -1.0, %v4807_v36  ;;  %8261 = vpow2.f32 %v2618_v8  ;;  %v14763_v9 = vld [vmem:[#allocation152_spill] sm:$0xff]  ;;  %v14764_v8 = vld [vmem:[#allocation5_spill] sm:$0xff]  ;;  %v14766_v24 = vld [vmem:[#allocation238_spill] sm:$0xff] }
 0x32f   : > { %7274 = vst.msk [vmem:[%s10900_s12 + $0x288] sm:$0xff] %vm634_vm0, %v6669_v48  ;;  %3890 = vrot.lane.b32.xlu1 %v3511_v34, %s8278_s22  ;;  %v6672_v13 = vpop.f32.mrb[82].mxu1  ;;  %v5705_v22 = vadd.f32 %v5704_v17, %v5703_v46  ;;  %v5708_v42 = vsel %vm5692_vm1, %v5572_v10, 0.0  ;;  %v5574_v36 = vsub.f32 %v7703_v20, %v14763_v9  ;;  %v2690_v17 = vmul.f32 %v14766_v24, %v14766_v24  ;;  %v14768_v46 = vld [vmem:[#allocation216_spill] sm:$0xff]  ;;  %v14769_v9 = vld [vmem:[#allocation155_spill] sm:$0xff] }
 0x330   : > { %v6673_v26 = vadd.f32 %v6672_v13, %v10881_v52  ;;  %3892 = vrot.lane.b32.xlu0 %v3512_v29, %s8278_s22  ;;  %v6674_v0 = vpop.f32.mrb[83].mxu1  ;;  %7915 = vmatmul.mubr.msk.f32.gmra.mrb[188].mxu1 %vm5692_vm1, %v4122_v61  ;;  %v12189_v34 = vpop.eup %8257  ;;  %v4808_v15 = vadd.f32 %v14764_v8, %v4168_v3  ;;  %v14765_v29 = vld [vmem:[#allocation288_spill] sm:$0xff]  ;;  %v5710_v20 = vsel %vm5692_vm1, %v5573_v38, 0.0  ;;  %v5575_v3 = vsub.f32 %v7704_v53, %v14769_v9  ;;  %v14772_v53 = vld [vmem:[#allocation122_spill] sm:$0xff] }
 0x331   : > { %v6675_v48 = vadd.f32 %v6674_v0, %v10889_v11  ;;  %v3835_v19 = vpop.permute.xlu1 %3834  ;;  %6994 = vmatprep.mubr.f32.mxu1 %v14213_v63  ;;  %14762 = vst [vmem:[#allocation231_spill] sm:$0xff] %v12189_v34  ;;  %v12197_v61 = vpop.eup %8259  ;;  %v5707_v10 = vadd.f32 %v5706_v18, %v5705_v22  ;;  %v14771_v22 = vld [vmem:[#allocation82_spill] sm:$0xff]  ;;  %v3513_v9 = vmul.f32 %v12189_v34, %v14772_v53 }
 0x332   : > { %7275 = vst [vmem:[%s10900_s12 + $0x290] sm:$0xff] %v6673_v26  ;;  %v4123_v40 = vadd.f32 %v3835_v19, %v14765_v29  ;;  %v3837_v13 = vpop.permute.xlu0 %3836  ;;  %14767 = vst [vmem:[#allocation128_spill] sm:$0xff] %v12197_v61  ;;  %v14770_v26 = vld [vmem:[#allocation77_spill] sm:$0xff] }
 0x333   : > { %7276 = vst.msk [vmem:[%s10900_s12 + $0x298] sm:$0xff] %vm634_vm0, %v6675_v48  ;;  %5316 = vrot.lane.b32.xlu1 %v14768_v46, %s8278_s22  ;;  %v6678_v0 = vpop.f32.mrb[84].mxu1  ;;  %v4169_v19 = vmul.f32 %v14770_v26, %v14770_v26  ;;  %v5709_v18 = vadd.f32 %v5708_v42, %v5707_v10  ;;  %v4170_v48 = vmul.f32 %v14771_v22, %v14771_v22  ;;  %v14773_v26 = vld [vmem:[#allocation289_spill] sm:$0xff]  ;;  %v14774_v42 = vld [vmem:[#allocation123_spill] sm:$0xff] }
 0x334   : > { %v6679_v8 = vadd.f32 %v6678_v0, %v10881_v52  ;;  %4552 = vrot.lane.b32.xlu0 %v2690_v17, %s8278_s22  ;;  %v6680_v24 = vpop.f32.mrb[85].mxu1  ;;  %7916 = vmatmul.mubr.msk.f32.gmra.mrb[190].mxu1 %vm5692_vm1, %v4123_v40  ;;  %v5712_v0 = vsel %vm5692_vm1, %v5574_v36, 0.0  ;;  %v7705_v17 = vadd.f32 -1.0, %v4808_v15  ;;  %v4124_v29 = vadd.f32 %v3837_v13, %v14773_v26  ;;  %v14776_v15 = vld [vmem:[#allocation7_spill] sm:$0xff] }
 0x335   : > { %v6681_v38 = vadd.f32 %v6680_v24, %v10889_v11  ;;  %v12213_v46 = vpop.permute.xlu1 %5288  ;;  %7000 = vmatprep.mubr.f32.mxu1 %v14213_v63  ;;  %v3514_v10 = vmul.f32 %v12197_v61, %v14774_v42  ;;  %v5711_v22 = vadd.f32 %v5710_v20, %v5709_v18  ;;  %v14775_v24 = vld [vmem:[#allocation172_spill] sm:$0xff]  ;;  %v5714_v36 = vsel %vm5692_vm1, %v5575_v3, 0.0  ;;  %v14777_v13 = vld [vmem:[#allocation31_spill] sm:$0xff] }
 0x336   : > { %7277 = vst [vmem:[%s10900_s12 + $0x2a0] sm:$0xff] %v6679_v8  ;;  %v12221_v40 = vpop.permute.xlu0 %4524  ;;  %v4809_v7 = vadd.f32 %v14775_v24, %v4169_v19  ;;  %v4810_v34 = vadd.f32 %v14776_v15, %v4170_v48  ;;  %v5576_v8 = vsub.f32 %v7705_v17, %v14777_v13  ;;  %v14779_v17 = vld [vmem:[#allocation36_spill] sm:$0xff]  ;;  %v14788_v61 = vld [vmem:[#allocation63_spill] sm:$0xff] }
 0x337   : > { %7278 = vst.msk [vmem:[%s10900_s12 + $0x2a8] sm:$0xff] %vm634_vm0, %v6681_v38  ;;  %3894 = vrot.lane.b32.xlu1 %v3513_v9, %s8278_s22  ;;  %v6684_v53 = vpop.f32.mrb[86].mxu1  ;;  %v5713_v19 = vadd.f32 %v5712_v0, %v5711_v22  ;;  %v2691_v42 = vmul.f32 %v14779_v17, %v14779_v17  ;;  %v14782_v22 = vld [vmem:[#allocation220_spill] sm:$0xff] }
 0x338   : > { %v6685_v26 = vadd.f32 %v6684_v53, %v10881_v52  ;;  %3896 = vrot.lane.b32.xlu0 %v3514_v10, %s8278_s22  ;;  %v6686_v20 = vpop.f32.mrb[87].mxu1  ;;  %7917 = vmatmul.mubr.msk.f32.gmra.mrb[192].mxu1 %vm5692_vm1, %v4124_v29  ;;  %v12237_v9 = vpop.eup %8261  ;;  %v14780_v10 = vld [vmem:[#allocation83_spill] sm:$0xff]  ;;  %v14781_v29 = vld [vmem:[#allocation88_spill] sm:$0xff]  ;;  %v7707_v13 = vadd.f32 -1.0, %v4810_v34 }
 0x339   : > { %v6687_v18 = vadd.f32 %v6686_v20, %v10889_v11  ;;  %v3839_v38 = vpop.permute.xlu1 %3838  ;;  %7006 = vmatprep.mubr.f32.mxu1 %v14213_v63  ;;  %14778 = vst [vmem:[#allocation145_spill] sm:$0xff] %v12237_v9  ;;  %v5715_v24 = vadd.f32 %v5714_v36, %v5713_v19  ;;  %v4171_v53 = vmul.f32 %v14780_v10, %v14780_v10  ;;  %v5716_v20 = vsel %vm5692_vm1, %v5576_v8, 0.0  ;;  %v14783_v19 = vld [vmem:[#allocation176_spill] sm:$0xff]  ;;  %v14786_v8 = vld [vmem:[#allocation29_spill] sm:$0xff] }
 0x33a   : > { %7279 = vst [vmem:[%s10900_s12 + $0x2b0] sm:$0xff] %v6685_v26  ;;  %v4125_v3 = vadd.f32 %v3839_v38, %v11190_v55  ;;  %v3841_v48 = vpop.permute.xlu0 %3840  ;;  %v4172_v0 = vmul.f32 %v14781_v29, %v14781_v29  ;;  %v7706_v26 = vadd.f32 -1.0, %v4809_v7  ;;  %v14785_v7 = vld [vmem:[#allocation125_spill] sm:$0xff] }
 0x33b   : > { %7280 = vst.msk [vmem:[%s10900_s12 + $0x2b8] sm:$0xff] %vm634_vm0, %v6687_v18  ;;  %5318 = vrot.lane.b32.xlu1 %v14782_v22, %s8278_s22  ;;  %v6690_v15 = vpop.f32.mrb[88].mxu1  ;;  %v4811_v17 = vadd.f32 %v14783_v19, %v4171_v53  ;;  %v14784_v18 = vld [vmem:[#allocation9_spill] sm:$0xff]  ;;  %v3515_v34 = vmul.f32 %v12237_v9, %v14785_v7  ;;  %v4126_v41 = vadd.f32 %v3841_v48, %v14788_v61  ;;  %v14789_v53 = vld [vmem:[#allocation244_spill] sm:$0xff]  ;;  %v14795_v61 = vld [vmem:[#allocation222_spill] sm:$0xff] }
 0x33c   : > { %v6691_v38 = vadd.f32 %v6690_v15, %v10881_v52  ;;  %4554 = vrot.lane.b32.xlu0 %v2691_v42, %s8278_s22  ;;  %v6692_v36 = vpop.f32.mrb[89].mxu1  ;;  %7918 = vmatmul.mubr.msk.f32.gmra.mrb[194].mxu1 %vm5692_vm1, %v4125_v3  ;;  %v4812_v10 = vadd.f32 %v14784_v18, %v4172_v0  ;;  %v5577_v15 = vsub.f32 %v7706_v26, %v14786_v8  ;;  %v14787_v42 = vld [vmem:[#allocation33_spill] sm:$0xff]  ;;  %v14797_v9 = vld [vmem:[#allocation35_spill] sm:$0xff] }
 0x33d   : > { %v6693_v29 = vadd.f32 %v6692_v36, %v10889_v11  ;;  %v12258_v22 = vpop.permute.xlu1 %5290  ;;  %7012 = vmatprep.mubr.f32.mxu1 %v14213_v63  ;;  %v5578_v55 = vsub.f32 %v7707_v13, %v14787_v42  ;;  %v2692_v0 = vmul.f32 %v14789_v53, %v14789_v53  ;;  %v5717_v36 = vadd.f32 %v5716_v20, %v5715_v24  ;;  %v14790_v18 = vld [vmem:[#allocation89_spill] sm:$0xff]  ;;  %v14791_v24 = vld [vmem:[#allocation94_spill] sm:$0xff] }
 0x33e   : > { %7281 = vst [vmem:[%s10900_s12 + $0x2c0] sm:$0xff] %v6691_v38  ;;  %v12267_v3 = vpop.permute.xlu0 %4526  ;;  %v4173_v26 = vmul.f32 %v14790_v18, %v14790_v18  ;;  %v7708_v38 = vadd.f32 -1.0, %v4811_v17  ;;  %v7709_v7 = vadd.f32 -1.0, %v4812_v10  ;;  %v4174_v20 = vmul.f32 %v14791_v24, %v14791_v24  ;;  %v14793_v10 = vld [vmem:[#allocation180_spill] sm:$0xff]  ;;  %v14794_v18 = vld [vmem:[#allocation11_spill] sm:$0xff] }
 0x33f   : > { %7282 = vst.msk [vmem:[%s10900_s12 + $0x2c8] sm:$0xff] %vm634_vm0, %v6693_v29  ;;  %3898 = vrot.lane.b32.xlu1 %v3515_v34, %s8278_s22  ;;  %v6696_v19 = vpop.f32.mrb[90].mxu1  ;;  %v5718_v8 = vsel %vm5692_vm1, %v5577_v15, 0.0  ;;  %v5720_v42 = vsel %vm5692_vm1, %v5578_v55, 0.0  ;;  %v14796_v55 = vld [vmem:[#allocation237_spill] sm:$0xff] }
 0x340   : > { %v6697_v13 = vadd.f32 %v6696_v19, %v10881_v52  ;;  %4556 = vrot.lane.b32.xlu0 %v2692_v0, %s8278_s22  ;;  %v6698_v48 = vpop.f32.mrb[91].mxu1  ;;  %7919 = vmatmul.mubr.msk.f32.gmra.mrb[196].mxu1 %vm5692_vm1, %v4126_v41  ;;  %v14792_v41 = vld [vmem:[#allocation39_spill] sm:$0xff]  ;;  %v4813_v19 = vadd.f32 %v14793_v10, %v4173_v26  ;;  %v4814_v24 = vadd.f32 %v14794_v18, %v4174_v20 }
 0x341   : > { %v6699_v29 = vadd.f32 %v6698_v48, %v10889_v11  ;;  %v3843_v34 = vpop.permute.xlu1 %3842  ;;  %7018 = vmatprep.mubr.f32.mxu1 %v14213_v63  ;;  %v2693_v17 = vmul.f32 %v14792_v41, %v14792_v41  ;;  %v5719_v48 = vadd.f32 %v5718_v8, %v5717_v36  ;;  %v14799_v41 = vld [vmem:[#allocation95_spill] sm:$0xff] }
 0x342   : > { %7283 = vst [vmem:[%s10900_s12 + $0x2d0] sm:$0xff] %v6697_v13  ;;  %v4127_v53 = vadd.f32 %v3843_v34, %v11245_v44  ;;  %v3845_v0 = vpop.permute.xlu0 %3844  ;;  %v5579_v13 = vsub.f32 %v7708_v38, %v14796_v55  ;;  %v5580_v34 = vsub.f32 %v7709_v7, %v14797_v9  ;;  %v14798_v9 = vld [vmem:[#allocation250_spill] sm:$0xff]  ;;  %v7710_v8 = vadd.f32 -1.0, %v4813_v19  ;;  %v14801_v10 = vld [vmem:[#allocation227_spill] sm:$0xff] }
 0x343   : > { %7284 = vst.msk [vmem:[%s10900_s12 + $0x2d8] sm:$0xff] %vm634_vm0, %v6699_v29  ;;  %5320 = vrot.lane.b32.xlu1 %v14795_v61, %s8278_s22  ;;  %v6702_v15 = vpop.f32.mrb[92].mxu1  ;;  %v5721_v20 = vadd.f32 %v5720_v42, %v5719_v48  ;;  %v4128_v61 = vadd.f32 %v3845_v0, %v11258_v51  ;;  %v2694_v7 = vmul.f32 %v14798_v9, %v14798_v9  ;;  %v14802_v55 = vld [vmem:[#allocation183_spill] sm:$0xff] }
 0x344   : > { %v6703_v44 = vadd.f32 %v6702_v15, %v10881_v52  ;;  %4558 = vrot.lane.b32.xlu0 %v2693_v17, %s8278_s22  ;;  %v6704_v26 = vpop.f32.mrb[93].mxu1  ;;  %7920 = vmatmul.mubr.msk.f32.gmra.mrb[198].mxu1 %vm5692_vm1, %v4127_v53  ;;  %v4175_v17 = vmul.f32 %v14799_v41, %v14799_v41  ;;  %v14800_v53 = vld [vmem:[#allocation99_spill] sm:$0xff]  ;;  %v5722_v0 = vsel %vm5692_vm1, %v5579_v13, 0.0  ;;  %v5724_v48 = vsel %vm5692_vm1, %v5580_v34, 0.0 }
 0x345   : > { %v6705_v36 = vadd.f32 %v6704_v26, %v10889_v11  ;;  %v12301_v29 = vpop.permute.xlu1 %5292  ;;  %7024 = vmatprep.mubr.f32.mxu1 %v14213_v63  ;;  %v4176_v42 = vmul.f32 %v14800_v53, %v14800_v53  ;;  %v5723_v41 = vadd.f32 %v5722_v0, %v5721_v20  ;;  %v14804_v13 = vld [vmem:[#allocation243_spill] sm:$0xff]  ;;  %v14807_v20 = vld [vmem:[#allocation229_spill] sm:$0xff] }
 0x346   : > { %7285 = vst [vmem:[%s10900_s12 + $0x2e0] sm:$0xff] %v6703_v44  ;;  %v12306_v38 = vpop.permute.xlu0 %4528  ;;  %v7711_v44 = vadd.f32 -1.0, %v4814_v24  ;;  %v4815_v26 = vadd.f32 %v14802_v55, %v4175_v17  ;;  %v5581_v34 = vsub.f32 %v7710_v8, %v14804_v13  ;;  %v14808_v0 = vld [vmem:[#allocation101_spill] sm:$0xff] }
 0x347   : > { %7286 = vst.msk [vmem:[%s10900_s12 + $0x2e8] sm:$0xff] %vm634_vm0, %v6705_v36  ;;  %5322 = vrot.lane.b32.xlu1 %v14801_v10, %s8278_s22  ;;  %v6708_v18 = vpop.f32.mrb[94].mxu1  ;;  %v14803_v36 = vld [vmem:[#allocation13_spill] sm:$0xff]  ;;  %v5725_v17 = vadd.f32 %v5724_v48, %v5723_v41  ;;  %v4177_v8 = vmul.f32 %v14808_v0, %v14808_v0 }
 0x348   : > { %v6709_v19 = vadd.f32 %v6708_v18, %v10881_v52  ;;  %4560 = vrot.lane.b32.xlu0 %v2694_v7, %s8278_s22  ;;  %v6710_v15 = vpop.f32.mrb[95].mxu1  ;;  %7921 = vmatmul.mubr.msk.f32.gmra.mrb[200].mxu1 %vm5692_vm1, %v4128_v61  ;;  %v4816_v9 = vadd.f32 %v14803_v36, %v4176_v42  ;;  %v14805_v10 = vld [vmem:[#allocation37_spill] sm:$0xff]  ;;  %v2695_v61 = vmul.f32 %v14806_v4, %v14806_v4  ;;  %v7712_v4 = vadd.f32 -1.0, %v4815_v26  ;;  %v14810_v26 = vld [vmem:[#allocation255_spill] sm:$0xff] }
 0x349   : > { %v6711_v53 = vadd.f32 %v6710_v15, %v10889_v11  ;;  %v3847_v24 = vpop.permute.xlu1 %3846  ;;  %7030 = vmatprep.mubr.f32.mxu1 %v14213_v63  ;;  %v5582_v18 = vsub.f32 %v7711_v44, %v14805_v10  ;;  %v14809_v15 = vld [vmem:[#allocation104_spill] sm:$0xff] }
 0x34a   : > { %7287 = vst [vmem:[%s10900_s12 + $0x2f0] sm:$0xff] %v6709_v19  ;;  %v4129_v7 = vadd.f32 %v3847_v24, %v11300_v54  ;;  %v3849_v51 = vpop.permute.xlu0 %3848  ;;  %v7713_v48 = vadd.f32 -1.0, %v4816_v9  ;;  %v4178_v55 = vmul.f32 %v14809_v15, %v14809_v15  ;;  %v2696_v9 = vmul.f32 %v14810_v26, %v14810_v26  ;;  %v14816_v26 = vld [vmem:[#allocation45_spill] sm:$0xff]  ;;  %v14842_v54 = vld [vmem:[#allocation51_spill] sm:$0xff] }
 0x34b   : > { %7288 = vst.msk [vmem:[%s10900_s12 + $0x2f8] sm:$0xff] %vm634_vm0, %v6711_v53  ;;  %5324 = vrot.lane.b32.xlu1 %v14807_v20, %s8278_s22  ;;  %v6714_v42 = vpop.f32.mrb[96].mxu1  ;;  %v5726_v53 = vsel %vm5692_vm1, %v5581_v34, 0.0  ;;  %v5728_v24 = vsel %vm5692_vm1, %v5582_v18, 0.0  ;;  %v4130_v13 = vadd.f32 %v3849_v51, %v11313_v21  ;;  %v14812_v20 = vld [vmem:[#allocation15_spill] sm:$0xff]  ;;  %v14813_v34 = vld [vmem:[#allocation233_spill] sm:$0xff] }
 0x34c   : > { %v6715_v44 = vadd.f32 %v6714_v42, %v10881_v52  ;;  %4562 = vrot.lane.b32.xlu0 %v2695_v61, %s8278_s22  ;;  %v6716_v19 = vpop.f32.mrb[97].mxu1  ;;  %7922 = vmatmul.mubr.msk.f32.gmra.mrb[202].mxu1 %vm5692_vm1, %v4129_v7  ;;  %v14811_v7 = vld [vmem:[#allocation187_spill] sm:$0xff]  ;;  %v4818_v42 = vadd.f32 %v14812_v20, %v4178_v55  ;;  %v5727_v0 = vadd.f32 %v5726_v53, %v5725_v17  ;;  %v14817_v20 = vld [vmem:[#allocation106_spill] sm:$0xff] }
 0x34d   : > { %v6717_v36 = vadd.f32 %v6716_v19, %v10889_v11  ;;  %v12345_v41 = vpop.permute.xlu1 %5294  ;;  %7036 = vmatprep.mubr.f32.mxu1 %v14213_v63  ;;  %v4817_v61 = vadd.f32 %v14811_v7, %v4177_v8  ;;  %v14814_v19 = vld [vmem:[#allocation249_spill] sm:$0xff] }
 0x34e   : > { %7289 = vst [vmem:[%s10900_s12 + $0x300] sm:$0xff] %v6715_v44  ;;  %v12352_v10 = vpop.permute.xlu0 %4530  ;;  %v5583_v51 = vsub.f32 %v7712_v4, %v14814_v19  ;;  %v14815_v44 = vld [vmem:[#allocation40_spill] sm:$0xff]  ;;  %v5729_v55 = vadd.f32 %v5728_v24, %v5727_v0  ;;  %v14819_v24 = vld [vmem:[#allocation235_spill] sm:$0xff] }
 0x34f   : > { %7290 = vst.msk [vmem:[%s10900_s12 + $0x308] sm:$0xff] %vm634_vm0, %v6717_v36  ;;  %5326 = vrot.lane.b32.xlu1 %v14813_v34, %s8278_s22  ;;  %v6720_v18 = vpop.f32.mrb[98].mxu1  ;;  %v5584_v15 = vsub.f32 %v7713_v48, %v14815_v44  ;;  %v2697_v48 = vmul.f32 %v14816_v26, %v14816_v26  ;;  %v7714_v7 = vadd.f32 -1.0, %v4817_v61  ;;  %v14818_v34 = vld [vmem:[#allocation110_spill] sm:$0xff] }
 0x350   : > { %v6721_v21 = vadd.f32 %v6720_v18, %v10881_v52  ;;  %4564 = vrot.lane.b32.xlu0 %v2696_v9, %s8278_s22  ;;  %v6722_v8 = vpop.f32.mrb[99].mxu1  ;;  %7923 = vmatmul.mubr.msk.f32.gmra.mrb[204].mxu1 %vm5692_vm1, %v4130_v13  ;;  %v4179_v9 = vmul.f32 %v14817_v20, %v14817_v20  ;;  %v4180_v13 = vmul.f32 %v14818_v34, %v14818_v34  ;;  %v5730_v18 = vsel %vm5692_vm1, %v5583_v51, 0.0  ;;  %v14822_v51 = vld [vmem:[#allocation254_spill] sm:$0xff] }
 0x351   : > { %v6723_v17 = vadd.f32 %v6722_v8, %v10889_v11  ;;  %v3851_v36 = vpop.permute.xlu1 %3850  ;;  %7042 = vmatprep.mubr.f32.mxu1 %v14213_v63  ;;  %v5732_v19 = vsel %vm5692_vm1, %v5584_v15, 0.0  ;;  %v14820_v8 = vld [vmem:[#allocation192_spill] sm:$0xff]  ;;  %v5731_v20 = vadd.f32 %v5730_v18, %v5729_v55  ;;  %v5585_v15 = vsub.f32 %v7714_v7, %v14822_v51  ;;  %v14825_v55 = vld [vmem:[#allocation239_spill] sm:$0xff] }
 0x352   : > { %7291 = vst [vmem:[%s10900_s12 + $0x310] sm:$0xff] %v6721_v21  ;;  %v4131_v53 = vadd.f32 %v3851_v36, %v11355_v56  ;;  %v3853_v4 = vpop.permute.xlu0 %3852  ;;  %v7715_v21 = vadd.f32 -1.0, %v4818_v42  ;;  %v14821_v36 = vld [vmem:[#allocation17_spill] sm:$0xff] }
 0x353   : > { %7292 = vst.msk [vmem:[%s10900_s12 + $0x318] sm:$0xff] %vm634_vm0, %v6723_v17  ;;  %5328 = vrot.lane.b32.xlu1 %v14819_v24, %s8278_s22  ;;  %v6726_v0 = vpop.f32.mrb[100].mxu1  ;;  %v4819_v17 = vadd.f32 %v14820_v8, %v4179_v9  ;;  %v4820_v26 = vadd.f32 %v14821_v36, %v4180_v13  ;;  %v14823_v24 = vld [vmem:[#allocation43_spill] sm:$0xff]  ;;  %v5733_v13 = vadd.f32 %v5732_v19, %v5731_v20  ;;  %v14827_v8 = vld [vmem:[#allocation114_spill] sm:$0xff]  ;;  %v5734_v51 = vsel %vm5692_vm1, %v5585_v15, 0.0 }
 0x354   : > { %v6727_v61 = vadd.f32 %v6726_v0, %v10881_v52  ;;  %4566 = vrot.lane.b32.xlu0 %v2697_v48, %s8278_s22  ;;  %v6728_v44 = vpop.f32.mrb[101].mxu1  ;;  %7924 = vmatmul.mubr.msk.f32.gmra.mrb[206].mxu1 %vm5692_vm1, %v4131_v53  ;;  %v5586_v0 = vsub.f32 %v7715_v21, %v14823_v24  ;;  %v4132_v48 = vadd.f32 %v3853_v4, %v11368_v32  ;;  %v14824_v53 = vld [vmem:[#allocation261_spill] sm:$0xff]  ;;  %v14833_v32 = vld [vmem:[#allocation46_spill] sm:$0xff] }
 0x355   : > { %v6729_v42 = vadd.f32 %v6728_v44, %v10889_v11  ;;  %v12389_v34 = vpop.permute.xlu1 %5296  ;;  %7048 = vmatprep.mubr.f32.mxu1 %v14213_v63  ;;  %v2698_v9 = vmul.f32 %v14824_v53, %v14824_v53  ;;  %v14826_v44 = vld [vmem:[#allocation111_spill] sm:$0xff]  ;;  %v7717_v19 = vadd.f32 -1.0, %v4820_v26  ;;  %v4182_v36 = vmul.f32 %v14827_v8, %v14827_v8  ;;  %v14829_v26 = vld [vmem:[#allocation196_spill] sm:$0xff]  ;;  %v14831_v8 = vld [vmem:[#allocation241_spill] sm:$0xff] }
 0x356   : > { %7293 = vst [vmem:[%s10900_s12 + $0x320] sm:$0xff] %v6727_v61  ;;  %v12396_v56 = vpop.permute.xlu0 %4532  ;;  %v4181_v7 = vmul.f32 %v14826_v44, %v14826_v44  ;;  %v7716_v61 = vadd.f32 -1.0, %v4819_v17  ;;  %v5736_v24 = vsel %vm5692_vm1, %v5586_v0, 0.0  ;;  %v14832_v0 = vld [vmem:[#allocation260_spill] sm:$0xff] }
 0x357   : > { %7294 = vst.msk [vmem:[%s10900_s12 + $0x328] sm:$0xff] %vm634_vm0, %v6729_v42  ;;  %5330 = vrot.lane.b32.xlu1 %v14825_v55, %s8278_s22  ;;  %v6732_v18 = vpop.f32.mrb[102].mxu1 }
 0x358   : > { %v6733_v21 = vadd.f32 %v6732_v18, %v10881_v52  ;;  %4568 = vrot.lane.b32.xlu0 %v2698_v9, %s8278_s22  ;;  %v6734_v4 = vpop.f32.mrb[103].mxu1  ;;  %7925 = vmatmul.mubr.msk.f32.gmra.mrb[208].mxu1 %vm5692_vm1, %v4132_v48  ;;  %v14828_v48 = vld [vmem:[#allocation48_spill] sm:$0xff]  ;;  %v4821_v55 = vadd.f32 %v14829_v26, %v4181_v7 }
 0x359   : > { %v6735_v20 = vadd.f32 %v6734_v4, %v10889_v11  ;;  %v3855_v42 = vpop.permute.xlu1 %3854  ;;  %7054 = vmatprep.mubr.f32.mxu1 %v14213_v63  ;;  %v2699_v17 = vmul.f32 %v14828_v48, %v14828_v48  ;;  %v14830_v18 = vld [vmem:[#allocation20_spill] sm:$0xff]  ;;  %v5735_v4 = vadd.f32 %v5734_v51, %v5733_v13 }
 0x35a   : > { %7295 = vst [vmem:[%s10900_s12 + $0x330] sm:$0xff] %v6733_v21  ;;  %v4133_v53 = vadd.f32 %v3855_v42, %v11410_v12  ;;  %v3857_v9 = vpop.permute.xlu0 %3856  ;;  %v4822_v44 = vadd.f32 %v14830_v18, %v4182_v36  ;;  %v5587_v21 = vsub.f32 %v7716_v61, %v14832_v0  ;;  %v5588_v42 = vsub.f32 %v7717_v19, %v14833_v32  ;;  %v14834_v32 = vld [vmem:[#allocation266_spill] sm:$0xff] }
 0x35b   : > { %7296 = vst.msk [vmem:[%s10900_s12 + $0x338] sm:$0xff] %vm634_vm0, %v6735_v20  ;;  %5332 = vrot.lane.b32.xlu1 %v14831_v8, %s8278_s22  ;;  %v6738_v15 = vpop.f32.mrb[104].mxu1  ;;  %v5737_v36 = vadd.f32 %v5736_v24, %v5735_v4  ;;  %v4134_v51 = vadd.f32 %v3857_v9, %v11423_v6  ;;  %v2700_v19 = vmul.f32 %v14834_v32, %v14834_v32  ;;  %v7718_v48 = vadd.f32 -1.0, %v4821_v55  ;;  %v14837_v18 = vld [vmem:[#allocation246_spill] sm:$0xff] }
 0x35c   : > { %v6739_v12 = vadd.f32 %v6738_v15, %v10881_v52  ;;  %4570 = vrot.lane.b32.xlu0 %v2699_v17, %s8278_s22  ;;  %v6740_v7 = vpop.f32.mrb[105].mxu1  ;;  %7926 = vmatmul.mubr.msk.f32.gmra.mrb[210].mxu1 %vm5692_vm1, %v4133_v53  ;;  %v14835_v17 = vld [vmem:[#allocation116_spill] sm:$0xff]  ;;  %v14836_v53 = vld [vmem:[#allocation119_spill] sm:$0xff]  ;;  %v5738_v9 = vsel %vm5692_vm1, %v5587_v21, 0.0  ;;  %v5740_v8 = vsel %vm5692_vm1, %v5588_v42, 0.0  ;;  %v14838_v0 = vld [vmem:[#allocation202_spill] sm:$0xff] }
 0x35d   : > { %v6741_v13 = vadd.f32 %v6740_v7, %v10889_v11  ;;  %v12431_v20 = vpop.permute.xlu1 %5298  ;;  %7060 = vmatprep.mubr.f32.mxu1 %v14213_v63  ;;  %v4183_v26 = vmul.f32 %v14835_v17, %v14835_v17  ;;  %v4184_v24 = vmul.f32 %v14836_v53, %v14836_v53  ;;  %v5739_v17 = vadd.f32 %v5738_v9, %v5737_v36  ;;  %v14840_v21 = vld [vmem:[#allocation265_spill] sm:$0xff]  ;;  %v14843_v36 = vld [vmem:[#allocation247_spill] sm:$0xff] }
 0x35e   : > { %7297 = vst [vmem:[%s10900_s12 + $0x340] sm:$0xff] %v6739_v12  ;;  %v12436_v61 = vpop.permute.xlu0 %4534  ;;  %v7719_v12 = vadd.f32 -1.0, %v4822_v44  ;;  %v5589_v42 = vsub.f32 %v7718_v48, %v14840_v21  ;;  %v14844_v9 = vld [vmem:[#allocation121_spill] sm:$0xff] }
 0x35f   : > { %7298 = vst.msk [vmem:[%s10900_s12 + $0x348] sm:$0xff] %vm634_vm0, %v6741_v13  ;;  %5334 = vrot.lane.b32.xlu1 %v14837_v18, %s8278_s22  ;;  %v6744_v4 = vpop.f32.mrb[106].mxu1  ;;  %v4823_v7 = vadd.f32 %v14838_v0, %v4183_v26  ;;  %v14839_v13 = vld [vmem:[#allocation22_spill] sm:$0xff]  ;;  %v5741_v26 = vadd.f32 %v5740_v8, %v5739_v17  ;;  %v4185_v48 = vmul.f32 %v14844_v9, %v14844_v9 }
 0x360   : > { %v6745_v55 = vadd.f32 %v6744_v4, %v10881_v52  ;;  %4572 = vrot.lane.b32.xlu0 %v2700_v19, %s8278_s22  ;;  %v6746_v15 = vpop.f32.mrb[107].mxu1  ;;  %7927 = vmatmul.mubr.msk.f32.gmra.mrb[212].mxu1 %vm5692_vm1, %v4134_v51  ;;  %v4824_v32 = vadd.f32 %v14839_v13, %v4184_v24  ;;  %v14841_v18 = vld [vmem:[#allocation270_spill] sm:$0xff]  ;;  %v2701_v51 = vmul.f32 %v14842_v54, %v14842_v54 }
 0x361   : > { %v6747_v53 = vadd.f32 %v6746_v15, %v10889_v11  ;;  %v3859_v44 = vpop.permute.xlu1 %3858  ;;  %7066 = vmatprep.mubr.f32.mxu1 %v14213_v63  ;;  %v5590_v4 = vsub.f32 %v7719_v12, %v14841_v18  ;;  %v7720_v54 = vadd.f32 -1.0, %v4823_v7  ;;  %v14845_v15 = vld [vmem:[#allocation124_spill] sm:$0xff]  ;;  %v14846_v7 = vld [vmem:[#allocation271_spill] sm:$0xff] }
 0x362   : > { %7299 = vst [vmem:[%s10900_s12 + $0x350] sm:$0xff] %v6745_v55  ;;  %v4135_v19 = vadd.f32 %v3859_v44, %v11465_v27  ;;  %v3861_v6 = vpop.permute.xlu0 %3860  ;;  %v7721_v8 = vadd.f32 -1.0, %v4824_v32  ;;  %v4186_v0 = vmul.f32 %v14845_v15, %v14845_v15  ;;  %v2702_v32 = vmul.f32 %v14846_v7, %v14846_v7  ;;  %v14852_v7 = vld [vmem:[#allocation54_spill] sm:$0xff] }
 0x363   : > { %7300 = vst.msk [vmem:[%s10900_s12 + $0x358] sm:$0xff] %vm634_vm0, %v6747_v53  ;;  %5336 = vrot.lane.b32.xlu1 %v14843_v36, %s8278_s22  ;;  %v6750_v24 = vpop.f32.mrb[108].mxu1  ;;  %v5742_v53 = vsel %vm5692_vm1, %v5589_v42, 0.0  ;;  %v5744_v44 = vsel %vm5692_vm1, %v5590_v4, 0.0  ;;  %v4136_v21 = vadd.f32 %v3861_v6, %v11478_v59  ;;  %v14848_v36 = vld [vmem:[#allocation24_spill] sm:$0xff]  ;;  %v14849_v42 = vld [vmem:[#allocation251_spill] sm:$0xff] }
 0x364   : > { %v6751_v12 = vadd.f32 %v6750_v24, %v10881_v52  ;;  %4574 = vrot.lane.b32.xlu0 %v2701_v51, %s8278_s22  ;;  %v6752_v55 = vpop.f32.mrb[109].mxu1  ;;  %7928 = vmatmul.mubr.msk.f32.gmra.mrb[214].mxu1 %vm5692_vm1, %v4135_v19  ;;  %v14847_v19 = vld [vmem:[#allocation208_spill] sm:$0xff]  ;;  %v4826_v24 = vadd.f32 %v14848_v36, %v4186_v0  ;;  %v5743_v9 = vadd.f32 %v5742_v53, %v5741_v26  ;;  %v14853_v36 = vld [vmem:[#allocation126_spill] sm:$0xff] }
 0x365   : > { %v6753_v13 = vadd.f32 %v6752_v55, %v10889_v11  ;;  %v12475_v17 = vpop.permute.xlu1 %5300  ;;  %7072 = vmatprep.mubr.f32.mxu1 %v14213_v63  ;;  %v4825_v51 = vadd.f32 %v14847_v19, %v4185_v48  ;;  %v14850_v55 = vld [vmem:[#allocation269_spill] sm:$0xff] }
 0x366   : > { %7301 = vst [vmem:[%s10900_s12 + $0x360] sm:$0xff] %v6751_v12  ;;  %v12482_v18 = vpop.permute.xlu0 %4536  ;;  %v5591_v6 = vsub.f32 %v7720_v54, %v14850_v55  ;;  %v14851_v12 = vld [vmem:[#allocation275_spill] sm:$0xff]  ;;  %v5745_v0 = vadd.f32 %v5744_v44, %v5743_v9  ;;  %v14855_v44 = vld [vmem:[#allocation253_spill] sm:$0xff] }
 0x367   : > { %7302 = vst.msk [vmem:[%s10900_s12 + $0x368] sm:$0xff] %vm634_vm0, %v6753_v13  ;;  %5338 = vrot.lane.b32.xlu1 %v14849_v42, %s8278_s22  ;;  %v6756_v4 = vpop.f32.mrb[110].mxu1  ;;  %v5592_v15 = vsub.f32 %v7721_v8, %v14851_v12  ;;  %v2703_v8 = vmul.f32 %v14852_v7, %v14852_v7  ;;  %v7722_v19 = vadd.f32 -1.0, %v4825_v51  ;;  %v14854_v42 = vld [vmem:[#allocation129_spill] sm:$0xff] }
 0x368   : > { %v6757_v59 = vadd.f32 %v6756_v4, %v10881_v52  ;;  %4576 = vrot.lane.b32.xlu0 %v2702_v32, %s8278_s22  ;;  %v6758_v48 = vpop.f32.mrb[111].mxu1  ;;  %7929 = vmatmul.mubr.msk.f32.gmra.mrb[216].mxu1 %vm5692_vm1, %v4136_v21  ;;  %v4187_v32 = vmul.f32 %v14853_v36, %v14853_v36  ;;  %v4188_v21 = vmul.f32 %v14854_v42, %v14854_v42  ;;  %v5746_v4 = vsel %vm5692_vm1, %v5591_v6, 0.0  ;;  %v14858_v6 = vld [vmem:[#allocation274_spill] sm:$0xff] }
 0x369   : > { %v6759_v26 = vadd.f32 %v6758_v48, %v10889_v11  ;;  %v3863_v13 = vpop.permute.xlu1 %3862  ;;  %7078 = vmatprep.mubr.f32.mxu1 %v14213_v63  ;;  %v5748_v55 = vsel %vm5692_vm1, %v5592_v15, 0.0  ;;  %v14856_v48 = vld [vmem:[#allocation214_spill] sm:$0xff]  ;;  %v5747_v36 = vadd.f32 %v5746_v4, %v5745_v0  ;;  %v5593_v15 = vsub.f32 %v7722_v19, %v14858_v6  ;;  %v14861_v0 = vld [vmem:[#allocation256_spill] sm:$0xff] }
 0x36a   : > { %7303 = vst [vmem:[%s10900_s12 + $0x370] sm:$0xff] %v6757_v59  ;;  %v4137_v53 = vadd.f32 %v3863_v13, %v11520_v5  ;;  %v3865_v54 = vpop.permute.xlu0 %3864  ;;  %v7723_v59 = vadd.f32 -1.0, %v4826_v24  ;;  %v14857_v13 = vld [vmem:[#allocation25_spill] sm:$0xff] }
 0x36b   : > { %7304 = vst.msk [vmem:[%s10900_s12 + $0x378] sm:$0xff] %vm634_vm0, %v6759_v26  ;;  %5340 = vrot.lane.b32.xlu1 %v14855_v44, %s8278_s22  ;;  %v6762_v9 = vpop.f32.mrb[112].mxu1  ;;  %v4827_v26 = vadd.f32 %v14856_v48, %v4187_v32  ;;  %v4828_v7 = vadd.f32 %v14857_v13, %v4188_v21  ;;  %v14859_v44 = vld [vmem:[#allocation55_spill] sm:$0xff]  ;;  %v5749_v21 = vadd.f32 %v5748_v55, %v5747_v36  ;;  %v14863_v48 = vld [vmem:[#allocation134_spill] sm:$0xff]  ;;  %v5750_v6 = vsel %vm5692_vm1, %v5593_v15, 0.0 }
 0x36c   : > { %v6763_v51 = vadd.f32 %v6762_v9, %v10881_v52  ;;  %4578 = vrot.lane.b32.xlu0 %v2703_v8, %s8278_s22  ;;  %v6764_v12 = vpop.f32.mrb[113].mxu1  ;;  %7930 = vmatmul.mubr.msk.f32.gmra.mrb[218].mxu1 %vm5692_vm1, %v4137_v53  ;;  %v5594_v9 = vsub.f32 %v7723_v59, %v14859_v44  ;;  %v4138_v8 = vadd.f32 %v3865_v54, %v11533_v30  ;;  %v14860_v53 = vld [vmem:[#allocation276_spill] sm:$0xff]  ;;  %v14869_v30 = vld [vmem:[#allocation58_spill] sm:$0xff] }
 0x36d   : > { %v6765_v24 = vadd.f32 %v6764_v12, %v10889_v11  ;;  %v12519_v42 = vpop.permute.xlu1 %5302  ;;  %7084 = vmatprep.mubr.f32.mxu1 %v14213_v63  ;;  %v2704_v32 = vmul.f32 %v14860_v53, %v14860_v53  ;;  %v14862_v12 = vld [vmem:[#allocation131_spill] sm:$0xff]  ;;  %v7725_v55 = vadd.f32 -1.0, %v4828_v7  ;;  %v4190_v13 = vmul.f32 %v14863_v48, %v14863_v48  ;;  %v14865_v7 = vld [vmem:[#allocation218_spill] sm:$0xff]  ;;  %v14867_v48 = vld [vmem:[#allocation257_spill] sm:$0xff] }
 0x36e   : > { %7305 = vst [vmem:[%s10900_s12 + $0x380] sm:$0xff] %v6763_v51  ;;  %v12526_v5 = vpop.permute.xlu0 %4538  ;;  %v4189_v19 = vmul.f32 %v14862_v12, %v14862_v12  ;;  %v7724_v51 = vadd.f32 -1.0, %v4827_v26  ;;  %v5752_v44 = vsel %vm5692_vm1, %v5594_v9, 0.0  ;;  %v14868_v9 = vld [vmem:[#allocation280_spill] sm:$0xff] }
 0x36f   : > { %7306 = vst.msk [vmem:[%s10900_s12 + $0x388] sm:$0xff] %vm634_vm0, %v6765_v24  ;;  %5342 = vrot.lane.b32.xlu1 %v14861_v0, %s8278_s22  ;;  %v6768_v4 = vpop.f32.mrb[114].mxu1 }
 0x370   : > { %v6769_v59 = vadd.f32 %v6768_v4, %v10881_v52  ;;  %4580 = vrot.lane.b32.xlu0 %v2704_v32, %s8278_s22  ;;  %v6770_v54 = vpop.f32.mrb[115].mxu1  ;;  %7931 = vmatmul.mubr.msk.f32.gmra.mrb[220].mxu1 %vm5692_vm1, %v4138_v8  ;;  %v14864_v8 = vld [vmem:[#allocation57_spill] sm:$0xff]  ;;  %v4829_v0 = vadd.f32 %v14865_v7, %v4189_v19  ;;  %v14866_v4 = vld [vmem:[#allocation28_spill] sm:$0xff] }
 0x371   : > { %v6771_v36 = vadd.f32 %v6770_v54, %v10889_v11  ;;  %v3867_v24 = vpop.permute.xlu1 %3866  ;;  %7090 = vmatprep.mubr.f32.mxu1 %v14213_v63  ;;  %v2705_v26 = vmul.f32 %v14864_v8, %v14864_v8  ;;  %v4830_v12 = vadd.f32 %v14866_v4, %v4190_v13  ;;  %v5751_v54 = vadd.f32 %v5750_v6, %v5749_v21  ;;  %v14873_v4 = vld [vmem:[#allocation142_spill] sm:$0xff] }
 0x372   : > { %7307 = vst [vmem:[%s10900_s12 + $0x390] sm:$0xff] %v6769_v59  ;;  %v4139_v53 = vadd.f32 %v3867_v24, %v11575_v45  ;;  %v3869_v32 = vpop.permute.xlu0 %3868  ;;  %v5595_v59 = vsub.f32 %v7724_v51, %v14868_v9  ;;  %v5596_v24 = vsub.f32 %v7725_v55, %v14869_v30  ;;  %v14870_v30 = vld [vmem:[#allocation281_spill] sm:$0xff]  ;;  %v7726_v8 = vadd.f32 -1.0, %v4829_v0 }
 0x373   : > { %7308 = vst.msk [vmem:[%s10900_s12 + $0x398] sm:$0xff] %vm634_vm0, %v6771_v36  ;;  %5344 = vrot.lane.b32.xlu1 %v14867_v48, %s8278_s22  ;;  %v6774_v15 = vpop.f32.mrb[116].mxu1  ;;  %v5753_v13 = vadd.f32 %v5752_v44, %v5751_v54  ;;  %v4140_v6 = vadd.f32 %v3869_v32, %v11588_v50  ;;  %v2706_v55 = vmul.f32 %v14870_v30, %v14870_v30  ;;  %v14874_v32 = vld [vmem:[#allocation161_spill] sm:$0xff]  ;;  %v7727_v48 = vadd.f32 -1.0, %v4830_v12  ;;  %v14875_v30 = vld [vmem:[#allocation224_spill] sm:$0xff] }
 0x374   : > { %v6775_v45 = vadd.f32 %v6774_v15, %v10881_v52  ;;  %4582 = vrot.lane.b32.xlu0 %v2705_v26, %s8278_s22  ;;  %v6776_v19 = vpop.f32.mrb[117].mxu1  ;;  %7932 = vmatmul.mubr.msk.f32.gmra.mrb[222].mxu1 %vm5692_vm1, %v4139_v53  ;;  %v14871_v26 = vld [vmem:[#allocation136_spill] sm:$0xff]  ;;  %v14872_v53 = vld [vmem:[#allocation138_spill] sm:$0xff]  ;;  %v4193_v54 = vmul.f32 %v14873_v4, %v14873_v4  ;;  %v5754_v15 = vsel %vm5692_vm1, %v5595_v59, 0.0  ;;  %v5756_v0 = vsel %vm5692_vm1, %v5596_v24, 0.0  ;;  %v14877_v59 = vld [vmem:[#allocation285_spill] sm:$0xff] }
 0x375   : > { %v6777_v21 = vadd.f32 %v6776_v19, %v10889_v11  ;;  %v12561_v36 = vpop.permute.xlu1 %5304  ;;  %7096 = vmatprep.mubr.f32.mxu1 %v14213_v63  ;;  %v4191_v7 = vmul.f32 %v14871_v26, %v14871_v26  ;;  %v4192_v44 = vmul.f32 %v14872_v53, %v14872_v53  ;;  %v14876_v26 = vld [vmem:[#allocation225_spill] sm:$0xff]  ;;  %v5755_v4 = vadd.f32 %v5754_v15, %v5753_v13 }
 0x376   : > { %7309 = vst [vmem:[%s10900_s12 + $0x3a0] sm:$0xff] %v6775_v45  ;;  %v12566_v51 = vpop.permute.xlu0 %4540  ;;  %v5597_v24 = vsub.f32 %v7726_v8, %v14877_v59  ;;  %v14878_v50 = vld [vmem:[#allocation61_spill] sm:$0xff]  ;;  %v14882_v8 = vld [vmem:[#allocation32_spill] sm:$0xff] }
 0x377   : > { %7310 = vst.msk [vmem:[%s10900_s12 + $0x3a8] sm:$0xff] %vm634_vm0, %v6777_v21  ;;  %5346 = vrot.lane.b32.xlu1 %v14874_v32, %s8278_s22  ;;  %v6780_v45 = vpop.f32.mrb[118].mxu1  ;;  %v4831_v21 = vadd.f32 %v14875_v30, %v4191_v7  ;;  %v4832_v53 = vadd.f32 %v14876_v26, %v4192_v44  ;;  %v5757_v7 = vadd.f32 %v5756_v0, %v5755_v4  ;;  %v14880_v30 = vld [vmem:[#allocation144_spill] sm:$0xff]  ;;  %v14881_v44 = vld [vmem:[#allocation263_spill] sm:$0xff]  ;;  %v14884_v4 = vld [vmem:[#allocation294_spill] sm:$0xff] }
 0x378   : > { %v6781_v9 = vadd.f32 %v6780_v45, %v10881_v52  ;;  %4584 = vrot.lane.b32.xlu0 %v2706_v55, %s8278_s22  ;;  %v6782_v19 = vpop.f32.mrb[119].mxu1  ;;  %7933 = vmatmul.mubr.msk.f32.gmra.mrb[224].mxu1 %vm5692_vm1, %v4140_v6  ;;  %v5598_v45 = vsub.f32 %v7727_v48, %v14878_v50  ;;  %v2707_v6 = vmul.f32 %v14879_v58, %v14879_v58  ;;  %v14883_v48 = vld [vmem:[#allocation148_spill] sm:$0xff] }
 0x379   : > { %v6783_v32 = vadd.f32 %v6782_v19, %v10889_v11  ;;  %v3871_v12 = vpop.permute.xlu1 %3870  ;;  %7102 = vmatprep.mubr.f32.mxu1 %v14213_v63  ;;  %v4194_v13 = vmul.f32 %v14880_v30, %v14880_v30  ;;  %v4833_v50 = vadd.f32 %v14882_v8, %v4193_v54  ;;  %v7728_v0 = vadd.f32 -1.0, %v4831_v21  ;;  %v14887_v8 = vld [vmem:[#allocation149_spill] sm:$0xff] }
 0x37a   : > { %7311 = vst [vmem:[%s10900_s12 + $0x3b0] sm:$0xff] %v6781_v9  ;;  %v4141_v55 = vadd.f32 %v3871_v12, %v11630_v43  ;;  %v3873_v27 = vpop.permute.xlu0 %3872  ;;  %v4195_v9 = vmul.f32 %v14883_v48, %v14883_v48  ;;  %v7729_v26 = vadd.f32 -1.0, %v4832_v53  ;;  %v5758_v54 = vsel %vm5692_vm1, %v5597_v24, 0.0  ;;  %v14888_v24 = vld [vmem:[#allocation164_spill] sm:$0xff]  ;;  %v14911_v43 = vld [vmem:[#allocation165_spill] sm:$0xff] }
 0x37b   : > { %7312 = vst.msk [vmem:[%s10900_s12 + $0x3b8] sm:$0xff] %vm634_vm0, %v6783_v32  ;;  %5348 = vrot.lane.b32.xlu1 %v14881_v44, %s8278_s22  ;;  %v6786_v15 = vpop.f32.mrb[120].mxu1  ;;  %v4834_v32 = vadd.f32 %v14884_v4, %v4194_v13  ;;  %v5760_v30 = vsel %vm5692_vm1, %v5598_v45, 0.0  ;;  %v5759_v53 = vadd.f32 %v5758_v54, %v5757_v7  ;;  %v14886_v13 = vld [vmem:[#allocation290_spill] sm:$0xff]  ;;  %v4196_v48 = vmul.f32 %v14887_v8, %v14887_v8  ;;  %v14890_v54 = vld [vmem:[#allocation153_spill] sm:$0xff] }
 0x37c   : > { %v6787_v19 = vadd.f32 %v6786_v15, %v10881_v52  ;;  %4586 = vrot.lane.b32.xlu0 %v2707_v6, %s8278_s22  ;;  %v6788_v58 = vpop.f32.mrb[121].mxu1  ;;  %7934 = vmatmul.mubr.msk.f32.gmra.mrb[226].mxu1 %vm5692_vm1, %v4141_v55  ;;  %v4142_v6 = vadd.f32 %v3873_v27, %v11643_v49  ;;  %v14885_v55 = vld [vmem:[#allocation286_spill] sm:$0xff]  ;;  %v5599_v15 = vsub.f32 %v7728_v0, %v14886_v13  ;;  %v7730_v27 = vadd.f32 -1.0, %v4833_v50 }
 0x37d   : > { %v6789_v12 = vadd.f32 %v6788_v58, %v10889_v11  ;;  %v12609_v59 = vpop.permute.xlu1 %5306  ;;  %7108 = vmatprep.mubr.f32.mxu1 %v14213_v63  ;;  %v2708_v21 = vmul.f32 %v14885_v55, %v14885_v55  ;;  %v4835_v4 = vadd.f32 %v11266_v23, %v4195_v9  ;;  %v5761_v0 = vadd.f32 %v5760_v30, %v5759_v53  ;;  %v14891_v9 = vld [vmem:[#allocation302_spill] sm:$0xff]  ;;  %v14893_v53 = vld [vmem:[#allocation301_spill] sm:$0xff] }
 0x37e   : > { %7313 = vst [vmem:[%s10900_s12 + $0x3c0] sm:$0xff] %v6787_v19  ;;  %v12616_v44 = vpop.permute.xlu0 %4542  ;;  %v14889_v19 = vld [vmem:[#allocation293_spill] sm:$0xff]  ;;  %v4197_v13 = vmul.f32 %v14890_v54, %v14890_v54  ;;  %v5601_v23 = vsub.f32 %v7730_v27, %v11261_v1  ;;  %v14895_v54 = vld [vmem:[#allocation2_spill] sm:$0xff] }
 0x37f   : > { %7314 = vst.msk [vmem:[%s10900_s12 + $0x3c8] sm:$0xff] %vm634_vm0, %v6789_v12  ;;  %5350 = vrot.lane.b32.xlu1 %v14888_v24, %s8278_s22  ;;  %v6792_v45 = vpop.f32.mrb[122].mxu1  ;;  %v5600_v58 = vsub.f32 %v7729_v26, %v14889_v19  ;;  %v7731_v12 = vadd.f32 -1.0, %v4834_v32  ;;  %v4836_v26 = vadd.f32 %v14891_v9, %v4196_v48  ;;  %v5762_v32 = vsel %vm5692_vm1, %v5599_v15, 0.0  ;;  %v14894_v19 = vld [vmem:[#allocation154_spill] sm:$0xff]  ;;  %v14896_v1 = vld [vmem:[#allocation49_spill] sm:$0xff] }
 0x380   : > { %v6793_v55 = vadd.f32 %v6792_v45, %v10881_v52  ;;  %4588 = vrot.lane.b32.xlu0 %v2708_v21, %s8278_s22  ;;  %v6794_v7 = vpop.f32.mrb[123].mxu1  ;;  %7935 = vmatmul.mubr.msk.f32.gmra.mrb[228].mxu1 %vm5692_vm1, %v4142_v6  ;;  %v14892_v6 = vld [vmem:[#allocation62_spill] sm:$0xff]  ;;  %v4199_v49 = vmul.f32 %v14895_v54, %v14895_v54 }
 0x381   : > { %v6795_v8 = vadd.f32 %v6794_v7, %v10889_v11  ;;  %v3875_v50 = vpop.permute.xlu1 %3874  ;;  %7114 = vmatprep.mubr.f32.mxu1 %v14213_v63  ;;  %v2709_v30 = vmul.f32 %v14892_v6, %v14892_v6  ;;  %v5602_v45 = vsub.f32 %v7731_v12, %v14893_v53  ;;  %v4198_v7 = vmul.f32 %v14894_v19, %v14894_v19  ;;  %v14898_v53 = vld [vmem:[#allocation310_spill] sm:$0xff] }
 0x382   : > { %7315 = vst [vmem:[%s10900_s12 + $0x3d0] sm:$0xff] %v6793_v55  ;;  %v4143_v21 = vadd.f32 %v3875_v50, %v11685_v57  ;;  %v3877_v24 = vpop.permute.xlu0 %3876  ;;  %v5764_v27 = vsel %vm5692_vm1, %v5600_v58, 0.0  ;;  %v7732_v55 = vadd.f32 -1.0, %v4835_v4  ;;  %v14897_v50 = vld [vmem:[#allocation306_spill] sm:$0xff]  ;;  %v5763_v6 = vadd.f32 %v5762_v32, %v5761_v0  ;;  %v14899_v58 = vld [vmem:[#allocation16_spill] sm:$0xff] }
 0x383   : > { %7316 = vst.msk [vmem:[%s10900_s12 + $0x3d8] sm:$0xff] %vm634_vm0, %v6795_v8  ;;  %5352 = vrot.lane.b32.xlu1 %v14896_v1, %s8278_s22  ;;  %v6798_v48 = vpop.f32.mrb[124].mxu1  ;;  %v4837_v15 = vadd.f32 %v14897_v50, %v4197_v13  ;;  %v4838_v8 = vadd.f32 %v14898_v53, %v4198_v7  ;;  %v2710_v4 = vmul.f32 %v14899_v58, %v14899_v58  ;;  %v5766_v13 = vsel %vm5692_vm1, %v5601_v23, 0.0  ;;  %v14901_v50 = vld [vmem:[#allocation158_spill] sm:$0xff]  ;;  %v14902_v53 = vld [vmem:[#allocation160_spill] sm:$0xff] }
 0x384   : > { %v6799_v12 = vadd.f32 %v6798_v48, %v10881_v52  ;;  %4590 = vrot.lane.b32.xlu0 %v2709_v30, %s8278_s22  ;;  %v6800_v9 = vpop.f32.mrb[125].mxu1  ;;  %7936 = vmatmul.mubr.msk.f32.gmra.mrb[230].mxu1 %vm5692_vm1, %v4143_v21  ;;  %v7733_v1 = vadd.f32 -1.0, %v4836_v26  ;;  %v14900_v30 = vld [vmem:[#allocation305_spill] sm:$0xff]  ;;  %v4144_v21 = vadd.f32 %v3877_v24, %v11698_v33  ;;  %v5765_v32 = vadd.f32 %v5764_v27, %v5763_v6  ;;  %v14903_v23 = vld [vmem:[#allocation166_spill] sm:$0xff] }
 0x385   : > { %v6801_v19 = vadd.f32 %v6800_v9, %v10889_v11  ;;  %v12659_v54 = vpop.permute.xlu1 %5308  ;;  %7120 = vmatprep.mubr.f32.mxu1 %v14213_v63  ;;  %v5603_v48 = vsub.f32 %v7732_v55, %v14900_v30  ;;  %v5768_v7 = vsel %vm5692_vm1, %v5602_v45, 0.0  ;;  %v4200_v9 = vmul.f32 %v14901_v50, %v14901_v50  ;;  %v14904_v24 = vld [vmem:[#allocation309_spill] sm:$0xff]  ;;  %v14905_v30 = vld [vmem:[#allocation314_spill] sm:$0xff] }
 0x386   : > { %7317 = vst [vmem:[%s10900_s12 + $0x3e0] sm:$0xff] %v6799_v12  ;;  %v12668_v0 = vpop.permute.xlu0 %4544  ;;  %v4201_v58 = vmul.f32 %v14902_v53, %v14902_v53  ;;  %v7734_v55 = vadd.f32 -1.0, %v4837_v15  ;;  %v5604_v12 = vsub.f32 %v7733_v1, %v14904_v24  ;;  %v4839_v27 = vadd.f32 %v14905_v30, %v4199_v49  ;;  %v14906_v33 = vld [vmem:[#allocation66_spill] sm:$0xff]  ;;  %v14907_v1 = vld [vmem:[#allocation313_spill] sm:$0xff] }
 0x387   : > { %7318 = vst.msk [vmem:[%s10900_s12 + $0x3e8] sm:$0xff] %vm634_vm0, %v6801_v19  ;;  %5354 = vrot.lane.b32.xlu1 %v14903_v23, %s8278_s22  ;;  %v6804_v26 = vpop.f32.mrb[126].mxu1  ;;  %v5767_v50 = vadd.f32 %v5766_v13, %v5765_v32  ;;  %v7735_v19 = vadd.f32 -1.0, %v4838_v8  ;;  %v2711_v15 = vmul.f32 %v14906_v33, %v14906_v33  ;;  %v5770_v49 = vsel %vm5692_vm1, %v5603_v48, 0.0  ;;  %v14908_v24 = vld [vmem:[#allocation318_spill] sm:$0xff]  ;;  %v14909_v8 = vld [vmem:[#allocation317_spill] sm:$0xff] }
 0x388   : > { %v6805_v45 = vadd.f32 %v6804_v26, %v10881_v52  ;;  %4592 = vrot.lane.b32.xlu0 %v2710_v4, %s8278_s22  ;;  %v6806_v6 = vpop.f32.mrb[127].mxu1  ;;  %7937 = vmatmul.mubr.msk.f32.gmra.mrb[232].mxu1 %vm5692_vm1, %v4144_v21  ;;  %v5605_v26 = vsub.f32 %v7734_v55, %v14907_v1  ;;  %v4840_v4 = vadd.f32 %v14908_v24, %v4200_v9  ;;  %v14912_v48 = vld [vmem:[#allocation52_spill] sm:$0xff]  ;;  %v5772_v9 = vsel %vm5692_vm1, %v5604_v12, 0.0  ;;  %v14914_v12 = vld [vmem:[#allocation295_spill] sm:$0xff] }
 0x389   : > { %v6807_v53 = vadd.f32 %v6806_v6, %v10889_v11  ;;  %v3879_v23 = vpop.permute.xlu1 %3878  ;;  %7126 = vmatprep.mubr.f32.mxu1 %v14213_v63  ;;  %v5769_v32 = vadd.f32 %v5768_v7, %v5767_v50  ;;  %v5606_v30 = vsub.f32 %v7735_v19, %v14909_v8  ;;  %v14910_v6 = vld [vmem:[#allocation162_spill] sm:$0xff]  ;;  %v4203_v33 = vmul.f32 %v14911_v43, %v14911_v43 }
 0x38a   : > { %7319 = vst [vmem:[%s10900_s12 + $0x3f0] sm:$0xff] %v6805_v45  ;;  %v4145_v21 = vadd.f32 %v3879_v23, %v11745_v39  ;;  %v3881_v13 = vpop.permute.xlu0 %3880  ;;  %v4202_v57 = vmul.f32 %v14910_v6, %v14910_v6  ;;  %v7736_v45 = vadd.f32 -1.0, %v4839_v27  ;;  %v14913_v23 = vld [vmem:[#allocation322_spill] sm:$0xff]  ;;  %v2712_v27 = vmul.f32 %v14914_v12, %v14914_v12  ;;  %v14927_v39 = vld [vmem:[#allocation173_spill] sm:$0xff] }
 0x38b   : > { %7320 = vst.msk [vmem:[%s10900_s12 + $0x3f8] sm:$0xff] %vm634_vm0, %v6807_v53  ;;  %5356 = vrot.lane.b32.xlu1 %v14912_v48, %s8278_s22  ;;  %v6810_v55 = vpop.f32.mrb[128].mxu1  ;;  %v4841_v7 = vadd.f32 %v14913_v23, %v4201_v58  ;;  %v5771_v43 = vadd.f32 %v5770_v49, %v5769_v32  ;;  %v5774_v58 = vsel %vm5692_vm1, %v5605_v26, 0.0  ;;  %v7737_v8 = vadd.f32 -1.0, %v4840_v4  ;;  %v14916_v32 = vld [vmem:[#allocation167_spill] sm:$0xff]  ;;  %v14918_v26 = vld [vmem:[#allocation277_spill] sm:$0xff] }
 0x38c   : > { %v6811_v50 = vadd.f32 %v6810_v55, %v10881_v52  ;;  %4594 = vrot.lane.b32.xlu0 %v2711_v15, %s8278_s22  ;;  %v6812_v19 = vpop.f32.mrb[129].mxu1  ;;  %7938 = vmatmul.mubr.msk.f32.gmra.mrb[234].mxu1 %vm5692_vm1, %v4145_v21  ;;  %v4842_v53 = vadd.f32 %v11651_v2, %v4202_v57  ;;  %v14915_v15 = vld [vmem:[#allocation321_spill] sm:$0xff]  ;;  %v4146_v21 = vadd.f32 %v3881_v13, %v11758_v28  ;;  %v5776_v2 = vsel %vm5692_vm1, %v5606_v30, 0.0 }
 0x38d   : > { %v6813_v1 = vadd.f32 %v6812_v19, %v10889_v11  ;;  %v12709_v24 = vpop.permute.xlu1 %5310  ;;  %7132 = vmatprep.mubr.f32.mxu1 %v14213_v63  ;;  %v5607_v6 = vsub.f32 %v7736_v45, %v14915_v15  ;;  %v5773_v57 = vadd.f32 %v5772_v9, %v5771_v43  ;;  %v4204_v48 = vmul.f32 %v14916_v32, %v14916_v32  ;;  %v14917_v55 = vld [vmem:[#allocation169_spill] sm:$0xff]  ;;  %v14920_v19 = vld [vmem:[#allocation330_spill] sm:$0xff] }
 0x38e   : > { %7321 = vst [vmem:[%s10900_s12 + $0x400] sm:$0xff] %v6811_v50  ;;  %v12718_v49 = vpop.permute.xlu0 %4546  ;;  %v4205_v23 = vmul.f32 %v14917_v55, %v14917_v55  ;;  %v7738_v45 = vadd.f32 -1.0, %v4841_v7  ;;  %v14919_v13 = vld [vmem:[#allocation325_spill] sm:$0xff]  ;;  %v4843_v9 = vadd.f32 %v14920_v19, %v4203_v33  ;;  %v14921_v55 = vld [vmem:[#allocation68_spill] sm:$0xff] }
 0x38f   : > { %7322 = vst.msk [vmem:[%s10900_s12 + $0x408] sm:$0xff] %vm634_vm0, %v6813_v1  ;;  %5358 = vrot.lane.b32.xlu1 %v14918_v26, %s8278_s22  ;;  %v6816_v4 = vpop.f32.mrb[130].mxu1  ;;  %v5608_v50 = vsub.f32 %v7737_v8, %v14919_v13  ;;  %v5775_v12 = vadd.f32 %v5774_v58, %v5773_v57  ;;  %v7739_v1 = vadd.f32 -1.0, %v4842_v53  ;;  %v2713_v7 = vmul.f32 %v14921_v55, %v14921_v55  ;;  %v14922_v8 = vld [vmem:[#allocation329_spill] sm:$0xff]  ;;  %v14924_v13 = vld [vmem:[#allocation198_spill] sm:$0xff] }
 0x390   : > { %v6817_v30 = vadd.f32 %v6816_v4, %v10881_v52  ;;  %4596 = vrot.lane.b32.xlu0 %v2712_v27, %s8278_s22  ;;  %v6818_v43 = vpop.f32.mrb[131].mxu1  ;;  %7939 = vmatmul.mubr.msk.f32.gmra.mrb[236].mxu1 %vm5692_vm1, %v4146_v21  ;;  %v5778_v33 = vsel %vm5692_vm1, %v5607_v6, 0.0  ;;  %v5609_v26 = vsub.f32 %v7738_v45, %v14922_v8  ;;  %v14923_v4 = vld [vmem:[#allocation335_spill] sm:$0xff]  ;;  %v14925_v53 = vld [vmem:[#allocation334_spill] sm:$0xff]  ;;  %v4207_v55 = vmul.f32 %v14927_v39, %v14927_v39 }
 0x391   : > { %v6819_v15 = vadd.f32 %v6818_v43, %v10889_v11  ;;  %v3883_v32 = vpop.permute.xlu1 %3882  ;;  %7138 = vmatprep.mubr.f32.mxu1 %v14213_v63  ;;  %v4844_v27 = vadd.f32 %v14923_v4, %v4204_v48  ;;  %v5777_v57 = vadd.f32 %v5776_v2, %v5775_v12  ;;  %v5610_v19 = vsub.f32 %v7739_v1, %v14925_v53  ;;  %v14926_v43 = vld [vmem:[#allocation171_spill] sm:$0xff] }
 0x392   : > { %7323 = vst [vmem:[%s10900_s12 + $0x410] sm:$0xff] %v6817_v30  ;;  %v4147_v21 = vadd.f32 %v3883_v32, %v14924_v13  ;;  %v3885_v58 = vpop.permute.xlu0 %3884  ;;  %v4206_v28 = vmul.f32 %v14926_v43, %v14926_v43  ;;  %v14928_v6 = vld [vmem:[#allocation279_spill] sm:$0xff]  ;;  %v5780_v48 = vsel %vm5692_vm1, %v5608_v50, 0.0  ;;  %v7740_v30 = vadd.f32 -1.0, %v4843_v9  ;;  %v14931_v50 = vld [vmem:[#allocation298_spill] sm:$0xff] }
 0x393   : > { %7324 = vst.msk [vmem:[%s10900_s12 + $0x418] sm:$0xff] %vm634_vm0, %v6819_v15  ;;  %5360 = vrot.lane.b32.xlu1 %v14928_v6, %s8278_s22  ;;  %v6822_v45 = vpop.f32.mrb[132].mxu1  ;;  %v14929_v32 = vld [vmem:[#allocation339_spill] sm:$0xff]  ;;  %v5779_v39 = vadd.f32 %v5778_v33, %v5777_v57  ;;  %v2714_v9 = vmul.f32 %v14931_v50, %v14931_v50  ;;  %v7741_v43 = vadd.f32 -1.0, %v4844_v27  ;;  %v5784_v57 = vsel %vm5692_vm1, %v5610_v19, 0.0 }
 0x394   : > { %v4845_v2 = vadd.f32 %v14929_v32, %v4205_v23  ;;  %v6823_v12 = vadd.f32 %v6822_v45, %v10881_v52  ;;  %4598 = vrot.lane.b32.xlu0 %v2713_v7, %s8278_s22  ;;  %v6824_v1 = vpop.f32.mrb[133].mxu1  ;;  %7940 = vmatmul.mubr.msk.f32.gmra.mrb[238].mxu1 %vm5692_vm1, %v4147_v21  ;;  %v14930_v8 = vld [vmem:[#allocation343_spill] sm:$0xff]  ;;  %v5782_v23 = vsel %vm5692_vm1, %v5609_v26, 0.0  ;;  %v14932_v7 = vld [vmem:[#allocation338_spill] sm:$0xff]  ;;  %v14933_v45 = vld [vmem:[#allocation337_spill] sm:$0xff] }
 0x395   : > { %v4846_v15 = vadd.f32 %v14930_v8, %v4206_v28  ;;  %v6825_v4 = vadd.f32 %v6824_v1, %v10889_v11  ;;  %v12759_v53 = vpop.permute.xlu1 %5312  ;;  %7144 = vmatprep.mubr.f32.mxu1 %v14213_v63  ;;  %v5611_v6 = vsub.f32 %v7740_v30, %v14932_v7  ;;  %v4148_v21 = vadd.f32 %v3885_v58, %v14933_v45  ;;  %v14934_v32 = vld [vmem:[#allocation175_spill] sm:$0xff]  ;;  %v14935_v8 = vld [vmem:[#allocation177_spill] sm:$0xff]  ;;  %v14936_v26 = vld [vmem:[#allocation282_spill] sm:$0xff] }
 0x396   : > { %7325 = vst [vmem:[%s10900_s12 + $0x420] sm:$0xff] %v6823_v12  ;;  %v12768_v33 = vpop.permute.xlu0 %4548  ;;  %v5781_v28 = vadd.f32 %v5780_v48, %v5779_v39  ;;  %v4208_v1 = vmul.f32 %v14934_v32, %v14934_v32  ;;  %v4209_v50 = vmul.f32 %v14935_v8, %v14935_v8  ;;  %v7742_v30 = vadd.f32 -1.0, %v4845_v2  ;;  %v14937_v58 = vld [vmem:[#allocation342_spill] sm:$0xff]  ;;  %v14938_v7 = vld [vmem:[#allocation347_spill] sm:$0xff]  ;;  %v14939_v45 = vld [vmem:[#allocation72_spill] sm:$0xff] }
 0x397   : > { %7326 = vst.msk [vmem:[%s10900_s12 + $0x428] sm:$0xff] %vm634_vm0, %v6825_v4  ;;  %5362 = vrot.lane.b32.xlu1 %v14936_v26, %s8278_s22  ;;  %v6828_v27 = vpop.f32.mrb[134].mxu1  ;;  %v5612_v12 = vsub.f32 %v7741_v43, %v14937_v58  ;;  %v4847_v48 = vadd.f32 %v14938_v7, %v4207_v55  ;;  %v7743_v4 = vadd.f32 -1.0, %v4846_v15  ;;  %v2715_v2 = vmul.f32 %v14939_v45, %v14939_v45  ;;  %v14940_v43 = vld [vmem:[#allocation346_spill] sm:$0xff]  ;;  %v14942_v7 = vld [vmem:[#allocation340_spill] sm:$0xff]  ;;  %v14943_v15 = vld [vmem:[#allocation47_spill] sm:$0xff] }
 0x398   : > { %v6829_v19 = vadd.f32 %v6828_v27, %v10881_v52  ;;  %4600 = vrot.lane.b32.xlu0 %v2714_v9, %s8278_s22  ;;  %v6830_v39 = vpop.f32.mrb[135].mxu1  ;;  %7941 = vmatmul.mubr.msk.f32.gmra.mrb[240].mxu1 %vm5692_vm1, %v4148_v21  ;;  %v5783_v32 = vadd.f32 %v5782_v23, %v5781_v28  ;;  %v5786_v55 = vsel %vm5692_vm1, %v5611_v6, 0.0  ;;  %v5613_v27 = vsub.f32 %v7742_v30, %v14940_v43  ;;  %v14941_v58 = vld [vmem:[#allocation50_spill] sm:$0xff] }
 0x399   : > { %v6831_v8 = vadd.f32 %v6830_v39, %v10889_v11  ;;  %v3887_v26 = vpop.permute.xlu1 %3886  ;;  %7150 = vmatprep.mubr.f32.mxu1 %v14213_v63  ;;  %v4848_v9 = vadd.f32 %v14941_v58, %v4208_v1  ;;  %v5614_v13 = vsub.f32 %v7743_v4, %v14943_v15  ;;  %v14944_v39 = vld [vmem:[#allocation179_spill] sm:$0xff]  ;;  %v4211_v45 = vmul.f32 %v14945_v16, %v14945_v16  ;;  %v14946_v6 = vld [vmem:[#allocation170_spill] sm:$0xff]  ;;  %v14949_v15 = vld [vmem:[#allocation341_spill] sm:$0xff] }
 0x39a   : > { %7327 = vst [vmem:[%s10900_s12 + $0x430] sm:$0xff] %v6829_v19  ;;  %v4149_v21 = vadd.f32 %v3887_v26, %v14942_v7  ;;  %v3889_v23 = vpop.permute.xlu0 %3888  ;;  %v5785_v28 = vadd.f32 %v5784_v57, %v5783_v32  ;;  %v4210_v60 = vmul.f32 %v14944_v39, %v14944_v39  ;;  %v5788_v1 = vsel %vm5692_vm1, %v5612_v12, 0.0  ;;  %v14947_v12 = vld [vmem:[#allocation19_spill] sm:$0xff] }
 0x39b   : > { %7328 = vst.msk [vmem:[%s10900_s12 + $0x438] sm:$0xff] %vm634_vm0, %v6831_v8  ;;  %5364 = vrot.lane.b32.xlu1 %v14946_v6, %s8278_s22  ;;  %v6834_v30 = vpop.f32.mrb[136].mxu1  ;;  %v7744_v19 = vadd.f32 -1.0, %v4847_v48  ;;  %v4849_v57 = vadd.f32 %v12072_v62, %v4209_v50  ;;  %v2716_v48 = vmul.f32 %v14947_v12, %v14947_v12  ;;  %v5790_v62 = vsel %vm5692_vm1, %v5613_v27, 0.0  ;;  %v14951_v6 = vld [vmem:[#allocation184_spill] sm:$0xff]  ;;  %v14952_v27 = vld [vmem:[#allocation287_spill] sm:$0xff] }
 0x39c   : > { %v6835_v32 = vadd.f32 %v6834_v30, %v10881_v52  ;;  %4602 = vrot.lane.b32.xlu0 %v2715_v2, %s8278_s22  ;;  %v6836_v4 = vpop.f32.mrb[137].mxu1  ;;  %7942 = vmatmul.mubr.msk.f32.gmra.mrb[242].mxu1 %vm5692_vm1, %v4149_v21  ;;  %v5787_v16 = vadd.f32 %v5786_v55, %v5785_v28  ;;  %v4850_v8 = vadd.f32 %v12125_v47, %v4210_v60  ;;  %v7745_v50 = vadd.f32 -1.0, %v4848_v9  ;;  %v14948_v2 = vld [vmem:[#allocation143_spill] sm:$0xff]  ;;  %v14950_v28 = vld [vmem:[#allocation182_spill] sm:$0xff] }
 0x39d   : > { %v6837_v26 = vadd.f32 %v6836_v4, %v10889_v11  ;;  %v12809_v43 = vpop.permute.xlu1 %5314  ;;  %7156 = vmatprep.mubr.f32.mxu1 %v14213_v63  ;;  %v5615_v58 = vsub.f32 %v7744_v19, %v14948_v2  ;;  %v4150_v21 = vadd.f32 %v3889_v23, %v14949_v15  ;;  %v5792_v47 = vsel %vm5692_vm1, %v5614_v13, 0.0  ;;  %v14953_v2 = vld [vmem:[#allocation74_spill] sm:$0xff] }
 0x39e   : > { %7329 = vst [vmem:[%s10900_s12 + $0x440] sm:$0xff] %v6835_v32  ;;  %v12818_v55 = vpop.permute.xlu0 %4550  ;;  %v5789_v60 = vadd.f32 %v5788_v1, %v5787_v16  ;;  %v4212_v39 = vmul.f32 %v14950_v28, %v14950_v28  ;;  %v4213_v30 = vmul.f32 %v14951_v6, %v14951_v6  ;;  %v7746_v19 = vadd.f32 -1.0, %v4849_v57  ;;  %v14956_v6 = vld [vmem:[#allocation189_spill] sm:$0xff] }
 0x39f   : > { %7330 = vst.msk [vmem:[%s10900_s12 + $0x448] sm:$0xff] %vm634_vm0, %v6837_v26  ;;  %5366 = vrot.lane.b32.xlu1 %v14952_v27, %s8278_s22  ;;  %v6840_v9 = vpop.f32.mrb[138].mxu1  ;;  %v5616_v23 = vsub.f32 %v7745_v50, %v12117_v25  ;;  %v4851_v1 = vadd.f32 %v12172_v35, %v4211_v45  ;;  %v7747_v16 = vadd.f32 -1.0, %v4850_v8  ;;  %v2717_v57 = vmul.f32 %v14953_v2, %v14953_v2 }
 0x3a0   : > { %v6841_v13 = vadd.f32 %v6840_v9, %v10881_v52  ;;  %4604 = vrot.lane.b32.xlu0 %v2716_v48, %s8278_s22  ;;  %v6842_v32 = vpop.f32.mrb[139].mxu1  ;;  %7943 = vmatmul.mubr.msk.f32.gmra.mrb[244].mxu1 %vm5692_vm1, %v4150_v21  ;;  %v5791_v4 = vadd.f32 %v5790_v62, %v5789_v60  ;;  %v5794_v25 = vsel %vm5692_vm1, %v5615_v58, 0.0  ;;  %v5617_v35 = vsub.f32 %v7746_v19, %v12164_v37  ;;  %v14954_v48 = vld [vmem:[#allocation344_spill] sm:$0xff]  ;;  %v14955_v60 = vld [vmem:[#allocation186_spill] sm:$0xff] }
 0x3a1   : > { %v6843_v26 = vadd.f32 %v6842_v32, %v10889_v11  ;;  %v3891_v12 = vpop.permute.xlu1 %3890  ;;  %7162 = vmatprep.mubr.f32.mxu1 %v14213_v63  ;;  %v4852_v45 = vadd.f32 %v12221_v40, %v4212_v39  ;;  %v5618_v8 = vsub.f32 %v7747_v16, %v12213_v46  ;;  %v4214_v28 = vmul.f32 %v14955_v60, %v14955_v60  ;;  %v14957_v58 = vld [vmem:[#allocation8_spill] sm:$0xff] }
 0x3a2   : > { %7331 = vst [vmem:[%s10900_s12 + $0x450] sm:$0xff] %v6841_v13  ;;  %v4151_v50 = vadd.f32 %v3891_v12, %v14954_v48  ;;  %v3893_v62 = vpop.permute.xlu0 %3892  ;;  %v5793_v21 = vadd.f32 %v5792_v47, %v5791_v4  ;;  %v4215_v27 = vmul.f32 %v14956_v6, %v14956_v6  ;;  %v5796_v40 = vsel %vm5692_vm1, %v5616_v23, 0.0  ;;  %v14958_v23 = vld [vmem:[#allocation197_spill] sm:$0xff] }
 0x3a3   : > { %7332 = vst.msk [vmem:[%s10900_s12 + $0x458] sm:$0xff] %vm634_vm0, %v6843_v26  ;;  %5368 = vrot.lane.b32.xlu1 %v14957_v58, %s8278_s22  ;;  %v6846_v37 = vpop.f32.mrb[140].mxu1  ;;  %v7748_v39 = vadd.f32 -1.0, %v4851_v1  ;;  %v4853_v47 = vadd.f32 %v12267_v3, %v4213_v30  ;;  %v4854_v13 = vadd.f32 %v12306_v38, %v4214_v28  ;;  %v2718_v1 = vmul.f32 %v14958_v23, %v14958_v23  ;;  %v14959_v26 = vld [vmem:[#allocation345_spill] sm:$0xff] }
 0x3a4   : > { %v6847_v46 = vadd.f32 %v6846_v37, %v10881_v52  ;;  %4606 = vrot.lane.b32.xlu0 %v2717_v57, %s8278_s22  ;;  %v6848_v9 = vpop.f32.mrb[141].mxu1  ;;  %7944 = vmatmul.mubr.msk.f32.gmra.mrb[246].mxu1 %vm5692_vm1, %v4151_v50  ;;  %v5795_v19 = vadd.f32 %v5794_v25, %v5793_v21  ;;  %v5798_v3 = vsel %vm5692_vm1, %v5617_v35, 0.0  ;;  %v7749_v30 = vadd.f32 -1.0, %v4852_v45  ;;  %v14960_v25 = vld [vmem:[#allocation191_spill] sm:$0xff]  ;;  %v14961_v21 = vld [vmem:[#allocation193_spill] sm:$0xff] }
 0x3a5   : > { %v6849_v32 = vadd.f32 %v6848_v9, %v10889_v11  ;;  %v12859_v4 = vpop.permute.xlu1 %5316  ;;  %7168 = vmatprep.mubr.f32.mxu1 %v14213_v63  ;;  %v5619_v16 = vsub.f32 %v7748_v39, %v12258_v22  ;;  %v4152_v12 = vadd.f32 %v3893_v62, %v14959_v26  ;;  %v5800_v57 = vsel %vm5692_vm1, %v5618_v8, 0.0  ;;  %v14962_v35 = vld [vmem:[#allocation291_spill] sm:$0xff]  ;;  %v14964_v9 = vld [vmem:[#allocation226_spill] sm:$0xff] }
 0x3a6   : > { %7333 = vst [vmem:[%s10900_s12 + $0x460] sm:$0xff] %v6847_v46  ;;  %v12868_v2 = vpop.permute.xlu0 %4552  ;;  %v5797_v38 = vadd.f32 %v5796_v40, %v5795_v19  ;;  %v4216_v50 = vmul.f32 %v14960_v25, %v14960_v25  ;;  %v4217_v60 = vmul.f32 %v14961_v21, %v14961_v21  ;;  %v7750_v45 = vadd.f32 -1.0, %v4853_v47  ;;  %v14963_v46 = vld [vmem:[#allocation78_spill] sm:$0xff] }
 0x3a7   : > { %7334 = vst.msk [vmem:[%s10900_s12 + $0x468] sm:$0xff] %vm634_vm0, %v6849_v32  ;;  %5370 = vrot.lane.b32.xlu1 %v14962_v35, %s8278_s22  ;;  %v6852_v22 = vpop.f32.mrb[142].mxu1  ;;  %v5620_v62 = vsub.f32 %v7749_v30, %v12301_v29  ;;  %v4855_v28 = vadd.f32 %v12352_v10, %v4215_v27  ;;  %v7751_v37 = vadd.f32 -1.0, %v4854_v13  ;;  %v2719_v47 = vmul.f32 %v14963_v46, %v14963_v46  ;;  %v14966_v30 = vld [vmem:[#allocation199_spill] sm:$0xff]  ;;  %v14971_v46 = vld [vmem:[#allocation205_spill] sm:$0xff] }
 0x3a8   : > { %v6853_v8 = vadd.f32 %v6852_v22, %v10881_v52  ;;  %4608 = vrot.lane.b32.xlu0 %v2718_v1, %s8278_s22  ;;  %v6854_v6 = vpop.f32.mrb[143].mxu1  ;;  %7945 = vmatmul.mubr.msk.f32.gmra.mrb[248].mxu1 %vm5692_vm1, %v4152_v12  ;;  %v5799_v58 = vadd.f32 %v5798_v3, %v5797_v38  ;;  %v5802_v29 = vsel %vm5692_vm1, %v5619_v16, 0.0  ;;  %v5621_v10 = vsub.f32 %v7750_v45, %v12345_v41  ;;  %v14965_v1 = vld [vmem:[#allocation195_spill] sm:$0xff]  ;;  %v14967_v16 = vld [vmem:[#allocation174_spill] sm:$0xff]  ;;  %v14968_v45 = vld [vmem:[#allocation21_spill] sm:$0xff] }
 0x3a9   : > { %v6855_v40 = vadd.f32 %v6854_v6, %v10889_v11  ;;  %v3895_v39 = vpop.permute.xlu1 %3894  ;;  %7174 = vmatprep.mubr.f32.mxu1 %v14213_v63  ;;  %v4856_v27 = vadd.f32 %v12396_v56, %v4216_v50  ;;  %v5622_v13 = vsub.f32 %v7751_v37, %v12389_v34  ;;  %v4218_v3 = vmul.f32 %v14965_v1, %v14965_v1 }
 0x3aa   : > { %7335 = vst [vmem:[%s10900_s12 + $0x470] sm:$0xff] %v6853_v8  ;;  %v4153_v19 = vadd.f32 %v3895_v39, %v14964_v9  ;;  %v3897_v32 = vpop.permute.xlu0 %3896  ;;  %v5801_v23 = vadd.f32 %v5800_v57, %v5799_v58  ;;  %v4219_v12 = vmul.f32 %v14966_v30, %v14966_v30  ;;  %v5804_v56 = vsel %vm5692_vm1, %v5620_v62, 0.0  ;;  %v14969_v8 = vld [vmem:[#allocation44_spill] sm:$0xff] }
 0x3ab   : > { %7336 = vst.msk [vmem:[%s10900_s12 + $0x478] sm:$0xff] %vm634_vm0, %v6855_v40  ;;  %5372 = vrot.lane.b32.xlu1 %v14967_v16, %s8278_s22  ;;  %v6858_v41 = vpop.f32.mrb[144].mxu1  ;;  %v7752_v38 = vadd.f32 -1.0, %v4855_v28  ;;  %v4857_v57 = vadd.f32 %v12436_v61, %v4217_v60  ;;  %v4858_v21 = vadd.f32 %v12482_v18, %v4218_v3  ;;  %v2720_v62 = vmul.f32 %v14968_v45, %v14968_v45  ;;  %v14970_v40 = vld [vmem:[#allocation201_spill] sm:$0xff]  ;;  %v14973_v16 = vld [vmem:[#allocation80_spill] sm:$0xff] }
 0x3ac   : > { %v6859_v34 = vadd.f32 %v6858_v41, %v10881_v52  ;;  %4610 = vrot.lane.b32.xlu0 %v2719_v47, %s8278_s22  ;;  %v6860_v25 = vpop.f32.mrb[145].mxu1  ;;  %7946 = vmatmul.mubr.msk.f32.gmra.mrb[250].mxu1 %vm5692_vm1, %v4153_v19  ;;  %v5803_v50 = vadd.f32 %v5802_v29, %v5801_v23  ;;  %v5806_v61 = vsel %vm5692_vm1, %v5621_v10, 0.0  ;;  %v7753_v60 = vadd.f32 -1.0, %v4856_v27  ;;  %v14972_v29 = vld [vmem:[#allocation296_spill] sm:$0xff] }
 0x3ad   : > { %v6861_v35 = vadd.f32 %v6860_v25, %v10889_v11  ;;  %v12909_v22 = vpop.permute.xlu1 %5318  ;;  %7180 = vmatprep.mubr.f32.mxu1 %v14213_v63  ;;  %v5623_v28 = vsub.f32 %v7752_v38, %v12431_v20  ;;  %v4154_v6 = vadd.f32 %v3897_v32, %v14969_v8  ;;  %v5808_v37 = vsel %vm5692_vm1, %v5622_v13, 0.0  ;;  %v14974_v25 = vld [vmem:[#allocation207_spill] sm:$0xff] }
 0x3ae   : > { %7337 = vst [vmem:[%s10900_s12 + $0x480] sm:$0xff] %v6859_v34  ;;  %v12918_v58 = vpop.permute.xlu0 %4554  ;;  %v5805_v18 = vadd.f32 %v5804_v56, %v5803_v50  ;;  %v4220_v39 = vmul.f32 %v14970_v40, %v14970_v40  ;;  %v4221_v47 = vmul.f32 %v14971_v46, %v14971_v46  ;;  %v7754_v10 = vadd.f32 -1.0, %v4857_v57  ;;  %v14977_v46 = vld [vmem:[#allocation203_spill] sm:$0xff] }
 0x3af   : > { %7338 = vst.msk [vmem:[%s10900_s12 + $0x488] sm:$0xff] %vm634_vm0, %v6861_v35  ;;  %5374 = vrot.lane.b32.xlu1 %v14972_v29, %s8278_s22  ;;  %v6864_v20 = vpop.f32.mrb[146].mxu1  ;;  %v5624_v27 = vsub.f32 %v7753_v60, %v12475_v17  ;;  %v4859_v19 = vadd.f32 %v12526_v5, %v4219_v12  ;;  %v7755_v1 = vadd.f32 -1.0, %v4858_v21  ;;  %v2721_v41 = vmul.f32 %v14973_v16, %v14973_v16  ;;  %v14976_v60 = vld [vmem:[#allocation211_spill] sm:$0xff] }
 0x3b0   : > { %v6865_v32 = vadd.f32 %v6864_v20, %v10881_v52  ;;  %4612 = vrot.lane.b32.xlu0 %v2720_v62, %s8278_s22  ;;  %v6866_v23 = vpop.f32.mrb[147].mxu1  ;;  %7947 = vmatmul.mubr.msk.f32.gmra.mrb[252].mxu1 %vm5692_vm1, %v4154_v6  ;;  %v5807_v13 = vadd.f32 %v5806_v61, %v5805_v18  ;;  %v5810_v5 = vsel %vm5692_vm1, %v5623_v28, 0.0  ;;  %v5625_v17 = vsub.f32 %v7754_v10, %v12519_v42  ;;  %v14978_v20 = vld [vmem:[#allocation213_spill] sm:$0xff]  ;;  %v14980_v16 = vld [vmem:[#allocation215_spill] sm:$0xff] }
 0x3b1   : > { %v6867_v3 = vadd.f32 %v6866_v23, %v10889_v11  ;;  %v3899_v30 = vpop.permute.xlu1 %3898  ;;  %7186 = vmatprep.mubr.f32.mxu1 %v14213_v63  ;;  %v4860_v12 = vadd.f32 %v12566_v51, %v4220_v39  ;;  %v5626_v34 = vsub.f32 %v7755_v1, %v12561_v36  ;;  %v4222_v50 = vmul.f32 %v14974_v25, %v14974_v25  ;;  %v14975_v63 = vld [vmem:[#allocation10_spill] sm:$0xff] }
 0x3b2   : > { %7339 = vst [vmem:[%s10900_s12 + $0x490] sm:$0xff] %v6865_v32  ;;  %v4155_v56 = vadd.f32 %v3899_v30, %v12049_v14  ;;  %v12943_v38 = vpop.permute.xlu0 %4556  ;;  %v5809_v57 = vadd.f32 %v5808_v37, %v5807_v13  ;;  %v5812_v42 = vsel %vm5692_vm1, %v5624_v27, 0.0  ;;  %v7756_v51 = vadd.f32 -1.0, %v4859_v19  ;;  %v14979_v27 = vld [vmem:[#allocation299_spill] sm:$0xff] }
 0x3b3   : > { %7340 = vst.msk [vmem:[%s10900_s12 + $0x498] sm:$0xff] %vm634_vm0, %v6867_v3  ;;  %5376 = vrot.lane.b32.xlu1 %v14975_v63, %s8278_s22  ;;  %v6870_v21 = vpop.f32.mrb[148].mxu1  ;;  %v4861_v35 = vadd.f32 %v12616_v44, %v4221_v47  ;;  %v4862_v61 = vadd.f32 %v12668_v0, %v4222_v50  ;;  %v4223_v28 = vmul.f32 %v14976_v60, %v14976_v60  ;;  %v5814_v44 = vsel %vm5692_vm1, %v5625_v17, 0.0  ;;  %v14982_v63 = vld [vmem:[#allocation217_spill] sm:$0xff] }
 0x3b4   : > { %v6871_v45 = vadd.f32 %v6870_v21, %v10881_v52  ;;  %4614 = vrot.lane.b32.xlu0 %v2721_v41, %s8278_s22  ;;  %v6872_v36 = vpop.f32.mrb[149].mxu1  ;;  %7948 = vmatmul.mubr.msk.f32.gmra.mrb[254].mxu1 %vm5692_vm1, %v4155_v56  ;;  %v5811_v62 = vadd.f32 %v5810_v5, %v5809_v57  ;;  %v7757_v37 = vadd.f32 -1.0, %v4860_v12  ;;  %v5627_v40 = vsub.f32 %v7756_v51, %v12609_v59  ;;  %v14981_v57 = vld [vmem:[#allocation84_spill] sm:$0xff] }
 0x3b5   : > { %v6873_v6 = vadd.f32 %v6872_v36, %v10889_v11  ;;  %v12961_v18 = vpop.permute.xlu1 %5320  ;;  %v2722_v47 = vmul.f32 %v14977_v46, %v14977_v46  ;;  %v5816_v0 = vsel %vm5692_vm1, %v5626_v34, 0.0  ;;  %v4224_v10 = vmul.f32 %v14978_v20, %v14978_v20  ;;  %v14985_v46 = vld [vmem:[#allocation23_spill] sm:$0xff] }
 0x3b6   : > { %7341 = vst [vmem:[%s10900_s12 + $0x4a0] sm:$0xff] %v6871_v45  ;;  %v12966_v39 = vpop.permute.xlu0 %4558  ;;  %v5813_v29 = vadd.f32 %v5812_v42, %v5811_v62  ;;  %v7758_v59 = vadd.f32 -1.0, %v4861_v35  ;;  %v5628_v32 = vsub.f32 %v7757_v37, %v12659_v54  ;;  %v4863_v23 = vadd.f32 %v12718_v49, %v4223_v28  ;;  %v14983_v42 = vld [vmem:[#allocation178_spill] sm:$0xff] }
 0x3b7   : > { %7342 = vst.msk [vmem:[%s10900_s12 + $0x4a8] sm:$0xff] %vm634_vm0, %v6873_v6  ;;  %5378 = vrot.lane.b32.xlu1 %v14979_v27, %s8278_s22  ;;  %v6876_v19 = vpop.f32.mrb[150].mxu1  ;;  %v7759_v30 = vadd.f32 -1.0, %v4862_v61  ;;  %v4225_v41 = vmul.f32 %v14980_v16, %v14980_v16  ;;  %v5818_v12 = vsel %vm5692_vm1, %v5627_v40, 0.0  ;;  %v4864_v49 = vadd.f32 %v12768_v33, %v4224_v10  ;;  %v14984_v61 = vld [vmem:[#allocation221_spill] sm:$0xff]  ;;  %v14987_v10 = vld [vmem:[#allocation303_spill] sm:$0xff] }
 0x3b8   : > { %v6877_v13 = vadd.f32 %v6876_v19, %v10881_v52  ;;  %4616 = vrot.lane.b32.xlu0 %v2722_v47, %s8278_s22  ;;  %v6878_v1 = vpop.f32.mrb[151].mxu1  ;;  %v5815_v3 = vadd.f32 %v5814_v44, %v5813_v29  ;;  %v5629_v54 = vsub.f32 %v7758_v59, %v12709_v24  ;;  %v2723_v34 = vmul.f32 %v14981_v57, %v14981_v57 }
 0x3b9   : > { %v6879_v5 = vadd.f32 %v6878_v1, %v10889_v11  ;;  %v12984_v17 = vpop.permute.xlu1 %5322  ;;  %v5630_v50 = vsub.f32 %v7759_v30, %v12759_v53  ;;  %v4226_v21 = vmul.f32 %v14982_v63, %v14982_v63  ;;  %v5820_v33 = vsel %vm5692_vm1, %v5628_v32, 0.0  ;;  %v14991_v63 = vld [vmem:[#allocation12_spill] sm:$0xff] }
 0x3ba   : > { %7343 = vst [vmem:[%s10900_s12 + $0x4b0] sm:$0xff] %v6877_v13  ;;  %v4561_v56 = vpop.permute.xlu0 %4560  ;;  %v5817_v25 = vadd.f32 %v5816_v0, %v5815_v3  ;;  %v7760_v51 = vadd.f32 -1.0, %v4863_v23  ;;  %v4865_v35 = vadd.f32 %v12818_v55, %v4225_v41  ;;  %v4227_v60 = vmul.f32 %v14984_v61, %v14984_v61  ;;  %v14986_v0 = vld [vmem:[#allocation223_spill] sm:$0xff]  ;;  %v14988_v3 = vld [vmem:[#allocation228_spill] sm:$0xff] }
 0x3bb   : > { %7344 = vst.msk [vmem:[%s10900_s12 + $0x4b8] sm:$0xff] %vm634_vm0, %v6879_v5  ;;  %5380 = vrot.lane.b32.xlu1 %v14983_v42, %s8278_s22  ;;  %v6882_v24 = vpop.f32.mrb[152].mxu1  ;;  %v4866_v62 = vadd.f32 %v12868_v2, %v4226_v21  ;;  %v5822_v44 = vsel %vm5692_vm1, %v5629_v54, 0.0  ;;  %v7761_v37 = vadd.f32 -1.0, %v4864_v49  ;;  %v2724_v47 = vmul.f32 %v14985_v46, %v14985_v46  ;;  %v14989_v54 = vld [vmem:[#allocation86_spill] sm:$0xff] }
 0x3bc   : > { %v6883_v45 = vadd.f32 %v6882_v24, %v10881_v52  ;;  %4618 = vrot.lane.b32.xlu0 %v2723_v34, %s8278_s22  ;;  %v6884_v53 = vpop.f32.mrb[153].mxu1  ;;  %v5819_v36 = vadd.f32 %v5818_v12, %v5817_v25  ;;  %v5631_v55 = vsub.f32 %v7760_v51, %v12809_v43  ;;  %v5824_v2 = vsel %vm5692_vm1, %v5630_v50, 0.0  ;;  %v14990_v25 = vld [vmem:[#allocation230_spill] sm:$0xff] }
 0x3bd   : > { %v6885_v28 = vadd.f32 %v6884_v53, %v10889_v11  ;;  %v13007_v6 = vpop.permute.xlu1 %5324  ;;  %v4228_v20 = vmul.f32 %v14986_v0, %v14986_v0  ;;  %v7762_v19 = vadd.f32 -1.0, %v4865_v35  ;;  %v5632_v43 = vsub.f32 %v7761_v37, %v12859_v4  ;;  %v14992_v35 = vld [vmem:[#allocation234_spill] sm:$0xff] }
 0x3be   : > { %7345 = vst [vmem:[%s10900_s12 + $0x4c0] sm:$0xff] %v6883_v45  ;;  %v4563_v40 = vpop.permute.xlu0 %4562  ;;  %v5821_v29 = vadd.f32 %v5820_v33, %v5819_v36  ;;  %v4867_v59 = vadd.f32 %v12918_v58, %v4227_v60  ;;  %v7763_v1 = vadd.f32 -1.0, %v4866_v62  ;;  %v4229_v30 = vmul.f32 %v14988_v3, %v14988_v3  ;;  %v14997_v3 = vld [vmem:[#allocation90_spill] sm:$0xff] }
 0x3bf   : > { %7346 = vst.msk [vmem:[%s10900_s12 + $0x4c8] sm:$0xff] %vm634_vm0, %v6885_v28  ;;  %5382 = vrot.lane.b32.xlu1 %v14987_v10, %s8278_s22  ;;  %v6888_v27 = vpop.f32.mrb[154].mxu1  ;;  %v5826_v5 = vsel %vm5692_vm1, %v5631_v55, 0.0  ;;  %v5633_v4 = vsub.f32 %v7762_v19, %v12909_v22  ;;  %v4868_v58 = vadd.f32 %v12943_v38, %v4228_v20  ;;  %v2725_v49 = vmul.f32 %v14989_v54, %v14989_v54  ;;  %v14993_v28 = vld [vmem:[#allocation209_spill] sm:$0xff] }
 0x3c0   : > { %v6889_v32 = vadd.f32 %v6888_v27, %v10881_v52  ;;  %4620 = vrot.lane.b32.xlu0 %v2724_v47, %s8278_s22  ;;  %v6890_v23 = vpop.f32.mrb[155].mxu1  ;;  %v5823_v13 = vadd.f32 %v5822_v44, %v5821_v29  ;;  %v5634_v34 = vsub.f32 %v7763_v1, %v12961_v18  ;;  %v4230_v50 = vmul.f32 %v14990_v25, %v14990_v25  ;;  %v14995_v47 = vld [vmem:[#allocation307_spill] sm:$0xff]  ;;  %v14999_v25 = vld [vmem:[#allocation242_spill] sm:$0xff] }
 0x3c1   : > { %v6891_v16 = vadd.f32 %v6890_v23, %v10889_v11  ;;  %v13028_v41 = vpop.permute.xlu1 %5326  ;;  %v5828_v38 = vsel %vm5692_vm1, %v5632_v43, 0.0  ;;  %v7764_v21 = vadd.f32 -1.0, %v4867_v59  ;;  %v4869_v42 = vadd.f32 %v12966_v39, %v4229_v30  ;;  %v14996_v43 = vld [vmem:[#allocation240_spill] sm:$0xff] }
 0x3c2   : > { %7347 = vst [vmem:[%s10900_s12 + $0x4d0] sm:$0xff] %v6889_v32  ;;  %v4565_v12 = vpop.permute.xlu0 %4564  ;;  %v5825_v57 = vadd.f32 %v5824_v2, %v5823_v13  ;;  %v4870_v51 = vadd.f32 %v4561_v56, %v4230_v50  ;;  %v4231_v45 = vmul.f32 %v14992_v35, %v14992_v35  ;;  %v5830_v62 = vsel %vm5692_vm1, %v5633_v4, 0.0  ;;  %v14994_v56 = vld [vmem:[#allocation236_spill] sm:$0xff]  ;;  %v14998_v4 = vld [vmem:[#allocation109_spill] sm:$0xff] }
 0x3c3   : > { %7348 = vst.msk [vmem:[%s10900_s12 + $0x4d8] sm:$0xff] %vm634_vm0, %v6891_v16  ;;  %5384 = vrot.lane.b32.xlu1 %v14991_v63, %s8278_s22  ;;  %v6894_v22 = vpop.f32.mrb[156].mxu1  ;;  %v7765_v61 = vadd.f32 -1.0, %v4868_v58  ;;  %v5635_v60 = vsub.f32 %v7764_v21, %v12984_v17  ;;  %v2726_v44 = vmul.f32 %v14993_v28, %v14993_v28  ;;  %v5832_v55 = vsel %vm5692_vm1, %v5634_v34, 0.0 }
 0x3c4   : > { %v6895_v24 = vadd.f32 %v6894_v22, %v10881_v52  ;;  %4622 = vrot.lane.b32.xlu0 %v2725_v49, %s8278_s22  ;;  %v6896_v18 = vpop.f32.mrb[157].mxu1  ;;  %v5827_v33 = vadd.f32 %v5826_v5, %v5825_v57  ;;  %v4232_v46 = vmul.f32 %v14994_v56, %v14994_v56  ;;  %v7766_v2 = vadd.f32 -1.0, %v4869_v42  ;;  %v15002_v56 = vld [vmem:[#allocation245_spill] sm:$0xff] }
 0x3c5   : > { %v6897_v53 = vadd.f32 %v6896_v18, %v10889_v11  ;;  %v5329_v36 = vpop.permute.xlu1 %5328  ;;  %v5636_v17 = vsub.f32 %v7765_v61, %v13007_v6  ;;  %v4871_v0 = vadd.f32 %v4563_v40, %v4231_v45  ;;  %v7767_v19 = vadd.f32 -1.0, %v4870_v51  ;;  %v15000_v18 = vld [vmem:[#allocation326_spill] sm:$0xff]  ;;  %v15001_v45 = vld [vmem:[#allocation311_spill] sm:$0xff] }
 0x3c6   : > { %7349 = vst [vmem:[%s10900_s12 + $0x4e0] sm:$0xff] %v6895_v24  ;;  %v4567_v39 = vpop.permute.xlu0 %4566  ;;  %v5829_v37 = vadd.f32 %v5828_v38, %v5827_v33  ;;  %v4233_v59 = vmul.f32 %v14996_v43, %v14996_v43  ;;  %v5834_v13 = vsel %vm5692_vm1, %v5635_v60, 0.0  ;;  %v5637_v1 = vsub.f32 %v7766_v2, %v13028_v41  ;;  %v15003_v2 = vld [vmem:[#allocation92_spill] sm:$0xff] }
 0x3c7   : > { %7350 = vst.msk [vmem:[%s10900_s12 + $0x4e8] sm:$0xff] %vm634_vm0, %v6897_v53  ;;  %5386 = vrot.lane.b32.xlu1 %v14995_v47, %s8278_s22  ;;  %v6900_v29 = vpop.f32.mrb[158].mxu1  ;;  %v4872_v6 = vadd.f32 %v4565_v12, %v4232_v46  ;;  %v2727_v30 = vmul.f32 %v14997_v3, %v14997_v3  ;;  %v5638_v5 = vsub.f32 %v7767_v19, %v5329_v36  ;;  %v5836_v54 = vsel %vm5692_vm1, %v5636_v17, 0.0 }
 0x3c8   : > { %v6901_v20 = vadd.f32 %v6900_v29, %v10881_v52  ;;  %4624 = vrot.lane.b32.xlu0 %v2726_v44, %s8278_s22  ;;  %v6902_v10 = vpop.f32.mrb[159].mxu1  ;;  %v5831_v27 = vadd.f32 %v5830_v62, %v5829_v37  ;;  %v7768_v49 = vadd.f32 -1.0, %v4871_v0  ;;  %v4873_v57 = vadd.f32 %v4567_v39, %v4233_v59 }
 0x3c9   : > { %v6903_v32 = vadd.f32 %v6902_v10, %v10889_v11  ;;  %v5331_v23 = vpop.permute.xlu1 %5330  ;;  %v4234_v50 = vmul.f32 %v14999_v25, %v14999_v25  ;;  %v5838_v38 = vsel %vm5692_vm1, %v5637_v1, 0.0  ;;  %v7769_v21 = vadd.f32 -1.0, %v4872_v6 }
 0x3ca   : > { %7351 = vst [vmem:[%s10900_s12 + $0x4f0] sm:$0xff] %v6901_v20  ;;  %v4569_v40 = vpop.permute.xlu0 %4568  ;;  %v5833_v16 = vadd.f32 %v5832_v55, %v5831_v27  ;;  %v5639_v42 = vsub.f32 %v7768_v49, %v5331_v23  ;;  %v2728_v33 = vmul.f32 %v15000_v18, %v15000_v18  ;;  %v5840_v35 = vsel %vm5692_vm1, %v5638_v5, 0.0  ;;  %v15004_v20 = vld [vmem:[#allocation14_spill] sm:$0xff]  ;;  %v15006_v5 = vld [vmem:[#allocation331_spill] sm:$0xff]  ;;  %v15009_v18 = vld [vmem:[#allocation96_spill] sm:$0xff] }
 0x3cb   : > { %7352 = vst.msk [vmem:[%s10900_s12 + $0x4f8] sm:$0xff] %vm634_vm0, %v6903_v32  ;;  %5388 = vrot.lane.b32.xlu1 %v14998_v4, %s8278_s22  ;;  %v6906_v58 = vpop.f32.mrb[160].mxu1  ;;  %v7770_v36 = vadd.f32 -1.0, %v4873_v57  ;;  %v4874_v62 = vadd.f32 %v4569_v40, %v4234_v50  ;;  %v4235_v46 = vmul.f32 %v15002_v56, %v15002_v56  ;;  %v2729_v17 = vmul.f32 %v15003_v2, %v15003_v2  ;;  %v15005_v40 = vld [vmem:[#allocation248_spill] sm:$0xff]  ;;  %v15013_v2 = vld [vmem:[#allocation319_spill] sm:$0xff] }
 0x3cc   : > { %v6907_v41 = vadd.f32 %v6906_v58, %v10881_v52  ;;  %4626 = vrot.lane.b32.xlu0 %v2727_v30, %s8278_s22  ;;  %v6908_v12 = vpop.f32.mrb[161].mxu1  ;;  %v5835_v34 = vadd.f32 %v5834_v13, %v5833_v16  ;;  %v5842_v55 = vsel %vm5692_vm1, %v5639_v42, 0.0  ;;  %v4236_v3 = vmul.f32 %v15005_v40, %v15005_v40  ;;  %v15015_v40 = vld [vmem:[#allocation98_spill] sm:$0xff] }
 0x3cd   : > { %v6909_v63 = vadd.f32 %v6908_v12, %v10889_v11  ;;  %v5333_v22 = vpop.permute.xlu1 %5332  ;;  %v7771_v27 = vadd.f32 -1.0, %v4874_v62  ;;  %v2730_v4 = vmul.f32 %v15006_v5, %v15006_v5 }
 0x3ce   : > { %7353 = vst [vmem:[%s10900_s12 + $0x500] sm:$0xff] %v6907_v41  ;;  %v4571_v24 = vpop.permute.xlu0 %4570  ;;  %v5837_v51 = vadd.f32 %v5836_v54, %v5835_v34  ;;  %v5640_v61 = vsub.f32 %v7769_v21, %v5333_v22  ;;  %v15007_v54 = vld [vmem:[#allocation315_spill] sm:$0xff] }
 0x3cf   : > { %7354 = vst.msk [vmem:[%s10900_s12 + $0x508] sm:$0xff] %vm634_vm0, %v6909_v63  ;;  %5390 = vrot.lane.b32.xlu1 %v15001_v45, %s8278_s22  ;;  %v6912_v53 = vpop.f32.mrb[162].mxu1  ;;  %v4875_v43 = vadd.f32 %v4571_v24, %v4235_v46 }
 0x3d0   : > { %v6913_v60 = vadd.f32 %v6912_v53, %v10881_v52  ;;  %4628 = vrot.lane.b32.xlu0 %v2728_v33, %s8278_s22  ;;  %v6914_v39 = vpop.f32.mrb[163].mxu1  ;;  %v5839_v28 = vadd.f32 %v5838_v38, %v5837_v51  ;;  %v5844_v19 = vsel %vm5692_vm1, %v5640_v61, 0.0  ;;  %v15008_v38 = vld [vmem:[#allocation252_spill] sm:$0xff]  ;;  %v2731_v33 = vmul.f32 %v15009_v18, %v15009_v18 }
 0x3d1   : > { %v6915_v44 = vadd.f32 %v6914_v39, %v10889_v11  ;;  %v5335_v37 = vpop.permute.xlu1 %5334  ;;  %v7772_v57 = vadd.f32 -1.0, %v4875_v43  ;;  %v4237_v21 = vmul.f32 %v15008_v38, %v15008_v38 }
 0x3d2   : > { %7355 = vst [vmem:[%s10900_s12 + $0x510] sm:$0xff] %v6913_v60  ;;  %v5641_v47 = vsub.f32 %v7770_v36, %v5335_v37  ;;  %v4573_v29 = vpop.permute.xlu0 %4572  ;;  %v5841_v0 = vadd.f32 %v5840_v35, %v5839_v28  ;;  %v15010_v35 = vld [vmem:[#allocation185_spill] sm:$0xff] }
 0x3d3   : > { %7356 = vst.msk [vmem:[%s10900_s12 + $0x518] sm:$0xff] %vm634_vm0, %v6915_v44  ;;  %5392 = vrot.lane.b32.xlu1 %v15004_v20, %s8278_s22  ;;  %v6918_v10 = vpop.f32.mrb[164].mxu1  ;;  %v4876_v41 = vadd.f32 %v4573_v29, %v4236_v3  ;;  %v15011_v37 = vld [vmem:[#allocation157_spill] sm:$0xff]  ;;  %v2733_v3 = vmul.f32 %v15015_v40, %v15015_v40 }
 0x3d4   : > { %v6919_v59 = vadd.f32 %v6918_v10, %v10881_v52  ;;  %4630 = vrot.lane.b32.xlu0 %v2729_v17, %s8278_s22  ;;  %v6920_v32 = vpop.f32.mrb[165].mxu1  ;;  %v5843_v23 = vadd.f32 %v5842_v55, %v5841_v0  ;;  %v5846_v6 = vsel %vm5692_vm1, %v5641_v47, 0.0  ;;  %v4238_v55 = vmul.f32 %v15011_v37, %v15011_v37  ;;  %v15012_v47 = vld [vmem:[#allocation27_spill] sm:$0xff]  ;;  %v15022_v37 = vld [vmem:[#allocation190_spill] sm:$0xff] }
 0x3d5   : > { %v6921_v13 = vadd.f32 %v6920_v32, %v10889_v11  ;;  %v5337_v1 = vpop.permute.xlu1 %5336  ;;  %v7773_v53 = vadd.f32 -1.0, %v4876_v41  ;;  %v2732_v29 = vmul.f32 %v15012_v47, %v15012_v47 }
 0x3d6   : > { %7357 = vst [vmem:[%s10900_s12 + $0x520] sm:$0xff] %v6919_v59  ;;  %v5642_v30 = vsub.f32 %v7771_v27, %v5337_v1  ;;  %v4575_v16 = vpop.permute.xlu0 %4574  ;;  %v5845_v58 = vadd.f32 %v5844_v19, %v5843_v23  ;;  %v15014_v23 = vld [vmem:[#allocation258_spill] sm:$0xff] }
 0x3d7   : > { %7358 = vst.msk [vmem:[%s10900_s12 + $0x528] sm:$0xff] %vm634_vm0, %v6921_v13  ;;  %5394 = vrot.lane.b32.xlu1 %v15007_v54, %s8278_s22  ;;  %v6924_v49 = vpop.f32.mrb[166].mxu1  ;;  %v4877_v36 = vadd.f32 %v4575_v16, %v4237_v21  ;;  %v4239_v13 = vmul.f32 %v15014_v23, %v15014_v23  ;;  %v15019_v21 = vld [vmem:[#allocation323_spill] sm:$0xff] }
 0x3d8   : > { %v5848_v12 = vsel %vm5692_vm1, %v5642_v30, 0.0  ;;  %v6925_v34 = vadd.f32 %v6924_v49, %v10881_v52  ;;  %4632 = vrot.lane.b32.xlu0 %v2730_v4, %s8278_s22  ;;  %v6926_v25 = vpop.f32.mrb[167].mxu1  ;;  %v5847_v50 = vadd.f32 %v5846_v6, %v5845_v58  ;;  %v15016_v30 = vld [vmem:[#allocation188_spill] sm:$0xff]  ;;  %v15025_v23 = vld [vmem:[#allocation327_spill] sm:$0xff] }
 0x3d9   : > { %v6927_v63 = vadd.f32 %v6926_v25, %v10889_v11  ;;  %v5339_v22 = vpop.permute.xlu1 %5338  ;;  %v7774_v0 = vadd.f32 -1.0, %v4877_v36 }
 0x3da   : > { %7359 = vst [vmem:[%s10900_s12 + $0x530] sm:$0xff] %v6925_v34  ;;  %v5643_v42 = vsub.f32 %v7772_v57, %v5339_v22  ;;  %v4577_v24 = vpop.permute.xlu0 %4576  ;;  %v5849_v51 = vadd.f32 %v5848_v12, %v5847_v50  ;;  %v15017_v34 = vld [vmem:[#allocation259_spill] sm:$0xff] }
 0x3db   : > { %7360 = vst.msk [vmem:[%s10900_s12 + $0x538] sm:$0xff] %vm634_vm0, %v6927_v63  ;;  %5396 = vrot.lane.b32.xlu1 %v15010_v35, %s8278_s22  ;;  %v6930_v45 = vpop.f32.mrb[168].mxu1  ;;  %v4878_v20 = vadd.f32 %v4577_v24, %v4238_v55  ;;  %v4240_v25 = vmul.f32 %v15017_v34, %v15017_v34  ;;  %v15018_v22 = vld [vmem:[#allocation219_spill] sm:$0xff]  ;;  %v15028_v34 = vld [vmem:[#allocation18_spill] sm:$0xff] }
 0x3dc   : > { %v5850_v62 = vsel %vm5692_vm1, %v5643_v42, 0.0  ;;  %v6931_v61 = vadd.f32 %v6930_v45, %v10881_v52  ;;  %4634 = vrot.lane.b32.xlu0 %v2731_v33, %s8278_s22  ;;  %v6932_v60 = vpop.f32.mrb[169].mxu1  ;;  %v2734_v38 = vmul.f32 %v15018_v22, %v15018_v22 }
 0x3dd   : > { %v5851_v39 = vadd.f32 %v5850_v62, %v5849_v51  ;;  %v6933_v28 = vadd.f32 %v6932_v60, %v10889_v11  ;;  %v5341_v44 = vpop.permute.xlu1 %5340  ;;  %v7775_v5 = vadd.f32 -1.0, %v4878_v20  ;;  %v15020_v62 = vld [vmem:[#allocation262_spill] sm:$0xff] }
 0x3de   : > { %7361 = vst [vmem:[%s10900_s12 + $0x540] sm:$0xff] %v6931_v61  ;;  %v5644_v56 = vsub.f32 %v7773_v53, %v5341_v44  ;;  %v4579_v46 = vpop.permute.xlu0 %4578  ;;  %v4241_v61 = vmul.f32 %v15020_v62, %v15020_v62  ;;  %v15031_v62 = vld [vmem:[#allocation332_spill] sm:$0xff] }
 0x3df   : > { %7362 = vst.msk [vmem:[%s10900_s12 + $0x548] sm:$0xff] %vm634_vm0, %v6933_v28  ;;  %5398 = vrot.lane.b32.xlu1 %v15013_v2, %s8278_s22  ;;  %v6936_v17 = vpop.f32.mrb[170].mxu1  ;;  %v4879_v4 = vadd.f32 %v4579_v46, %v4239_v13  ;;  %v15021_v28 = vld [vmem:[#allocation102_spill] sm:$0xff] }
 0x3e0   : > { %v5852_v10 = vsel %vm5692_vm1, %v5644_v56, 0.0  ;;  %v6937_v27 = vadd.f32 %v6936_v17, %v10881_v52  ;;  %4636 = vrot.lane.b32.xlu0 %v2732_v29, %s8278_s22  ;;  %v6938_v19 = vpop.f32.mrb[171].mxu1  ;;  %v2735_v44 = vmul.f32 %v15021_v28, %v15021_v28 }
 0x3e1   : > { %v5853_v43 = vadd.f32 %v5852_v10, %v5851_v39  ;;  %v6939_v59 = vadd.f32 %v6938_v19, %v10889_v11  ;;  %v5343_v32 = vpop.permute.xlu1 %5342  ;;  %v7776_v24 = vadd.f32 -1.0, %v4879_v4  ;;  %v15023_v10 = vld [vmem:[#allocation264_spill] sm:$0xff] }
 0x3e2   : > { %7363 = vst [vmem:[%s10900_s12 + $0x550] sm:$0xff] %v6937_v27  ;;  %v5645_v1 = vsub.f32 %v7774_v0, %v5343_v32  ;;  %v4581_v6 = vpop.permute.xlu0 %4580  ;;  %v4242_v27 = vmul.f32 %v15023_v10, %v15023_v10  ;;  %v15034_v10 = vld [vmem:[#allocation194_spill] sm:$0xff] }
 0x3e3   : > { %7364 = vst.msk [vmem:[%s10900_s12 + $0x558] sm:$0xff] %vm634_vm0, %v6939_v59  ;;  %5400 = vrot.lane.b32.xlu1 %v15016_v30, %s8278_s22  ;;  %v6942_v16 = vpop.f32.mrb[172].mxu1  ;;  %v4880_v18 = vadd.f32 %v4581_v6, %v4240_v25  ;;  %v15024_v59 = vld [vmem:[#allocation30_spill] sm:$0xff] }
 0x3e4   : > { %v5854_v58 = vsel %vm5692_vm1, %v5645_v1, 0.0  ;;  %v6943_v54 = vadd.f32 %v6942_v16, %v10881_v52  ;;  %4638 = vrot.lane.b32.xlu0 %v2733_v3, %s8278_s22  ;;  %v6944_v49 = vpop.f32.mrb[173].mxu1  ;;  %v2736_v32 = vmul.f32 %v15024_v59, %v15024_v59 }
 0x3e5   : > { %v5855_v57 = vadd.f32 %v5854_v58, %v5853_v43  ;;  %v6945_v41 = vadd.f32 %v6944_v49, %v10889_v11  ;;  %v5345_v12 = vpop.permute.xlu1 %5344  ;;  %v7777_v56 = vadd.f32 -1.0, %v4880_v18  ;;  %v15026_v58 = vld [vmem:[#allocation267_spill] sm:$0xff] }
 0x3e6   : > { %7365 = vst [vmem:[%s10900_s12 + $0x560] sm:$0xff] %v6943_v54  ;;  %v5646_v50 = vsub.f32 %v7775_v5, %v5345_v12  ;;  %v4583_v63 = vpop.permute.xlu0 %4582  ;;  %v4243_v54 = vmul.f32 %v15026_v58, %v15026_v58  ;;  %v15037_v58 = vld [vmem:[#allocation336_spill] sm:$0xff] }
 0x3e7   : > { %7366 = vst.msk [vmem:[%s10900_s12 + $0x568] sm:$0xff] %vm634_vm0, %v6945_v41  ;;  %5402 = vrot.lane.b32.xlu1 %v15019_v21, %s8278_s22  ;;  %v6948_v42 = vpop.f32.mrb[174].mxu1  ;;  %v4881_v46 = vadd.f32 %v4583_v63, %v4241_v61  ;;  %v15027_v41 = vld [vmem:[#allocation105_spill] sm:$0xff] }
 0x3e8   : > { %v5856_v33 = vsel %vm5692_vm1, %v5646_v50, 0.0  ;;  %v6949_v51 = vadd.f32 %v6948_v42, %v10881_v52  ;;  %4640 = vrot.lane.b32.xlu0 %v2734_v38, %s8278_s22  ;;  %v6950_v35 = vpop.f32.mrb[175].mxu1  ;;  %v2737_v12 = vmul.f32 %v15027_v41, %v15027_v41 }
 0x3e9   : > { %v5857_v45 = vadd.f32 %v5856_v33, %v5855_v57  ;;  %v6951_v53 = vadd.f32 %v6950_v35, %v10889_v11  ;;  %v5347_v36 = vpop.permute.xlu1 %5346  ;;  %v7778_v1 = vadd.f32 -1.0, %v4881_v46  ;;  %v15029_v33 = vld [vmem:[#allocation268_spill] sm:$0xff] }
 0x3ea   : > { %7367 = vst [vmem:[%s10900_s12 + $0x570] sm:$0xff] %v6949_v51  ;;  %v5647_v60 = vsub.f32 %v7776_v24, %v5347_v36  ;;  %v4585_v39 = vpop.permute.xlu0 %4584  ;;  %v4244_v51 = vmul.f32 %v15029_v33, %v15029_v33 }
 0x3eb   : > { %7368 = vst.msk [vmem:[%s10900_s12 + $0x578] sm:$0xff] %vm634_vm0, %v6951_v53  ;;  %5404 = vrot.lane.b32.xlu1 %v15022_v37, %s8278_s22  ;;  %v6954_v55 = vpop.f32.mrb[176].mxu1  ;;  %v4882_v6 = vadd.f32 %v4585_v39, %v4242_v27  ;;  %v15030_v53 = vld [vmem:[#allocation38_spill] sm:$0xff] }
 0x3ec   : > { %v5858_v47 = vsel %vm5692_vm1, %v5647_v60, 0.0  ;;  %v6955_v29 = vadd.f32 %v6954_v55, %v10881_v52  ;;  %4642 = vrot.lane.b32.xlu0 %v2735_v44, %s8278_s22  ;;  %v6956_v2 = vpop.f32.mrb[177].mxu1  ;;  %v2738_v36 = vmul.f32 %v15030_v53, %v15030_v53 }
 0x3ed   : > { %v5859_v17 = vadd.f32 %v5858_v47, %v5857_v45  ;;  %v6957_v0 = vadd.f32 %v6956_v2, %v10889_v11  ;;  %v5349_v20 = vpop.permute.xlu1 %5348  ;;  %v7779_v50 = vadd.f32 -1.0, %v4882_v6  ;;  %v15032_v47 = vld [vmem:[#allocation272_spill] sm:$0xff] }
 0x3ee   : > { %7369 = vst [vmem:[%s10900_s12 + $0x580] sm:$0xff] %v6955_v29  ;;  %v5648_v19 = vsub.f32 %v7777_v56, %v5349_v20  ;;  %v4587_v43 = vpop.permute.xlu0 %4586  ;;  %v4245_v29 = vmul.f32 %v15032_v47, %v15032_v47 }
 0x3ef   : > { %7370 = vst.msk [vmem:[%s10900_s12 + $0x588] sm:$0xff] %vm634_vm0, %v6957_v0  ;;  %5406 = vrot.lane.b32.xlu1 %v15025_v23, %s8278_s22  ;;  %v6960_v13 = vpop.f32.mrb[178].mxu1  ;;  %v4883_v63 = vadd.f32 %v4587_v43, %v4243_v54  ;;  %v15033_v0 = vld [vmem:[#allocation206_spill] sm:$0xff] }
 0x3f0   : > { %v5860_v40 = vsel %vm5692_vm1, %v5648_v19, 0.0  ;;  %v6961_v3 = vadd.f32 %v6960_v13, %v10881_v52  ;;  %4644 = vrot.lane.b32.xlu0 %v2736_v32, %s8278_s22  ;;  %v6962_v30 = vpop.f32.mrb[179].mxu1  ;;  %v2739_v20 = vmul.f32 %v15033_v0, %v15033_v0 }
 0x3f1   : > { %v5861_v16 = vadd.f32 %v5860_v40, %v5859_v17  ;;  %v6963_v5 = vadd.f32 %v6962_v30, %v10889_v11  ;;  %v5351_v4 = vpop.permute.xlu1 %5350  ;;  %v7780_v60 = vadd.f32 -1.0, %v4883_v63  ;;  %v15035_v40 = vld [vmem:[#allocation273_spill] sm:$0xff] }
 0x3f2   : > { %7371 = vst [vmem:[%s10900_s12 + $0x590] sm:$0xff] %v6961_v3  ;;  %v5649_v49 = vsub.f32 %v7778_v1, %v5351_v4  ;;  %v4589_v57 = vpop.permute.xlu0 %4588  ;;  %v4246_v3 = vmul.f32 %v15035_v40, %v15035_v40 }
 0x3f3   : > { %7372 = vst.msk [vmem:[%s10900_s12 + $0x598] sm:$0xff] %vm634_vm0, %v6963_v5  ;;  %5408 = vrot.lane.b32.xlu1 %v15028_v34, %s8278_s22  ;;  %v6966_v25 = vpop.f32.mrb[180].mxu1  ;;  %v4884_v39 = vadd.f32 %v4589_v57, %v4244_v51  ;;  %v15036_v5 = vld [vmem:[#allocation107_spill] sm:$0xff] }
 0x3f4   : > { %v5862_v22 = vsel %vm5692_vm1, %v5649_v49, 0.0  ;;  %v6967_v38 = vadd.f32 %v6966_v25, %v10881_v52  ;;  %4646 = vrot.lane.b32.xlu0 %v2737_v12, %s8278_s22  ;;  %v6968_v21 = vpop.f32.mrb[181].mxu1  ;;  %v2740_v4 = vmul.f32 %v15036_v5, %v15036_v5 }
 0x3f5   : > { %v5863_v42 = vadd.f32 %v5862_v22, %v5861_v16  ;;  %v6969_v24 = vadd.f32 %v6968_v21, %v10889_v11  ;;  %v5353_v18 = vpop.permute.xlu1 %5352  ;;  %v7781_v19 = vadd.f32 -1.0, %v4884_v39  ;;  %v15038_v22 = vld [vmem:[#allocation278_spill] sm:$0xff] }
 0x3f6   : > { %7373 = vst [vmem:[%s10900_s12 + $0x5a0] sm:$0xff] %v6967_v38  ;;  %v5650_v35 = vsub.f32 %v7779_v50, %v5353_v18  ;;  %v4591_v45 = vpop.permute.xlu0 %4590  ;;  %v4247_v38 = vmul.f32 %v15038_v22, %v15038_v22  ;;  %v15039_v18 = vld [vmem:[#allocation97_spill] sm:$0xff] }
 0x3f7   : > { %7374 = vst.msk [vmem:[%s10900_s12 + $0x5a8] sm:$0xff] %vm634_vm0, %v6969_v24  ;;  %5410 = vrot.lane.b32.xlu1 %v15031_v62, %s8278_s22  ;;  %v6972_v61 = vpop.f32.mrb[182].mxu1  ;;  %v4885_v43 = vadd.f32 %v4591_v45, %v4245_v29  ;;  %v2741_v24 = vmul.f32 %v12090_v31, %v12090_v31 }
 0x3f8   : > { %v5864_v28 = vsel %vm5692_vm1, %v5650_v35, 0.0  ;;  %v6973_v44 = vadd.f32 %v6972_v61, %v10881_v52  ;;  %4648 = vrot.lane.b32.xlu0 %v2738_v36, %s8278_s22  ;;  %v6974_v37 = vpop.f32.mrb[183].mxu1 }
 0x3f9   : > { %v5865_v55 = vadd.f32 %v5864_v28, %v5863_v42  ;;  %v6975_v56 = vadd.f32 %v6974_v37, %v10889_v11  ;;  %v5355_v46 = vpop.permute.xlu1 %5354  ;;  %v7782_v49 = vadd.f32 -1.0, %v4885_v43  ;;  %v15041_v37 = vld [vmem:[#allocation53_spill] sm:$0xff] }
 0x3fa   : > { %7375 = vst [vmem:[%s10900_s12 + $0x5b0] sm:$0xff] %v6973_v44  ;;  %v5651_v2 = vsub.f32 %v7780_v60, %v5355_v46  ;;  %v4593_v17 = vpop.permute.xlu0 %4592  ;;  %v15040_v60 = vld [vmem:[#allocation6_spill] sm:$0xff] }
 0x3fb   : > { %7376 = vst.msk [vmem:[%s10900_s12 + $0x5b8] sm:$0xff] %vm634_vm0, %v6975_v56  ;;  %5412 = vrot.lane.b32.xlu1 %v15034_v10, %s8278_s22  ;;  %v6978_v27 = vpop.f32.mrb[184].mxu1  ;;  %v4886_v57 = vadd.f32 %v4593_v17, %v4246_v3  ;;  %v4248_v39 = vmul.f32 %v15040_v60, %v15040_v60  ;;  %v15042_v56 = vld [vmem:[#allocation200_spill] sm:$0xff] }
 0x3fc   : > { %v5866_v59 = vsel %vm5692_vm1, %v5651_v2, 0.0  ;;  %v6979_v32 = vadd.f32 %v6978_v27, %v10881_v52  ;;  %4650 = vrot.lane.b32.xlu0 %v2739_v20, %s8278_s22  ;;  %v6980_v23 = vpop.f32.mrb[185].mxu1 }
 0x3fd   : > { %v5867_v13 = vadd.f32 %v5866_v59, %v5865_v55  ;;  %v6981_v1 = vadd.f32 %v6980_v23, %v10889_v11  ;;  %v5357_v6 = vpop.permute.xlu1 %5356  ;;  %v7783_v51 = vadd.f32 -1.0, %v4886_v57  ;;  %v2742_v55 = vmul.f32 %v15041_v37, %v15041_v37  ;;  %v15044_v23 = vld [vmem:[#allocation59_spill] sm:$0xff] }
 0x3fe   : > { %7377 = vst [vmem:[%s10900_s12 + $0x5c0] sm:$0xff] %v6979_v32  ;;  %v5652_v30 = vsub.f32 %v7781_v19, %v5357_v6  ;;  %v4595_v16 = vpop.permute.xlu0 %4594  ;;  %v15043_v19 = vld [vmem:[#allocation283_spill] sm:$0xff] }
 0x3ff   : > { %7378 = vst.msk [vmem:[%s10900_s12 + $0x5c8] sm:$0xff] %vm634_vm0, %v6981_v1  ;;  %5414 = vrot.lane.b32.xlu1 %v15037_v58, %s8278_s22  ;;  %v6984_v54 = vpop.f32.mrb[186].mxu1  ;;  %v4887_v35 = vadd.f32 %v4595_v16, %v4247_v38  ;;  %v4249_v43 = vmul.f32 %v15043_v19, %v15043_v19  ;;  %v15045_v1 = vld [vmem:[#allocation100_spill] sm:$0xff] }
 0x400   : > { %v5868_v41 = vsel %vm5692_vm1, %v5652_v30, 0.0  ;;  %v6985_v12 = vadd.f32 %v6984_v54, %v10881_v52  ;;  %4652 = vrot.lane.b32.xlu0 %v2740_v4, %s8278_s22  ;;  %v6986_v34 = vpop.f32.mrb[187].mxu1 }
 0x401   : > { %v5869_v25 = vadd.f32 %v5868_v41, %v5867_v13  ;;  %v6987_v50 = vadd.f32 %v6986_v34, %v10889_v11  ;;  %v5359_v63 = vpop.permute.xlu1 %5358  ;;  %v7784_v47 = vadd.f32 -1.0, %v4887_v35  ;;  %v2743_v13 = vmul.f32 %v15044_v23, %v15044_v23  ;;  %v15047_v34 = vld [vmem:[#allocation64_spill] sm:$0xff] }
 0x402   : > { %7379 = vst [vmem:[%s10900_s12 + $0x5d0] sm:$0xff] %v6985_v12  ;;  %v5653_v21 = vsub.f32 %v7782_v49, %v5359_v63  ;;  %v4597_v42 = vpop.permute.xlu0 %4596  ;;  %v15046_v49 = vld [vmem:[#allocation284_spill] sm:$0xff] }
 0x403   : > { %7380 = vst.msk [vmem:[%s10900_s12 + $0x5d8] sm:$0xff] %vm634_vm0, %v6987_v50  ;;  %5416 = vrot.lane.b32.xlu1 %v15039_v18, %s8278_s22  ;;  %v6990_v33 = vpop.f32.mrb[188].mxu1  ;;  %v4888_v29 = vadd.f32 %v4597_v42, %v4248_v39  ;;  %v4250_v57 = vmul.f32 %v15046_v49, %v15046_v49  ;;  %v15048_v50 = vld [vmem:[#allocation204_spill] sm:$0xff] }
 0x404   : > { %v5870_v45 = vsel %vm5692_vm1, %v5653_v21, 0.0  ;;  %v6991_v53 = vadd.f32 %v6990_v33, %v10881_v52  ;;  %4654 = vrot.lane.b32.xlu0 %v2741_v24, %s8278_s22  ;;  %v6992_v36 = vpop.f32.mrb[189].mxu1  ;;  %v15049_v35 = vld [vmem:[#allocation288_spill] sm:$0xff] }
 0x405   : > { %v5871_v62 = vadd.f32 %v5870_v45, %v5869_v25  ;;  %v6993_v61 = vadd.f32 %v6992_v36, %v10889_v11  ;;  %v5361_v31 = vpop.permute.xlu1 %5360  ;;  %v7785_v40 = vadd.f32 -1.0, %v4888_v29  ;;  %v2744_v25 = vmul.f32 %v15047_v34, %v15047_v34  ;;  %v15052_v29 = vld [vmem:[#allocation289_spill] sm:$0xff] }
 0x406   : > { %7381 = vst [vmem:[%s10900_s12 + $0x5e0] sm:$0xff] %v6991_v53  ;;  %v5654_v28 = vsub.f32 %v7783_v51, %v5361_v31  ;;  %v4599_v44 = vpop.permute.xlu0 %4598  ;;  %v4251_v45 = vmul.f32 %v15049_v35, %v15049_v35  ;;  %v15051_v31 = vld [vmem:[#allocation103_spill] sm:$0xff] }
 0x407   : > { %7382 = vst.msk [vmem:[%s10900_s12 + $0x5e8] sm:$0xff] %vm634_vm0, %v6993_v61  ;;  %5418 = vrot.lane.b32.xlu1 %v15042_v56, %s8278_s22  ;;  %v6996_v46 = vpop.f32.mrb[190].mxu1  ;;  %v4889_v3 = vadd.f32 %v4599_v44, %v4249_v43 }
 0x408   : > { %v5872_v2 = vsel %vm5692_vm1, %v5654_v28, 0.0  ;;  %v6997_v17 = vadd.f32 %v6996_v46, %v10881_v52  ;;  %4656 = vrot.lane.b32.xlu0 %v2742_v55, %s8278_s22  ;;  %v6998_v0 = vpop.f32.mrb[191].mxu1 }
 0x409   : > { %v5873_v20 = vadd.f32 %v5872_v2, %v5871_v62  ;;  %v6999_v10 = vadd.f32 %v6998_v0, %v10889_v11  ;;  %v5363_v27 = vpop.permute.xlu1 %5362  ;;  %v7786_v22 = vadd.f32 -1.0, %v4889_v3  ;;  %v15050_v62 = vld [vmem:[#allocation231_spill] sm:$0xff]  ;;  %v4252_v2 = vmul.f32 %v15052_v29, %v15052_v29 }
 0x40a   : > { %7383 = vst [vmem:[%s10900_s12 + $0x5f0] sm:$0xff] %v6997_v17  ;;  %v5655_v59 = vsub.f32 %v7784_v47, %v5363_v27  ;;  %v4601_v32 = vpop.permute.xlu0 %4600  ;;  %v2745_v61 = vmul.f32 %v15050_v62, %v15050_v62  ;;  %v15054_v27 = vld [vmem:[#allocation41_spill] sm:$0xff] }
 0x40b   : > { %7384 = vst.msk [vmem:[%s10900_s12 + $0x5f8] sm:$0xff] %vm634_vm0, %v6999_v10  ;;  %5420 = vrot.lane.b32.xlu1 %v15045_v1, %s8278_s22  ;;  %v7002_v6 = vpop.f32.mrb[192].mxu1  ;;  %v4890_v38 = vadd.f32 %v4601_v32, %v4250_v57 }
 0x40c   : > { %v5874_v30 = vsel %vm5692_vm1, %v5655_v59, 0.0  ;;  %v7003_v16 = vadd.f32 %v7002_v6, %v10881_v52  ;;  %4658 = vrot.lane.b32.xlu0 %v2743_v13, %s8278_s22  ;;  %v7004_v5 = vpop.f32.mrb[193].mxu1 }
 0x40d   : > { %v5875_v4 = vadd.f32 %v5874_v30, %v5873_v20  ;;  %v7005_v58 = vadd.f32 %v7004_v5, %v10889_v11  ;;  %v5365_v54 = vpop.permute.xlu1 %5364  ;;  %v7787_v39 = vadd.f32 -1.0, %v4890_v38  ;;  %v15053_v20 = vld [vmem:[#allocation128_spill] sm:$0xff] }
 0x40e   : > { %7385 = vst [vmem:[%s10900_s12 + $0x600] sm:$0xff] %v7003_v16  ;;  %v5656_v41 = vsub.f32 %v7785_v40, %v5365_v54  ;;  %v4603_v12 = vpop.permute.xlu0 %4602  ;;  %v2746_v10 = vmul.f32 %v15053_v20, %v15053_v20  ;;  %v15055_v16 = vld [vmem:[#allocation145_spill] sm:$0xff] }
 0x40f   : > { %7386 = vst.msk [vmem:[%s10900_s12 + $0x608] sm:$0xff] %vm634_vm0, %v7005_v58  ;;  %5422 = vrot.lane.b32.xlu1 %v15048_v50, %s8278_s22  ;;  %v7008_v63 = vpop.f32.mrb[194].mxu1  ;;  %v4891_v28 = vadd.f32 %v4603_v12, %v4251_v45  ;;  %v2747_v5 = vmul.f32 %v15055_v16, %v15055_v16 }
 0x410   : > { %v5876_v21 = vsel %vm5692_vm1, %v5656_v41, 0.0  ;;  %v7009_v42 = vadd.f32 %v7008_v63, %v10881_v52  ;;  %4660 = vrot.lane.b32.xlu0 %v2744_v25, %s8278_s22  ;;  %v7010_v24 = vpop.f32.mrb[195].mxu1 }
 0x411   : > { %v5877_v18 = vadd.f32 %v5876_v21, %v5875_v4  ;;  %v7011_v33 = vadd.f32 %v7010_v24, %v10889_v11  ;;  %v5367_v51 = vpop.permute.xlu1 %5366  ;;  %v7788_v43 = vadd.f32 -1.0, %v4891_v28  ;;  %v15056_v4 = vld [vmem:[#allocation139_spill] sm:$0xff]  ;;  %v15058_v24 = vld [vmem:[#allocation108_spill] sm:$0xff] }
 0x412   : > { %7387 = vst [vmem:[%s10900_s12 + $0x610] sm:$0xff] %v7009_v42  ;;  %v5657_v53 = vsub.f32 %v7786_v22, %v5367_v51  ;;  %v4605_v36 = vpop.permute.xlu0 %4604  ;;  %v15057_v22 = vld [vmem:[#allocation137_spill] sm:$0xff] }
 0x413   : > { %7388 = vst.msk [vmem:[%s10900_s12 + $0x618] sm:$0xff] %vm634_vm0, %v7011_v33  ;;  %5424 = vrot.lane.b32.xlu1 %v15051_v31, %s8278_s22  ;;  %v7014_v60 = vpop.f32.mrb[196].mxu1  ;;  %v4892_v59 = vadd.f32 %v4605_v36, %v4252_v2 }
 0x414   : > { %v5878_v44 = vsel %vm5692_vm1, %v5657_v53, 0.0  ;;  %v7015_v37 = vadd.f32 %v7014_v60, %v10881_v52  ;;  %4662 = vrot.lane.b32.xlu0 %v2745_v61, %s8278_s22  ;;  %v7016_v55 = vpop.f32.mrb[197].mxu1  ;;  %v15059_v53 = vld [vmem:[#allocation56_spill] sm:$0xff] }
 0x415   : > { %v5879_v56 = vadd.f32 %v5878_v44, %v5877_v18  ;;  %v7017_v46 = vadd.f32 %v7016_v55, %v10889_v11  ;;  %v5369_v47 = vpop.permute.xlu1 %5368  ;;  %v7789_v54 = vadd.f32 -1.0, %v4892_v59 }
 0x416   : > { %7389 = vst [vmem:[%s10900_s12 + $0x620] sm:$0xff] %v7015_v37  ;;  %v5658_v17 = vsub.f32 %v7787_v39, %v5369_v47  ;;  %v13321_v0 = vpop.permute.xlu0 %4606 }
 0x417   : > { %7390 = vst.msk [vmem:[%s10900_s12 + $0x628] sm:$0xff] %vm634_vm0, %v7017_v46  ;;  %5426 = vrot.lane.b32.xlu1 %v15054_v27, %s8278_s22  ;;  %v7020_v19 = vpop.f32.mrb[198].mxu1 }
 0x418   : > { %v5880_v32 = vsel %vm5692_vm1, %v5658_v17, 0.0  ;;  %v7021_v23 = vadd.f32 %v7020_v19, %v10881_v52  ;;  %4664 = vrot.lane.b32.xlu0 %v2746_v10, %s8278_s22  ;;  %v7022_v13 = vpop.f32.mrb[199].mxu1 }
 0x419   : > { %v5881_v1 = vadd.f32 %v5880_v32, %v5879_v56  ;;  %v7023_v6 = vadd.f32 %v7022_v13, %v10889_v11  ;;  %v5371_v40 = vpop.permute.xlu1 %5370 }
 0x41a   : > { %7391 = vst [vmem:[%s10900_s12 + $0x630] sm:$0xff] %v7021_v23  ;;  %v5659_v3 = vsub.f32 %v7788_v43, %v5371_v40  ;;  %v13334_v30 = vpop.permute.xlu0 %4608 }
 0x41b   : > { %7392 = vst.msk [vmem:[%s10900_s12 + $0x638] sm:$0xff] %vm634_vm0, %v7023_v6  ;;  %5428 = vrot.lane.b32.xlu1 %v15056_v4, %s8278_s22  ;;  %v7026_v58 = vpop.f32.mrb[200].mxu1 }
 0x41c   : > { %v5882_v49 = vsel %vm5692_vm1, %v5659_v3, 0.0  ;;  %v7027_v57 = vadd.f32 %v7026_v58, %v10881_v52  ;;  %4666 = vrot.lane.b32.xlu0 %v2747_v5, %s8278_s22  ;;  %v7028_v41 = vpop.f32.mrb[201].mxu1 }
 0x41d   : > { %v5883_v12 = vadd.f32 %v5882_v49, %v5881_v1  ;;  %v7029_v34 = vadd.f32 %v7028_v41, %v10889_v11  ;;  %v5373_v25 = vpop.permute.xlu1 %5372 }
 0x41e   : > { %7393 = vst [vmem:[%s10900_s12 + $0x640] sm:$0xff] %v7027_v57  ;;  %v5660_v50 = vsub.f32 %v7789_v54, %v5373_v25  ;;  %v13347_v63 = vpop.permute.xlu0 %4610 }
 0x41f   : > { %7394 = vst.msk [vmem:[%s10900_s12 + $0x648] sm:$0xff] %vm634_vm0, %v7029_v34  ;;  %5430 = vrot.lane.b32.xlu1 %v15057_v22, %s8278_s22  ;;  %v7032_v38 = vpop.f32.mrb[202].mxu1 }
 0x420   : > { %v5884_v21 = vsel %vm5692_vm1, %v5660_v50, 0.0  ;;  %v7033_v42 = vadd.f32 %v7032_v38, %v10881_v52  ;;  %5432 = vrot.lane.b32.xlu0 %v15058_v24, %s8278_s22  ;;  %v7034_v18 = vpop.f32.mrb[203].mxu1 }
 0x421   : > { %v13357_v33 = vadd.f32 %v5884_v21, %v5883_v12  ;;  %v7035_v51 = vadd.f32 %v7034_v18, %v10889_v11  ;;  %v13360_v35 = vpop.permute.xlu1 %5374 }
 0x422   : > { %7395 = vst [vmem:[%s10900_s12 + $0x650] sm:$0xff] %v7033_v42  ;;  %v13363_v45 = vpop.permute.xlu0 %4612 }
 0x423   : > { %7396 = vst.msk [vmem:[%s10900_s12 + $0x658] sm:$0xff] %vm634_vm0, %v7035_v51  ;;  %5434 = vrot.lane.b32.xlu1 %v15059_v53, %s8278_s22  ;;  %v7038_v36 = vpop.f32.mrb[204].mxu1  ;;  %s7563_s22 = sshll.u32 %s15087_s28, 3 }
 0x424   : > { %v7039_v62 = vadd.f32 %v7038_v36, %v10881_v52  ;;  %v7040_v61 = vpop.f32.mrb[205].mxu1  ;;  %s346_s14 = scalar_lea.vmem %s13734_s8, %s7563_s22 }
 0x425   : > { %v7041_v31 = vadd.f32 %v7040_v61, %v10889_v11  ;;  %v13371_v60 = vpop.permute.xlu1 %5376 }
 0x426   : > { %7397 = vst [vmem:[%s10900_s12 + $0x660] sm:$0xff] %v7039_v62  ;;  %v13374_v39 = vpop.permute.xlu0 %4614 }
 0x427   : > { %7398 = vst.msk [vmem:[%s10900_s12 + $0x668] sm:$0xff] %vm634_vm0, %v7041_v31  ;;  %v7044_v28 = vpop.f32.mrb[206].mxu1 }
 0x428   : > { %v7045_v44 = vadd.f32 %v7044_v28, %v10881_v52  ;;  %v7046_v37 = vpop.f32.mrb[207].mxu1 }
 0x429   : > { %v7047_v55 = vadd.f32 %v7046_v37, %v10889_v11  ;;  %v13380_v56 = vpop.permute.xlu1 %5378 }
 0x42a   : > { %7399 = vst [vmem:[%s10900_s12 + $0x670] sm:$0xff] %v7045_v44  ;;  %v13383_v46 = vpop.permute.xlu0 %4616 }
 0x42b   : > { %7400 = vst.msk [vmem:[%s10900_s12 + $0x678] sm:$0xff] %vm634_vm0, %v7047_v55  ;;  %v7050_v47 = vpop.f32.mrb[208].mxu1 }
 0x42c   : > { %v7051_v29 = vadd.f32 %v7050_v47, %v10881_v52  ;;  %v7052_v2 = vpop.f32.mrb[209].mxu1 }
 0x42d   : > { %v7053_v17 = vadd.f32 %v7052_v2, %v10889_v11  ;;  %v13389_v20 = vpop.permute.xlu1 %5380 }
 0x42e   : > { %7401 = vst [vmem:[%s10900_s12 + $0x680] sm:$0xff] %v7051_v29  ;;  %v13392_v10 = vpop.permute.xlu0 %4618 }
 0x42f   : > { %7402 = vst.msk [vmem:[%s10900_s12 + $0x688] sm:$0xff] %vm634_vm0, %v7053_v17  ;;  %v7056_v27 = vpop.f32.mrb[210].mxu1 }
 0x430   : > { %v7057_v19 = vadd.f32 %v7056_v27, %v10881_v52  ;;  %v7058_v43 = vpop.f32.mrb[211].mxu1 }
 0x431   : > { %v7059_v59 = vadd.f32 %v7058_v43, %v10889_v11  ;;  %v13398_v32 = vpop.permute.xlu1 %5382 }
 0x432   : > { %7403 = vst [vmem:[%s10900_s12 + $0x690] sm:$0xff] %v7057_v19  ;;  %v13401_v23 = vpop.permute.xlu0 %4620 }
 0x433   : > { %7404 = vst.msk [vmem:[%s10900_s12 + $0x698] sm:$0xff] %vm634_vm0, %v7059_v59  ;;  %v7062_v13 = vpop.f32.mrb[212].mxu1 }
 0x434   : > { %v7063_v1 = vadd.f32 %v7062_v13, %v10881_v52  ;;  %v7064_v6 = vpop.f32.mrb[213].mxu1  ;;  %v15060_v13 = vld [vmem:[#allocation292_spill] sm:$0xff] }
 0x435   : > { %v7065_v40 = vadd.f32 %v7064_v6, %v10889_v11  ;;  %v13407_v3 = vpop.permute.xlu1 %5384 }
 0x436   : > { %7405 = vst [vmem:[%s10900_s12 + $0x6a0] sm:$0xff] %v7063_v1  ;;  %v13410_v16 = vpop.permute.xlu0 %4622  ;;  %v4253_v1 = vmul.f32 %v15060_v13, %v15060_v13  ;;  %v15065_v13 = vld [vmem:[#allocation69_spill] sm:$0xff] }
 0x437   : > { %7406 = vst.msk [vmem:[%s10900_s12 + $0x6a8] sm:$0xff] %vm634_vm0, %v7065_v40  ;;  %v7068_v5 = vpop.f32.mrb[214].mxu1 }
 0x438   : > { %v7069_v4 = vadd.f32 %v7068_v5, %v10881_v52  ;;  %v7070_v58 = vpop.f32.mrb[215].mxu1  ;;  %v4893_v5 = vadd.f32 %v13321_v0, %v4253_v1  ;;  %v15063_v0 = vld [vmem:[#allocation67_spill] sm:$0xff] }
 0x439   : > { %v7071_v54 = vadd.f32 %v7070_v58, %v10889_v11  ;;  %v13416_v49 = vpop.permute.xlu1 %5386 }
 0x43a   : > { %7407 = vst [vmem:[%s10900_s12 + $0x6b0] sm:$0xff] %v7069_v4  ;;  %v13419_v57 = vpop.permute.xlu0 %4624  ;;  %v15061_v4 = vld [vmem:[#allocation63_spill] sm:$0xff] }
 0x43b   : > { %7408 = vst.msk [vmem:[%s10900_s12 + $0x6b8] sm:$0xff] %vm634_vm0, %v7071_v54  ;;  %v7074_v41 = vpop.f32.mrb[216].mxu1  ;;  %v4254_v58 = vmul.f32 %v15061_v4, %v15061_v4 }
 0x43c   : > { %v7075_v12 = vadd.f32 %v7074_v41, %v10881_v52  ;;  %v7076_v34 = vpop.f32.mrb[217].mxu1 }
 0x43d   : > { %v7077_v25 = vadd.f32 %v7076_v34, %v10889_v11  ;;  %v13425_v50 = vpop.permute.xlu1 %5388 }
 0x43e   : > { %7409 = vst [vmem:[%s10900_s12 + $0x6c0] sm:$0xff] %v7075_v12  ;;  %v13428_v22 = vpop.permute.xlu0 %4626 }
 0x43f   : > { %7410 = vst.msk [vmem:[%s10900_s12 + $0x6c8] sm:$0xff] %vm634_vm0, %v7077_v25  ;;  %v7080_v38 = vpop.f32.mrb[218].mxu1  ;;  %v4894_v25 = vadd.f32 %v13334_v30, %v4254_v58 }
 0x440   : > { %v7081_v21 = vadd.f32 %v7080_v38, %v10881_v52  ;;  %v7082_v42 = vpop.f32.mrb[219].mxu1  ;;  %v15062_v38 = vld [vmem:[#allocation297_spill] sm:$0xff] }
 0x441   : > { %v7083_v24 = vadd.f32 %v7082_v42, %v10889_v11  ;;  %v13434_v18 = vpop.permute.xlu1 %5390 }
 0x442   : > { %7411 = vst [vmem:[%s10900_s12 + $0x6d0] sm:$0xff] %v7081_v21  ;;  %v13437_v51 = vpop.permute.xlu0 %4628  ;;  %v4255_v21 = vmul.f32 %v15062_v38, %v15062_v38 }
 0x443   : > { %7412 = vst.msk [vmem:[%s10900_s12 + $0x6d8] sm:$0xff] %vm634_vm0, %v7083_v24  ;;  %v7086_v53 = vpop.f32.mrb[220].mxu1  ;;  %v4256_v24 = vmul.f32 %v15063_v0, %v15063_v0 }
 0x444   : > { %v7087_v36 = vadd.f32 %v7086_v53, %v10881_v52  ;;  %v7088_v62 = vpop.f32.mrb[221].mxu1 }
 0x445   : > { %v7089_v61 = vadd.f32 %v7088_v62, %v10889_v11  ;;  %v13443_v31 = vpop.permute.xlu1 %5392  ;;  %v4895_v62 = vadd.f32 %v13347_v63, %v4255_v21  ;;  %v4258_v63 = vmul.f32 %v15065_v13, %v15065_v13  ;;  %v15066_v21 = vld [vmem:[#allocation304_spill] sm:$0xff] }
 0x446   : > { %7413 = vst [vmem:[%s10900_s12 + $0x6e0] sm:$0xff] %v7087_v36  ;;  %v13446_v28 = vpop.permute.xlu0 %4630  ;;  %v7790_v36 = vadd.f32 -1.0, %v4893_v5  ;;  %v4259_v0 = vmul.f32 %v15066_v21, %v15066_v21  ;;  %v15068_v13 = vld [vmem:[#allocation308_spill] sm:$0xff] }
 0x447   : > { %7414 = vst.msk [vmem:[%s10900_s12 + $0x6e8] sm:$0xff] %vm634_vm0, %v7089_v61  ;;  %v7092_v44 = vpop.f32.mrb[222].mxu1  ;;  %v7792_v1 = vadd.f32 -1.0, %v4895_v62  ;;  %v4898_v38 = vadd.f32 %v13383_v46, %v4258_v63 }
 0x448   : > { %v7093_v37 = vadd.f32 %v7092_v44, %v10881_v52  ;;  %v7094_v55 = vpop.f32.mrb[223].mxu1  ;;  %v4896_v44 = vadd.f32 %v13363_v45, %v4256_v24  ;;  %v15067_v24 = vld [vmem:[#allocation73_spill] sm:$0xff]  ;;  %v4899_v46 = vadd.f32 %v13392_v10, %v4259_v0  ;;  %v4261_v10 = vmul.f32 %v15068_v13, %v15068_v13 }
 0x449   : > { %v7095_v47 = vadd.f32 %v7094_v55, %v10889_v11  ;;  %v13452_v29 = vpop.permute.xlu1 %5394 }
 0x44a   : > { %7415 = vst [vmem:[%s10900_s12 + $0x6f0] sm:$0xff] %v7093_v37  ;;  %v13455_v2 = vpop.permute.xlu0 %4632  ;;  %v7793_v58 = vadd.f32 -1.0, %v4896_v44 }
 0x44b   : > { %7416 = vst.msk [vmem:[%s10900_s12 + $0x6f8] sm:$0xff] %vm634_vm0, %v7095_v47  ;;  %v7098_v17 = vpop.f32.mrb[224].mxu1  ;;  %v7791_v47 = vadd.f32 -1.0, %v4894_v25  ;;  %v5663_v25 = vsub.f32 %v7792_v1, %v13380_v56  ;;  %v15069_v1 = vld [vmem:[#allocation75_spill] sm:$0xff] }
 0x44c   : > { %v7099_v27 = vadd.f32 %v7098_v17, %v10881_v52  ;;  %v7100_v19 = vpop.f32.mrb[225].mxu1  ;;  %v5661_v17 = vsub.f32 %v7790_v36, %v13360_v35 }
 0x44d   : > { %v7101_v43 = vadd.f32 %v7100_v19, %v10889_v11  ;;  %v13461_v59 = vpop.permute.xlu1 %5396 }
 0x44e   : > { %7417 = vst [vmem:[%s10900_s12 + $0x700] sm:$0xff] %v7099_v27  ;;  %v13466_v6 = vpop.permute.xlu0 %4634  ;;  %v15064_v27 = vld [vmem:[#allocation300_spill] sm:$0xff] }
 0x44f   : > { %7418 = vst.msk [vmem:[%s10900_s12 + $0x708] sm:$0xff] %vm634_vm0, %v7101_v43  ;;  %v7104_v40 = vpop.f32.mrb[226].mxu1  ;;  %v4257_v19 = vmul.f32 %v15064_v27, %v15064_v27  ;;  %v7795_v27 = vadd.f32 -1.0, %v4898_v38 }
 0x450   : > { %v7105_v54 = vadd.f32 %v7104_v40, %v10881_v52  ;;  %v7106_v41 = vpop.f32.mrb[227].mxu1  ;;  %v5662_v40 = vsub.f32 %v7791_v47, %v13371_v60 }
 0x451   : > { %v7107_v12 = vadd.f32 %v7106_v41, %v10889_v11  ;;  %v13475_v34 = vpop.permute.xlu1 %5398  ;;  %v4897_v5 = vadd.f32 %v13374_v39, %v4257_v19  ;;  %v5664_v39 = vsub.f32 %v7793_v58, %v13389_v20 }
 0x452   : > { %7419 = vst [vmem:[%s10900_s12 + $0x710] sm:$0xff] %v7105_v54  ;;  %v13481_v42 = vpop.permute.xlu0 %4636  ;;  %v5888_v62 = vsel %vm5692_vm1, %v5662_v40, 0.0 }
 0x453   : > { %7420 = vst.msk [vmem:[%s10900_s12 + $0x718] sm:$0xff] %vm634_vm0, %v7107_v12  ;;  %v7110_v53 = vpop.f32.mrb[228].mxu1  ;;  %v5886_v12 = vsel %vm5692_vm1, %v5661_v17, 0.0  ;;  %v7794_v56 = vadd.f32 -1.0, %v4897_v5  ;;  %v5890_v17 = vsel %vm5692_vm1, %v5663_v25, 0.0  ;;  %v7796_v5 = vadd.f32 -1.0, %v4899_v46 }
 0x454   : > { %v7111_v61 = vadd.f32 %v7110_v53, %v10881_v52  ;;  %v7112_v30 = vpop.f32.mrb[229].mxu1  ;;  %v4260_v53 = vmul.f32 %v15067_v24, %v15067_v24  ;;  %v5887_v44 = vadd.f32 %v5886_v12, %v13357_v33  ;;  %v5892_v33 = vsel %vm5692_vm1, %v5664_v39, 0.0  ;;  %v15070_v24 = vld [vmem:[#allocation312_spill] sm:$0xff] }
 0x455   : > { %v7113_v37 = vadd.f32 %v7112_v30, %v10889_v11  ;;  %v13491_v55 = vpop.permute.xlu1 %5400  ;;  %v5665_v19 = vsub.f32 %v7794_v56, %v13398_v32  ;;  %v4901_v32 = vadd.f32 %v13410_v16, %v4261_v10  ;;  %v5667_v0 = vsub.f32 %v7796_v5, %v13416_v49  ;;  %v15072_v10 = vld [vmem:[#allocation316_spill] sm:$0xff] }
 0x456   : > { %7421 = vst [vmem:[%s10900_s12 + $0x720] sm:$0xff] %v7111_v61  ;;  %v13497_v43 = vpop.permute.xlu0 %4638  ;;  %v4900_v20 = vadd.f32 %v13401_v23, %v4260_v53  ;;  %v4262_v23 = vmul.f32 %v15069_v1, %v15069_v1 }
 0x457   : > { %7422 = vst.msk [vmem:[%s10900_s12 + $0x728] sm:$0xff] %vm634_vm0, %v7113_v37  ;;  %v7116_v45 = vpop.f32.mrb[230].mxu1  ;;  %v5894_v21 = vsel %vm5692_vm1, %v5665_v19, 0.0 }
 0x458   : > { %v7117_v35 = vadd.f32 %v7116_v45, %v10881_v52  ;;  %v7118_v4 = vpop.f32.mrb[231].mxu1  ;;  %v5889_v45 = vadd.f32 %v5888_v62, %v5887_v44  ;;  %v7797_v12 = vadd.f32 -1.0, %v4900_v20  ;;  %v4902_v39 = vadd.f32 %v13419_v57, %v4262_v23  ;;  %v15071_v62 = vld [vmem:[#allocation79_spill] sm:$0xff]  ;;  %v15073_v23 = vld [vmem:[#allocation81_spill] sm:$0xff] }
 0x459   : > { %v7119_v54 = vadd.f32 %v7118_v4, %v10889_v11  ;;  %v13507_v41 = vpop.permute.xlu1 %5402  ;;  %v4264_v56 = vmul.f32 %v15071_v62, %v15071_v62 }
 0x45a   : > { %7423 = vst [vmem:[%s10900_s12 + $0x730] sm:$0xff] %v7117_v35  ;;  %v13515_v60 = vpop.permute.xlu0 %4640  ;;  %v5666_v35 = vsub.f32 %v7795_v27, %v13407_v3  ;;  %v4263_v3 = vmul.f32 %v15070_v24, %v15070_v24  ;;  %v5898_v27 = vsel %vm5692_vm1, %v5667_v0, 0.0  ;;  %v7799_v19 = vadd.f32 -1.0, %v4902_v39  ;;  %v15074_v24 = vld [vmem:[#allocation320_spill] sm:$0xff] }
 0x45b   : > { %7424 = vst.msk [vmem:[%s10900_s12 + $0x738] sm:$0xff] %vm634_vm0, %v7119_v54  ;;  %v7122_v36 = vpop.f32.mrb[232].mxu1  ;;  %v5891_v54 = vadd.f32 %v5890_v17, %v5889_v45  ;;  %v4265_v45 = vmul.f32 %v15072_v10, %v15072_v10 }
 0x45c   : > { %v7123_v61 = vadd.f32 %v7122_v36, %v10881_v52  ;;  %v7124_v30 = vpop.f32.mrb[233].mxu1  ;;  %v5668_v36 = vsub.f32 %v7797_v12, %v13425_v50  ;;  %v5896_v49 = vsel %vm5692_vm1, %v5666_v35, 0.0  ;;  %v4903_v57 = vadd.f32 %v13428_v22, %v4263_v3 }
 0x45d   : > { %v7125_v37 = vadd.f32 %v7124_v30, %v10889_v11  ;;  %v13528_v47 = vpop.permute.xlu1 %5404  ;;  %v5893_v53 = vadd.f32 %v5892_v33, %v5891_v54  ;;  %v5670_v35 = vsub.f32 %v7799_v19, %v13443_v31  ;;  %v4267_v31 = vmul.f32 %v15074_v24, %v15074_v24 }
 0x45e   : > { %7425 = vst [vmem:[%s10900_s12 + $0x740] sm:$0xff] %v7123_v61  ;;  %v13535_v63 = vpop.permute.xlu0 %4642  ;;  %v7798_v61 = vadd.f32 -1.0, %v4901_v32  ;;  %v5900_v1 = vsel %vm5692_vm1, %v5668_v36, 0.0  ;;  %v7800_v5 = vadd.f32 -1.0, %v4903_v57  ;;  %v15075_v36 = vld [vmem:[#allocation85_spill] sm:$0xff] }
 0x45f   : > { %7426 = vst.msk [vmem:[%s10900_s12 + $0x748] sm:$0xff] %vm634_vm0, %v7125_v37  ;;  %v7128_v40 = vpop.f32.mrb[234].mxu1  ;;  %v5895_v20 = vadd.f32 %v5894_v21, %v5893_v53  ;;  %v4904_v37 = vadd.f32 %v13437_v51, %v4264_v56  ;;  %v4266_v51 = vmul.f32 %v15073_v23, %v15073_v23  ;;  %v4268_v62 = vmul.f32 %v15075_v36, %v15075_v36 }
 0x460   : > { %v7129_v4 = vadd.f32 %v7128_v40, %v10881_v52  ;;  %v7130_v58 = vpop.f32.mrb[235].mxu1  ;;  %v5669_v13 = vsub.f32 %v7798_v61, %v13434_v18  ;;  %v4905_v18 = vadd.f32 %v13446_v28, %v4265_v45  ;;  %v5671_v0 = vsub.f32 %v7800_v5, %v13452_v29  ;;  %v15077_v45 = vld [vmem:[#allocation87_spill] sm:$0xff] }
 0x461   : > { %v7131_v25 = vadd.f32 %v7130_v58, %v10889_v11  ;;  %v13546_v38 = vpop.permute.xlu1 %5406  ;;  %v5897_v33 = vadd.f32 %v5896_v49, %v5895_v20  ;;  %v7801_v54 = vadd.f32 -1.0, %v4904_v37  ;;  %v4906_v39 = vadd.f32 %v13455_v2, %v4266_v51 }
 0x462   : > { %7427 = vst [vmem:[%s10900_s12 + $0x750] sm:$0xff] %v7129_v4  ;;  %v13554_v16 = vpop.permute.xlu0 %4644  ;;  %v5902_v21 = vsel %vm5692_vm1, %v5669_v13, 0.0  ;;  %v5904_v29 = vsel %vm5692_vm1, %v5670_v35, 0.0  ;;  %v4907_v2 = vadd.f32 %v13466_v6, %v4267_v31  ;;  %v5906_v20 = vsel %vm5692_vm1, %v5671_v0, 0.0 }
 0x463   : > { %7428 = vst.msk [vmem:[%s10900_s12 + $0x758] sm:$0xff] %vm634_vm0, %v7131_v25  ;;  %v7134_v46 = vpop.f32.mrb[236].mxu1  ;;  %v5899_v58 = vadd.f32 %v5898_v27, %v5897_v33  ;;  %v5672_v53 = vsub.f32 %v7801_v54, %v13461_v59  ;;  %v7803_v37 = vadd.f32 -1.0, %v4906_v39  ;;  %v15076_v27 = vld [vmem:[#allocation324_spill] sm:$0xff]  ;;  %v15079_v39 = vld [vmem:[#allocation91_spill] sm:$0xff] }
 0x464   : > { %v7135_v30 = vadd.f32 %v7134_v46, %v10881_v52  ;;  %v7136_v44 = vpop.f32.mrb[237].mxu1  ;;  %v7802_v46 = vadd.f32 -1.0, %v4905_v18  ;;  %v4269_v19 = vmul.f32 %v15076_v27, %v15076_v27  ;;  %v4272_v24 = vmul.f32 %v15079_v39, %v15079_v39 }
 0x465   : > { %v7137_v50 = vadd.f32 %v7136_v44, %v10889_v11  ;;  %v13566_v17 = vpop.permute.xlu1 %5408  ;;  %v5901_v3 = vadd.f32 %v5900_v1, %v5899_v58  ;;  %v5908_v10 = vsel %vm5692_vm1, %v5672_v53, 0.0  ;;  %v7804_v1 = vadd.f32 -1.0, %v4907_v2 }
 0x466   : > { %7429 = vst [vmem:[%s10900_s12 + $0x760] sm:$0xff] %v7135_v30  ;;  %v13573_v22 = vpop.permute.xlu0 %4646  ;;  %v4908_v30 = vadd.f32 %v13481_v42, %v4268_v62  ;;  %v4270_v42 = vmul.f32 %v15077_v45, %v15077_v45  ;;  %v5674_v23 = vsub.f32 %v7803_v37, %v13491_v55 }
 0x467   : > { %7430 = vst.msk [vmem:[%s10900_s12 + $0x768] sm:$0xff] %vm634_vm0, %v7137_v50  ;;  %v7140_v40 = vpop.f32.mrb[238].mxu1  ;;  %v5903_v57 = vadd.f32 %v5902_v21, %v5901_v3  ;;  %v5673_v50 = vsub.f32 %v7802_v46, %v13475_v34  ;;  %v4909_v34 = vadd.f32 %v13497_v43, %v4269_v19  ;;  %v5675_v58 = vsub.f32 %v7804_v1, %v13507_v41 }
 0x468   : > { %v7141_v32 = vadd.f32 %v7140_v40, %v10881_v52  ;;  %v7142_v4 = vpop.f32.mrb[239].mxu1  ;;  %v7805_v35 = vadd.f32 -1.0, %v4908_v30  ;;  %v4910_v54 = vadd.f32 %v13515_v60, %v4270_v42  ;;  %v5912_v3 = vsel %vm5692_vm1, %v5674_v23, 0.0 }
 0x469   : > { %v7143_v12 = vadd.f32 %v7142_v4, %v10889_v11  ;;  %v13584_v25 = vpop.permute.xlu1 %5410  ;;  %v5905_v13 = vadd.f32 %v5904_v29, %v5903_v57  ;;  %v5910_v4 = vsel %vm5692_vm1, %v5673_v50, 0.0  ;;  %v7806_v41 = vadd.f32 -1.0, %v4909_v34 }
 0x46a   : > { %7431 = vst [vmem:[%s10900_s12 + $0x770] sm:$0xff] %v7141_v32  ;;  %v13592_v28 = vpop.permute.xlu0 %4648  ;;  %v5676_v0 = vsub.f32 %v7805_v35, %v13528_v47  ;;  %v5914_v46 = vsel %vm5692_vm1, %v5675_v58, 0.0  ;;  %v7807_v2 = vadd.f32 -1.0, %v4910_v54  ;;  %v15083_v35 = vld [vmem:[#allocation337_spill] sm:$0xff] }
 0x46b   : > { %7432 = vst.msk [vmem:[%s10900_s12 + $0x778] sm:$0xff] %vm634_vm0, %v7143_v12  ;;  %v7146_v56 = vpop.f32.mrb[240].mxu1  ;;  %v5907_v5 = vadd.f32 %v5906_v20, %v5905_v13  ;;  %v15078_v12 = vld [vmem:[#allocation328_spill] sm:$0xff]  ;;  %v15081_v20 = vld [vmem:[#allocation93_spill] sm:$0xff] }
 0x46c   : > { %v7147_v49 = vadd.f32 %v7146_v56, %v10881_v52  ;;  %v7148_v61 = vpop.f32.mrb[241].mxu1  ;;  %v4271_v55 = vmul.f32 %v15078_v12, %v15078_v12  ;;  %v4912_v56 = vadd.f32 %v13554_v16, %v4272_v24  ;;  %v4274_v16 = vmul.f32 %v15081_v20, %v15081_v20 }
 0x46d   : > { %v7149_v59 = vadd.f32 %v7148_v61, %v10889_v11  ;;  %v13604_v44 = vpop.permute.xlu1 %5412  ;;  %v5909_v21 = vadd.f32 %v5908_v10, %v5907_v5  ;;  %v15080_v61 = vld [vmem:[#allocation333_spill] sm:$0xff]  ;;  %v5678_v27 = vsub.f32 %v7807_v2, %v13566_v17 }
 0x46e   : > { %7433 = vst [vmem:[%s10900_s12 + $0x780] sm:$0xff] %v7147_v49  ;;  %v13611_v6 = vpop.permute.xlu0 %4650  ;;  %v4911_v60 = vadd.f32 %v13535_v63, %v4271_v55  ;;  %v5677_v49 = vsub.f32 %v7806_v41, %v13546_v38  ;;  %v4273_v57 = vmul.f32 %v15080_v61, %v15080_v61  ;;  %v7809_v45 = vadd.f32 -1.0, %v4912_v56 }
 0x46f   : > { %7434 = vst.msk [vmem:[%s10900_s12 + $0x788] sm:$0xff] %vm634_vm0, %v7149_v59  ;;  %v7152_v33 = vpop.f32.mrb[242].mxu1  ;;  %v5911_v62 = vadd.f32 %v5910_v4, %v5909_v21  ;;  %v5916_v59 = vsel %vm5692_vm1, %v5676_v0, 0.0  ;;  %v4914_v34 = vadd.f32 %v13592_v28, %v4274_v16  ;;  %v5920_v58 = vsel %vm5692_vm1, %v5678_v27, 0.0 }
 0x470   : > { %v7153_v51 = vadd.f32 %v7152_v33, %v10881_v52  ;;  %v7154_v40 = vpop.f32.mrb[243].mxu1  ;;  %v7808_v50 = vadd.f32 -1.0, %v4911_v60  ;;  %v4913_v38 = vadd.f32 %v13573_v22, %v4273_v57  ;;  %v5918_v1 = vsel %vm5692_vm1, %v5677_v49, 0.0 }
 0x471   : > { %v7155_v18 = vadd.f32 %v7154_v40, %v10889_v11  ;;  %v13622_v32 = vpop.permute.xlu1 %5414  ;;  %v5913_v30 = vadd.f32 %v5912_v3, %v5911_v62  ;;  %v5680_v5 = vsub.f32 %v7809_v45, %v13604_v44  ;;  %v7811_v24 = vadd.f32 -1.0, %v4914_v34 }
 0x472   : > { %7435 = vst [vmem:[%s10900_s12 + $0x790] sm:$0xff] %v7153_v51  ;;  %v4653_v43 = vpop.permute.xlu0 %4652  ;;  %v5679_v23 = vsub.f32 %v7808_v50, %v13584_v25  ;;  %v15082_v51 = vld [vmem:[#allocation198_spill] sm:$0xff]  ;;  %v7810_v25 = vadd.f32 -1.0, %v4913_v38  ;;  %v4277_v3 = vmul.f32 %v14942_v7, %v14942_v7 }
 0x473   : > { %7436 = vst.msk [vmem:[%s10900_s12 + $0x798] sm:$0xff] %vm634_vm0, %v7155_v18  ;;  %v7158_v31 = vpop.f32.mrb[244].mxu1  ;;  %v5915_v10 = vadd.f32 %v5914_v46, %v5913_v30  ;;  %v4275_v17 = vmul.f32 %v15082_v51, %v15082_v51  ;;  %v4276_v18 = vmul.f32 %v15083_v35, %v15083_v35  ;;  %v5924_v60 = vsel %vm5692_vm1, %v5680_v5, 0.0 }
 0x474   : > { %v7159_v53 = vadd.f32 %v7158_v31, %v10881_v52  ;;  %v7160_v36 = vpop.f32.mrb[245].mxu1  ;;  %v5922_v39 = vsel %vm5692_vm1, %v5679_v23, 0.0  ;;  %v5681_v31 = vsub.f32 %v7810_v25, %v13622_v32  ;;  %v4279_v30 = vmul.f32 %v14954_v48, %v14954_v48 }
 0x475   : > { %v7161_v47 = vadd.f32 %v7160_v36, %v10889_v11  ;;  %v13640_v29 = vpop.permute.xlu1 %5416  ;;  %v5917_v40 = vadd.f32 %v5916_v59, %v5915_v10  ;;  %v4915_v28 = vadd.f32 %v13611_v6, %v4275_v17  ;;  %v4916_v21 = vadd.f32 %v4653_v43, %v4276_v18 }
 0x476   : > { %7437 = vst [vmem:[%s10900_s12 + $0x7a0] sm:$0xff] %v7159_v53  ;;  %v4655_v63 = vpop.permute.xlu0 %4654  ;;  %v4278_v53 = vmul.f32 %v14949_v15, %v14949_v15  ;;  %v5682_v62 = vsub.f32 %v7811_v24, %v13640_v29  ;;  %v5926_v61 = vsel %vm5692_vm1, %v5681_v31, 0.0  ;;  %v4281_v25 = vmul.f32 %v14964_v9, %v14964_v9 }
 0x477   : > { %7438 = vst.msk [vmem:[%s10900_s12 + $0x7a8] sm:$0xff] %vm634_vm0, %v7161_v47  ;;  %v7164_v37 = vpop.f32.mrb[246].mxu1  ;;  %v5919_v55 = vadd.f32 %v5918_v1, %v5917_v40  ;;  %v7812_v36 = vadd.f32 -1.0, %v4915_v28  ;;  %v4917_v32 = vadd.f32 %v4655_v63, %v4277_v3  ;;  %v7813_v46 = vadd.f32 -1.0, %v4916_v21 }
 0x478   : > { %v7165_v19 = vadd.f32 %v7164_v37, %v10881_v52  ;;  %v7166_v13 = vpop.f32.mrb[247].mxu1  ;;  %v5928_v16 = vsel %vm5692_vm1, %v5682_v62, 0.0  ;;  %v4283_v9 = vmul.f32 %v12049_v14, %v12049_v14 }
 0x479   : > { %v7167_v42 = vadd.f32 %v7166_v13, %v10889_v11  ;;  %v5419_v33 = vpop.permute.xlu1 %5418  ;;  %v5921_v6 = vadd.f32 %v5920_v58, %v5919_v55  ;;  %v7814_v37 = vadd.f32 -1.0, %v4917_v32  ;;  %v4282_v55 = vmul.f32 %v14969_v8, %v14969_v8 }
 0x47a   : > { %7439 = vst [vmem:[%s10900_s12 + $0x7b0] sm:$0xff] %v7165_v19  ;;  %v4657_v22 = vpop.permute.xlu0 %4656  ;;  %v5683_v15 = vsub.f32 %v7812_v36, %v5419_v33  ;;  %v4280_v33 = vmul.f32 %v14959_v26, %v14959_v26 }
 0x47b   : > { %7440 = vst.msk [vmem:[%s10900_s12 + $0x7b8] sm:$0xff] %vm634_vm0, %v7167_v42  ;;  %v7170_v4 = vpop.f32.mrb[248].mxu1  ;;  %v5923_v47 = vadd.f32 %v5922_v39, %v5921_v6  ;;  %v4918_v57 = vadd.f32 %v4657_v22, %v4278_v53 }
 0x47c   : > { %v7171_v54 = vadd.f32 %v7170_v4, %v10881_v52  ;;  %v7172_v12 = vpop.f32.mrb[249].mxu1  ;;  %v5930_v10 = vsel %vm5692_vm1, %v5683_v15, 0.0 }
 0x47d   : > { %v7173_v44 = vadd.f32 %v7172_v12, %v10889_v11  ;;  %v5421_v0 = vpop.permute.xlu1 %5420  ;;  %v5925_v29 = vadd.f32 %v5924_v60, %v5923_v47  ;;  %v7815_v45 = vadd.f32 -1.0, %v4918_v57 }
 0x47e   : > { %7441 = vst [vmem:[%s10900_s12 + $0x7c0] sm:$0xff] %v7171_v54  ;;  %v4659_v41 = vpop.permute.xlu0 %4658  ;;  %v5684_v63 = vsub.f32 %v7813_v46, %v5421_v0 }
 0x47f   : > { %7442 = vst.msk [vmem:[%s10900_s12 + $0x7c8] sm:$0xff] %vm634_vm0, %v7173_v44  ;;  %v7176_v43 = vpop.f32.mrb[250].mxu1  ;;  %v4919_v50 = vadd.f32 %v4659_v41, %v4279_v30  ;;  %v5927_v19 = vadd.f32 %v5926_v61, %v5925_v29 }
 0x480   : > { %v7177_v56 = vadd.f32 %v7176_v43, %v10881_v52  ;;  %v7178_v7 = vpop.f32.mrb[251].mxu1  ;;  %v5932_v34 = vsel %vm5692_vm1, %v5684_v63, 0.0 }
 0x481   : > { %v7179_v2 = vadd.f32 %v7178_v7, %v10889_v11  ;;  %v5423_v49 = vpop.permute.xlu1 %5422  ;;  %v5929_v23 = vadd.f32 %v5928_v16, %v5927_v19  ;;  %v7816_v17 = vadd.f32 -1.0, %v4919_v50 }
 0x482   : > { %7443 = vst [vmem:[%s10900_s12 + $0x7d0] sm:$0xff] %v7177_v56  ;;  %v4661_v59 = vpop.permute.xlu0 %4660  ;;  %v5685_v42 = vsub.f32 %v7814_v37, %v5423_v49 }
 0x483   : > { %7444 = vst.msk [vmem:[%s10900_s12 + $0x7d8] sm:$0xff] %vm634_vm0, %v7179_v2  ;;  %v7182_v20 = vpop.f32.mrb[252].mxu1  ;;  %v4920_v22 = vadd.f32 %v4661_v59, %v4280_v33  ;;  %v5931_v18 = vadd.f32 %v5930_v10, %v5929_v23 }
 0x484   : > { %v7183_v27 = vadd.f32 %v7182_v20, %v10881_v52  ;;  %v7184_v38 = vpop.f32.mrb[253].mxu1  ;;  %v5934_v58 = vsel %vm5692_vm1, %v5685_v42, 0.0 }
 0x485   : > { %v7185_v13 = vadd.f32 %v7184_v38, %v10889_v11  ;;  %v5425_v48 = vpop.permute.xlu1 %5424  ;;  %v5933_v12 = vadd.f32 %v5932_v34, %v5931_v18 }
 0x486   : > { %7445 = vst [vmem:[%s10900_s12 + $0x7e0] sm:$0xff] %v7183_v27  ;;  %v4663_v1 = vpop.permute.xlu0 %4662  ;;  %v5686_v40 = vsub.f32 %v7815_v45, %v5425_v48 }
 0x487   : > { %7446 = vst.msk [vmem:[%s10900_s12 + $0x7e8] sm:$0xff] %vm634_vm0, %v7185_v13  ;;  %v7188_v51 = vpop.f32.mrb[254].mxu1  ;;  %v4921_v44 = vadd.f32 %v4663_v1, %v4281_v25 }
 0x488   : > { %v7189_v5 = vadd.f32 %v7188_v51, %v10881_v52  ;;  %v7190_v35 = vpop.f32.mrb[255].mxu1  ;;  %v7817_v52 = vadd.f32 -1.0, %v4920_v22  ;;  %v5936_v21 = vsel %vm5692_vm1, %v5686_v40, 0.0 }
 0x489   : > { %v7191_v4 = vadd.f32 %v7190_v35, %v10889_v11  ;;  %v5427_v26 = vpop.permute.xlu1 %5426  ;;  %v5935_v11 = vadd.f32 %v5934_v58, %v5933_v12  ;;  %v7818_v6 = vadd.f32 -1.0, %v4921_v44 }
 0x48a   : > { %7447 = vst [vmem:[%s10900_s12 + $0x7f0] sm:$0xff] %v7189_v5  ;;  %v5687_v28 = vsub.f32 %v7816_v17, %v5427_v26  ;;  %v4665_v54 = vpop.permute.xlu0 %4664 }
 0x48b   : > { %7448 = vst.msk [vmem:[%s10900_s12 + $0x7f8] sm:$0xff] %vm634_vm0, %v7191_v4  ;;  %v4922_v0 = vadd.f32 %v4665_v54, %v4282_v55  ;;  %v5937_v41 = vadd.f32 %v5936_v21, %v5935_v11 }
 0x48c   : > { %v5938_v24 = vsel %vm5692_vm1, %v5687_v28, 0.0 }
 0x48d   : > { %v5429_v39 = vpop.permute.xlu1 %5428  ;;  %v5939_v8 = vadd.f32 %v5938_v24, %v5937_v41  ;;  %v7819_v43 = vadd.f32 -1.0, %v4922_v0 }
 0x48e   : > { %v5688_v31 = vsub.f32 %v7817_v52, %v5429_v39  ;;  %v4667_v3 = vpop.permute.xlu0 %4666 }
 0x48f   : > { %v4923_v53 = vadd.f32 %v4667_v3, %v4283_v9 }
 0x490   : > { %v5940_v60 = vsel %vm5692_vm1, %v5688_v31, 0.0 }
 0x491   : > { %v5431_v36 = vpop.permute.xlu1 %5430  ;;  %v5941_v56 = vadd.f32 %v5940_v60, %v5939_v8  ;;  %v7820_v47 = vadd.f32 -1.0, %v4923_v53 }
 0x492   : > { %v5689_v62 = vsub.f32 %v7818_v6, %v5431_v36  ;;  %v5433_v32 = vpop.permute.xlu0 %5432 }
 0x493   : > { %v5690_v7 = vsub.f32 %v7819_v43, %v5433_v32 }
 0x494   : > { %v5942_v46 = vsel %vm5692_vm1, %v5689_v62, 0.0 }
 0x495   : > { %v5943_v2 = vadd.f32 %v5942_v46, %v5941_v56  ;;  %v5435_v49 = vpop.permute.xlu1 %5434  ;;  %v5944_v14 = vsel %vm5692_vm1, %v5690_v7, 0.0 }
 0x496   : > { %v5691_v61 = vsub.f32 %v7820_v47, %v5435_v49 }
 0x497   : > { %v5945_v15 = vadd.f32 %v5944_v14, %v5943_v2 }
 0x498   : > { %v5946_v57 = vsel %vm5692_vm1, %v5691_v61, 0.0 }
 0x499   : > { %v5947_v30 = vadd.f32 %v5946_v57, %v5945_v15 }
 0x49b   : > { %5948 = vadd.xlane.f32.xlu0 %v5947_v30 }
 0x528   : > { %v5949_v59 = vpop.xlane.xlu0 %5948 }
 0x529   : > { %v5950_v29 = vrot.slane %v5949_v59, 4 }
 0x52b   : > { %v5951_v63 = vadd.f32 %v5950_v29, %v5949_v59 }
 0x52d   : > { %v5952_v20 = vrot.slane %v5951_v63, 2 }
 0x52f   : > { %v5953_v16 = vadd.f32 %v5952_v20, %v5951_v63 }
 0x531   : > { %v5954_v37 = vrot.slane %v5953_v16, 1 }
 0x533   : > { %v5955_v50 = vadd.f32 %v5954_v37, %v5953_v16 }
 0x535   : > { %7993 = vpush %v5955_v50 }
 0x566   : > { %s7994_s12 = spop %7993 }
 0x567   : > { %v5957_v27 = vstv %s7994_s12 }
 0x568   : > { %v5958_v38 = vmul.f32 0.5, %v5957_v27 }
 0x56a   : > { %5959 = vst [vmem:[%s346_s14] sm:$0xff] %v5958_v38 }
 0x56b PF: > { %s19_s27 = sadd.s32 1, %s8274_s27  }
 0x56c   : > { %p16_p5 = scmp.ge.s32.totalorder %s19_s27, 4  }
 0x56e   :  { %18 = sbr.rel (!%p16_p5) target bundleno = 1 (0x1), region = 93 }

</bundles_post_ra>
